<compile_context>
chip_gen: v5e
topology: v5e:2x2
jax: 0.10.0
libtpu: 0.0.40
codegen_flags: <defaults>
</compile_context>

<pallas_src>
import jax
import jax.numpy as jnp
from jax.experimental import pallas as pl
from jax.experimental.pallas import tpu as pltpu


def _round_up(x, m):
    return ((x + m - 1) // m) * m


def bilstm_tagger_kernel(embeds_ref, len_ref,
                         wih_f_ref, whh_f_ref, b_f_ref,
                         wih_b_ref, whh_b_ref, b_b_ref,
                         wtag_f_ref, wtag_b_ref, btag_ref,
                         out_ref,
                         gxf_scr, gxb_scr, hf_scr, hb_scr):
    """Bidirectional LSTM + Linear + log_softmax.

    embeds_ref : (T, Bp, E)  f32
    len_ref    : (Bp, 1)     int32 valid lengths (0 for padded batch rows)
    wih_*  : (E, 4*Hp), whh_* : (Hp, 4*Hp), b_* : (1, 4*Hp)  (gate order i,f,g,o,
             biases fused b_ih + b_hh, gate blocks zero-padded H -> Hp)
    wtag_f/wtag_b : (Hp, Np), btag : (1, Np) (padded tags biased to -1e30)
    out_ref : (T, Bp, Np) f32 log-probabilities
    """
    T, Bp, E = embeds_ref.shape
    Hp = whh_f_ref.shape[0]
    G = 4 * Hp
    Np = out_ref.shape[-1]

    # ---- hoisted input projection: big MXU matmuls outside the recurrence ----
    x2d = embeds_ref[...].reshape(T * Bp, E)
    gxf_scr[...] = (jnp.dot(x2d, wih_f_ref[...],
                            preferred_element_type=jnp.float32)
                    + b_f_ref[...]).reshape(T, Bp, G)
    gxb_scr[...] = (jnp.dot(x2d, wih_b_ref[...],
                            preferred_element_type=jnp.float32)
                    + b_b_ref[...]).reshape(T, Bp, G)

    # ---- hoisted loads: read once, closed over by the loop body ----
    whh_f = whh_f_ref[...]
    whh_b = whh_b_ref[...]
    lengths = len_ref[...]                      # (Bp, 1) int32

    def lstm_cell(gates, c):
        i_g = jax.nn.sigmoid(gates[:, 0 * Hp:1 * Hp])
        f_g = jax.nn.sigmoid(gates[:, 1 * Hp:2 * Hp])
        g_g = jnp.tanh(gates[:, 2 * Hp:3 * Hp])
        o_g = jax.nn.sigmoid(gates[:, 3 * Hp:4 * Hp])
        c_new = f_g * c + i_g * g_g
        h_new = o_g * jnp.tanh(c_new)
        return h_new, c_new

    zeros = jnp.zeros((Bp, Hp), jnp.float32)

    # One interleaved, fully-unrolled loop: fwd step t and bwd step T-1-t are
    # independent chains -> ILP to hide MXU/EUP latency on the serial path.
    def body(i, carry):
        hf, cf, hb, cb = carry
        tf = i
        tb = T - 1 - i

        # forward direction (packed-sequence semantics: frozen on padded steps)
        gates_f = gxf_scr[tf] + jnp.dot(hf, whh_f,
                                        preferred_element_type=jnp.float32)
        hf_new, cf_new = lstm_cell(gates_f, cf)
        mf = lengths > tf                       # (Bp, 1) bool
        hf = jnp.where(mf, hf_new, hf)
        cf = jnp.where(mf, cf_new, cf)
        hf_scr[tf] = jnp.where(mf, hf, 0.0)     # pad_packed_sequence zeros pads

        # backward direction (state starts from zeros at each seq's last token)
        gates_b = gxb_scr[tb] + jnp.dot(hb, whh_b,
                                        preferred_element_type=jnp.float32)
        hb_new, cb_new = lstm_cell(gates_b, cb)
        mb = lengths > tb
        hb = jnp.where(mb, hb_new, hb)
        cb = jnp.where(mb, cb_new, cb)
        hb_scr[tb] = jnp.where(mb, hb, 0.0)

        return hf, cf, hb, cb

    jax.lax.fori_loop(0, T, body, (zeros, zeros, zeros, zeros), unroll=True)

    # ---- hidden2tag (split matmul, no concat/reshape copies) + log_softmax ----
    hf_all = hf_scr[...].reshape(T * Bp, Hp)
    hb_all = hb_scr[...].reshape(T * Bp, Hp)
    logits = (jnp.dot(hf_all, wtag_f_ref[...], preferred_element_type=jnp.float32)
              + jnp.dot(hb_all, wtag_b_ref[...], preferred_element_type=jnp.float32)
              + btag_ref[...])
    mx = jnp.max(logits, axis=-1, keepdims=True)
    lse = jnp.log(jnp.sum(jnp.exp(logits - mx), axis=-1, keepdims=True)) + mx
    out_ref[...] = (logits - lse).reshape(T, Bp, Np)


def prepare_params(params, hidden_dim, tagset_size):
    """Pad / transpose PyTorch-layout parameters into the lane-aligned kernel layout."""
    H = hidden_dim // 2
    Hp = _round_up(H, 128)
    Np = _round_up(tagset_size, 128)
    E = params["w_ih_f"].shape[1]

    def pad_gate_mat(w, in_dim):          # (4H, in_dim) -> (in_dim, 4*Hp)
        w = w.reshape(4, H, in_dim)
        w = jnp.pad(w, ((0, 0), (0, Hp - H), (0, 0)))
        return w.reshape(4 * Hp, in_dim).T

    def pad_gate_vec(b):                  # (4H,) -> (1, 4*Hp)
        b = b.reshape(4, H)
        b = jnp.pad(b, ((0, 0), (0, Hp - H)))
        return b.reshape(1, 4 * Hp)

    def pad_hh(w):                        # (4H, H) -> (Hp, 4*Hp)
        w = w.reshape(4, H, H)
        w = jnp.pad(w, ((0, 0), (0, Hp - H), (0, Hp - H)))
        return w.reshape(4 * Hp, Hp).T

    w_tag = params["w_tag"]               # (tagset, 2H)
    wtag_f = jnp.pad(w_tag[:, :H].T, ((0, Hp - H), (0, Np - tagset_size)))
    wtag_b = jnp.pad(w_tag[:, H:].T, ((0, Hp - H), (0, Np - tagset_size)))
    btag = jnp.pad(params["b_tag"], (0, Np - tagset_size),
                   constant_values=-1e30).reshape(1, Np)

    return {
        "wih_f": pad_gate_mat(params["w_ih_f"], E),
        "whh_f": pad_hh(params["w_hh_f"]),
        "b_f": pad_gate_vec(params["b_ih_f"] + params["b_hh_f"]),
        "wih_b": pad_gate_mat(params["w_ih_b"], E),
        "whh_b": pad_hh(params["w_hh_b"]),
        "b_b": pad_gate_vec(params["b_ih_b"] + params["b_hh_b"]),
        "wtag_f": wtag_f, "wtag_b": wtag_b, "btag": btag,
        "Hp": Hp, "Np": Np,
    }


def bilstm_tagger_forward(sentence, sentence_lengths, params,
                          hidden_dim, tagset_size):
    """sentence: (T, B) int32; sentence_lengths: (B,) int32 (sorted descending)."""
    T, B = sentence.shape
    Bp = _round_up(B, 8)
    prep = prepare_params(params, hidden_dim, tagset_size)
    Hp, Np = prep["Hp"], prep["Np"]

    # Pad batch to a sublane multiple; padded rows get length 0 (fully masked).
    sent_p = jnp.pad(sentence, ((0, 0), (0, Bp - B)))
    len_p = jnp.pad(sentence_lengths, (0, Bp - B)).astype(jnp.int32).reshape(Bp, 1)

    # Embedding lookup (glue).
    embeds = jnp.take(params["embedding"], sent_p, axis=0).astype(jnp.float32)
    # TODO(synk): nn.Dropout(p) — identity in eval mode; training-mode RNG
    # dropout intentionally not applied here.

    vmem = pl.BlockSpec(memory_space=pltpu.MemorySpace.VMEM)
    out_tb = pl.pallas_call(
        bilstm_tagger_kernel,
        out_shape=jax.ShapeDtypeStruct((T, Bp, Np), jnp.float32),
        in_specs=[vmem] * 11,
        out_specs=vmem,
        scratch_shapes=[
            pltpu.VMEM((T, Bp, 4 * Hp), jnp.float32),   # precomputed fwd input gates
            pltpu.VMEM((T, Bp, 4 * Hp), jnp.float32),   # precomputed bwd input gates
            pltpu.VMEM((T, Bp, Hp), jnp.float32),       # forward hidden states
            pltpu.VMEM((T, Bp, Hp), jnp.float32),       # backward hidden states
        ],
    )(embeds, len_p,
      prep["wih_f"], prep["whh_f"], prep["b_f"],
      prep["wih_b"], prep["whh_b"], prep["b_b"],
      prep["wtag_f"], prep["wtag_b"], prep["btag"])

    # Strip batch/tag padding; lstm_out.transpose(0,1) -> (B, T, tagset).
    return jnp.transpose(out_tb[:, :B, :tagset_size], (1, 0, 2))


def init_params(key, vocab_size, embedding_dim, hidden_dim, tagset_size):
    """Deterministic synthetic params in PyTorch nn.LSTM / nn.Linear layout."""
    H = hidden_dim // 2
    ks = jax.random.split(key, 12)
    u = lambda k, shape, s: jax.random.uniform(k, shape, jnp.float32, -s, s)
    s_lstm = 1.0 / (H ** 0.5)
    s_tag = 1.0 / (hidden_dim ** 0.5)
    return {
        "embedding": jax.random.normal(ks[0], (vocab_size, embedding_dim),
                                       jnp.float32),
        # gate order (i, f, g, o), PyTorch weight layout
        "w_ih_f": u(ks[1], (4 * H, embedding_dim), s_lstm),
        "w_hh_f": u(ks[2], (4 * H, H), s_lstm),
        "b_ih_f": u(ks[3], (4 * H,), s_lstm),
        "b_hh_f": u(ks[4], (4 * H,), s_lstm),
        "w_ih_b": u(ks[5], (4 * H, embedding_dim), s_lstm),
        "w_hh_b": u(ks[6], (4 * H, H), s_lstm),
        "b_ih_b": u(ks[7], (4 * H,), s_lstm),
        "b_hh_b": u(ks[8], (4 * H,), s_lstm),
        "w_tag": u(ks[9], (tagset_size, hidden_dim), s_tag),
        "b_tag": u(ks[10], (tagset_size,), s_tag),
    }


if __name__ == "__main__":
    # Small, module-consistent shapes.
    T, B = 8, 2
    vocab_size, embedding_dim, hidden_dim, tagset_size = 50, 16, 32, 8

    key = jax.random.PRNGKey(0)
    k_tok, k_par = jax.random.split(key)

    sentence = jax.random.randint(k_tok, (T, B), 0, vocab_size, dtype=jnp.int32)
    sentence_lengths = jnp.array([8, 5], dtype=jnp.int32)  # sorted descending

    params = init_params(k_par, vocab_size, embedding_dim, hidden_dim, tagset_size)

    tag_scores = bilstm_tagger_forward(sentence, sentence_lengths, params,
                                       hidden_dim, tagset_size)
    tag_scores = jax.block_until_ready(tag_scores)

    assert tag_scores.shape == (B, T, tagset_size)
    assert bool(jnp.all(jnp.isfinite(tag_scores)))
    print("KERNEL_OK")
</pallas_src>

<mosaic_0001>
module attributes {stable_mosaic.version = 11 : i64} {
  func.func @bilstm_tagger_kernel(%arg0: memref<8x8x16xf32, #tpu.memory_space<vmem>>, %arg1: memref<8x1xi32, #tpu.memory_space<vmem>>, %arg2: memref<16x512xf32, #tpu.memory_space<vmem>>, %arg3: memref<128x512xf32, #tpu.memory_space<vmem>>, %arg4: memref<1x512xf32, #tpu.memory_space<vmem>>, %arg5: memref<16x512xf32, #tpu.memory_space<vmem>>, %arg6: memref<128x512xf32, #tpu.memory_space<vmem>>, %arg7: memref<1x512xf32, #tpu.memory_space<vmem>>, %arg8: memref<128x128xf32, #tpu.memory_space<vmem>>, %arg9: memref<128x128xf32, #tpu.memory_space<vmem>>, %arg10: memref<1x128xf32, #tpu.memory_space<vmem>>, %arg11: memref<8x8x128xf32, #tpu.memory_space<vmem>>, %arg12: memref<8x8x512xf32, #tpu.memory_space<vmem>>, %arg13: memref<8x8x512xf32, #tpu.memory_space<vmem>>, %arg14: memref<8x8x128xf32, #tpu.memory_space<vmem>>, %arg15: memref<8x8x128xf32, #tpu.memory_space<vmem>>) attributes {dimension_semantics = [], scalar_prefetch = 0 : i64, scratch_operands = 4 : i64, tpu.core_type = #tpu.core_type<tc>} {
    %c0 = arith.constant 0 : index
    %c0_0 = arith.constant 0 : index
    %c0_1 = arith.constant 0 : index
    %0 = vector.load %arg0[%c0, %c0_0, %c0_1] : memref<8x8x16xf32, #tpu.memory_space<vmem>>, vector<8x8x16xf32>
    %1 = vector.shape_cast %0 : vector<8x8x16xf32> to vector<64x16xf32>
    %c0_2 = arith.constant 0 : index
    %c0_3 = arith.constant 0 : index
    %2 = vector.load %arg2[%c0_2, %c0_3] : memref<16x512xf32, #tpu.memory_space<vmem>>, vector<16x512xf32>
    %cst = arith.constant dense<0.000000e+00> : vector<64x512xf32>
    %3 = tpu.matmul %1, %2, %cst {dimension_numbers = #tpu.dot_dimension_numbers<[1], [0], [0], [1], [0, 0, 1, 1], [], []>} : vector<64x16xf32>, vector<16x512xf32>, vector<64x512xf32> -> vector<64x512xf32>
    %c0_4 = arith.constant 0 : index
    %c0_5 = arith.constant 0 : index
    %4 = vector.load %arg4[%c0_4, %c0_5] : memref<1x512xf32, #tpu.memory_space<vmem>>, vector<1x512xf32>
    %5 = vector.broadcast %4 : vector<1x512xf32> to vector<64x512xf32>
    %6 = arith.addf %3, %5 : vector<64x512xf32>
    %7 = vector.shape_cast %6 : vector<64x512xf32> to vector<8x8x512xf32>
    %c0_6 = arith.constant 0 : index
    %c0_7 = arith.constant 0 : index
    %c0_8 = arith.constant 0 : index
    %8 = vector.load %arg12[%c0_6, %c0_7, %c0_8] : memref<8x8x512xf32, #tpu.memory_space<vmem>>, vector<8x8x512xf32>
    tpu.vector_store %arg12[%c0_6, %c0_7, %c0_8], %7 {strides = array<i32>} : memref<8x8x512xf32, #tpu.memory_space<vmem>>, vector<8x8x512xf32>,
    %c0_9 = arith.constant 0 : index
    %c0_10 = arith.constant 0 : index
    %9 = vector.load %arg5[%c0_9, %c0_10] : memref<16x512xf32, #tpu.memory_space<vmem>>, vector<16x512xf32>
    %cst_11 = arith.constant dense<0.000000e+00> : vector<64x512xf32>
    %10 = tpu.matmul %1, %9, %cst_11 {dimension_numbers = #tpu.dot_dimension_numbers<[1], [0], [0], [1], [0, 0, 1, 1], [], []>} : vector<64x16xf32>, vector<16x512xf32>, vector<64x512xf32> -> vector<64x512xf32>
    %c0_12 = arith.constant 0 : index
    %c0_13 = arith.constant 0 : index
    %11 = vector.load %arg7[%c0_12, %c0_13] : memref<1x512xf32, #tpu.memory_space<vmem>>, vector<1x512xf32>
    %12 = vector.broadcast %11 : vector<1x512xf32> to vector<64x512xf32>
    %13 = arith.addf %10, %12 : vector<64x512xf32>
    %14 = vector.shape_cast %13 : vector<64x512xf32> to vector<8x8x512xf32>
    %c0_14 = arith.constant 0 : index
    %c0_15 = arith.constant 0 : index
    %c0_16 = arith.constant 0 : index
    %15 = vector.load %arg13[%c0_14, %c0_15, %c0_16] : memref<8x8x512xf32, #tpu.memory_space<vmem>>, vector<8x8x512xf32>
    tpu.vector_store %arg13[%c0_14, %c0_15, %c0_16], %14 {strides = array<i32>} : memref<8x8x512xf32, #tpu.memory_space<vmem>>, vector<8x8x512xf32>,
    %c0_17 = arith.constant 0 : index
    %c0_18 = arith.constant 0 : index
    %16 = vector.load %arg3[%c0_17, %c0_18] : memref<128x512xf32, #tpu.memory_space<vmem>>, vector<128x512xf32>
    %c0_19 = arith.constant 0 : index
    %c0_20 = arith.constant 0 : index
    %17 = vector.load %arg6[%c0_19, %c0_20] : memref<128x512xf32, #tpu.memory_space<vmem>>, vector<128x512xf32>
    %c0_21 = arith.constant 0 : index
    %c0_22 = arith.constant 0 : index
    %18 = vector.load %arg1[%c0_21, %c0_22] : memref<8x1xi32, #tpu.memory_space<vmem>>, vector<8x1xi32>
    %cst_23 = arith.constant 0.000000e+00 : f32
    %19 = vector.broadcast %cst_23 : f32 to vector<8x128xf32>
    %c0_i32 = arith.constant 0 : i32
    %c7_i32 = arith.constant 7 : i32
    %20 = arith.subi %c7_i32, %c0_i32 : i32
    %21 = arith.index_cast %c0_i32 : i32 to index
    %c0_24 = arith.constant 0 : index
    %c0_25 = arith.constant 0 : index
    %22 = vector.load %arg12[%21, %c0_24, %c0_25] : memref<8x8x512xf32, #tpu.memory_space<vmem>>, vector<1x8x512xf32>
    %23 = vector.shape_cast %22 : vector<1x8x512xf32> to vector<8x512xf32>
    %cst_26 = arith.constant dense<0.000000e+00> : vector<8x512xf32>
    %24 = tpu.matmul %19, %16, %cst_26 {dimension_numbers = #tpu.dot_dimension_numbers<[1], [0], [0], [1], [0, 0, 1, 1], [], []>} : vector<8x128xf32>, vector<128x512xf32>, vector<8x512xf32> -> vector<8x512xf32>
    %25 = arith.addf %23, %24 : vector<8x512xf32>
    %26 = vector.extract_strided_slice %25 {offsets = [0, 0], sizes = [8, 128], strides = [1, 1]} : vector<8x512xf32> to vector<8x128xf32>
    %27 = arith.negf %26 : vector<8x128xf32>
    %28 = math.exp %27 : vector<8x128xf32>
    %cst_27 = arith.constant 1.000000e+00 : f32
    %29 = vector.broadcast %cst_27 : f32 to vector<8x128xf32>
    %30 = arith.addf %29, %28 : vector<8x128xf32>
    %31 = arith.divf %29, %30 : vector<8x128xf32>
    %32 = vector.extract_strided_slice %25 {offsets = [0, 128], sizes = [8, 128], strides = [1, 1]} : vector<8x512xf32> to vector<8x128xf32>
    %33 = arith.negf %32 : vector<8x128xf32>
    %34 = math.exp %33 : vector<8x128xf32>
    %cst_28 = arith.constant 1.000000e+00 : f32
    %35 = vector.broadcast %cst_28 : f32 to vector<8x128xf32>
    %36 = arith.addf %35, %34 : vector<8x128xf32>
    %37 = arith.divf %35, %36 : vector<8x128xf32>
    %38 = vector.extract_strided_slice %25 {offsets = [0, 256], sizes = [8, 128], strides = [1, 1]} : vector<8x512xf32> to vector<8x128xf32>
    %39 = math.tanh %38 : vector<8x128xf32>
    %40 = vector.extract_strided_slice %25 {offsets = [0, 384], sizes = [8, 128], strides = [1, 1]} : vector<8x512xf32> to vector<8x128xf32>
    %41 = arith.negf %40 : vector<8x128xf32>
    %42 = math.exp %41 : vector<8x128xf32>
    %cst_29 = arith.constant 1.000000e+00 : f32
    %43 = vector.broadcast %cst_29 : f32 to vector<8x128xf32>
    %44 = arith.addf %43, %42 : vector<8x128xf32>
    %45 = arith.divf %43, %44 : vector<8x128xf32>
    %46 = arith.mulf %37, %19 : vector<8x128xf32>
    %47 = arith.mulf %31, %39 : vector<8x128xf32>
    %48 = arith.addf %46, %47 : vector<8x128xf32>
    %49 = math.tanh %48 : vector<8x128xf32>
    %50 = arith.mulf %45, %49 : vector<8x128xf32>
    %51 = vector.broadcast %c0_i32 : i32 to vector<8x1xi32>
    %52 = arith.cmpi sgt, %18, %51 : vector<8x1xi32>
    %53 = vector.shape_cast %52 : vector<8x1xi1> to vector<8x1xi1>
    %54 = vector.broadcast %53 : vector<8x1xi1> to vector<8x128xi1>
    %55 = arith.select %54, %50, %19 : vector<8x128xi1>, vector<8x128xf32>
    %56 = vector.shape_cast %52 : vector<8x1xi1> to vector<8x1xi1>
    %57 = vector.broadcast %56 : vector<8x1xi1> to vector<8x128xi1>
    %58 = arith.select %57, %48, %19 : vector<8x128xi1>, vector<8x128xf32>
    %cst_30 = arith.constant 0.000000e+00 : f32
    %59 = vector.shape_cast %52 : vector<8x1xi1> to vector<8x1xi1>
    %60 = vector.broadcast %59 : vector<8x1xi1> to vector<8x128xi1>
    %61 = vector.broadcast %cst_30 : f32 to vector<8x128xf32>
    %62 = arith.select %60, %55, %61 : vector<8x128xi1>, vector<8x128xf32>
    %63 = arith.index_cast %c0_i32 : i32 to index
    %c0_31 = arith.constant 0 : index
    %c0_32 = arith.constant 0 : index
    %64 = vector.load %arg14[%63, %c0_31, %c0_32] : memref<8x8x128xf32, #tpu.memory_space<vmem>>, vector<1x8x128xf32>
    %65 = vector.shape_cast %64 : vector<1x8x128xf32> to vector<8x128xf32>
    %66 = vector.shape_cast %62 : vector<8x128xf32> to vector<1x8x128xf32>
    tpu.vector_store %arg14[%63, %c0_31, %c0_32], %66 {strides = array<i32>} : memref<8x8x128xf32, #tpu.memory_space<vmem>>, vector<1x8x128xf32>,
    %67 = arith.index_cast %20 : i32 to index
    %c0_33 = arith.constant 0 : index
    %c0_34 = arith.constant 0 : index
    %68 = vector.load %arg13[%67, %c0_33, %c0_34] : memref<8x8x512xf32, #tpu.memory_space<vmem>>, vector<1x8x512xf32>
    %69 = vector.shape_cast %68 : vector<1x8x512xf32> to vector<8x512xf32>
    %cst_35 = arith.constant dense<0.000000e+00> : vector<8x512xf32>
    %70 = tpu.matmul %19, %17, %cst_35 {dimension_numbers = #tpu.dot_dimension_numbers<[1], [0], [0], [1], [0, 0, 1, 1], [], []>} : vector<8x128xf32>, vector<128x512xf32>, vector<8x512xf32> -> vector<8x512xf32>
    %71 = arith.addf %69, %70 : vector<8x512xf32>
    %72 = vector.extract_strided_slice %71 {offsets = [0, 0], sizes = [8, 128], strides = [1, 1]} : vector<8x512xf32> to vector<8x128xf32>
    %73 = arith.negf %72 : vector<8x128xf32>
    %74 = math.exp %73 : vector<8x128xf32>
    %cst_36 = arith.constant 1.000000e+00 : f32
    %75 = vector.broadcast %cst_36 : f32 to vector<8x128xf32>
    %76 = arith.addf %75, %74 : vector<8x128xf32>
    %77 = arith.divf %75, %76 : vector<8x128xf32>
    %78 = vector.extract_strided_slice %71 {offsets = [0, 128], sizes = [8, 128], strides = [1, 1]} : vector<8x512xf32> to vector<8x128xf32>
    %79 = arith.negf %78 : vector<8x128xf32>
    %80 = math.exp %79 : vector<8x128xf32>
    %cst_37 = arith.constant 1.000000e+00 : f32
    %81 = vector.broadcast %cst_37 : f32 to vector<8x128xf32>
    %82 = arith.addf %81, %80 : vector<8x128xf32>
    %83 = arith.divf %81, %82 : vector<8x128xf32>
    %84 = vector.extract_strided_slice %71 {offsets = [0, 256], sizes = [8, 128], strides = [1, 1]} : vector<8x512xf32> to vector<8x128xf32>
    %85 = math.tanh %84 : vector<8x128xf32>
    %86 = vector.extract_strided_slice %71 {offsets = [0, 384], sizes = [8, 128], strides = [1, 1]} : vector<8x512xf32> to vector<8x128xf32>
    %87 = arith.negf %86 : vector<8x128xf32>
    %88 = math.exp %87 : vector<8x128xf32>
    %cst_38 = arith.constant 1.000000e+00 : f32
    %89 = vector.broadcast %cst_38 : f32 to vector<8x128xf32>
    %90 = arith.addf %89, %88 : vector<8x128xf32>
    %91 = arith.divf %89, %90 : vector<8x128xf32>
    %92 = arith.mulf %83, %19 : vector<8x128xf32>
    %93 = arith.mulf %77, %85 : vector<8x128xf32>
    %94 = arith.addf %92, %93 : vector<8x128xf32>
    %95 = math.tanh %94 : vector<8x128xf32>
    %96 = arith.mulf %91, %95 : vector<8x128xf32>
    %97 = vector.broadcast %20 : i32 to vector<8x1xi32>
    %98 = arith.cmpi sgt, %18, %97 : vector<8x1xi32>
    %99 = vector.shape_cast %98 : vector<8x1xi1> to vector<8x1xi1>
    %100 = vector.broadcast %99 : vector<8x1xi1> to vector<8x128xi1>
    %101 = arith.select %100, %96, %19 : vector<8x128xi1>, vector<8x128xf32>
    %102 = vector.shape_cast %98 : vector<8x1xi1> to vector<8x1xi1>
    %103 = vector.broadcast %102 : vector<8x1xi1> to vector<8x128xi1>
    %104 = arith.select %103, %94, %19 : vector<8x128xi1>, vector<8x128xf32>
    %cst_39 = arith.constant 0.000000e+00 : f32
    %105 = vector.shape_cast %98 : vector<8x1xi1> to vector<8x1xi1>
    %106 = vector.broadcast %105 : vector<8x1xi1> to vector<8x128xi1>
    %107 = vector.broadcast %cst_39 : f32 to vector<8x128xf32>
    %108 = arith.select %106, %101, %107 : vector<8x128xi1>, vector<8x128xf32>
    %109 = arith.index_cast %20 : i32 to index
    %c0_40 = arith.constant 0 : index
    %c0_41 = arith.constant 0 : index
    %110 = vector.load %arg15[%109, %c0_40, %c0_41] : memref<8x8x128xf32, #tpu.memory_space<vmem>>, vector<1x8x128xf32>
    %111 = vector.shape_cast %110 : vector<1x8x128xf32> to vector<8x128xf32>
    %112 = vector.shape_cast %108 : vector<8x128xf32> to vector<1x8x128xf32>
    tpu.vector_store %arg15[%109, %c0_40, %c0_41], %112 {strides = array<i32>} : memref<8x8x128xf32, #tpu.memory_space<vmem>>, vector<1x8x128xf32>,
    %c1_i32 = arith.constant 1 : i32
    %c7_i32_42 = arith.constant 7 : i32
    %113 = arith.subi %c7_i32_42, %c1_i32 : i32
    %114 = arith.index_cast %c1_i32 : i32 to index
    %c0_43 = arith.constant 0 : index
    %c0_44 = arith.constant 0 : index
    %115 = vector.load %arg12[%114, %c0_43, %c0_44] : memref<8x8x512xf32, #tpu.memory_space<vmem>>, vector<1x8x512xf32>
    %116 = vector.shape_cast %115 : vector<1x8x512xf32> to vector<8x512xf32>
    %cst_45 = arith.constant dense<0.000000e+00> : vector<8x512xf32>
    %117 = tpu.matmul %55, %16, %cst_45 {dimension_numbers = #tpu.dot_dimension_numbers<[1], [0], [0], [1], [0, 0, 1, 1], [], []>} : vector<8x128xf32>, vector<128x512xf32>, vector<8x512xf32> -> vector<8x512xf32>
    %118 = arith.addf %116, %117 : vector<8x512xf32>
    %119 = vector.extract_strided_slice %118 {offsets = [0, 0], sizes = [8, 128], strides = [1, 1]} : vector<8x512xf32> to vector<8x128xf32>
    %120 = arith.negf %119 : vector<8x128xf32>
    %121 = math.exp %120 : vector<8x128xf32>
    %cst_46 = arith.constant 1.000000e+00 : f32
    %122 = vector.broadcast %cst_46 : f32 to vector<8x128xf32>
    %123 = arith.addf %122, %121 : vector<8x128xf32>
    %124 = arith.divf %122, %123 : vector<8x128xf32>
    %125 = vector.extract_strided_slice %118 {offsets = [0, 128], sizes = [8, 128], strides = [1, 1]} : vector<8x512xf32> to vector<8x128xf32>
    %126 = arith.negf %125 : vector<8x128xf32>
    %127 = math.exp %126 : vector<8x128xf32>
    %cst_47 = arith.constant 1.000000e+00 : f32
    %128 = vector.broadcast %cst_47 : f32 to vector<8x128xf32>
    %129 = arith.addf %128, %127 : vector<8x128xf32>
    %130 = arith.divf %128, %129 : vector<8x128xf32>
    %131 = vector.extract_strided_slice %118 {offsets = [0, 256], sizes = [8, 128], strides = [1, 1]} : vector<8x512xf32> to vector<8x128xf32>
    %132 = math.tanh %131 : vector<8x128xf32>
    %133 = vector.extract_strided_slice %118 {offsets = [0, 384], sizes = [8, 128], strides = [1, 1]} : vector<8x512xf32> to vector<8x128xf32>
    %134 = arith.negf %133 : vector<8x128xf32>
    %135 = math.exp %134 : vector<8x128xf32>
    %cst_48 = arith.constant 1.000000e+00 : f32
    %136 = vector.broadcast %cst_48 : f32 to vector<8x128xf32>
    %137 = arith.addf %136, %135 : vector<8x128xf32>
    %138 = arith.divf %136, %137 : vector<8x128xf32>
    %139 = arith.mulf %130, %58 : vector<8x128xf32>
    %140 = arith.mulf %124, %132 : vector<8x128xf32>
    %141 = arith.addf %139, %140 : vector<8x128xf32>
    %142 = math.tanh %141 : vector<8x128xf32>
    %143 = arith.mulf %138, %142 : vector<8x128xf32>
    %144 = vector.broadcast %c1_i32 : i32 to vector<8x1xi32>
    %145 = arith.cmpi sgt, %18, %144 : vector<8x1xi32>
    %146 = vector.shape_cast %145 : vector<8x1xi1> to vector<8x1xi1>
    %147 = vector.broadcast %146 : vector<8x1xi1> to vector<8x128xi1>
    %148 = arith.select %147, %143, %55 : vector<8x128xi1>, vector<8x128xf32>
    %149 = vector.shape_cast %145 : vector<8x1xi1> to vector<8x1xi1>
    %150 = vector.broadcast %149 : vector<8x1xi1> to vector<8x128xi1>
    %151 = arith.select %150, %141, %58 : vector<8x128xi1>, vector<8x128xf32>
    %cst_49 = arith.constant 0.000000e+00 : f32
    %152 = vector.shape_cast %145 : vector<8x1xi1> to vector<8x1xi1>
    %153 = vector.broadcast %152 : vector<8x1xi1> to vector<8x128xi1>
    %154 = vector.broadcast %cst_49 : f32 to vector<8x128xf32>
    %155 = arith.select %153, %148, %154 : vector<8x128xi1>, vector<8x128xf32>
    %156 = arith.index_cast %c1_i32 : i32 to index
    %c0_50 = arith.constant 0 : index
    %c0_51 = arith.constant 0 : index
    %157 = vector.load %arg14[%156, %c0_50, %c0_51] : memref<8x8x128xf32, #tpu.memory_space<vmem>>, vector<1x8x128xf32>
    %158 = vector.shape_cast %157 : vector<1x8x128xf32> to vector<8x128xf32>
    %159 = vector.shape_cast %155 : vector<8x128xf32> to vector<1x8x128xf32>
    tpu.vector_store %arg14[%156, %c0_50, %c0_51], %159 {strides = array<i32>} : memref<8x8x128xf32, #tpu.memory_space<vmem>>, vector<1x8x128xf32>,
    %160 = arith.index_cast %113 : i32 to index
    %c0_52 = arith.constant 0 : index
    %c0_53 = arith.constant 0 : index
    %161 = vector.load %arg13[%160, %c0_52, %c0_53] : memref<8x8x512xf32, #tpu.memory_space<vmem>>, vector<1x8x512xf32>
    %162 = vector.shape_cast %161 : vector<1x8x512xf32> to vector<8x512xf32>
    %cst_54 = arith.constant dense<0.000000e+00> : vector<8x512xf32>
    %163 = tpu.matmul %101, %17, %cst_54 {dimension_numbers = #tpu.dot_dimension_numbers<[1], [0], [0], [1], [0, 0, 1, 1], [], []>} : vector<8x128xf32>, vector<128x512xf32>, vector<8x512xf32> -> vector<8x512xf32>
    %164 = arith.addf %162, %163 : vector<8x512xf32>
    %165 = vector.extract_strided_slice %164 {offsets = [0, 0], sizes = [8, 128], strides = [1, 1]} : vector<8x512xf32> to vector<8x128xf32>
    %166 = arith.negf %165 : vector<8x128xf32>
    %167 = math.exp %166 : vector<8x128xf32>
    %cst_55 = arith.constant 1.000000e+00 : f32
    %168 = vector.broadcast %cst_55 : f32 to vector<8x128xf32>
    %169 = arith.addf %168, %167 : vector<8x128xf32>
    %170 = arith.divf %168, %169 : vector<8x128xf32>
    %171 = vector.extract_strided_slice %164 {offsets = [0, 128], sizes = [8, 128], strides = [1, 1]} : vector<8x512xf32> to vector<8x128xf32>
    %172 = arith.negf %171 : vector<8x128xf32>
    %173 = math.exp %172 : vector<8x128xf32>
    %cst_56 = arith.constant 1.000000e+00 : f32
    %174 = vector.broadcast %cst_56 : f32 to vector<8x128xf32>
    %175 = arith.addf %174, %173 : vector<8x128xf32>
    %176 = arith.divf %174, %175 : vector<8x128xf32>
    %177 = vector.extract_strided_slice %164 {offsets = [0, 256], sizes = [8, 128], strides = [1, 1]} : vector<8x512xf32> to vector<8x128xf32>
    %178 = math.tanh %177 : vector<8x128xf32>
    %179 = vector.extract_strided_slice %164 {offsets = [0, 384], sizes = [8, 128], strides = [1, 1]} : vector<8x512xf32> to vector<8x128xf32>
    %180 = arith.negf %179 : vector<8x128xf32>
    %181 = math.exp %180 : vector<8x128xf32>
    %cst_57 = arith.constant 1.000000e+00 : f32
    %182 = vector.broadcast %cst_57 : f32 to vector<8x128xf32>
    %183 = arith.addf %182, %181 : vector<8x128xf32>
    %184 = arith.divf %182, %183 : vector<8x128xf32>
    %185 = arith.mulf %176, %104 : vector<8x128xf32>
    %186 = arith.mulf %170, %178 : vector<8x128xf32>
    %187 = arith.addf %185, %186 : vector<8x128xf32>
    %188 = math.tanh %187 : vector<8x128xf32>
    %189 = arith.mulf %184, %188 : vector<8x128xf32>
    %190 = vector.broadcast %113 : i32 to vector<8x1xi32>
    %191 = arith.cmpi sgt, %18, %190 : vector<8x1xi32>
    %192 = vector.shape_cast %191 : vector<8x1xi1> to vector<8x1xi1>
    %193 = vector.broadcast %192 : vector<8x1xi1> to vector<8x128xi1>
    %194 = arith.select %193, %189, %101 : vector<8x128xi1>, vector<8x128xf32>
    %195 = vector.shape_cast %191 : vector<8x1xi1> to vector<8x1xi1>
    %196 = vector.broadcast %195 : vector<8x1xi1> to vector<8x128xi1>
    %197 = arith.select %196, %187, %104 : vector<8x128xi1>, vector<8x128xf32>
    %cst_58 = arith.constant 0.000000e+00 : f32
    %198 = vector.shape_cast %191 : vector<8x1xi1> to vector<8x1xi1>
    %199 = vector.broadcast %198 : vector<8x1xi1> to vector<8x128xi1>
    %200 = vector.broadcast %cst_58 : f32 to vector<8x128xf32>
    %201 = arith.select %199, %194, %200 : vector<8x128xi1>, vector<8x128xf32>
    %202 = arith.index_cast %113 : i32 to index
    %c0_59 = arith.constant 0 : index
    %c0_60 = arith.constant 0 : index
    %203 = vector.load %arg15[%202, %c0_59, %c0_60] : memref<8x8x128xf32, #tpu.memory_space<vmem>>, vector<1x8x128xf32>
    %204 = vector.shape_cast %203 : vector<1x8x128xf32> to vector<8x128xf32>
    %205 = vector.shape_cast %201 : vector<8x128xf32> to vector<1x8x128xf32>
    tpu.vector_store %arg15[%202, %c0_59, %c0_60], %205 {strides = array<i32>} : memref<8x8x128xf32, #tpu.memory_space<vmem>>, vector<1x8x128xf32>,
    %c2_i32 = arith.constant 2 : i32
    %c7_i32_61 = arith.constant 7 : i32
    %206 = arith.subi %c7_i32_61, %c2_i32 : i32
    %207 = arith.index_cast %c2_i32 : i32 to index
    %c0_62 = arith.constant 0 : index
    %c0_63 = arith.constant 0 : index
    %208 = vector.load %arg12[%207, %c0_62, %c0_63] : memref<8x8x512xf32, #tpu.memory_space<vmem>>, vector<1x8x512xf32>
    %209 = vector.shape_cast %208 : vector<1x8x512xf32> to vector<8x512xf32>
    %cst_64 = arith.constant dense<0.000000e+00> : vector<8x512xf32>
    %210 = tpu.matmul %148, %16, %cst_64 {dimension_numbers = #tpu.dot_dimension_numbers<[1], [0], [0], [1], [0, 0, 1, 1], [], []>} : vector<8x128xf32>, vector<128x512xf32>, vector<8x512xf32> -> vector<8x512xf32>
    %211 = arith.addf %209, %210 : vector<8x512xf32>
    %212 = vector.extract_strided_slice %211 {offsets = [0, 0], sizes = [8, 128], strides = [1, 1]} : vector<8x512xf32> to vector<8x128xf32>
    %213 = arith.negf %212 : vector<8x128xf32>
    %214 = math.exp %213 : vector<8x128xf32>
    %cst_65 = arith.constant 1.000000e+00 : f32
    %215 = vector.broadcast %cst_65 : f32 to vector<8x128xf32>
    %216 = arith.addf %215, %214 : vector<8x128xf32>
    %217 = arith.divf %215, %216 : vector<8x128xf32>
    %218 = vector.extract_strided_slice %211 {offsets = [0, 128], sizes = [8, 128], strides = [1, 1]} : vector<8x512xf32> to vector<8x128xf32>
    %219 = arith.negf %218 : vector<8x128xf32>
    %220 = math.exp %219 : vector<8x128xf32>
    %cst_66 = arith.constant 1.000000e+00 : f32
    %221 = vector.broadcast %cst_66 : f32 to vector<8x128xf32>
    %222 = arith.addf %221, %220 : vector<8x128xf32>
    %223 = arith.divf %221, %222 : vector<8x128xf32>
    %224 = vector.extract_strided_slice %211 {offsets = [0, 256], sizes = [8, 128], strides = [1, 1]} : vector<8x512xf32> to vector<8x128xf32>
    %225 = math.tanh %224 : vector<8x128xf32>
    %226 = vector.extract_strided_slice %211 {offsets = [0, 384], sizes = [8, 128], strides = [1, 1]} : vector<8x512xf32> to vector<8x128xf32>
    %227 = arith.negf %226 : vector<8x128xf32>
    %228 = math.exp %227 : vector<8x128xf32>
    %cst_67 = arith.constant 1.000000e+00 : f32
    %229 = vector.broadcast %cst_67 : f32 to vector<8x128xf32>
    %230 = arith.addf %229, %228 : vector<8x128xf32>
    %231 = arith.divf %229, %230 : vector<8x128xf32>
    %232 = arith.mulf %223, %151 : vector<8x128xf32>
    %233 = arith.mulf %217, %225 : vector<8x128xf32>
    %234 = arith.addf %232, %233 : vector<8x128xf32>
    %235 = math.tanh %234 : vector<8x128xf32>
    %236 = arith.mulf %231, %235 : vector<8x128xf32>
    %237 = vector.broadcast %c2_i32 : i32 to vector<8x1xi32>
    %238 = arith.cmpi sgt, %18, %237 : vector<8x1xi32>
    %239 = vector.shape_cast %238 : vector<8x1xi1> to vector<8x1xi1>
    %240 = vector.broadcast %239 : vector<8x1xi1> to vector<8x128xi1>
    %241 = arith.select %240, %236, %148 : vector<8x128xi1>, vector<8x128xf32>
    %242 = vector.shape_cast %238 : vector<8x1xi1> to vector<8x1xi1>
    %243 = vector.broadcast %242 : vector<8x1xi1> to vector<8x128xi1>
    %244 = arith.select %243, %234, %151 : vector<8x128xi1>, vector<8x128xf32>
    %cst_68 = arith.constant 0.000000e+00 : f32
    %245 = vector.shape_cast %238 : vector<8x1xi1> to vector<8x1xi1>
    %246 = vector.broadcast %245 : vector<8x1xi1> to vector<8x128xi1>
    %247 = vector.broadcast %cst_68 : f32 to vector<8x128xf32>
    %248 = arith.select %246, %241, %247 : vector<8x128xi1>, vector<8x128xf32>
    %249 = arith.index_cast %c2_i32 : i32 to index
    %c0_69 = arith.constant 0 : index
    %c0_70 = arith.constant 0 : index
    %250 = vector.load %arg14[%249, %c0_69, %c0_70] : memref<8x8x128xf32, #tpu.memory_space<vmem>>, vector<1x8x128xf32>
    %251 = vector.shape_cast %250 : vector<1x8x128xf32> to vector<8x128xf32>
    %252 = vector.shape_cast %248 : vector<8x128xf32> to vector<1x8x128xf32>
    tpu.vector_store %arg14[%249, %c0_69, %c0_70], %252 {strides = array<i32>} : memref<8x8x128xf32, #tpu.memory_space<vmem>>, vector<1x8x128xf32>,
    %253 = arith.index_cast %206 : i32 to index
    %c0_71 = arith.constant 0 : index
    %c0_72 = arith.constant 0 : index
    %254 = vector.load %arg13[%253, %c0_71, %c0_72] : memref<8x8x512xf32, #tpu.memory_space<vmem>>, vector<1x8x512xf32>
    %255 = vector.shape_cast %254 : vector<1x8x512xf32> to vector<8x512xf32>
    %cst_73 = arith.constant dense<0.000000e+00> : vector<8x512xf32>
    %256 = tpu.matmul %194, %17, %cst_73 {dimension_numbers = #tpu.dot_dimension_numbers<[1], [0], [0], [1], [0, 0, 1, 1], [], []>} : vector<8x128xf32>, vector<128x512xf32>, vector<8x512xf32> -> vector<8x512xf32>
    %257 = arith.addf %255, %256 : vector<8x512xf32>
    %258 = vector.extract_strided_slice %257 {offsets = [0, 0], sizes = [8, 128], strides = [1, 1]} : vector<8x512xf32> to vector<8x128xf32>
    %259 = arith.negf %258 : vector<8x128xf32>
    %260 = math.exp %259 : vector<8x128xf32>
    %cst_74 = arith.constant 1.000000e+00 : f32
    %261 = vector.broadcast %cst_74 : f32 to vector<8x128xf32>
    %262 = arith.addf %261, %260 : vector<8x128xf32>
    %263 = arith.divf %261, %262 : vector<8x128xf32>
    %264 = vector.extract_strided_slice %257 {offsets = [0, 128], sizes = [8, 128], strides = [1, 1]} : vector<8x512xf32> to vector<8x128xf32>
    %265 = arith.negf %264 : vector<8x128xf32>
    %266 = math.exp %265 : vector<8x128xf32>
    %cst_75 = arith.constant 1.000000e+00 : f32
    %267 = vector.broadcast %cst_75 : f32 to vector<8x128xf32>
    %268 = arith.addf %267, %266 : vector<8x128xf32>
    %269 = arith.divf %267, %268 : vector<8x128xf32>
    %270 = vector.extract_strided_slice %257 {offsets = [0, 256], sizes = [8, 128], strides = [1, 1]} : vector<8x512xf32> to vector<8x128xf32>
    %271 = math.tanh %270 : vector<8x128xf32>
    %272 = vector.extract_strided_slice %257 {offsets = [0, 384], sizes = [8, 128], strides = [1, 1]} : vector<8x512xf32> to vector<8x128xf32>
    %273 = arith.negf %272 : vector<8x128xf32>
    %274 = math.exp %273 : vector<8x128xf32>
    %cst_76 = arith.constant 1.000000e+00 : f32
    %275 = vector.broadcast %cst_76 : f32 to vector<8x128xf32>
    %276 = arith.addf %275, %274 : vector<8x128xf32>
    %277 = arith.divf %275, %276 : vector<8x128xf32>
    %278 = arith.mulf %269, %197 : vector<8x128xf32>
    %279 = arith.mulf %263, %271 : vector<8x128xf32>
    %280 = arith.addf %278, %279 : vector<8x128xf32>
    %281 = math.tanh %280 : vector<8x128xf32>
    %282 = arith.mulf %277, %281 : vector<8x128xf32>
    %283 = vector.broadcast %206 : i32 to vector<8x1xi32>
    %284 = arith.cmpi sgt, %18, %283 : vector<8x1xi32>
    %285 = vector.shape_cast %284 : vector<8x1xi1> to vector<8x1xi1>
    %286 = vector.broadcast %285 : vector<8x1xi1> to vector<8x128xi1>
    %287 = arith.select %286, %282, %194 : vector<8x128xi1>, vector<8x128xf32>
    %288 = vector.shape_cast %284 : vector<8x1xi1> to vector<8x1xi1>
    %289 = vector.broadcast %288 : vector<8x1xi1> to vector<8x128xi1>
    %290 = arith.select %289, %280, %197 : vector<8x128xi1>, vector<8x128xf32>
    %cst_77 = arith.constant 0.000000e+00 : f32
    %291 = vector.shape_cast %284 : vector<8x1xi1> to vector<8x1xi1>
    %292 = vector.broadcast %291 : vector<8x1xi1> to vector<8x128xi1>
    %293 = vector.broadcast %cst_77 : f32 to vector<8x128xf32>
    %294 = arith.select %292, %287, %293 : vector<8x128xi1>, vector<8x128xf32>
    %295 = arith.index_cast %206 : i32 to index
    %c0_78 = arith.constant 0 : index
    %c0_79 = arith.constant 0 : index
    %296 = vector.load %arg15[%295, %c0_78, %c0_79] : memref<8x8x128xf32, #tpu.memory_space<vmem>>, vector<1x8x128xf32>
    %297 = vector.shape_cast %296 : vector<1x8x128xf32> to vector<8x128xf32>
    %298 = vector.shape_cast %294 : vector<8x128xf32> to vector<1x8x128xf32>
    tpu.vector_store %arg15[%295, %c0_78, %c0_79], %298 {strides = array<i32>} : memref<8x8x128xf32, #tpu.memory_space<vmem>>, vector<1x8x128xf32>,
    %c3_i32 = arith.constant 3 : i32
    %c7_i32_80 = arith.constant 7 : i32
    %299 = arith.subi %c7_i32_80, %c3_i32 : i32
    %300 = arith.index_cast %c3_i32 : i32 to index
    %c0_81 = arith.constant 0 : index
    %c0_82 = arith.constant 0 : index
    %301 = vector.load %arg12[%300, %c0_81, %c0_82] : memref<8x8x512xf32, #tpu.memory_space<vmem>>, vector<1x8x512xf32>
    %302 = vector.shape_cast %301 : vector<1x8x512xf32> to vector<8x512xf32>
    %cst_83 = arith.constant dense<0.000000e+00> : vector<8x512xf32>
    %303 = tpu.matmul %241, %16, %cst_83 {dimension_numbers = #tpu.dot_dimension_numbers<[1], [0], [0], [1], [0, 0, 1, 1], [], []>} : vector<8x128xf32>, vector<128x512xf32>, vector<8x512xf32> -> vector<8x512xf32>
    %304 = arith.addf %302, %303 : vector<8x512xf32>
    %305 = vector.extract_strided_slice %304 {offsets = [0, 0], sizes = [8, 128], strides = [1, 1]} : vector<8x512xf32> to vector<8x128xf32>
    %306 = arith.negf %305 : vector<8x128xf32>
    %307 = math.exp %306 : vector<8x128xf32>
    %cst_84 = arith.constant 1.000000e+00 : f32
    %308 = vector.broadcast %cst_84 : f32 to vector<8x128xf32>
    %309 = arith.addf %308, %307 : vector<8x128xf32>
    %310 = arith.divf %308, %309 : vector<8x128xf32>
    %311 = vector.extract_strided_slice %304 {offsets = [0, 128], sizes = [8, 128], strides = [1, 1]} : vector<8x512xf32> to vector<8x128xf32>
    %312 = arith.negf %311 : vector<8x128xf32>
    %313 = math.exp %312 : vector<8x128xf32>
    %cst_85 = arith.constant 1.000000e+00 : f32
    %314 = vector.broadcast %cst_85 : f32 to vector<8x128xf32>
    %315 = arith.addf %314, %313 : vector<8x128xf32>
    %316 = arith.divf %314, %315 : vector<8x128xf32>
    %317 = vector.extract_strided_slice %304 {offsets = [0, 256], sizes = [8, 128], strides = [1, 1]} : vector<8x512xf32> to vector<8x128xf32>
    %318 = math.tanh %317 : vector<8x128xf32>
    %319 = vector.extract_strided_slice %304 {offsets = [0, 384], sizes = [8, 128], strides = [1, 1]} : vector<8x512xf32> to vector<8x128xf32>
    %320 = arith.negf %319 : vector<8x128xf32>
    %321 = math.exp %320 : vector<8x128xf32>
    %cst_86 = arith.constant 1.000000e+00 : f32
    %322 = vector.broadcast %cst_86 : f32 to vector<8x128xf32>
    %323 = arith.addf %322, %321 : vector<8x128xf32>
    %324 = arith.divf %322, %323 : vector<8x128xf32>
    %325 = arith.mulf %316, %244 : vector<8x128xf32>
    %326 = arith.mulf %310, %318 : vector<8x128xf32>
    %327 = arith.addf %325, %326 : vector<8x128xf32>
    %328 = math.tanh %327 : vector<8x128xf32>
    %329 = arith.mulf %324, %328 : vector<8x128xf32>
    %330 = vector.broadcast %c3_i32 : i32 to vector<8x1xi32>
    %331 = arith.cmpi sgt, %18, %330 : vector<8x1xi32>
    %332 = vector.shape_cast %331 : vector<8x1xi1> to vector<8x1xi1>
    %333 = vector.broadcast %332 : vector<8x1xi1> to vector<8x128xi1>
    %334 = arith.select %333, %329, %241 : vector<8x128xi1>, vector<8x128xf32>
    %335 = vector.shape_cast %331 : vector<8x1xi1> to vector<8x1xi1>
    %336 = vector.broadcast %335 : vector<8x1xi1> to vector<8x128xi1>
    %337 = arith.select %336, %327, %244 : vector<8x128xi1>, vector<8x128xf32>
    %cst_87 = arith.constant 0.000000e+00 : f32
    %338 = vector.shape_cast %331 : vector<8x1xi1> to vector<8x1xi1>
    %339 = vector.broadcast %338 : vector<8x1xi1> to vector<8x128xi1>
    %340 = vector.broadcast %cst_87 : f32 to vector<8x128xf32>
    %341 = arith.select %339, %334, %340 : vector<8x128xi1>, vector<8x128xf32>
    %342 = arith.index_cast %c3_i32 : i32 to index
    %c0_88 = arith.constant 0 : index
    %c0_89 = arith.constant 0 : index
    %343 = vector.load %arg14[%342, %c0_88, %c0_89] : memref<8x8x128xf32, #tpu.memory_space<vmem>>, vector<1x8x128xf32>
    %344 = vector.shape_cast %343 : vector<1x8x128xf32> to vector<8x128xf32>
    %345 = vector.shape_cast %341 : vector<8x128xf32> to vector<1x8x128xf32>
    tpu.vector_store %arg14[%342, %c0_88, %c0_89], %345 {strides = array<i32>} : memref<8x8x128xf32, #tpu.memory_space<vmem>>, vector<1x8x128xf32>,
    %346 = arith.index_cast %299 : i32 to index
    %c0_90 = arith.constant 0 : index
    %c0_91 = arith.constant 0 : index
    %347 = vector.load %arg13[%346, %c0_90, %c0_91] : memref<8x8x512xf32, #tpu.memory_space<vmem>>, vector<1x8x512xf32>
    %348 = vector.shape_cast %347 : vector<1x8x512xf32> to vector<8x512xf32>
    %cst_92 = arith.constant dense<0.000000e+00> : vector<8x512xf32>
    %349 = tpu.matmul %287, %17, %cst_92 {dimension_numbers = #tpu.dot_dimension_numbers<[1], [0], [0], [1], [0, 0, 1, 1], [], []>} : vector<8x128xf32>, vector<128x512xf32>, vector<8x512xf32> -> vector<8x512xf32>
    %350 = arith.addf %348, %349 : vector<8x512xf32>
    %351 = vector.extract_strided_slice %350 {offsets = [0, 0], sizes = [8, 128], strides = [1, 1]} : vector<8x512xf32> to vector<8x128xf32>
    %352 = arith.negf %351 : vector<8x128xf32>
    %353 = math.exp %352 : vector<8x128xf32>
    %cst_93 = arith.constant 1.000000e+00 : f32
    %354 = vector.broadcast %cst_93 : f32 to vector<8x128xf32>
    %355 = arith.addf %354, %353 : vector<8x128xf32>
    %356 = arith.divf %354, %355 : vector<8x128xf32>
    %357 = vector.extract_strided_slice %350 {offsets = [0, 128], sizes = [8, 128], strides = [1, 1]} : vector<8x512xf32> to vector<8x128xf32>
    %358 = arith.negf %357 : vector<8x128xf32>
    %359 = math.exp %358 : vector<8x128xf32>
    %cst_94 = arith.constant 1.000000e+00 : f32
    %360 = vector.broadcast %cst_94 : f32 to vector<8x128xf32>
    %361 = arith.addf %360, %359 : vector<8x128xf32>
    %362 = arith.divf %360, %361 : vector<8x128xf32>
    %363 = vector.extract_strided_slice %350 {offsets = [0, 256], sizes = [8, 128], strides = [1, 1]} : vector<8x512xf32> to vector<8x128xf32>
    %364 = math.tanh %363 : vector<8x128xf32>
    %365 = vector.extract_strided_slice %350 {offsets = [0, 384], sizes = [8, 128], strides = [1, 1]} : vector<8x512xf32> to vector<8x128xf32>
    %366 = arith.negf %365 : vector<8x128xf32>
    %367 = math.exp %366 : vector<8x128xf32>
    %cst_95 = arith.constant 1.000000e+00 : f32
    %368 = vector.broadcast %cst_95 : f32 to vector<8x128xf32>
    %369 = arith.addf %368, %367 : vector<8x128xf32>
    %370 = arith.divf %368, %369 : vector<8x128xf32>
    %371 = arith.mulf %362, %290 : vector<8x128xf32>
    %372 = arith.mulf %356, %364 : vector<8x128xf32>
    %373 = arith.addf %371, %372 : vector<8x128xf32>
    %374 = math.tanh %373 : vector<8x128xf32>
    %375 = arith.mulf %370, %374 : vector<8x128xf32>
    %376 = vector.broadcast %299 : i32 to vector<8x1xi32>
    %377 = arith.cmpi sgt, %18, %376 : vector<8x1xi32>
    %378 = vector.shape_cast %377 : vector<8x1xi1> to vector<8x1xi1>
    %379 = vector.broadcast %378 : vector<8x1xi1> to vector<8x128xi1>
    %380 = arith.select %379, %375, %287 : vector<8x128xi1>, vector<8x128xf32>
    %381 = vector.shape_cast %377 : vector<8x1xi1> to vector<8x1xi1>
    %382 = vector.broadcast %381 : vector<8x1xi1> to vector<8x128xi1>
    %383 = arith.select %382, %373, %290 : vector<8x128xi1>, vector<8x128xf32>
    %cst_96 = arith.constant 0.000000e+00 : f32
    %384 = vector.shape_cast %377 : vector<8x1xi1> to vector<8x1xi1>
    %385 = vector.broadcast %384 : vector<8x1xi1> to vector<8x128xi1>
    %386 = vector.broadcast %cst_96 : f32 to vector<8x128xf32>
    %387 = arith.select %385, %380, %386 : vector<8x128xi1>, vector<8x128xf32>
    %388 = arith.index_cast %299 : i32 to index
    %c0_97 = arith.constant 0 : index
    %c0_98 = arith.constant 0 : index
    %389 = vector.load %arg15[%388, %c0_97, %c0_98] : memref<8x8x128xf32, #tpu.memory_space<vmem>>, vector<1x8x128xf32>
    %390 = vector.shape_cast %389 : vector<1x8x128xf32> to vector<8x128xf32>
    %391 = vector.shape_cast %387 : vector<8x128xf32> to vector<1x8x128xf32>
    tpu.vector_store %arg15[%388, %c0_97, %c0_98], %391 {strides = array<i32>} : memref<8x8x128xf32, #tpu.memory_space<vmem>>, vector<1x8x128xf32>,
    %c4_i32 = arith.constant 4 : i32
    %c7_i32_99 = arith.constant 7 : i32
    %392 = arith.subi %c7_i32_99, %c4_i32 : i32
    %393 = arith.index_cast %c4_i32 : i32 to index
    %c0_100 = arith.constant 0 : index
    %c0_101 = arith.constant 0 : index
    %394 = vector.load %arg12[%393, %c0_100, %c0_101] : memref<8x8x512xf32, #tpu.memory_space<vmem>>, vector<1x8x512xf32>
    %395 = vector.shape_cast %394 : vector<1x8x512xf32> to vector<8x512xf32>
    %cst_102 = arith.constant dense<0.000000e+00> : vector<8x512xf32>
    %396 = tpu.matmul %334, %16, %cst_102 {dimension_numbers = #tpu.dot_dimension_numbers<[1], [0], [0], [1], [0, 0, 1, 1], [], []>} : vector<8x128xf32>, vector<128x512xf32>, vector<8x512xf32> -> vector<8x512xf32>
    %397 = arith.addf %395, %396 : vector<8x512xf32>
    %398 = vector.extract_strided_slice %397 {offsets = [0, 0], sizes = [8, 128], strides = [1, 1]} : vector<8x512xf32> to vector<8x128xf32>
    %399 = arith.negf %398 : vector<8x128xf32>
    %400 = math.exp %399 : vector<8x128xf32>
    %cst_103 = arith.constant 1.000000e+00 : f32
    %401 = vector.broadcast %cst_103 : f32 to vector<8x128xf32>
    %402 = arith.addf %401, %400 : vector<8x128xf32>
    %403 = arith.divf %401, %402 : vector<8x128xf32>
    %404 = vector.extract_strided_slice %397 {offsets = [0, 128], sizes = [8, 128], strides = [1, 1]} : vector<8x512xf32> to vector<8x128xf32>
    %405 = arith.negf %404 : vector<8x128xf32>
    %406 = math.exp %405 : vector<8x128xf32>
    %cst_104 = arith.constant 1.000000e+00 : f32
    %407 = vector.broadcast %cst_104 : f32 to vector<8x128xf32>
    %408 = arith.addf %407, %406 : vector<8x128xf32>
    %409 = arith.divf %407, %408 : vector<8x128xf32>
    %410 = vector.extract_strided_slice %397 {offsets = [0, 256], sizes = [8, 128], strides = [1, 1]} : vector<8x512xf32> to vector<8x128xf32>
    %411 = math.tanh %410 : vector<8x128xf32>
    %412 = vector.extract_strided_slice %397 {offsets = [0, 384], sizes = [8, 128], strides = [1, 1]} : vector<8x512xf32> to vector<8x128xf32>
    %413 = arith.negf %412 : vector<8x128xf32>
    %414 = math.exp %413 : vector<8x128xf32>
    %cst_105 = arith.constant 1.000000e+00 : f32
    %415 = vector.broadcast %cst_105 : f32 to vector<8x128xf32>
    %416 = arith.addf %415, %414 : vector<8x128xf32>
    %417 = arith.divf %415, %416 : vector<8x128xf32>
    %418 = arith.mulf %409, %337 : vector<8x128xf32>
    %419 = arith.mulf %403, %411 : vector<8x128xf32>
    %420 = arith.addf %418, %419 : vector<8x128xf32>
    %421 = math.tanh %420 : vector<8x128xf32>
    %422 = arith.mulf %417, %421 : vector<8x128xf32>
    %423 = vector.broadcast %c4_i32 : i32 to vector<8x1xi32>
    %424 = arith.cmpi sgt, %18, %423 : vector<8x1xi32>
    %425 = vector.shape_cast %424 : vector<8x1xi1> to vector<8x1xi1>
    %426 = vector.broadcast %425 : vector<8x1xi1> to vector<8x128xi1>
    %427 = arith.select %426, %422, %334 : vector<8x128xi1>, vector<8x128xf32>
    %428 = vector.shape_cast %424 : vector<8x1xi1> to vector<8x1xi1>
    %429 = vector.broadcast %428 : vector<8x1xi1> to vector<8x128xi1>
    %430 = arith.select %429, %420, %337 : vector<8x128xi1>, vector<8x128xf32>
    %cst_106 = arith.constant 0.000000e+00 : f32
    %431 = vector.shape_cast %424 : vector<8x1xi1> to vector<8x1xi1>
    %432 = vector.broadcast %431 : vector<8x1xi1> to vector<8x128xi1>
    %433 = vector.broadcast %cst_106 : f32 to vector<8x128xf32>
    %434 = arith.select %432, %427, %433 : vector<8x128xi1>, vector<8x128xf32>
    %435 = arith.index_cast %c4_i32 : i32 to index
    %c0_107 = arith.constant 0 : index
    %c0_108 = arith.constant 0 : index
    %436 = vector.load %arg14[%435, %c0_107, %c0_108] : memref<8x8x128xf32, #tpu.memory_space<vmem>>, vector<1x8x128xf32>
    %437 = vector.shape_cast %436 : vector<1x8x128xf32> to vector<8x128xf32>
    %438 = vector.shape_cast %434 : vector<8x128xf32> to vector<1x8x128xf32>
    tpu.vector_store %arg14[%435, %c0_107, %c0_108], %438 {strides = array<i32>} : memref<8x8x128xf32, #tpu.memory_space<vmem>>, vector<1x8x128xf32>,
    %439 = arith.index_cast %392 : i32 to index
    %c0_109 = arith.constant 0 : index
    %c0_110 = arith.constant 0 : index
    %440 = vector.load %arg13[%439, %c0_109, %c0_110] : memref<8x8x512xf32, #tpu.memory_space<vmem>>, vector<1x8x512xf32>
    %441 = vector.shape_cast %440 : vector<1x8x512xf32> to vector<8x512xf32>
    %cst_111 = arith.constant dense<0.000000e+00> : vector<8x512xf32>
    %442 = tpu.matmul %380, %17, %cst_111 {dimension_numbers = #tpu.dot_dimension_numbers<[1], [0], [0], [1], [0, 0, 1, 1], [], []>} : vector<8x128xf32>, vector<128x512xf32>, vector<8x512xf32> -> vector<8x512xf32>
    %443 = arith.addf %441, %442 : vector<8x512xf32>
    %444 = vector.extract_strided_slice %443 {offsets = [0, 0], sizes = [8, 128], strides = [1, 1]} : vector<8x512xf32> to vector<8x128xf32>
    %445 = arith.negf %444 : vector<8x128xf32>
    %446 = math.exp %445 : vector<8x128xf32>
    %cst_112 = arith.constant 1.000000e+00 : f32
    %447 = vector.broadcast %cst_112 : f32 to vector<8x128xf32>
    %448 = arith.addf %447, %446 : vector<8x128xf32>
    %449 = arith.divf %447, %448 : vector<8x128xf32>
    %450 = vector.extract_strided_slice %443 {offsets = [0, 128], sizes = [8, 128], strides = [1, 1]} : vector<8x512xf32> to vector<8x128xf32>
    %451 = arith.negf %450 : vector<8x128xf32>
    %452 = math.exp %451 : vector<8x128xf32>
    %cst_113 = arith.constant 1.000000e+00 : f32
    %453 = vector.broadcast %cst_113 : f32 to vector<8x128xf32>
    %454 = arith.addf %453, %452 : vector<8x128xf32>
    %455 = arith.divf %453, %454 : vector<8x128xf32>
    %456 = vector.extract_strided_slice %443 {offsets = [0, 256], sizes = [8, 128], strides = [1, 1]} : vector<8x512xf32> to vector<8x128xf32>
    %457 = math.tanh %456 : vector<8x128xf32>
    %458 = vector.extract_strided_slice %443 {offsets = [0, 384], sizes = [8, 128], strides = [1, 1]} : vector<8x512xf32> to vector<8x128xf32>
    %459 = arith.negf %458 : vector<8x128xf32>
    %460 = math.exp %459 : vector<8x128xf32>
    %cst_114 = arith.constant 1.000000e+00 : f32
    %461 = vector.broadcast %cst_114 : f32 to vector<8x128xf32>
    %462 = arith.addf %461, %460 : vector<8x128xf32>
    %463 = arith.divf %461, %462 : vector<8x128xf32>
    %464 = arith.mulf %455, %383 : vector<8x128xf32>
    %465 = arith.mulf %449, %457 : vector<8x128xf32>
    %466 = arith.addf %464, %465 : vector<8x128xf32>
    %467 = math.tanh %466 : vector<8x128xf32>
    %468 = arith.mulf %463, %467 : vector<8x128xf32>
    %469 = vector.broadcast %392 : i32 to vector<8x1xi32>
    %470 = arith.cmpi sgt, %18, %469 : vector<8x1xi32>
    %471 = vector.shape_cast %470 : vector<8x1xi1> to vector<8x1xi1>
    %472 = vector.broadcast %471 : vector<8x1xi1> to vector<8x128xi1>
    %473 = arith.select %472, %468, %380 : vector<8x128xi1>, vector<8x128xf32>
    %474 = vector.shape_cast %470 : vector<8x1xi1> to vector<8x1xi1>
    %475 = vector.broadcast %474 : vector<8x1xi1> to vector<8x128xi1>
    %476 = arith.select %475, %466, %383 : vector<8x128xi1>, vector<8x128xf32>
    %cst_115 = arith.constant 0.000000e+00 : f32
    %477 = vector.shape_cast %470 : vector<8x1xi1> to vector<8x1xi1>
    %478 = vector.broadcast %477 : vector<8x1xi1> to vector<8x128xi1>
    %479 = vector.broadcast %cst_115 : f32 to vector<8x128xf32>
    %480 = arith.select %478, %473, %479 : vector<8x128xi1>, vector<8x128xf32>
    %481 = arith.index_cast %392 : i32 to index
    %c0_116 = arith.constant 0 : index
    %c0_117 = arith.constant 0 : index
    %482 = vector.load %arg15[%481, %c0_116, %c0_117] : memref<8x8x128xf32, #tpu.memory_space<vmem>>, vector<1x8x128xf32>
    %483 = vector.shape_cast %482 : vector<1x8x128xf32> to vector<8x128xf32>
    %484 = vector.shape_cast %480 : vector<8x128xf32> to vector<1x8x128xf32>
    tpu.vector_store %arg15[%481, %c0_116, %c0_117], %484 {strides = array<i32>} : memref<8x8x128xf32, #tpu.memory_space<vmem>>, vector<1x8x128xf32>,
    %c5_i32 = arith.constant 5 : i32
    %c7_i32_118 = arith.constant 7 : i32
    %485 = arith.subi %c7_i32_118, %c5_i32 : i32
    %486 = arith.index_cast %c5_i32 : i32 to index
    %c0_119 = arith.constant 0 : index
    %c0_120 = arith.constant 0 : index
    %487 = vector.load %arg12[%486, %c0_119, %c0_120] : memref<8x8x512xf32, #tpu.memory_space<vmem>>, vector<1x8x512xf32>
    %488 = vector.shape_cast %487 : vector<1x8x512xf32> to vector<8x512xf32>
    %cst_121 = arith.constant dense<0.000000e+00> : vector<8x512xf32>
    %489 = tpu.matmul %427, %16, %cst_121 {dimension_numbers = #tpu.dot_dimension_numbers<[1], [0], [0], [1], [0, 0, 1, 1], [], []>} : vector<8x128xf32>, vector<128x512xf32>, vector<8x512xf32> -> vector<8x512xf32>
    %490 = arith.addf %488, %489 : vector<8x512xf32>
    %491 = vector.extract_strided_slice %490 {offsets = [0, 0], sizes = [8, 128], strides = [1, 1]} : vector<8x512xf32> to vector<8x128xf32>
    %492 = arith.negf %491 : vector<8x128xf32>
    %493 = math.exp %492 : vector<8x128xf32>
    %cst_122 = arith.constant 1.000000e+00 : f32
    %494 = vector.broadcast %cst_122 : f32 to vector<8x128xf32>
    %495 = arith.addf %494, %493 : vector<8x128xf32>
    %496 = arith.divf %494, %495 : vector<8x128xf32>
    %497 = vector.extract_strided_slice %490 {offsets = [0, 128], sizes = [8, 128], strides = [1, 1]} : vector<8x512xf32> to vector<8x128xf32>
    %498 = arith.negf %497 : vector<8x128xf32>
    %499 = math.exp %498 : vector<8x128xf32>
    %cst_123 = arith.constant 1.000000e+00 : f32
    %500 = vector.broadcast %cst_123 : f32 to vector<8x128xf32>
    %501 = arith.addf %500, %499 : vector<8x128xf32>
    %502 = arith.divf %500, %501 : vector<8x128xf32>
    %503 = vector.extract_strided_slice %490 {offsets = [0, 256], sizes = [8, 128], strides = [1, 1]} : vector<8x512xf32> to vector<8x128xf32>
    %504 = math.tanh %503 : vector<8x128xf32>
    %505 = vector.extract_strided_slice %490 {offsets = [0, 384], sizes = [8, 128], strides = [1, 1]} : vector<8x512xf32> to vector<8x128xf32>
    %506 = arith.negf %505 : vector<8x128xf32>
    %507 = math.exp %506 : vector<8x128xf32>
    %cst_124 = arith.constant 1.000000e+00 : f32
    %508 = vector.broadcast %cst_124 : f32 to vector<8x128xf32>
    %509 = arith.addf %508, %507 : vector<8x128xf32>
    %510 = arith.divf %508, %509 : vector<8x128xf32>
    %511 = arith.mulf %502, %430 : vector<8x128xf32>
    %512 = arith.mulf %496, %504 : vector<8x128xf32>
    %513 = arith.addf %511, %512 : vector<8x128xf32>
    %514 = math.tanh %513 : vector<8x128xf32>
    %515 = arith.mulf %510, %514 : vector<8x128xf32>
    %516 = vector.broadcast %c5_i32 : i32 to vector<8x1xi32>
    %517 = arith.cmpi sgt, %18, %516 : vector<8x1xi32>
    %518 = vector.shape_cast %517 : vector<8x1xi1> to vector<8x1xi1>
    %519 = vector.broadcast %518 : vector<8x1xi1> to vector<8x128xi1>
    %520 = arith.select %519, %515, %427 : vector<8x128xi1>, vector<8x128xf32>
    %521 = vector.shape_cast %517 : vector<8x1xi1> to vector<8x1xi1>
    %522 = vector.broadcast %521 : vector<8x1xi1> to vector<8x128xi1>
    %523 = arith.select %522, %513, %430 : vector<8x128xi1>, vector<8x128xf32>
    %cst_125 = arith.constant 0.000000e+00 : f32
    %524 = vector.shape_cast %517 : vector<8x1xi1> to vector<8x1xi1>
    %525 = vector.broadcast %524 : vector<8x1xi1> to vector<8x128xi1>
    %526 = vector.broadcast %cst_125 : f32 to vector<8x128xf32>
    %527 = arith.select %525, %520, %526 : vector<8x128xi1>, vector<8x128xf32>
    %528 = arith.index_cast %c5_i32 : i32 to index
    %c0_126 = arith.constant 0 : index
    %c0_127 = arith.constant 0 : index
    %529 = vector.load %arg14[%528, %c0_126, %c0_127] : memref<8x8x128xf32, #tpu.memory_space<vmem>>, vector<1x8x128xf32>
    %530 = vector.shape_cast %529 : vector<1x8x128xf32> to vector<8x128xf32>
    %531 = vector.shape_cast %527 : vector<8x128xf32> to vector<1x8x128xf32>
    tpu.vector_store %arg14[%528, %c0_126, %c0_127], %531 {strides = array<i32>} : memref<8x8x128xf32, #tpu.memory_space<vmem>>, vector<1x8x128xf32>,
    %532 = arith.index_cast %485 : i32 to index
    %c0_128 = arith.constant 0 : index
    %c0_129 = arith.constant 0 : index
    %533 = vector.load %arg13[%532, %c0_128, %c0_129] : memref<8x8x512xf32, #tpu.memory_space<vmem>>, vector<1x8x512xf32>
    %534 = vector.shape_cast %533 : vector<1x8x512xf32> to vector<8x512xf32>
    %cst_130 = arith.constant dense<0.000000e+00> : vector<8x512xf32>
    %535 = tpu.matmul %473, %17, %cst_130 {dimension_numbers = #tpu.dot_dimension_numbers<[1], [0], [0], [1], [0, 0, 1, 1], [], []>} : vector<8x128xf32>, vector<128x512xf32>, vector<8x512xf32> -> vector<8x512xf32>
    %536 = arith.addf %534, %535 : vector<8x512xf32>
    %537 = vector.extract_strided_slice %536 {offsets = [0, 0], sizes = [8, 128], strides = [1, 1]} : vector<8x512xf32> to vector<8x128xf32>
    %538 = arith.negf %537 : vector<8x128xf32>
    %539 = math.exp %538 : vector<8x128xf32>
    %cst_131 = arith.constant 1.000000e+00 : f32
    %540 = vector.broadcast %cst_131 : f32 to vector<8x128xf32>
    %541 = arith.addf %540, %539 : vector<8x128xf32>
    %542 = arith.divf %540, %541 : vector<8x128xf32>
    %543 = vector.extract_strided_slice %536 {offsets = [0, 128], sizes = [8, 128], strides = [1, 1]} : vector<8x512xf32> to vector<8x128xf32>
    %544 = arith.negf %543 : vector<8x128xf32>
    %545 = math.exp %544 : vector<8x128xf32>
    %cst_132 = arith.constant 1.000000e+00 : f32
    %546 = vector.broadcast %cst_132 : f32 to vector<8x128xf32>
    %547 = arith.addf %546, %545 : vector<8x128xf32>
    %548 = arith.divf %546, %547 : vector<8x128xf32>
    %549 = vector.extract_strided_slice %536 {offsets = [0, 256], sizes = [8, 128], strides = [1, 1]} : vector<8x512xf32> to vector<8x128xf32>
    %550 = math.tanh %549 : vector<8x128xf32>
    %551 = vector.extract_strided_slice %536 {offsets = [0, 384], sizes = [8, 128], strides = [1, 1]} : vector<8x512xf32> to vector<8x128xf32>
    %552 = arith.negf %551 : vector<8x128xf32>
    %553 = math.exp %552 : vector<8x128xf32>
    %cst_133 = arith.constant 1.000000e+00 : f32
    %554 = vector.broadcast %cst_133 : f32 to vector<8x128xf32>
    %555 = arith.addf %554, %553 : vector<8x128xf32>
    %556 = arith.divf %554, %555 : vector<8x128xf32>
    %557 = arith.mulf %548, %476 : vector<8x128xf32>
    %558 = arith.mulf %542, %550 : vector<8x128xf32>
    %559 = arith.addf %557, %558 : vector<8x128xf32>
    %560 = math.tanh %559 : vector<8x128xf32>
    %561 = arith.mulf %556, %560 : vector<8x128xf32>
    %562 = vector.broadcast %485 : i32 to vector<8x1xi32>
    %563 = arith.cmpi sgt, %18, %562 : vector<8x1xi32>
    %564 = vector.shape_cast %563 : vector<8x1xi1> to vector<8x1xi1>
    %565 = vector.broadcast %564 : vector<8x1xi1> to vector<8x128xi1>
    %566 = arith.select %565, %561, %473 : vector<8x128xi1>, vector<8x128xf32>
    %567 = vector.shape_cast %563 : vector<8x1xi1> to vector<8x1xi1>
    %568 = vector.broadcast %567 : vector<8x1xi1> to vector<8x128xi1>
    %569 = arith.select %568, %559, %476 : vector<8x128xi1>, vector<8x128xf32>
    %cst_134 = arith.constant 0.000000e+00 : f32
    %570 = vector.shape_cast %563 : vector<8x1xi1> to vector<8x1xi1>
    %571 = vector.broadcast %570 : vector<8x1xi1> to vector<8x128xi1>
    %572 = vector.broadcast %cst_134 : f32 to vector<8x128xf32>
    %573 = arith.select %571, %566, %572 : vector<8x128xi1>, vector<8x128xf32>
    %574 = arith.index_cast %485 : i32 to index
    %c0_135 = arith.constant 0 : index
    %c0_136 = arith.constant 0 : index
    %575 = vector.load %arg15[%574, %c0_135, %c0_136] : memref<8x8x128xf32, #tpu.memory_space<vmem>>, vector<1x8x128xf32>
    %576 = vector.shape_cast %575 : vector<1x8x128xf32> to vector<8x128xf32>
    %577 = vector.shape_cast %573 : vector<8x128xf32> to vector<1x8x128xf32>
    tpu.vector_store %arg15[%574, %c0_135, %c0_136], %577 {strides = array<i32>} : memref<8x8x128xf32, #tpu.memory_space<vmem>>, vector<1x8x128xf32>,
    %c6_i32 = arith.constant 6 : i32
    %c7_i32_137 = arith.constant 7 : i32
    %578 = arith.subi %c7_i32_137, %c6_i32 : i32
    %579 = arith.index_cast %c6_i32 : i32 to index
    %c0_138 = arith.constant 0 : index
    %c0_139 = arith.constant 0 : index
    %580 = vector.load %arg12[%579, %c0_138, %c0_139] : memref<8x8x512xf32, #tpu.memory_space<vmem>>, vector<1x8x512xf32>
    %581 = vector.shape_cast %580 : vector<1x8x512xf32> to vector<8x512xf32>
    %cst_140 = arith.constant dense<0.000000e+00> : vector<8x512xf32>
    %582 = tpu.matmul %520, %16, %cst_140 {dimension_numbers = #tpu.dot_dimension_numbers<[1], [0], [0], [1], [0, 0, 1, 1], [], []>} : vector<8x128xf32>, vector<128x512xf32>, vector<8x512xf32> -> vector<8x512xf32>
    %583 = arith.addf %581, %582 : vector<8x512xf32>
    %584 = vector.extract_strided_slice %583 {offsets = [0, 0], sizes = [8, 128], strides = [1, 1]} : vector<8x512xf32> to vector<8x128xf32>
    %585 = arith.negf %584 : vector<8x128xf32>
    %586 = math.exp %585 : vector<8x128xf32>
    %cst_141 = arith.constant 1.000000e+00 : f32
    %587 = vector.broadcast %cst_141 : f32 to vector<8x128xf32>
    %588 = arith.addf %587, %586 : vector<8x128xf32>
    %589 = arith.divf %587, %588 : vector<8x128xf32>
    %590 = vector.extract_strided_slice %583 {offsets = [0, 128], sizes = [8, 128], strides = [1, 1]} : vector<8x512xf32> to vector<8x128xf32>
    %591 = arith.negf %590 : vector<8x128xf32>
    %592 = math.exp %591 : vector<8x128xf32>
    %cst_142 = arith.constant 1.000000e+00 : f32
    %593 = vector.broadcast %cst_142 : f32 to vector<8x128xf32>
    %594 = arith.addf %593, %592 : vector<8x128xf32>
    %595 = arith.divf %593, %594 : vector<8x128xf32>
    %596 = vector.extract_strided_slice %583 {offsets = [0, 256], sizes = [8, 128], strides = [1, 1]} : vector<8x512xf32> to vector<8x128xf32>
    %597 = math.tanh %596 : vector<8x128xf32>
    %598 = vector.extract_strided_slice %583 {offsets = [0, 384], sizes = [8, 128], strides = [1, 1]} : vector<8x512xf32> to vector<8x128xf32>
    %599 = arith.negf %598 : vector<8x128xf32>
    %600 = math.exp %599 : vector<8x128xf32>
    %cst_143 = arith.constant 1.000000e+00 : f32
    %601 = vector.broadcast %cst_143 : f32 to vector<8x128xf32>
    %602 = arith.addf %601, %600 : vector<8x128xf32>
    %603 = arith.divf %601, %602 : vector<8x128xf32>
    %604 = arith.mulf %595, %523 : vector<8x128xf32>
    %605 = arith.mulf %589, %597 : vector<8x128xf32>
    %606 = arith.addf %604, %605 : vector<8x128xf32>
    %607 = math.tanh %606 : vector<8x128xf32>
    %608 = arith.mulf %603, %607 : vector<8x128xf32>
    %609 = vector.broadcast %c6_i32 : i32 to vector<8x1xi32>
    %610 = arith.cmpi sgt, %18, %609 : vector<8x1xi32>
    %611 = vector.shape_cast %610 : vector<8x1xi1> to vector<8x1xi1>
    %612 = vector.broadcast %611 : vector<8x1xi1> to vector<8x128xi1>
    %613 = arith.select %612, %608, %520 : vector<8x128xi1>, vector<8x128xf32>
    %614 = vector.shape_cast %610 : vector<8x1xi1> to vector<8x1xi1>
    %615 = vector.broadcast %614 : vector<8x1xi1> to vector<8x128xi1>
    %616 = arith.select %615, %606, %523 : vector<8x128xi1>, vector<8x128xf32>
    %cst_144 = arith.constant 0.000000e+00 : f32
    %617 = vector.shape_cast %610 : vector<8x1xi1> to vector<8x1xi1>
    %618 = vector.broadcast %617 : vector<8x1xi1> to vector<8x128xi1>
    %619 = vector.broadcast %cst_144 : f32 to vector<8x128xf32>
    %620 = arith.select %618, %613, %619 : vector<8x128xi1>, vector<8x128xf32>
    %621 = arith.index_cast %c6_i32 : i32 to index
    %c0_145 = arith.constant 0 : index
    %c0_146 = arith.constant 0 : index
    %622 = vector.load %arg14[%621, %c0_145, %c0_146] : memref<8x8x128xf32, #tpu.memory_space<vmem>>, vector<1x8x128xf32>
    %623 = vector.shape_cast %622 : vector<1x8x128xf32> to vector<8x128xf32>
    %624 = vector.shape_cast %620 : vector<8x128xf32> to vector<1x8x128xf32>
    tpu.vector_store %arg14[%621, %c0_145, %c0_146], %624 {strides = array<i32>} : memref<8x8x128xf32, #tpu.memory_space<vmem>>, vector<1x8x128xf32>,
    %625 = arith.index_cast %578 : i32 to index
    %c0_147 = arith.constant 0 : index
    %c0_148 = arith.constant 0 : index
    %626 = vector.load %arg13[%625, %c0_147, %c0_148] : memref<8x8x512xf32, #tpu.memory_space<vmem>>, vector<1x8x512xf32>
    %627 = vector.shape_cast %626 : vector<1x8x512xf32> to vector<8x512xf32>
    %cst_149 = arith.constant dense<0.000000e+00> : vector<8x512xf32>
    %628 = tpu.matmul %566, %17, %cst_149 {dimension_numbers = #tpu.dot_dimension_numbers<[1], [0], [0], [1], [0, 0, 1, 1], [], []>} : vector<8x128xf32>, vector<128x512xf32>, vector<8x512xf32> -> vector<8x512xf32>
    %629 = arith.addf %627, %628 : vector<8x512xf32>
    %630 = vector.extract_strided_slice %629 {offsets = [0, 0], sizes = [8, 128], strides = [1, 1]} : vector<8x512xf32> to vector<8x128xf32>
    %631 = arith.negf %630 : vector<8x128xf32>
    %632 = math.exp %631 : vector<8x128xf32>
    %cst_150 = arith.constant 1.000000e+00 : f32
    %633 = vector.broadcast %cst_150 : f32 to vector<8x128xf32>
    %634 = arith.addf %633, %632 : vector<8x128xf32>
    %635 = arith.divf %633, %634 : vector<8x128xf32>
    %636 = vector.extract_strided_slice %629 {offsets = [0, 128], sizes = [8, 128], strides = [1, 1]} : vector<8x512xf32> to vector<8x128xf32>
    %637 = arith.negf %636 : vector<8x128xf32>
    %638 = math.exp %637 : vector<8x128xf32>
    %cst_151 = arith.constant 1.000000e+00 : f32
    %639 = vector.broadcast %cst_151 : f32 to vector<8x128xf32>
    %640 = arith.addf %639, %638 : vector<8x128xf32>
    %641 = arith.divf %639, %640 : vector<8x128xf32>
    %642 = vector.extract_strided_slice %629 {offsets = [0, 256], sizes = [8, 128], strides = [1, 1]} : vector<8x512xf32> to vector<8x128xf32>
    %643 = math.tanh %642 : vector<8x128xf32>
    %644 = vector.extract_strided_slice %629 {offsets = [0, 384], sizes = [8, 128], strides = [1, 1]} : vector<8x512xf32> to vector<8x128xf32>
    %645 = arith.negf %644 : vector<8x128xf32>
    %646 = math.exp %645 : vector<8x128xf32>
    %cst_152 = arith.constant 1.000000e+00 : f32
    %647 = vector.broadcast %cst_152 : f32 to vector<8x128xf32>
    %648 = arith.addf %647, %646 : vector<8x128xf32>
    %649 = arith.divf %647, %648 : vector<8x128xf32>
    %650 = arith.mulf %641, %569 : vector<8x128xf32>
    %651 = arith.mulf %635, %643 : vector<8x128xf32>
    %652 = arith.addf %650, %651 : vector<8x128xf32>
    %653 = math.tanh %652 : vector<8x128xf32>
    %654 = arith.mulf %649, %653 : vector<8x128xf32>
    %655 = vector.broadcast %578 : i32 to vector<8x1xi32>
    %656 = arith.cmpi sgt, %18, %655 : vector<8x1xi32>
    %657 = vector.shape_cast %656 : vector<8x1xi1> to vector<8x1xi1>
    %658 = vector.broadcast %657 : vector<8x1xi1> to vector<8x128xi1>
    %659 = arith.select %658, %654, %566 : vector<8x128xi1>, vector<8x128xf32>
    %660 = vector.shape_cast %656 : vector<8x1xi1> to vector<8x1xi1>
    %661 = vector.broadcast %660 : vector<8x1xi1> to vector<8x128xi1>
    %662 = arith.select %661, %652, %569 : vector<8x128xi1>, vector<8x128xf32>
    %cst_153 = arith.constant 0.000000e+00 : f32
    %663 = vector.shape_cast %656 : vector<8x1xi1> to vector<8x1xi1>
    %664 = vector.broadcast %663 : vector<8x1xi1> to vector<8x128xi1>
    %665 = vector.broadcast %cst_153 : f32 to vector<8x128xf32>
    %666 = arith.select %664, %659, %665 : vector<8x128xi1>, vector<8x128xf32>
    %667 = arith.index_cast %578 : i32 to index
    %c0_154 = arith.constant 0 : index
    %c0_155 = arith.constant 0 : index
    %668 = vector.load %arg15[%667, %c0_154, %c0_155] : memref<8x8x128xf32, #tpu.memory_space<vmem>>, vector<1x8x128xf32>
    %669 = vector.shape_cast %668 : vector<1x8x128xf32> to vector<8x128xf32>
    %670 = vector.shape_cast %666 : vector<8x128xf32> to vector<1x8x128xf32>
    tpu.vector_store %arg15[%667, %c0_154, %c0_155], %670 {strides = array<i32>} : memref<8x8x128xf32, #tpu.memory_space<vmem>>, vector<1x8x128xf32>,
    %c7_i32_156 = arith.constant 7 : i32
    %c7_i32_157 = arith.constant 7 : i32
    %671 = arith.subi %c7_i32_157, %c7_i32_156 : i32
    %672 = arith.index_cast %c7_i32_156 : i32 to index
    %c0_158 = arith.constant 0 : index
    %c0_159 = arith.constant 0 : index
    %673 = vector.load %arg12[%672, %c0_158, %c0_159] : memref<8x8x512xf32, #tpu.memory_space<vmem>>, vector<1x8x512xf32>
    %674 = vector.shape_cast %673 : vector<1x8x512xf32> to vector<8x512xf32>
    %cst_160 = arith.constant dense<0.000000e+00> : vector<8x512xf32>
    %675 = tpu.matmul %613, %16, %cst_160 {dimension_numbers = #tpu.dot_dimension_numbers<[1], [0], [0], [1], [0, 0, 1, 1], [], []>} : vector<8x128xf32>, vector<128x512xf32>, vector<8x512xf32> -> vector<8x512xf32>
    %676 = arith.addf %674, %675 : vector<8x512xf32>
    %677 = vector.extract_strided_slice %676 {offsets = [0, 0], sizes = [8, 128], strides = [1, 1]} : vector<8x512xf32> to vector<8x128xf32>
    %678 = arith.negf %677 : vector<8x128xf32>
    %679 = math.exp %678 : vector<8x128xf32>
    %cst_161 = arith.constant 1.000000e+00 : f32
    %680 = vector.broadcast %cst_161 : f32 to vector<8x128xf32>
    %681 = arith.addf %680, %679 : vector<8x128xf32>
    %682 = arith.divf %680, %681 : vector<8x128xf32>
    %683 = vector.extract_strided_slice %676 {offsets = [0, 128], sizes = [8, 128], strides = [1, 1]} : vector<8x512xf32> to vector<8x128xf32>
    %684 = arith.negf %683 : vector<8x128xf32>
    %685 = math.exp %684 : vector<8x128xf32>
    %cst_162 = arith.constant 1.000000e+00 : f32
    %686 = vector.broadcast %cst_162 : f32 to vector<8x128xf32>
    %687 = arith.addf %686, %685 : vector<8x128xf32>
    %688 = arith.divf %686, %687 : vector<8x128xf32>
    %689 = vector.extract_strided_slice %676 {offsets = [0, 256], sizes = [8, 128], strides = [1, 1]} : vector<8x512xf32> to vector<8x128xf32>
    %690 = math.tanh %689 : vector<8x128xf32>
    %691 = vector.extract_strided_slice %676 {offsets = [0, 384], sizes = [8, 128], strides = [1, 1]} : vector<8x512xf32> to vector<8x128xf32>
    %692 = arith.negf %691 : vector<8x128xf32>
    %693 = math.exp %692 : vector<8x128xf32>
    %cst_163 = arith.constant 1.000000e+00 : f32
    %694 = vector.broadcast %cst_163 : f32 to vector<8x128xf32>
    %695 = arith.addf %694, %693 : vector<8x128xf32>
    %696 = arith.divf %694, %695 : vector<8x128xf32>
    %697 = arith.mulf %688, %616 : vector<8x128xf32>
    %698 = arith.mulf %682, %690 : vector<8x128xf32>
    %699 = arith.addf %697, %698 : vector<8x128xf32>
    %700 = math.tanh %699 : vector<8x128xf32>
    %701 = arith.mulf %696, %700 : vector<8x128xf32>
    %702 = vector.broadcast %c7_i32_156 : i32 to vector<8x1xi32>
    %703 = arith.cmpi sgt, %18, %702 : vector<8x1xi32>
    %704 = vector.shape_cast %703 : vector<8x1xi1> to vector<8x1xi1>
    %705 = vector.broadcast %704 : vector<8x1xi1> to vector<8x128xi1>
    %706 = arith.select %705, %701, %613 : vector<8x128xi1>, vector<8x128xf32>
    %707 = vector.shape_cast %703 : vector<8x1xi1> to vector<8x1xi1>
    %708 = vector.broadcast %707 : vector<8x1xi1> to vector<8x128xi1>
    %709 = arith.select %708, %699, %616 : vector<8x128xi1>, vector<8x128xf32>
    %cst_164 = arith.constant 0.000000e+00 : f32
    %710 = vector.shape_cast %703 : vector<8x1xi1> to vector<8x1xi1>
    %711 = vector.broadcast %710 : vector<8x1xi1> to vector<8x128xi1>
    %712 = vector.broadcast %cst_164 : f32 to vector<8x128xf32>
    %713 = arith.select %711, %706, %712 : vector<8x128xi1>, vector<8x128xf32>
    %714 = arith.index_cast %c7_i32_156 : i32 to index
    %c0_165 = arith.constant 0 : index
    %c0_166 = arith.constant 0 : index
    %715 = vector.load %arg14[%714, %c0_165, %c0_166] : memref<8x8x128xf32, #tpu.memory_space<vmem>>, vector<1x8x128xf32>
    %716 = vector.shape_cast %715 : vector<1x8x128xf32> to vector<8x128xf32>
    %717 = vector.shape_cast %713 : vector<8x128xf32> to vector<1x8x128xf32>
    tpu.vector_store %arg14[%714, %c0_165, %c0_166], %717 {strides = array<i32>} : memref<8x8x128xf32, #tpu.memory_space<vmem>>, vector<1x8x128xf32>,
    %718 = arith.index_cast %671 : i32 to index
    %c0_167 = arith.constant 0 : index
    %c0_168 = arith.constant 0 : index
    %719 = vector.load %arg13[%718, %c0_167, %c0_168] : memref<8x8x512xf32, #tpu.memory_space<vmem>>, vector<1x8x512xf32>
    %720 = vector.shape_cast %719 : vector<1x8x512xf32> to vector<8x512xf32>
    %cst_169 = arith.constant dense<0.000000e+00> : vector<8x512xf32>
    %721 = tpu.matmul %659, %17, %cst_169 {dimension_numbers = #tpu.dot_dimension_numbers<[1], [0], [0], [1], [0, 0, 1, 1], [], []>} : vector<8x128xf32>, vector<128x512xf32>, vector<8x512xf32> -> vector<8x512xf32>
    %722 = arith.addf %720, %721 : vector<8x512xf32>
    %723 = vector.extract_strided_slice %722 {offsets = [0, 0], sizes = [8, 128], strides = [1, 1]} : vector<8x512xf32> to vector<8x128xf32>
    %724 = arith.negf %723 : vector<8x128xf32>
    %725 = math.exp %724 : vector<8x128xf32>
    %cst_170 = arith.constant 1.000000e+00 : f32
    %726 = vector.broadcast %cst_170 : f32 to vector<8x128xf32>
    %727 = arith.addf %726, %725 : vector<8x128xf32>
    %728 = arith.divf %726, %727 : vector<8x128xf32>
    %729 = vector.extract_strided_slice %722 {offsets = [0, 128], sizes = [8, 128], strides = [1, 1]} : vector<8x512xf32> to vector<8x128xf32>
    %730 = arith.negf %729 : vector<8x128xf32>
    %731 = math.exp %730 : vector<8x128xf32>
    %cst_171 = arith.constant 1.000000e+00 : f32
    %732 = vector.broadcast %cst_171 : f32 to vector<8x128xf32>
    %733 = arith.addf %732, %731 : vector<8x128xf32>
    %734 = arith.divf %732, %733 : vector<8x128xf32>
    %735 = vector.extract_strided_slice %722 {offsets = [0, 256], sizes = [8, 128], strides = [1, 1]} : vector<8x512xf32> to vector<8x128xf32>
    %736 = math.tanh %735 : vector<8x128xf32>
    %737 = vector.extract_strided_slice %722 {offsets = [0, 384], sizes = [8, 128], strides = [1, 1]} : vector<8x512xf32> to vector<8x128xf32>
    %738 = arith.negf %737 : vector<8x128xf32>
    %739 = math.exp %738 : vector<8x128xf32>
    %cst_172 = arith.constant 1.000000e+00 : f32
    %740 = vector.broadcast %cst_172 : f32 to vector<8x128xf32>
    %741 = arith.addf %740, %739 : vector<8x128xf32>
    %742 = arith.divf %740, %741 : vector<8x128xf32>
    %743 = arith.mulf %734, %662 : vector<8x128xf32>
    %744 = arith.mulf %728, %736 : vector<8x128xf32>
    %745 = arith.addf %743, %744 : vector<8x128xf32>
    %746 = math.tanh %745 : vector<8x128xf32>
    %747 = arith.mulf %742, %746 : vector<8x128xf32>
    %748 = vector.broadcast %671 : i32 to vector<8x1xi32>
    %749 = arith.cmpi sgt, %18, %748 : vector<8x1xi32>
    %750 = vector.shape_cast %749 : vector<8x1xi1> to vector<8x1xi1>
    %751 = vector.broadcast %750 : vector<8x1xi1> to vector<8x128xi1>
    %752 = arith.select %751, %747, %659 : vector<8x128xi1>, vector<8x128xf32>
    %753 = vector.shape_cast %749 : vector<8x1xi1> to vector<8x1xi1>
    %754 = vector.broadcast %753 : vector<8x1xi1> to vector<8x128xi1>
    %755 = arith.select %754, %745, %662 : vector<8x128xi1>, vector<8x128xf32>
    %cst_173 = arith.constant 0.000000e+00 : f32
    %756 = vector.shape_cast %749 : vector<8x1xi1> to vector<8x1xi1>
    %757 = vector.broadcast %756 : vector<8x1xi1> to vector<8x128xi1>
    %758 = vector.broadcast %cst_173 : f32 to vector<8x128xf32>
    %759 = arith.select %757, %752, %758 : vector<8x128xi1>, vector<8x128xf32>
    %760 = arith.index_cast %671 : i32 to index
    %c0_174 = arith.constant 0 : index
    %c0_175 = arith.constant 0 : index
    %761 = vector.load %arg15[%760, %c0_174, %c0_175] : memref<8x8x128xf32, #tpu.memory_space<vmem>>, vector<1x8x128xf32>
    %762 = vector.shape_cast %761 : vector<1x8x128xf32> to vector<8x128xf32>
    %763 = vector.shape_cast %759 : vector<8x128xf32> to vector<1x8x128xf32>
    tpu.vector_store %arg15[%760, %c0_174, %c0_175], %763 {strides = array<i32>} : memref<8x8x128xf32, #tpu.memory_space<vmem>>, vector<1x8x128xf32>,
    %c8_i32 = arith.constant 8 : i32
    %c0_176 = arith.constant 0 : index
    %c0_177 = arith.constant 0 : index
    %c0_178 = arith.constant 0 : index
    %764 = vector.load %arg14[%c0_176, %c0_177, %c0_178] : memref<8x8x128xf32, #tpu.memory_space<vmem>>, vector<8x8x128xf32>
    %765 = vector.shape_cast %764 : vector<8x8x128xf32> to vector<64x128xf32>
    %c0_179 = arith.constant 0 : index
    %c0_180 = arith.constant 0 : index
    %c0_181 = arith.constant 0 : index
    %766 = vector.load %arg15[%c0_179, %c0_180, %c0_181] : memref<8x8x128xf32, #tpu.memory_space<vmem>>, vector<8x8x128xf32>
    %767 = vector.shape_cast %766 : vector<8x8x128xf32> to vector<64x128xf32>
    %c0_182 = arith.constant 0 : index
    %c0_183 = arith.constant 0 : index
    %768 = vector.load %arg8[%c0_182, %c0_183] : memref<128x128xf32, #tpu.memory_space<vmem>>, vector<128x128xf32>
    %cst_184 = arith.constant dense<0.000000e+00> : vector<64x128xf32>
    %769 = tpu.matmul %765, %768, %cst_184 {dimension_numbers = #tpu.dot_dimension_numbers<[1], [0], [0], [1], [0, 0, 1, 1], [], []>} : vector<64x128xf32>, vector<128x128xf32>, vector<64x128xf32> -> vector<64x128xf32>
    %c0_185 = arith.constant 0 : index
    %c0_186 = arith.constant 0 : index
    %770 = vector.load %arg9[%c0_185, %c0_186] : memref<128x128xf32, #tpu.memory_space<vmem>>, vector<128x128xf32>
    %cst_187 = arith.constant dense<0.000000e+00> : vector<64x128xf32>
    %771 = tpu.matmul %767, %770, %cst_187 {dimension_numbers = #tpu.dot_dimension_numbers<[1], [0], [0], [1], [0, 0, 1, 1], [], []>} : vector<64x128xf32>, vector<128x128xf32>, vector<64x128xf32> -> vector<64x128xf32>
    %772 = arith.addf %769, %771 : vector<64x128xf32>
    %c0_188 = arith.constant 0 : index
    %c0_189 = arith.constant 0 : index
    %773 = vector.load %arg10[%c0_188, %c0_189] : memref<1x128xf32, #tpu.memory_space<vmem>>, vector<1x128xf32>
    %774 = vector.broadcast %773 : vector<1x128xf32> to vector<64x128xf32>
    %775 = arith.addf %772, %774 : vector<64x128xf32>
    %cst_190 = arith.constant dense<0xFF800000> : vector<64xf32>
    %776 = vector.multi_reduction <maximumf>, %775, %cst_190 [1] : vector<64x128xf32> to vector<64xf32>
    %777 = vector.shape_cast %776 : vector<64xf32> to vector<64x1xf32>
    %778 = vector.broadcast %777 : vector<64x1xf32> to vector<64x128xf32>
    %779 = arith.subf %775, %778 : vector<64x128xf32>
    %780 = math.exp %779 : vector<64x128xf32>
    %cst_191 = arith.constant dense<0.000000e+00> : vector<64xf32>
    %781 = vector.multi_reduction <add>, %780, %cst_191 [1] : vector<64x128xf32> to vector<64xf32>
    %782 = vector.shape_cast %781 : vector<64xf32> to vector<64x1xf32>
    %783 = math.log %782 : vector<64x1xf32>
    %784 = arith.addf %783, %777 : vector<64x1xf32>
    %785 = vector.broadcast %784 : vector<64x1xf32> to vector<64x128xf32>
    %786 = arith.subf %775, %785 : vector<64x128xf32>
    %787 = vector.shape_cast %786 : vector<64x128xf32> to vector<8x8x128xf32>
    %c0_192 = arith.constant 0 : index
    %c0_193 = arith.constant 0 : index
    %c0_194 = arith.constant 0 : index
    %788 = vector.load %arg11[%c0_192, %c0_193, %c0_194] : memref<8x8x128xf32, #tpu.memory_space<vmem>>, vector<8x8x128xf32>
    tpu.vector_store %arg11[%c0_192, %c0_193, %c0_194], %787 {strides = array<i32>} : memref<8x8x128xf32, #tpu.memory_space<vmem>>, vector<8x8x128xf32>,
    return
  }
}

</mosaic_0001>

<bundles_post_ra>
// kernel: tpu_custom_call.1
= control target key start
LH: loop header
LB: loop body
LE: loop exit
PB: predicated region body
PF: predicated region fallthrough
CT: control target
= control target key end

     0   :  { %16 = vsyncpa [#allocation7], 0  ;;  %s7891_s0 = inlined_call_operand.hbm [shape: f32[8,8,16], index: 0, kind: input, shape index: {}]   ;;  %s7892_s1 = inlined_call_operand.vmem [shape: s32[8,1], index: 1, kind: input, shape index: {}]   ;;  %s7893_s2 = inlined_call_operand.hbm [shape: f32[16,512], index: 2, kind: input, shape index: {}]   ;;  %s7894_s3 = inlined_call_operand.hbm [shape: f32[128,512], index: 3, kind: input, shape index: {}]   ;;  %s7895_s4 = inlined_call_operand.vmem [shape: f32[1,512], index: 4, kind: input, shape index: {}]   ;;  %s7896_s5 = inlined_call_operand.hbm [shape: f32[16,512], index: 5, kind: input, shape index: {}]   ;;  %s7897_s6 = inlined_call_operand.hbm [shape: f32[128,512], index: 6, kind: input, shape index: {}]   ;;  %s7898_s7 = inlined_call_operand.vmem [shape: f32[1,512], index: 7, kind: input, shape index: {}]   ;;  %s7899_s8 = inlined_call_operand.hbm [shape: f32[128,128], index: 8, kind: input, shape index: {}]   ;;  %s7900_s9 = inlined_call_operand.hbm [shape: f32[128,128], index: 9, kind: input, shape index: {}]   ;;  %s7901_s10 = inlined_call_operand.vmem [shape: f32[1,128], index: 10, kind: input, shape index: {}]   ;;  %s7902_s11 = inlined_call_operand.hbm [shape: f32[8,8,128], index: 11, kind: output, shape index: {}]  }
   0x1   :  { %17 = vsyncpa [#allocation10], 0 }
   0x2   :  { %18 = vsyncpa [#allocation13], 0 }
   0x3   :  { %19 = vsyncpa [#allocation16], 0  ;;  %s40_s19 = sshll.u32 %s7893_s2, 4  ;;  %s41_s19 = int_to_ptr.hbm [resolvable:$true] %s40_s19 }
   0x4   :  { %20 = vsyncpa [#allocation8], 0  ;;  %s4581_s20 = smov [#allocation9]   ;;  %s68_s24 = sshll.u32 %s7896_s5, 4  ;;  %s69_s24 = int_to_ptr.hbm [resolvable:$true] %s68_s24 }
   0x5   :  { %s42_s21 = sshll.u32 %s4581_s20, 4  ;;  %s4582_s25 = smov 512   ;;  %s43_s21 = int_to_ptr.vmem [resolvable:$true] %s42_s21 }
   0x6   :  { %s4583_s26 = smov 32   ;;  %s4584_s27 = smov [#allocation12]  }
   0x7   :  { %48 = dma.hbm_to_vmem [thread:$0]  %s41_s19, 1024, %s43_s21, [#allocation10], %s4582_s25, %s4582_s25, %s4583_s26  }
   0x8   :  { %s70_s28 = sshll.u32 %s4584_s27, 4  ;;  %s96_s30 = sshll.u32 %s7899_s8, 4  ;;  %s71_s28 = int_to_ptr.vmem [resolvable:$true] %s70_s28  ;;  %s97_s30 = int_to_ptr.hbm [resolvable:$true] %s96_s30 }
   0x9   :  { %76 = dma.hbm_to_vmem [thread:$0]  %s69_s24, 1024, %s71_s28, [#allocation13], %s4582_s25, %s4582_s25, %s4583_s26  }
   0xa   :  { %s4585_s5 = smov [#allocation15]   ;;  %s25_s15 = sshll.u32 %s7891_s0, 4  ;;  %s26_s15 = int_to_ptr.hbm [resolvable:$true] %s25_s15 }
   0xb   :  { %s98_s12 = sshll.u32 %s4585_s5, 4  ;;  %s4586_s16 = smov 128   ;;  %s99_s12 = int_to_ptr.vmem [resolvable:$true] %s98_s12 }
   0xc   :  { %s4587_s17 = smov 8   ;;  %s4588_s18 = smov [#allocation6]  }
   0xd   :  { %104 = dma.hbm_to_vmem [thread:$0]  %s97_s30, 2048, %s99_s12, [#allocation16], %s4586_s16, %s4586_s16, %s4587_s17  }
   0xe   :  { %s27_s19 = sshll.u32 %s4588_s18, 4  ;;  %s53_s8 = sshll.u32 %s7894_s3, 4  ;;  %s28_s19 = int_to_ptr.vmem [resolvable:$true] %s27_s19  ;;  %s54_s8 = int_to_ptr.hbm [resolvable:$true] %s53_s8 }
   0xf   :  { %33 = dma.hbm_to_vmem [thread:$0]  %s26_s15, 1024, %s28_s19, [#allocation7], %s4586_s16, %s4586_s16, %s4587_s17  }
  0x10   :  { %s81_s23 = sshll.u32 %s7897_s6, 4  ;;  %s4589_s24 = smov [#allocation11]   ;;  %s82_s23 = int_to_ptr.hbm [resolvable:$true] %s81_s23 }
  0x11   :  { %s55_s27 = sshll.u32 %s4589_s24, 4  ;;  %s4590_s28 = smov [#allocation14]   ;;  %s56_s27 = int_to_ptr.vmem [resolvable:$true] %s55_s27 }
  0x12   :  { %61 = dma.hbm_to_vmem [thread:$0]  %s54_s8, 8192, %s56_s27, [#allocation10], %s4582_s25, %s4582_s25, %s4583_s26  }
  0x13   :  { %s83_s3 = sshll.u32 %s4590_s28, 4  ;;  %s109_s30 = sshll.u32 %s7900_s9, 4  ;;  %s84_s3 = int_to_ptr.vmem [resolvable:$true] %s83_s3  ;;  %s110_s30 = int_to_ptr.hbm [resolvable:$true] %s109_s30 }
  0x14   :  { %89 = dma.hbm_to_vmem [thread:$0]  %s82_s23, 8192, %s84_s3, [#allocation13], %s4582_s25, %s4582_s25, %s4583_s26  }
  0x15   :  { %s4591_s6 = smov [#allocation17]  }
  0x16   :  { %s111_s5 = sshll.u32 %s4591_s6, 4  ;;  %s112_s5 = int_to_ptr.vmem [resolvable:$true] %s111_s5 }
  0x17   :  { %117 = dma.hbm_to_vmem [thread:$0]  %s110_s30, 2048, %s112_s5, [#allocation16], %s4586_s16, %s4586_s16, %s4587_s17  }
  0x18   :  { %4571 = dma.done.wait [#allocation7], 1024  }
  0x19   :  { %4572 = vsyncadd [#allocation7], 4294966272 }
  0x1a   :  { %4573 = dma.done.wait [#allocation10], 9216  }
  0x1b   :  { %4574 = vsyncadd [#allocation10], 4294958080 }
  0x1c   :  { %4575 = dma.done.wait [#allocation13], 9216  }
  0x1d   :  { %4576 = vsyncadd [#allocation13], 4294958080 }
  0x1e   :  { %4577 = dma.done.wait [#allocation16], 4096  }
  0x1f   :  { %4578 = vsyncadd [#allocation16], 4294963200  ;;  %v160_v0 = vld [vmem:[#allocation9 + $0x20] sm:$0xff]  ;;  %v161_v1 = vld [vmem:[#allocation9 + $0x28] sm:$0xff]  ;;  %vm174_vm0 = vcmask 130048   ;;  %s3532_s21 = sshll.u32 %s7902_s11, 4  ;;  %s3533_s21 = int_to_ptr.hbm [resolvable:$true] %s3532_s21 }
  0x20   :  { %v156_v2 = vld [vmem:[#allocation9] sm:$0xff]  ;;  %213 = vmatpush.msra.mxu0 %v160_v0  ;;  %3684 = vmatpush.msra.mxu2 %v160_v0  ;;  %v157_v3 = vld [vmem:[#allocation9 + $0x8] sm:$0xff]  ;;  %v4699_v5 = vld [vmem:[#allocation6 + $0x18] sm:$0xff] }
  0x21   :  { %254 = vmatpush.msra.mxu1 %v161_v1  ;;  %3686 = vmatpush.msra.mxu3 %v161_v1  ;;  %v4697_v4 = vld [vmem:[#allocation6] sm:$0xff]  ;;  %v163_v6 = vld [vmem:[#allocation9 + $0x38] sm:$0xff]  ;;  %v162_v7 = vld [vmem:[#allocation9 + $0x30] sm:$0xff] }
  0x22   :  { %214 = vmatpush.msra.mxu0 %v156_v2  ;;  %3685 = vmatpush.msra.mxu2 %v156_v2  ;;  %v399_v8 = vld [vmem:[#allocation12 + $0x20] sm:$0xff]  ;;  %v400_v9 = vld [vmem:[#allocation12 + $0x28] sm:$0xff]  ;;  %v159_v10 = vld [vmem:[#allocation9 + $0x18] sm:$0xff] }
  0x23   :  { %255 = vmatpush.msra.mxu1 %v157_v3  ;;  %3687 = vmatpush.msra.mxu3 %v157_v3  ;;  %v158_v11 = vld [vmem:[#allocation9 + $0x10] sm:$0xff]  ;;  %v395_v12 = vld [vmem:[#allocation12] sm:$0xff]  ;;  %v396_v13 = vld [vmem:[#allocation12 + $0x8] sm:$0xff] }
  0x24   :  { %3548 = vmatmul.msk.f32.vlgmr.msra.gmra.mxu0 %vm174_vm0, %v4697_v4  ;;  %3551 = vmatmul.msk.f32.vlgmr.msra.gmra.mxu2 %vm174_vm0, %v4699_v5  ;;  %v4709_v14 = vld [vmem:[#allocation6 + $0x8] sm:$0xff]  ;;  %v4711_v15 = vld [vmem:[#allocation6 + $0x20] sm:$0xff]  ;;  %v402_v16 = vld [vmem:[#allocation12 + $0x38] sm:$0xff] }
  0x25   :  { %3556 = vmatmul.msk.f32.vlgmr.msra.gmra.mxu1 %vm174_vm0, %v4697_v4  ;;  %3559 = vmatmul.msk.f32.vlgmr.msra.gmra.mxu3 %vm174_vm0, %v4699_v5  ;;  %v4721_v17 = vld [vmem:[#allocation6 + $0x10] sm:$0xff]  ;;  %v4723_v18 = vld [vmem:[#allocation6 + $0x28] sm:$0xff]  ;;  %v4743_v21 = vld [vmem:[#allocation11 + $0x1e0] sm:$0xff] }
  0x26   :  { %336 = vmatpush.msrb.mxu3 %v163_v6  ;;  %295 = vmatpush.msrb.mxu2 %v162_v7  ;;  %v401_v19 = vld [vmem:[#allocation12 + $0x30] sm:$0xff]  ;;  %v4745_v22 = vld [vmem:[#allocation11 + $0x1e8] sm:$0xff]  ;;  %v4747_v23 = vld [vmem:[#allocation11 + $0x1c0] sm:$0xff] }
  0x27   :  { %427 = vmatpush.msrb.mxu0 %v399_v8  ;;  %468 = vmatpush.msrb.mxu1 %v400_v9  ;;  %v4733_v20 = vld [vmem:[#allocation6 + $0x30] sm:$0xff]  ;;  %v4751_v24 = vld [vmem:[#allocation11 + $0x1c8] sm:$0xff]  ;;  %v4753_v25 = vld [vmem:[#allocation11 + $0x1a0] sm:$0xff]  ;;  %v7903_v9 = vmov 0.0  }
  0x28   :  { %337 = vmatpush.msrb.mxu3 %v159_v10  ;;  %296 = vmatpush.msrb.mxu2 %v158_v11  ;;  %v4755_v26 = vld [vmem:[#allocation11 + $0x1a8] sm:$0xff]  ;;  %v4759_v27 = vld [vmem:[#allocation6 + $0x38] sm:$0xff]  ;;  %v4763_v28 = vld [vmem:[#allocation11 + $0x180] sm:$0xff] }
  0x29   :  { %428 = vmatpush.msrb.mxu0 %v395_v12  ;;  %469 = vmatpush.msrb.mxu1 %v396_v13  ;;  %v4765_v29 = vld [vmem:[#allocation11 + $0x188] sm:$0xff]  ;;  %v4775_v30 = vld [vmem:[#allocation11 + $0x160] sm:$0xff]  ;;  %v398_v38 = vld [vmem:[#allocation12 + $0x18] sm:$0xff] }
  0x2a   :  { %550 = vmatpush.msra.mxu3 %v402_v16  ;;  %509 = vmatpush.msra.mxu2 %v401_v19  ;;  %v4777_v31 = vld [vmem:[#allocation11 + $0x168] sm:$0xff]  ;;  %v4781_v32 = vld [vmem:[#allocation11 + $0x140] sm:$0xff]  ;;  %v397_v45 = vld [vmem:[#allocation12 + $0x10] sm:$0xff] }
  0x2b   :  { %742 = vmatpush.msra.mxu0 %v4743_v21  ;;  %762 = vmatpush.msra.mxu1 %v4745_v22  ;;  %v4783_v33 = vld [vmem:[#allocation11 + $0x148] sm:$0xff]  ;;  %v4789_v34 = vld [vmem:[#allocation11 + $0x120] sm:$0xff]  ;;  %v4889_v56 = vld [vmem:[#allocation11 + $0x1f8] sm:$0xff] }
  0x2c   :  { %3549 = vmatmul.msk.f32.gmra.mxu0 %vm174_vm0, %v4709_v14  ;;  %3552 = vmatmul.msk.f32.gmra.mxu2 %vm174_vm0, %v4711_v15  ;;  %v4791_v35 = vld [vmem:[#allocation11 + $0x128] sm:$0xff]  ;;  %v4801_v36 = vld [vmem:[#allocation11 + $0x100] sm:$0xff]  ;;  %v4891_v57 = vld [vmem:[#allocation11 + $0x1d8] sm:$0xff] }
  0x2d   :  { %3557 = vmatmul.msk.f32.gmra.mxu1 %vm174_vm0, %v4709_v14  ;;  %3560 = vmatmul.msk.f32.gmra.mxu3 %vm174_vm0, %v4711_v15  ;;  %v4803_v37 = vld [vmem:[#allocation11 + $0x108] sm:$0xff]  ;;  %v4807_v39 = vld [vmem:[#allocation11 + $0xe0] sm:$0xff]  ;;  %8299 = vst [vmem:[#allocation24_spill] sm:$0xff] %v4891_v57  ;;  %v4903_v58 = vld [vmem:[#allocation11 + $0x1b8] sm:$0xff] }
  0x2e   :  { %743 = vmatpush.msra.mxu0 %v4747_v23  ;;  %763 = vmatpush.msra.mxu1 %v4751_v24  ;;  %v4809_v40 = vld [vmem:[#allocation11 + $0xe8] sm:$0xff]  ;;  %v4815_v41 = vld [vmem:[#allocation11 + $0xc0] sm:$0xff]  ;;  %8300 = vst [vmem:[#allocation25_spill] sm:$0xff] %v4903_v58  ;;  %v4911_v61 = vld [vmem:[#allocation11 + $0x1f0] sm:$0xff] }
  0x2f   :  { %551 = vmatpush.msra.mxu3 %v398_v38  ;;  %v4817_v42 = vld [vmem:[#allocation11 + $0xc8] sm:$0xff]  ;;  %v4827_v43 = vld [vmem:[#allocation11 + $0xa0] sm:$0xff]  ;;  %510 = vmatpush.msra.mxu2 %v397_v45  ;;  %v4919_v0 = vld [vmem:[#allocation11 + $0x1d0] sm:$0xff] }
  0x30   :  { %744 = vmatpush.msra.mxu0 %v4753_v25  ;;  %764 = vmatpush.msra.mxu1 %v4755_v26  ;;  %v4829_v44 = vld [vmem:[#allocation11 + $0xa8] sm:$0xff]  ;;  %v4833_v46 = vld [vmem:[#allocation11 + $0x80] sm:$0xff]  ;;  %8301 = vst [vmem:[#allocation26_spill] sm:$0xff] %v4919_v0  ;;  %v4921_v1 = vld [vmem:[#allocation11 + $0x198] sm:$0xff] }
  0x31   :  { %v4835_v47 = vld [vmem:[#allocation11 + $0x88] sm:$0xff]  ;;  %v4841_v48 = vld [vmem:[#allocation11 + $0x60] sm:$0xff]  ;;  %8302 = vst [vmem:[#allocation27_spill] sm:$0xff] %v4921_v1  ;;  %v4929_v6 = vld [vmem:[#allocation11 + $0x1b0] sm:$0xff] }
  0x32   :  { %745 = vmatpush.msra.mxu0 %v4763_v28  ;;  %765 = vmatpush.msra.mxu1 %v4765_v29  ;;  %v4843_v49 = vld [vmem:[#allocation11 + $0x68] sm:$0xff]  ;;  %v4853_v50 = vld [vmem:[#allocation11 + $0x40] sm:$0xff]  ;;  %8303 = vst [vmem:[#allocation28_spill] sm:$0xff] %v4929_v6  ;;  %v4943_v10 = vld [vmem:[#allocation11 + $0x190] sm:$0xff] }
  0x33   :  { %v4855_v51 = vld [vmem:[#allocation11 + $0x48] sm:$0xff]  ;;  %v4859_v52 = vld [vmem:[#allocation11 + $0x20] sm:$0xff]  ;;  %8304 = vst [vmem:[#allocation29_spill] sm:$0xff] %v4943_v10  ;;  %v4948_v11 = vld [vmem:[#allocation11 + $0x178] sm:$0xff] }
  0x34   :  { %3550 = vmatmul.msk.f32.gmra.mxu0 %vm174_vm0, %v4721_v17  ;;  %3553 = vmatmul.msk.f32.gmra.mxu2 %vm174_vm0, %v4723_v18  ;;  %v4861_v53 = vld [vmem:[#allocation11 + $0x28] sm:$0xff]  ;;  %v4867_v54 = vld [vmem:[#allocation11] sm:$0xff]  ;;  %8305 = vst [vmem:[#allocation30_spill] sm:$0xff] %v4948_v11  ;;  %v4956_v16 = vld [vmem:[#allocation11 + $0x170] sm:$0xff] }
  0x35   :  { %3558 = vmatmul.msk.f32.gmra.mxu1 %vm174_vm0, %v4721_v17  ;;  %3561 = vmatmul.msk.f32.gmra.mxu3 %vm174_vm0, %v4723_v18  ;;  %v4869_v55 = vld [vmem:[#allocation11 + $0x8] sm:$0xff]  ;;  %v4905_v59 = vld [vmem:[#allocation14 + $0x1e0] sm:$0xff]  ;;  %8306 = vst [vmem:[#allocation31_spill] sm:$0xff] %v4956_v16  ;;  %v4964_v45 = vld [vmem:[#allocation11 + $0x158] sm:$0xff] }
  0x36   :  { %746 = vmatpush.msra.mxu0 %v4775_v30  ;;  %766 = vmatpush.msra.mxu1 %v4777_v31  ;;  %v4907_v60 = vld [vmem:[#allocation14 + $0x1e8] sm:$0xff]  ;;  %v4913_v62 = vld [vmem:[#allocation14 + $0x1c0] sm:$0xff]  ;;  %8308 = vst [vmem:[#allocation33_spill] sm:$0xff] %v4964_v45 }
  0x37   :  { %v4915_v63 = vld [vmem:[#allocation14 + $0x1c8] sm:$0xff]  ;;  %v4923_v2 = vld [vmem:[#allocation14 + $0x1a0] sm:$0xff] }
  0x38   :  { %747 = vmatpush.msra.mxu0 %v4781_v32  ;;  %767 = vmatpush.msra.mxu1 %v4783_v33  ;;  %v4927_v3 = vld [vmem:[#allocation14 + $0x1a8] sm:$0xff]  ;;  %v4936_v7 = vld [vmem:[#allocation14 + $0x180] sm:$0xff] }
  0x39   :  { %v4938_v8 = vld [vmem:[#allocation14 + $0x188] sm:$0xff]  ;;  %v4950_v12 = vld [vmem:[#allocation14 + $0x160] sm:$0xff] }
  0x3a   :  { %748 = vmatpush.msra.mxu0 %v4789_v34  ;;  %768 = vmatpush.msra.mxu1 %v4791_v35  ;;  %v4952_v13 = vld [vmem:[#allocation14 + $0x168] sm:$0xff]  ;;  %v4960_v19 = vld [vmem:[#allocation14 + $0x140] sm:$0xff] }
  0x3b   :  { %v4962_v38 = vld [vmem:[#allocation14 + $0x148] sm:$0xff] }
  0x3c   :  { %3554 = vmatmul.msk.f32.gmra.mxu2 %vm174_vm0, %v4733_v20  ;;  %3580 = vmatmul.msk.f32.vlgmr.msrb.gmra.mxu0 %vm174_vm0, %v4697_v4  ;;  %8307 = vst [vmem:[#allocation32_spill] sm:$0xff] %v4962_v38 }
  0x3d   :  { %3562 = vmatmul.msk.f32.gmra.mxu3 %vm174_vm0, %v4733_v20  ;;  %3588 = vmatmul.msk.f32.vlgmr.msrb.gmra.mxu1 %vm174_vm0, %v4697_v4 }
  0x3e   :  { %749 = vmatpush.msra.mxu0 %v4801_v36  ;;  %769 = vmatpush.msra.mxu1 %v4803_v37 }
  0x40   :  { %750 = vmatpush.msra.mxu0 %v4807_v39  ;;  %770 = vmatpush.msra.mxu1 %v4809_v40 }
  0x42   :  { %751 = vmatpush.msra.mxu0 %v4815_v41  ;;  %771 = vmatpush.msra.mxu1 %v4817_v42 }
  0x44   :  { %3555 = vmatmul.msk.f32.gmra.mxu2 %vm174_vm0, %v4759_v27  ;;  %3581 = vmatmul.msk.f32.gmra.mxu0 %vm174_vm0, %v4709_v14 }
  0x45   :  { %3563 = vmatmul.msk.f32.gmra.mxu3 %vm174_vm0, %v4759_v27  ;;  %3589 = vmatmul.msk.f32.gmra.mxu1 %vm174_vm0, %v4709_v14 }
  0x46   :  { %752 = vmatpush.msra.mxu0 %v4827_v43  ;;  %772 = vmatpush.msra.mxu1 %v4829_v44 }
  0x48   :  { %753 = vmatpush.msra.mxu0 %v4833_v46  ;;  %773 = vmatpush.msra.mxu1 %v4835_v47 }
  0x4a   :  { %754 = vmatpush.msra.mxu0 %v4841_v48  ;;  %774 = vmatpush.msra.mxu1 %v4843_v49 }
  0x4c   :  { %3564 = vmatmul.msk.f32.vlgmr.msrb.gmra.mxu2 %vm174_vm0, %v4697_v4  ;;  %3582 = vmatmul.msk.f32.gmra.mxu0 %vm174_vm0, %v4721_v17 }
  0x4d   :  { %3572 = vmatmul.msk.f32.vlgmr.msrb.gmra.mxu3 %vm174_vm0, %v4697_v4  ;;  %3590 = vmatmul.msk.f32.gmra.mxu1 %vm174_vm0, %v4721_v17 }
  0x4e   :  { %755 = vmatpush.msra.mxu0 %v4853_v50  ;;  %775 = vmatpush.msra.mxu1 %v4855_v51 }
  0x4f   :  { %802 = vmatpush.msrb.mxu3 %v4889_v56  ;;  %782 = vmatpush.msrb.mxu2 %v4911_v61 }
  0x50   :  { %756 = vmatpush.msra.mxu0 %v4859_v52  ;;  %776 = vmatpush.msra.mxu1 %v4861_v53 }
  0x51   :  { %803 = vmatpush.msrb.mxu3 %v4891_v57  ;;  %783 = vmatpush.msrb.mxu2 %v4919_v0  ;;  %v4998_v57 = vld [vmem:[#allocation14 + $0xe0] sm:$0xff] }
  0x52   :  { %757 = vmatpush.msra.mxu0 %v4867_v54  ;;  %777 = vmatpush.msra.mxu1 %v4869_v55  ;;  %8317 = vst [vmem:[#allocation42_spill] sm:$0xff] %v4998_v57  ;;  %v5010_v0 = vld [vmem:[#allocation14 + $0xc0] sm:$0xff] }
  0x53   :  { %804 = vmatpush.msrb.mxu3 %v4903_v58  ;;  %784 = vmatpush.msrb.mxu2 %v4929_v6  ;;  %v4981_v58 = vld [vmem:[#allocation11 + $0x130] sm:$0xff]  ;;  %v4984_v6 = vld [vmem:[#allocation14 + $0x100] sm:$0xff]  ;;  %8321 = vst [vmem:[#allocation46_spill] sm:$0xff] %v5010_v0 }
  0x54   :  { %3565 = vmatmul.msk.f32.gmra.mxu2 %vm174_vm0, %v4709_v14  ;;  %3583 = vmatmul.msk.f32.gmra.mxu0 %vm174_vm0, %v4699_v5  ;;  %8313 = vst [vmem:[#allocation38_spill] sm:$0xff] %v4981_v58 }
  0x55   :  { %3573 = vmatmul.msk.f32.gmra.mxu3 %vm174_vm0, %v4709_v14  ;;  %3591 = vmatmul.msk.f32.gmra.mxu1 %vm174_vm0, %v4699_v5  ;;  %8314 = vst [vmem:[#allocation39_spill] sm:$0xff] %v4984_v6 }
  0x56   :  { %903 = vmatpush.msrb.mxu0 %v4905_v59  ;;  %923 = vmatpush.msrb.mxu1 %v4907_v60 }
  0x57   :  { %805 = vmatpush.msrb.mxu3 %v4921_v1  ;;  %785 = vmatpush.msrb.mxu2 %v4943_v10  ;;  %v4972_v1 = vld [vmem:[#allocation14 + $0x120] sm:$0xff]  ;;  %v4978_v10 = vld [vmem:[#allocation11 + $0x138] sm:$0xff] }
  0x58   :  { %904 = vmatpush.msrb.mxu0 %v4913_v62  ;;  %924 = vmatpush.msrb.mxu1 %v4915_v63  ;;  %8310 = vst [vmem:[#allocation35_spill] sm:$0xff] %v4972_v1 }
  0x59   :  { %806 = vmatpush.msrb.mxu3 %v4948_v11  ;;  %786 = vmatpush.msrb.mxu2 %v4956_v16  ;;  %v4976_v11 = vld [vmem:[#allocation14 + $0x128] sm:$0xff]  ;;  %8312 = vst [vmem:[#allocation37_spill] sm:$0xff] %v4978_v10  ;;  %v4991_v16 = vld [vmem:[#allocation11 + $0x118] sm:$0xff] }
  0x5a   :  { %905 = vmatpush.msrb.mxu0 %v4923_v2  ;;  %925 = vmatpush.msrb.mxu1 %v4927_v3  ;;  %8311 = vst [vmem:[#allocation36_spill] sm:$0xff] %v4976_v11 }
  0x5b   :  { %807 = vmatpush.msrb.mxu3 %v4964_v45  ;;  %v4989_v45 = vld [vmem:[#allocation14 + $0x108] sm:$0xff]  ;;  %8315 = vst [vmem:[#allocation40_spill] sm:$0xff] %v4991_v16 }
  0x5c   :  { %3566 = vmatmul.msk.f32.gmra.mxu2 %vm174_vm0, %v4721_v17  ;;  %3584 = vmatmul.msk.f32.gmra.mxu0 %vm174_vm0, %v4711_v15 }
  0x5d   :  { %3574 = vmatmul.msk.f32.gmra.mxu3 %vm174_vm0, %v4721_v17  ;;  %3592 = vmatmul.msk.f32.gmra.mxu1 %vm174_vm0, %v4711_v15 }
  0x5e   :  { %906 = vmatpush.msrb.mxu0 %v4936_v7  ;;  %926 = vmatpush.msrb.mxu1 %v4938_v8 }
  0x5f   :  { %808 = vmatpush.msrb.mxu3 %v4978_v10  ;;  %v5002_v10 = vld [vmem:[#allocation14 + $0xe8] sm:$0xff] }
  0x60   :  { %907 = vmatpush.msrb.mxu0 %v4950_v12  ;;  %927 = vmatpush.msrb.mxu1 %v4952_v13  ;;  %8318 = vst [vmem:[#allocation43_spill] sm:$0xff] %v5002_v10 }
  0x61   :  { %809 = vmatpush.msrb.mxu3 %v4991_v16  ;;  %v5024_v16 = vld [vmem:[#allocation11 + $0xd0] sm:$0xff] }
  0x62   :  { %908 = vmatpush.msrb.mxu0 %v4960_v19  ;;  %928 = vmatpush.msrb.mxu1 %v4962_v38  ;;  %v5008_v38 = vld [vmem:[#allocation11 + $0xf0] sm:$0xff]  ;;  %8325 = vst [vmem:[#allocation50_spill] sm:$0xff] %v5024_v16 }
  0x63   :  { %8320 = vst [vmem:[#allocation45_spill] sm:$0xff] %v5008_v38 }
  0x64   :  { %3567 = vmatmul.msk.f32.gmra.mxu2 %vm174_vm0, %v4699_v5  ;;  %3585 = vmatmul.msk.f32.gmra.mxu0 %vm174_vm0, %v4723_v18 }
  0x65   :  { %3575 = vmatmul.msk.f32.gmra.mxu3 %vm174_vm0, %v4699_v5  ;;  %3593 = vmatmul.msk.f32.gmra.mxu1 %vm174_vm0, %v4723_v18 }
  0x66   :  { %909 = vmatpush.msrb.mxu0 %v4972_v1  ;;  %929 = vmatpush.msrb.mxu1 %v4976_v11  ;;  %v5004_v1 = vld [vmem:[#allocation11 + $0xf8] sm:$0xff]  ;;  %v5014_v11 = vld [vmem:[#allocation14 + $0xc8] sm:$0xff] }
  0x67   :  { %8319 = vst [vmem:[#allocation44_spill] sm:$0xff] %v5004_v1  ;;  %810 = vmatpush.msrb.mxu3 %v5004_v1  ;;  %v5035_v1 = vld [vmem:[#allocation11 + $0xb0] sm:$0xff] }
  0x68   :  { %910 = vmatpush.msrb.mxu0 %v4984_v6  ;;  %930 = vmatpush.msrb.mxu1 %v4989_v45  ;;  %8322 = vst [vmem:[#allocation47_spill] sm:$0xff] %v5014_v11  ;;  %v5020_v6 = vld [vmem:[#allocation14 + $0xa0] sm:$0xff] }
  0x69   :  { %8324 = vst [vmem:[#allocation49_spill] sm:$0xff] %v5020_v6 }
  0x6a   :  { %911 = vmatpush.msrb.mxu0 %v4998_v57  ;;  %931 = vmatpush.msrb.mxu1 %v5002_v10  ;;  %v5030_v57 = vld [vmem:[#allocation11 + $0xb8] sm:$0xff]  ;;  %8328 = vst [vmem:[#allocation53_spill] sm:$0xff] %v5035_v1  ;;  %v5054_v10 = vld [vmem:[#allocation14 + $0x68] sm:$0xff] }
  0x6b   :  { %8327 = vst [vmem:[#allocation52_spill] sm:$0xff] %v5030_v57 }
  0x6c   :  { %3568 = vmatmul.msk.f32.gmra.mxu2 %vm174_vm0, %v4711_v15  ;;  %3586 = vmatmul.msk.f32.gmra.mxu0 %vm174_vm0, %v4733_v20  ;;  %8333 = vst [vmem:[#allocation58_spill] sm:$0xff] %v5054_v10 }
  0x6d   :  { %3576 = vmatmul.msk.f32.gmra.mxu3 %vm174_vm0, %v4711_v15  ;;  %3594 = vmatmul.msk.f32.gmra.mxu1 %vm174_vm0, %v4733_v20 }
  0x6e   :  { %912 = vmatpush.msrb.mxu0 %v5010_v0  ;;  %932 = vmatpush.msrb.mxu1 %v5014_v11  ;;  %v5042_v11 = vld [vmem:[#allocation14 + $0x88] sm:$0xff]  ;;  %v5048_v0 = vld [vmem:[#allocation11 + $0x90] sm:$0xff] }
  0x6f   :  { %8329 = vst [vmem:[#allocation54_spill] sm:$0xff] %v5042_v11 }
  0x70   :  { %913 = vmatpush.msrb.mxu0 %v5020_v6  ;;  %8331 = vst [vmem:[#allocation56_spill] sm:$0xff] %v5048_v0  ;;  %v5050_v6 = vld [vmem:[#allocation14 + $0x60] sm:$0xff] }
  0x71   :  { %8332 = vst [vmem:[#allocation57_spill] sm:$0xff] %v5050_v6 }
  0x74   :  { %3569 = vmatmul.msk.f32.gmra.mxu2 %vm174_vm0, %v4723_v18  ;;  %3587 = vmatmul.msk.f32.gmra.mxu0 %vm174_vm0, %v4759_v27 }
  0x75   :  { %3577 = vmatmul.msk.f32.gmra.mxu3 %vm174_vm0, %v4723_v18  ;;  %3595 = vmatmul.msk.f32.gmra.mxu1 %vm174_vm0, %v4759_v27 }
  0x7c   :  { %3570 = vmatmul.msk.f32.gmra.mxu2 %vm174_vm0, %v4733_v20  ;;  %758 = vmatmul.f32.vlgmr.msra.gmra.mxu0 %v7903_v9 }
  0x7d   :  { %3578 = vmatmul.msk.f32.gmra.mxu3 %vm174_vm0, %v4733_v20  ;;  %778 = vmatmul.f32.vlgmr.msra.gmra.mxu1 %v7903_v9  ;;  %v4968_v9 = vld [vmem:[#allocation11 + $0x150] sm:$0xff] }
  0x7e   :  { %8309 = vst [vmem:[#allocation34_spill] sm:$0xff] %v4968_v9  ;;  %787 = vmatpush.msrb.mxu2 %v4968_v9  ;;  %v4996_v9 = vld [vmem:[#allocation11 + $0x110] sm:$0xff] }
  0x7f   :  { %8316 = vst [vmem:[#allocation41_spill] sm:$0xff] %v4996_v9 }
  0x80   :  { %788 = vmatpush.msrb.mxu2 %v4981_v58  ;;  %v5016_v58 = vld [vmem:[#allocation11 + $0xd8] sm:$0xff] }
  0x81   :  { %8323 = vst [vmem:[#allocation48_spill] sm:$0xff] %v5016_v58  ;;  %811 = vmatpush.msrb.mxu3 %v5016_v58  ;;  %v5044_v58 = vld [vmem:[#allocation11 + $0x98] sm:$0xff] }
  0x82   :  { %789 = vmatpush.msrb.mxu2 %v4996_v9  ;;  %v5028_v9 = vld [vmem:[#allocation14 + $0xa8] sm:$0xff]  ;;  %8330 = vst [vmem:[#allocation55_spill] sm:$0xff] %v5044_v58 }
  0x83   :  { %8326 = vst [vmem:[#allocation51_spill] sm:$0xff] %v5028_v9  ;;  %933 = vmatpush.msrb.mxu1 %v5028_v9  ;;  %812 = vmatpush.msrb.mxu3 %v5030_v57  ;;  %v5062_v9 = vld [vmem:[#allocation14 + $0x40] sm:$0xff]  ;;  %v5066_v57 = vld [vmem:[#allocation14 + $0x48] sm:$0xff] }
  0x84   :  { %3571 = vmatmul.msk.f32.gmra.mxu2 %vm174_vm0, %v4759_v27  ;;  %8336 = vst [vmem:[#allocation61_spill] sm:$0xff] %v5062_v9 }
  0x85   :  { %3579 = vmatmul.msk.f32.gmra.mxu3 %vm174_vm0, %v4759_v27  ;;  %790 = vmatpush.msrb.mxu2 %v5008_v38  ;;  %v5037_v38 = vld [vmem:[#allocation14 + $0x80] sm:$0xff]  ;;  %8337 = vst [vmem:[#allocation62_spill] sm:$0xff] %v5066_v57 }
  0x86   :  { %914 = vmatpush.msrb.mxu0 %v5037_v38  ;;  %934 = vmatpush.msrb.mxu1 %v5042_v11  ;;  %v5076_v11 = vld [vmem:[#allocation14 + $0x20] sm:$0xff] }
  0x87   :  { %791 = vmatpush.msrb.mxu2 %v5024_v16  ;;  %813 = vmatpush.msrb.mxu3 %v5044_v58  ;;  %v5060_v16 = vld [vmem:[#allocation11 + $0x70] sm:$0xff]  ;;  %v5074_v58 = vld [vmem:[#allocation11 + $0x58] sm:$0xff] }
  0x88   :  { %8335 = vst [vmem:[#allocation60_spill] sm:$0xff] %v5060_v16  ;;  %915 = vmatpush.msrb.mxu0 %v5050_v6  ;;  %935 = vmatpush.msrb.mxu1 %v5054_v10  ;;  %v5083_v10 = vld [vmem:[#allocation11 + $0x30] sm:$0xff]  ;;  %v5100_v6 = vld [vmem:[#allocation11 + $0x18] sm:$0xff] }
  0x89   :  { %792 = vmatpush.msrb.mxu2 %v5035_v1  ;;  %v5070_v1 = vld [vmem:[#allocation11 + $0x50] sm:$0xff]  ;;  %8339 = vst [vmem:[#allocation64_spill] sm:$0xff] %v5074_v58 }
  0x8a   :  { %8338 = vst [vmem:[#allocation63_spill] sm:$0xff] %v5070_v1  ;;  %916 = vmatpush.msrb.mxu0 %v5062_v9  ;;  %936 = vmatpush.msrb.mxu1 %v5066_v57  ;;  %v5094_v9 = vld [vmem:[#allocation14 + $0x8] sm:$0xff]  ;;  %v5096_v57 = vld [vmem:[#allocation11 + $0x10] sm:$0xff] }
  0x8b   :  { %793 = vmatpush.msrb.mxu2 %v5048_v0  ;;  %v5081_v0 = vld [vmem:[#allocation14 + $0x28] sm:$0xff]  ;;  %8341 = vst [vmem:[#allocation66_spill] sm:$0xff] %v5083_v10 }
  0x8c   :  { %3596 = vmatmul.msk.f32.vlgmr.msra.gmra.mxu2 %vm174_vm0, %v4697_v4  ;;  %8340 = vst [vmem:[#allocation65_spill] sm:$0xff] %v5081_v0  ;;  %917 = vmatpush.msrb.mxu0 %v5076_v11 }
  0x8d   :  { %3604 = vmatmul.msk.f32.vlgmr.msra.gmra.mxu3 %vm174_vm0, %v4697_v4  ;;  %v5056_v4 = vld [vmem:[#allocation11 + $0x78] sm:$0xff]  ;;  %794 = vmatpush.msrb.mxu2 %v5060_v16  ;;  %v5090_v16 = vld [vmem:[#allocation14] sm:$0xff]  ;;  %8343 = vst [vmem:[#allocation68_spill] sm:$0xff] %v5096_v57 }
  0x8e   :  { %8334 = vst [vmem:[#allocation59_spill] sm:$0xff] %v5056_v4  ;;  %814 = vmatpush.msrb.mxu3 %v5056_v4  ;;  %v5088_v4 = vld [vmem:[#allocation11 + $0x38] sm:$0xff]  ;;  %937 = vmatpush.msrb.mxu1 %v5081_v0  ;;  %v5112_v0 = vld [vmem:[#allocation14 + $0x1d0] sm:$0xff] }
  0x8f   :  { %795 = vmatpush.msrb.mxu2 %v5070_v1  ;;  %8342 = vst [vmem:[#allocation67_spill] sm:$0xff] %v5088_v4  ;;  %918 = vmatpush.msrb.mxu0 %v5090_v16  ;;  %v8347_v1 = vmov 0.0  }
  0x90   :  { %815 = vmatpush.msrb.mxu3 %v5074_v58  ;;  %8344 = vst [vmem:[#allocation69_spill] sm:$0xff] %v5100_v6  ;;  %938 = vmatpush.msrb.mxu1 %v5094_v9  ;;  %v5108_v58 = vld [vmem:[#allocation14 + $0x1f8] sm:$0xff] }
  0x91   :  { %796 = vmatpush.msrb.mxu2 %v5083_v10  ;;  %8346 = vst [vmem:[#allocation71_spill] sm:$0xff] %v5108_v58  ;;  %919 = vmatmul.f32.vlgmr.msrb.gmra.mxu0 %v8347_v1  ;;  %v5129_v10 = vld [vmem:[#allocation14 + $0x190] sm:$0xff] }
  0x92   :  { %816 = vmatpush.msrb.mxu3 %v5088_v4  ;;  %939 = vmatmul.f32.vlgmr.msrb.gmra.mxu1 %v8347_v1  ;;  %v5116_v4 = vld [vmem:[#allocation14 + $0x1d8] sm:$0xff] }
  0x93   :  { %797 = vmatpush.msrb.mxu2 %v5096_v57  ;;  %v5121_v57 = vld [vmem:[#allocation14 + $0x1b0] sm:$0xff]  ;;  %1065 = vmatpush.msra.mxu0 %v4743_v21 }
  0x94   :  { %3597 = vmatmul.msk.f32.gmra.mxu2 %vm174_vm0, %v4709_v14  ;;  %817 = vmatpush.msrb.mxu3 %v5100_v6  ;;  %v5126_v6 = vld [vmem:[#allocation14 + $0x1b8] sm:$0xff]  ;;  %v5145_v21 = vld [vmem:[#allocation14 + $0x150] sm:$0xff] }
  0x95   :  { %3605 = vmatmul.msk.f32.gmra.mxu3 %vm174_vm0, %v4709_v14  ;;  %v5104_v14 = vld [vmem:[#allocation14 + $0x1f0] sm:$0xff]  ;;  %1085 = vmatpush.msra.mxu1 %v4745_v22  ;;  %v5149_v22 = vld [vmem:[#allocation14 + $0x158] sm:$0xff] }
  0x96   :  { %8345 = vst [vmem:[#allocation70_spill] sm:$0xff] %v5104_v14  ;;  %943 = vmatpush.msra.mxu2 %v5104_v14  ;;  %963 = vmatpush.msra.mxu3 %v5108_v58  ;;  %v5133_v14 = vld [vmem:[#allocation14 + $0x198] sm:$0xff]  ;;  %v5137_v58 = vld [vmem:[#allocation14 + $0x170] sm:$0xff] }
  0x97   :  { %8348 = vst [vmem:[#allocation72_spill] sm:$0xff] %v5137_v58  ;;  %1066 = vmatpush.msra.mxu0 %v4747_v23  ;;  %1086 = vmatpush.msra.mxu1 %v4751_v24  ;;  %v5155_v23 = vld [vmem:[#allocation14 + $0x130] sm:$0xff]  ;;  %v5160_v24 = vld [vmem:[#allocation14 + $0x138] sm:$0xff] }
  0x98   :  { %944 = vmatpush.msra.mxu2 %v5112_v0  ;;  %964 = vmatpush.msra.mxu3 %v5116_v4  ;;  %8350 = vst [vmem:[#allocation74_spill] sm:$0xff] %v5149_v22 }
  0x99   :  { %1067 = vmatpush.msra.mxu0 %v4753_v25  ;;  %1087 = vmatpush.msra.mxu1 %v4755_v26  ;;  %v5163_v25 = vld [vmem:[#allocation14 + $0x110] sm:$0xff] }
  0x9a   :  { %945 = vmatpush.msra.mxu2 %v5121_v57  ;;  %965 = vmatpush.msra.mxu3 %v5126_v6 }
  0x9b   :  { %1068 = vmatpush.msra.mxu0 %v4763_v28  ;;  %1088 = vmatpush.msra.mxu1 %v4765_v29  ;;  %v5183_v28 = vld [vmem:[#allocation14 + $0xd0] sm:$0xff]  ;;  %v5187_v29 = vld [vmem:[#allocation14 + $0xd8] sm:$0xff] }
  0x9c   :  { %3598 = vmatmul.msk.f32.gmra.mxu2 %vm174_vm0, %v4721_v17  ;;  %966 = vmatpush.msra.mxu3 %v5133_v14  ;;  %8353 = vst [vmem:[#allocation77_spill] sm:$0xff] %v5187_v29 }
  0x9d   :  { %3606 = vmatmul.msk.f32.gmra.mxu3 %vm174_vm0, %v4721_v17  ;;  %946 = vmatpush.msra.mxu2 %v5129_v10  ;;  %v5141_v17 = vld [vmem:[#allocation14 + $0x178] sm:$0xff] }
  0x9e   :  { %8349 = vst [vmem:[#allocation73_spill] sm:$0xff] %v5141_v17  ;;  %967 = vmatpush.msra.mxu3 %v5141_v17  ;;  %v5169_v17 = vld [vmem:[#allocation14 + $0x118] sm:$0xff]  ;;  %1069 = vmatpush.msra.mxu0 %v4775_v30  ;;  %v5193_v30 = vld [vmem:[#allocation14 + $0xb0] sm:$0xff] }
  0x9f   :  { %947 = vmatpush.msra.mxu2 %v5137_v58  ;;  %1089 = vmatpush.msra.mxu1 %v4777_v31  ;;  %v5198_v31 = vld [vmem:[#allocation14 + $0xb8] sm:$0xff] }
  0xa0   :  { %968 = vmatpush.msra.mxu3 %v5149_v22  ;;  %v5179_v22 = vld [vmem:[#allocation14 + $0xf8] sm:$0xff]  ;;  %1070 = vmatpush.msra.mxu0 %v4781_v32  ;;  %v5201_v32 = vld [vmem:[#allocation14 + $0x90] sm:$0xff] }
  0xa1   :  { %948 = vmatpush.msra.mxu2 %v5145_v21  ;;  %1090 = vmatpush.msra.mxu1 %v4783_v33 }
  0xa2   :  { %969 = vmatpush.msra.mxu3 %v5160_v24  ;;  %1071 = vmatpush.msra.mxu0 %v4789_v34  ;;  %v5221_v34 = vld [vmem:[#allocation14 + $0x50] sm:$0xff] }
  0xa3   :  { %949 = vmatpush.msra.mxu2 %v5155_v23  ;;  %1091 = vmatpush.msra.mxu1 %v4791_v35  ;;  %v5225_v35 = vld [vmem:[#allocation14 + $0x58] sm:$0xff] }
  0xa4   :  { %3599 = vmatmul.msk.f32.gmra.mxu2 %vm174_vm0, %v4699_v5  ;;  %970 = vmatpush.msra.mxu3 %v5169_v17 }
  0xa5   :  { %3607 = vmatmul.msk.f32.gmra.mxu3 %vm174_vm0, %v4699_v5  ;;  %v5175_v5 = vld [vmem:[#allocation14 + $0xf0] sm:$0xff]  ;;  %950 = vmatpush.msra.mxu2 %v5163_v25 }
  0xa6   :  { %971 = vmatpush.msra.mxu3 %v5179_v22  ;;  %1072 = vmatpush.msra.mxu0 %v4801_v36  ;;  %v5231_v36 = vld [vmem:[#allocation14 + $0x30] sm:$0xff] }
  0xa7   :  { %v5166_v26 = vpop.f32.mrf.mxu2  ;;  %951 = vmatpush.msra.mxu2 %v5175_v5  ;;  %1092 = vmatpush.msra.mxu1 %v4803_v37  ;;  %v5236_v37 = vld [vmem:[#allocation14 + $0x38] sm:$0xff] }
  0xa8   :  { %8351 = vst [vmem:[#allocation75_spill] sm:$0xff] %v5166_v26  ;;  %v5172_v58 = vpop.f32.mrf.mxu3  ;;  %972 = vmatpush.msra.mxu3 %v5187_v29  ;;  %v5217_v29 = vld [vmem:[#allocation14 + $0x78] sm:$0xff]  ;;  %1073 = vmatpush.msra.mxu0 %v4807_v39  ;;  %v5239_v39 = vld [vmem:[#allocation14 + $0x10] sm:$0xff] }
  0xa9   :  { %8352 = vst [vmem:[#allocation76_spill] sm:$0xff] %v5172_v58  ;;  %952 = vmatpush.msra.mxu2 %v5183_v28  ;;  %v5207_v58 = vld [vmem:[#allocation14 + $0x98] sm:$0xff]  ;;  %1093 = vmatpush.msra.mxu1 %v4809_v40 }
  0xaa   :  { %973 = vmatpush.msra.mxu3 %v5198_v31  ;;  %1074 = vmatpush.msra.mxu0 %v4815_v41  ;;  %v5259_v41 = vpop.f32.mrf.mxu0 }
  0xab   :  { %953 = vmatpush.msra.mxu2 %v5193_v30  ;;  %1094 = vmatpush.msra.mxu1 %v4817_v42 }
  0xac   :  { %3600 = vmatmul.msk.f32.gmra.mxu2 %vm174_vm0, %v4711_v15  ;;  %974 = vmatpush.msra.mxu3 %v5207_v58 }
  0xad   :  { %3608 = vmatmul.msk.f32.gmra.mxu3 %vm174_vm0, %v4711_v15  ;;  %v5213_v15 = vld [vmem:[#allocation14 + $0x70] sm:$0xff]  ;;  %954 = vmatpush.msra.mxu2 %v5201_v32 }
  0xae   :  { %975 = vmatpush.msra.mxu3 %v5217_v29  ;;  %1075 = vmatpush.msra.mxu0 %v4827_v43 }
  0xaf   :  { %v5204_v33 = vpop.f32.mrf.mxu2  ;;  %955 = vmatpush.msra.mxu2 %v5213_v15  ;;  %1095 = vmatpush.msra.mxu1 %v4829_v44 }
  0xb0   :  { %8354 = vst [vmem:[#allocation78_spill] sm:$0xff] %v5204_v33  ;;  %v5210_v26 = vpop.f32.mrf.mxu3  ;;  %976 = vmatpush.msra.mxu3 %v5225_v35  ;;  %v5248_v33 = vpop.f32.mrf.mxu1  ;;  %1076 = vmatpush.msra.mxu0 %v4833_v46 }
  0xb1   :  { %8355 = vst [vmem:[#allocation79_spill] sm:$0xff] %v5210_v26  ;;  %956 = vmatpush.msra.mxu2 %v5221_v34  ;;  %v5245_v26 = vld [vmem:[#allocation14 + $0x18] sm:$0xff]  ;;  %1096 = vmatpush.msra.mxu1 %v4835_v47  ;;  %v5294_v47 = vld [vmem:[%s7892_s1] sm:$0xff] }
  0xb2   :  { %977 = vmatpush.msra.mxu3 %v5236_v37  ;;  %1077 = vmatpush.msra.mxu0 %v4841_v48  ;;  %vm889_vm1 = vcmp.gt.s32.totalorder %v5294_v47, 0  ;;  %vm1050_vm2 = vcmp.gt.s32.totalorder %v5294_v47, 7  ;;  %vm1864_vm3 = vcmp.gt.s32.totalorder %v5294_v47, 3  ;;  %vm1212_vm11 = vcmp.gt.s32.totalorder %v5294_v47, 1 }
  0xb3   :  { %957 = vmatpush.msra.mxu2 %v5231_v36  ;;  %1097 = vmatpush.msra.mxu1 %v4843_v49 }
  0xb4   :  { %3601 = vmatmul.msk.f32.gmra.mxu2 %vm174_vm0, %v4723_v18  ;;  %978 = vmatpush.msra.mxu3 %v5245_v26 }
  0xb5   :  { %3609 = vmatmul.msk.f32.gmra.mxu3 %vm174_vm0, %v4723_v18  ;;  %958 = vmatpush.msra.mxu2 %v5239_v39 }
  0xb6   :  { %1078 = vmatpush.msra.mxu0 %v4853_v50  ;;  %1098 = vmatpush.msra.mxu1 %v4855_v51 }
  0xb7   :  { %v5242_v40 = vpop.f32.mrf.mxu2 }
  0xb8   :  { %8356 = vst [vmem:[#allocation80_spill] sm:$0xff] %v5242_v40  ;;  %v5250_v18 = vpop.f32.mrf.mxu3  ;;  %1079 = vmatpush.msra.mxu0 %v4859_v52  ;;  %1099 = vmatpush.msra.mxu1 %v4861_v53  ;;  %v5275_v44 = vpop.f32.mrf.mxu1  ;;  %v8363_v52 = vld [vmem:[#allocation26_spill] sm:$0xff]  ;;  %v8364_v53 = vld [vmem:[#allocation32_spill] sm:$0xff] }
  0xb9   :  { %8357 = vst [vmem:[#allocation81_spill] sm:$0xff] %v5250_v18 }
  0xba   :  { %1080 = vmatpush.msra.mxu0 %v4867_v54  ;;  %1100 = vmatpush.msra.mxu1 %v4869_v55 }
  0xbc   :  { %3602 = vmatmul.msk.f32.gmra.mxu2 %vm174_vm0, %v4733_v20  ;;  %1228 = vmatpush.msrb.mxu0 %v4905_v59  ;;  %v8366_v59 = vld [vmem:[#allocation24_spill] sm:$0xff] }
  0xbd   :  { %3610 = vmatmul.msk.f32.gmra.mxu3 %vm174_vm0, %v4733_v20  ;;  %1248 = vmatpush.msrb.mxu1 %v4907_v60  ;;  %v5286_v20 = vpop.f32.mrf.mxu0  ;;  %v8367_v60 = vld [vmem:[#allocation35_spill] sm:$0xff] }
  0xbe   :  { %1229 = vmatpush.msrb.mxu0 %v4913_v62  ;;  %v8369_v62 = vld [vmem:[#allocation36_spill] sm:$0xff] }
  0xbf   :  { %v5268_v42 = vpop.f32.mrf.mxu2  ;;  %1249 = vmatpush.msrb.mxu1 %v4915_v63  ;;  %v8370_v63 = vld [vmem:[#allocation25_spill] sm:$0xff] }
  0xc0   :  { %8358 = vst [vmem:[#allocation82_spill] sm:$0xff] %v5268_v42  ;;  %v5271_v43 = vpop.f32.mrf.mxu3  ;;  %1230 = vmatpush.msrb.mxu0 %v4923_v2  ;;  %v5307_v50 = vpop.f32.mrf.mxu1  ;;  %v8371_v2 = vld [vmem:[#allocation29_spill] sm:$0xff] }
  0xc1   :  { %8359 = vst [vmem:[#allocation83_spill] sm:$0xff] %v5271_v43  ;;  %1250 = vmatpush.msrb.mxu1 %v4927_v3  ;;  %v8372_v3 = vld [vmem:[#allocation39_spill] sm:$0xff] }
  0xc2   :  { %1231 = vmatpush.msrb.mxu0 %v4936_v7  ;;  %8362 = vst [vmem:[#allocation86_spill] sm:$0xff] %v5307_v50  ;;  %v8373_v7 = vld [vmem:[#allocation27_spill] sm:$0xff]  ;;  %v5793_v50 = vld [vmem:[#allocation11 + $0xa8] sm:$0xff] }
  0xc3   :  { %1251 = vmatpush.msrb.mxu1 %v4938_v8  ;;  %v8374_v8 = vld [vmem:[#allocation31_spill] sm:$0xff]  ;;  %8484 = vst [vmem:[#allocation95_spill] sm:$0xff] %v5793_v50 }
  0xc4   :  { %3603 = vmatmul.msk.f32.gmra.mxu2 %vm174_vm0, %v4759_v27  ;;  %1232 = vmatpush.msrb.mxu0 %v4950_v12 }
  0xc5   :  { %3611 = vmatmul.msk.f32.gmra.mxu3 %vm174_vm0, %v4759_v27  ;;  %v7957_v27 = vmov 0   ;;  %1252 = vmatpush.msrb.mxu1 %v4952_v13  ;;  %v5319_v54 = vpop.f32.mrf.mxu0  ;;  %v8376_v13 = vld [vmem:[#allocation30_spill] sm:$0xff] }
  0xc6   :  { %3702 = vset.pattern.permute.xlu0 %v7957_v27  ;;  %v890_v49 = vsel %vm889_vm1, 1, %v7957_v27  ;;  %3703 = vset.pattern.permute.xlu1 %v7957_v27  ;;  %8365 = vst [vmem:[#allocation26_spill] sm:$0xff] %v5319_v54  ;;  %vm1375_vm1 = vcmp.gt.s32.totalorder %v5294_v47, 6  ;;  %v5796_v54 = vld [vmem:[#allocation11 + $0xb0] sm:$0xff] }
  0xc7   :  { %v5289_v46 = vpop.f32.mrf.mxu2  ;;  %892 = vperm.xlu0 %3702, %v890_v49   ;;  %1233 = vmatpush.msrb.mxu0 %v4960_v19  ;;  %v8377_v49 = vld [vmem:[#allocation34_spill] sm:$0xff]  ;;  %8485 = vst [vmem:[#allocation96_spill] sm:$0xff] %v5796_v54 }
  0xc8   :  { %8360 = vst [vmem:[#allocation84_spill] sm:$0xff] %v5289_v46  ;;  %v5297_v48 = vpop.f32.mrf.mxu3  ;;  %1253 = vmatpush.msrb.mxu1 %v8364_v53  ;;  %v5336_v12 = vpop.f32.mrf.mxu1  ;;  %3704 = vset.pattern.permute.xlu2 %v7957_v27 }
  0xc9   :  { %8361 = vst [vmem:[#allocation85_spill] sm:$0xff] %v5297_v48  ;;  %1234 = vmatpush.msrb.mxu0 %v8367_v60  ;;  %v8380_v60 = vld [vmem:[#allocation43_spill] sm:$0xff] }
  0xca   :  { %1254 = vmatpush.msrb.mxu1 %v8369_v62  ;;  %8375 = vst [vmem:[#allocation32_spill] sm:$0xff] %v5336_v12  ;;  %v8384_v62 = vld [vmem:[#allocation37_spill] sm:$0xff] }
  0xcb   :  { %1235 = vmatpush.msrb.mxu0 %v8372_v3  ;;  %v1865_v3 = vsel %vm1864_vm3, 1, %v7957_v27 }
  0xcc   :  { %798 = vmatmul.f32.vlgmr.msrb.gmra.mxu2 %v8347_v1  ;;  %1255 = vmatpush.msrb.mxu1 %v4989_v45  ;;  %v8385_v45 = vld [vmem:[#allocation47_spill] sm:$0xff] }
  0xcd   :  { %818 = vmatmul.f32.vlgmr.msrb.gmra.mxu3 %v8347_v1  ;;  %1105 = vmatpush.msrb.mxu2 %v4911_v61  ;;  %v8368_v61 = vld [vmem:[#allocation28_spill] sm:$0xff] }
  0xce   :  { %1125 = vmatpush.msrb.mxu3 %v4889_v56  ;;  %v1051_v56 = vsel %vm1050_vm2, 1, %v7957_v27  ;;  %1256 = vmatpush.msrb.mxu1 %v8380_v60  ;;  %v8394_v60 = vld [vmem:[#allocation54_spill] sm:$0xff] }
  0xcf   :  { %v5315_v51 = vpop.f32.mrf.mxu2  ;;  %1106 = vmatpush.msrb.mxu2 %v8363_v52  ;;  %1053 = vperm.xlu0 %3702, %v1051_v56   ;;  %v8378_v52 = vld [vmem:[#allocation42_spill] sm:$0xff] }
  0xd0   :  { %v5321_v55 = vpop.f32.mrf.mxu3  ;;  %1126 = vmatpush.msrb.mxu3 %v8366_v59  ;;  %1236 = vmatpush.msrb.mxu0 %v8378_v52  ;;  %v8379_v59 = vld [vmem:[#allocation33_spill] sm:$0xff]  ;;  %v8382_v56 = vld [vmem:[#allocation46_spill] sm:$0xff] }
  0xd1   :  { %1107 = vmatpush.msrb.mxu2 %v8368_v61  ;;  %v5350_v61 = vpop.f32.mrf.mxu0  ;;  %1257 = vmatpush.msrb.mxu1 %v8385_v45  ;;  %v8398_v45 = vld [vmem:[#allocation57_spill] sm:$0xff] }
  0xd2   :  { %1127 = vmatpush.msrb.mxu3 %v8370_v63  ;;  %1237 = vmatpush.msrb.mxu0 %v8382_v56  ;;  %8383 = vst [vmem:[#allocation24_spill] sm:$0xff] %v5350_v61  ;;  %v8386_v63 = vld [vmem:[#allocation41_spill] sm:$0xff] }
  0xd3   :  { %1108 = vmatpush.msrb.mxu2 %v8371_v2  ;;  %v8387_v2 = vld [vmem:[#allocation49_spill] sm:$0xff] }
  0xd4   :  { %959 = vmatmul.f32.vlgmr.msra.gmra.mxu2 %v8347_v1  ;;  %1128 = vmatpush.msrb.mxu3 %v8373_v7  ;;  %v8388_v7 = vld [vmem:[#allocation40_spill] sm:$0xff] }
  0xd5   :  { %979 = vmatmul.f32.vlgmr.msra.gmra.mxu3 %v8347_v1  ;;  %1109 = vmatpush.msrb.mxu2 %v8374_v8  ;;  %v8381_v1 = vld [vmem:[#allocation38_spill] sm:$0xff]  ;;  %v8389_v8 = vld [vmem:[#allocation51_spill] sm:$0xff] }
  0xd6   :  { %1129 = vmatpush.msrb.mxu3 %v8376_v13  ;;  %1238 = vmatpush.msrb.mxu0 %v8387_v2  ;;  %v8390_v13 = vld [vmem:[#allocation45_spill] sm:$0xff]  ;;  %v8400_v2 = vld [vmem:[#allocation58_spill] sm:$0xff] }
  0xd7   :  { %v5340_v19 = vpop.f32.mrf.mxu2  ;;  %1110 = vmatpush.msrb.mxu2 %v8377_v49  ;;  %1258 = vmatpush.msrb.mxu1 %v8389_v8  ;;  %v8391_v49 = vld [vmem:[#allocation44_spill] sm:$0xff]  ;;  %v8404_v8 = vld [vmem:[#allocation62_spill] sm:$0xff] }
  0xd8   :  { %v5344_v53 = vpop.f32.mrf.mxu3  ;;  %1130 = vmatpush.msrb.mxu3 %v8379_v59  ;;  %1867 = vperm.xlu0 %3702, %v1865_v3   ;;  %v8393_v59 = vld [vmem:[#allocation50_spill] sm:$0xff]  ;;  %v8401_v3 = vld [vmem:[#allocation52_spill] sm:$0xff] }
  0xd9   :  { %1111 = vmatpush.msrb.mxu2 %v8381_v1  ;;  %1239 = vmatpush.msrb.mxu0 %v5037_v38  ;;  %v5367_v1 = vpop.f32.mrf.mxu1  ;;  %v8402_v38 = vld [vmem:[#allocation61_spill] sm:$0xff] }
  0xda   :  { %1131 = vmatpush.msrb.mxu3 %v8384_v62  ;;  %1259 = vmatpush.msrb.mxu1 %v8394_v60  ;;  %8395 = vst [vmem:[#allocation28_spill] sm:$0xff] %v5367_v1  ;;  %v8397_v62 = vld [vmem:[#allocation48_spill] sm:$0xff]  ;;  %v8408_v60 = vld [vmem:[#allocation65_spill] sm:$0xff] }
  0xdb   :  { %1112 = vmatpush.msrb.mxu2 %v8386_v63  ;;  %1240 = vmatpush.msrb.mxu0 %v8398_v45  ;;  %v8399_v63 = vld [vmem:[#allocation53_spill] sm:$0xff] }
  0xdc   :  { %1132 = vmatpush.msrb.mxu3 %v8388_v7  ;;  %1260 = vmatpush.msrb.mxu1 %v8400_v2  ;;  %v8403_v7 = vld [vmem:[#allocation56_spill] sm:$0xff] }
  0xdd   :  { %1113 = vmatpush.msrb.mxu2 %v8390_v13  ;;  %1241 = vmatpush.msrb.mxu0 %v8402_v38  ;;  %v5379_v13 = vpop.f32.mrf.mxu0 }
  0xde   :  { %1133 = vmatpush.msrb.mxu3 %v8391_v49  ;;  %1261 = vmatpush.msrb.mxu1 %v8404_v8  ;;  %8405 = vst [vmem:[#allocation25_spill] sm:$0xff] %v5379_v13  ;;  %v8406_v49 = vld [vmem:[#allocation55_spill] sm:$0xff]  ;;  %v8417_v8 = vld [vmem:[#allocation68_spill] sm:$0xff] }
  0xdf   :  { %v5363_v52 = vpop.f32.mrf.mxu2  ;;  %1114 = vmatpush.msrb.mxu2 %v8393_v59  ;;  %1242 = vmatpush.msrb.mxu0 %v5076_v11  ;;  %v8407_v59 = vld [vmem:[#allocation60_spill] sm:$0xff]  ;;  %v8414_v11 = vld [vmem:[#allocation66_spill] sm:$0xff] }
  0xe0   :  { %8392 = vst [vmem:[#allocation35_spill] sm:$0xff] %v5363_v52  ;;  %v5369_v56 = vpop.f32.mrf.mxu3  ;;  %1134 = vmatpush.msrb.mxu3 %v8397_v62  ;;  %1262 = vmatpush.msrb.mxu1 %v8408_v60  ;;  %v8409_v62 = vld [vmem:[#allocation59_spill] sm:$0xff]  ;;  %v5781_v52 = vld [vmem:[#allocation11 + $0xc8] sm:$0xff] }
  0xe1   :  { %8396 = vst [vmem:[#allocation36_spill] sm:$0xff] %v5369_v56  ;;  %1115 = vmatpush.msrb.mxu2 %v8399_v63  ;;  %1243 = vmatpush.msrb.mxu0 %v5090_v16  ;;  %v8411_v63 = vld [vmem:[#allocation63_spill] sm:$0xff]  ;;  %v5396_v38 = vpop.f32.mrf.mxu1  ;;  %v8418_v16 = vld [vmem:[#allocation69_spill] sm:$0xff]  ;;  %v5790_v56 = vld [vmem:[#allocation11 + $0xa0] sm:$0xff] }
  0xe2   :  { %1135 = vmatpush.msrb.mxu3 %v8401_v3  ;;  %1263 = vmatpush.msrb.mxu1 %v5094_v9  ;;  %v8413_v3 = vld [vmem:[#allocation64_spill] sm:$0xff]  ;;  %8415 = vst [vmem:[#allocation27_spill] sm:$0xff] %v5396_v38 }
  0xe3   :  { %1116 = vmatpush.msrb.mxu2 %v8403_v7  ;;  %v8416_v7 = vld [vmem:[#allocation67_spill] sm:$0xff]  ;;  %8480 = vst [vmem:[#allocation91_spill] sm:$0xff] %v5781_v52 }
  0xe4   :  { %1136 = vmatpush.msrb.mxu3 %v8406_v49  ;;  %v8419_v49 = vld [vmem:[#allocation70_spill] sm:$0xff]  ;;  %8483 = vst [vmem:[#allocation94_spill] sm:$0xff] %v5790_v56 }
  0xe5   :  { %1117 = vmatpush.msrb.mxu2 %v8407_v59  ;;  %v8420_v59 = vld [vmem:[#allocation71_spill] sm:$0xff]  ;;  %v5403_v9 = vpop.f32.mrf.mxu0 }
  0xe6   :  { %1137 = vmatpush.msrb.mxu3 %v8409_v62  ;;  %8421 = vst [vmem:[#allocation31_spill] sm:$0xff] %v5403_v9 }
  0xe7   :  { %v5387_v45 = vpop.f32.mrf.mxu2  ;;  %1118 = vmatpush.msrb.mxu2 %v8411_v63 }
  0xe8   :  { %8410 = vst [vmem:[#allocation29_spill] sm:$0xff] %v5387_v45  ;;  %v5391_v2 = vpop.f32.mrf.mxu3  ;;  %1138 = vmatpush.msrb.mxu3 %v8413_v3  ;;  %v8425_v3 = vld [vmem:[#allocation72_spill] sm:$0xff]  ;;  %v5763_v45 = vld [vmem:[#allocation11 + $0x118] sm:$0xff] }
  0xe9   :  { %8412 = vst [vmem:[#allocation39_spill] sm:$0xff] %v5391_v2  ;;  %1119 = vmatpush.msrb.mxu2 %v8414_v11  ;;  %v5415_v63 = vpop.f32.mrf.mxu1  ;;  %v8426_v11 = vld [vmem:[#allocation73_spill] sm:$0xff]  ;;  %v5772_v2 = vld [vmem:[#allocation11 + $0xf0] sm:$0xff] }
  0xea   :  { %1139 = vmatpush.msrb.mxu3 %v8416_v7  ;;  %8424 = vst [vmem:[#allocation42_spill] sm:$0xff] %v5415_v63  ;;  %v5748_v63 = vld [vmem:[#allocation11 + $0x130] sm:$0xff] }
  0xeb   :  { %1120 = vmatpush.msrb.mxu2 %v8417_v8  ;;  %8477 = vst [vmem:[#allocation88_spill] sm:$0xff] %v5772_v2 }
  0xec   :  { %1140 = vmatpush.msrb.mxu3 %v8418_v16 }
  0xed   :  { %1268 = vmatpush.msra.mxu2 %v8419_v49  ;;  %v5423_v7 = vpop.f32.mrf.mxu0 }
  0xee   :  { %1288 = vmatpush.msra.mxu3 %v8420_v59  ;;  %8429 = vst [vmem:[#allocation43_spill] sm:$0xff] %v5423_v7  ;;  %v5751_v7 = vld [vmem:[#allocation11 + $0x138] sm:$0xff] }
  0xef   :  { %1269 = vmatpush.msra.mxu2 %v5112_v0  ;;  %v5406_v60 = vpop.f32.mrf.mxu2 }
  0xf0   :  { %8422 = vst [vmem:[#allocation30_spill] sm:$0xff] %v5406_v60  ;;  %1289 = vmatpush.msra.mxu3 %v5116_v4  ;;  %v5409_v62 = vpop.f32.mrf.mxu3  ;;  %v8428_v4 = vld [vmem:[#allocation74_spill] sm:$0xff]  ;;  %v5745_v60 = vld [vmem:[#allocation11 + $0x128] sm:$0xff] }
  0xf1   :  { %8423 = vst [vmem:[#allocation34_spill] sm:$0xff] %v5409_v62  ;;  %1270 = vmatpush.msra.mxu2 %v5121_v57  ;;  %v5754_v62 = vld [vmem:[#allocation11 + $0x100] sm:$0xff] }
  0xf2   :  { %1290 = vmatpush.msra.mxu3 %v5126_v6  ;;  %v5433_v6 = vpop.f32.mrf.mxu1  ;;  %8471 = vst [vmem:[#allocation71_spill] sm:$0xff] %v5754_v62 }
  0xf3   :  { %1271 = vmatpush.msra.mxu2 %v5129_v10  ;;  %8431 = vst [vmem:[#allocation46_spill] sm:$0xff] %v5433_v6  ;;  %v5766_v6 = vld [vmem:[#allocation11 + $0xe0] sm:$0xff] }
  0xf4   :  { %1291 = vmatpush.msra.mxu3 %v5133_v14  ;;  %v8433_v14 = vld [vmem:[#allocation77_spill] sm:$0xff]  ;;  %8474 = vst [vmem:[#allocation74_spill] sm:$0xff] %v5763_v45 }
  0xf5   :  { %1272 = vmatpush.msra.mxu2 %v8425_v3  ;;  %8475 = vst [vmem:[#allocation77_spill] sm:$0xff] %v5766_v6 }
  0xf6   :  { %1292 = vmatpush.msra.mxu3 %v8426_v11  ;;  %v164_v11 = vld [vmem:[%s7895_s4] sm:$0xf] }
  0xf7   :  { %1273 = vmatpush.msra.mxu2 %v5145_v21  ;;  %v5420_v0 = vpop.f32.mrf.mxu2  ;;  %v5550_v1 = vperm.slane %v164_v11, 2 }
  0xf8   :  { %8427 = vst [vmem:[#allocation33_spill] sm:$0xff] %v5420_v0  ;;  %1293 = vmatpush.msra.mxu3 %v8428_v4  ;;  %v5425_v57 = vpop.f32.mrf.mxu3  ;;  %v5495_v4 = vperm.slane %v164_v11, 1 }
  0xf9   :  { %8430 = vst [vmem:[#allocation38_spill] sm:$0xff] %v5425_v57  ;;  %1274 = vmatpush.msra.mxu2 %v5155_v23  ;;  %v5443_v23 = vpop.f32.mrf.mxu0 }
  0xfa   :  { %1294 = vmatpush.msra.mxu3 %v5160_v24  ;;  %8435 = vst [vmem:[#allocation41_spill] sm:$0xff] %v5443_v23  ;;  %v5769_v23 = vld [vmem:[#allocation11 + $0xe8] sm:$0xff] }
  0xfb   :  { %1275 = vmatpush.msra.mxu2 %v5163_v25  ;;  %8446 = vst [vmem:[#allocation58_spill] sm:$0xff] %v5495_v4 }
  0xfc   :  { %1295 = vmatpush.msra.mxu3 %v5169_v17  ;;  %8457 = vst [vmem:[#allocation66_spill] sm:$0xff] %v5550_v1 }
  0xfd   :  { %1276 = vmatpush.msra.mxu2 %v5175_v5  ;;  %8476 = vst [vmem:[#allocation87_spill] sm:$0xff] %v5769_v23 }
  0xfe   :  { %1296 = vmatpush.msra.mxu3 %v5179_v22  ;;  %v5453_v22 = vpop.f32.mrf.mxu1 }
  0xff   :  { %1277 = vmatpush.msra.mxu2 %v5183_v28  ;;  %v5436_v10 = vpop.f32.mrf.mxu2  ;;  %8437 = vst [vmem:[#allocation40_spill] sm:$0xff] %v5453_v22  ;;  %v5784_v22 = vld [vmem:[#allocation11 + $0xd0] sm:$0xff] }
 0x100   :  { %8432 = vst [vmem:[#allocation37_spill] sm:$0xff] %v5436_v10  ;;  %1297 = vmatpush.msra.mxu3 %v8433_v14  ;;  %v5439_v21 = vpop.f32.mrf.mxu3 }
 0x101   :  { %8434 = vst [vmem:[#allocation47_spill] sm:$0xff] %v5439_v21  ;;  %1278 = vmatpush.msra.mxu2 %v5193_v30  ;;  %v5464_v25 = vpop.f32.mrf.mxu0 }
 0x102   :  { %1298 = vmatpush.msra.mxu3 %v5198_v31  ;;  %8439 = vst [vmem:[#allocation45_spill] sm:$0xff] %v5464_v25  ;;  %v5787_v25 = vld [vmem:[#allocation11 + $0xd8] sm:$0xff] }
 0x103   :  { %1279 = vmatpush.msra.mxu2 %v5201_v32  ;;  %8481 = vst [vmem:[#allocation92_spill] sm:$0xff] %v5784_v22 }
 0x104   :  { %1299 = vmatpush.msra.mxu3 %v5207_v58  ;;  %v403_v58 = vld [vmem:[%s7898_s7] sm:$0xf]  ;;  %8482 = vst [vmem:[#allocation93_spill] sm:$0xff] %v5787_v25 }
 0x105   :  { %1280 = vmatpush.msra.mxu2 %v5213_v15  ;;  %v5466_v5 = vperm.slane %v403_v58, 2  ;;  %v5468_v28 = vperm.slane %v403_v58, 3 }
 0x106   :  { %1300 = vmatpush.msra.mxu3 %v5217_v29  ;;  %v5476_v15 = vpop.f32.mrf.mxu1 }
 0x107   :  { %1281 = vmatpush.msra.mxu2 %v5221_v34  ;;  %v5450_v17 = vpop.f32.mrf.mxu2 }
 0x108   :  { %8436 = vst [vmem:[#allocation49_spill] sm:$0xff] %v5450_v17  ;;  %1301 = vmatpush.msra.mxu3 %v5225_v35  ;;  %v5455_v24 = vpop.f32.mrf.mxu3 }
 0x109   :  { %8438 = vst [vmem:[#allocation51_spill] sm:$0xff] %v5455_v24  ;;  %1282 = vmatpush.msra.mxu2 %v5231_v36  ;;  %v5478_v34 = vpop.f32.mrf.mxu0 }
 0x10a   :  { %1302 = vmatpush.msra.mxu3 %v5236_v37 }
 0x10b   :  { %1283 = vmatpush.msra.mxu2 %v5239_v39 }
 0x10c   :  { %1303 = vmatpush.msra.mxu3 %v5245_v26 }
 0x10e   :  { %v492_v39 = vpop.f32.mrf.mxu1 }
 0x10f   :  { %v512_v29 = vpop.f32.mrf.mxu2 }
 0x110   :  { %v5471_v30 = vadd.f32 %v512_v29, %v5466_v5  ;;  %v553_v31 = vpop.f32.mrf.mxu3  ;;  %v258_v29 = vadd.f32 %v5248_v33, %v5495_v4 }
 0x111   :  { %v5474_v32 = vadd.f32 %v553_v31, %v5468_v28  ;;  %v451_v16 = vpop.f32.mrf.mxu0 }
 0x112   :  { %8440 = vst [vmem:[#allocation44_spill] sm:$0xff] %v5471_v30 }
 0x113   :  { %8441 = vst [vmem:[#allocation50_spill] sm:$0xff] %v5474_v32 }
 0x116   :  { %v779_v14 = vpop.f32.mrf.mxu1 }
 0x117   :  { %v515_v35 = vpop.f32.mrf.mxu2  ;;  %v823_v27 = vadd.f32 %v779_v14, %v258_v29  ;;  %v5517_v29 = vperm.slane %v403_v58, 1 }
 0x118   :  { %v5481_v26 = vadd.f32 %v515_v35, %v5466_v5  ;;  %v556_v36 = vpop.f32.mrf.mxu3 }
 0x119   :  { %v5484_v37 = vadd.f32 %v556_v36, %v5468_v28  ;;  %v759_v30 = vpop.f32.mrf.mxu0  ;;  %v3613_v12 = vmul.f32 -1.442695, %v823_v27  ;;  %8453 = vst [vmem:[#allocation65_spill] sm:$0xff] %v5517_v29 }
 0x11a   :  { %8442 = vst [vmem:[#allocation54_spill] sm:$0xff] %v5481_v26 }
 0x11b   :  { %8443 = vst [vmem:[#allocation48_spill] sm:$0xff] %v5484_v37  ;;  %3706 = vpow2.f32 %v3613_v12 }
 0x11e   :  { %v940_v27 = vpop.f32.mrf.mxu1 }
 0x11f   :  { %v518_v8 = vpop.f32.mrf.mxu2 }
 0x120   :  { %v5487_v49 = vadd.f32 %v518_v8, %v5466_v5  ;;  %v559_v59 = vpop.f32.mrf.mxu3  ;;  %v5502_v8 = vperm.slane %v164_v11, 0 }
 0x121   :  { %v5490_v3 = vadd.f32 %v559_v59, %v5468_v28 }
 0x122   :  { %8444 = vst [vmem:[#allocation57_spill] sm:$0xff] %v5487_v49  ;;  %v217_v32 = vadd.f32 %v5259_v41, %v5502_v8  ;;  %v493_v41 = vadd.f32 %v492_v39, %v5517_v29 }
 0x123   :  { %8445 = vst [vmem:[#allocation53_spill] sm:$0xff] %v5490_v3 }
 0x124   :  { %8448 = vst [vmem:[#allocation61_spill] sm:$0xff] %v5502_v8  ;;  %v822_v17 = vadd.f32 %v759_v30, %v217_v32  ;;  %v920_v30 = vpop.f32.mrf.mxu0  ;;  %v3707_v32 = vpop.eup %3706  ;;  %v984_v26 = vadd.f32 %v940_v27, %v493_v41 }
 0x126   :  { %v3612_v48 = vmul.f32 -1.442695, %v822_v17  ;;  %v3616_v10 = vmul.f32 -1.442695, %v984_v26 }
 0x127   :  { %v521_v31 = vpop.f32.mrf.mxu2 }
 0x128   :  { %v5500_v35 = vadd.f32 %v521_v31, %v5466_v5  ;;  %v562_v36 = vpop.f32.mrf.mxu3  ;;  %v5512_v31 = vperm.slane %v403_v58, 0  ;;  %3708 = vpow2.f32 %v3612_v48 }
 0x129   :  { %v5505_v59 = vadd.f32 %v562_v36, %v5468_v28 }
 0x12a   :  { %8447 = vst [vmem:[#allocation52_spill] sm:$0xff] %v5500_v35  ;;  %v452_v36 = vadd.f32 %v451_v16, %v5512_v31 }
 0x12b   :  { %8449 = vst [vmem:[#allocation56_spill] sm:$0xff] %v5505_v59  ;;  %v5742_v59 = vld [vmem:[#allocation11 + $0x120] sm:$0xff] }
 0x12c   :  { %8451 = vst [vmem:[#allocation55_spill] sm:$0xff] %v5512_v31 }
 0x12e   :  { %v3709_v58 = vpop.eup %3708 }
 0x12f   :  { %v524_v61 = vpop.f32.mrf.mxu2  ;;  %v5529_v39 = vadd.f32 1.0, %v3709_v58 }
 0x130   :  { %v5510_v33 = vadd.f32 %v524_v61, %v5466_v5  ;;  %v565_v24 = vpop.f32.mrf.mxu3  ;;  %v983_v61 = vadd.f32 %v920_v30, %v452_v36 }
 0x131   :  { %v5515_v14 = vadd.f32 %v565_v24, %v5468_v28  ;;  %v5527_v24 = vadd.f32 1.0, %v3707_v32  ;;  %vm835_vm8 = vweird.f32 %v5529_v39 }
 0x132   :  { %8450 = vst [vmem:[#allocation62_spill] sm:$0xff] %v5510_v33  ;;  %v3615_v16 = vmul.f32 -1.442695, %v983_v61  ;;  %v5757_v33 = vld [vmem:[#allocation11 + $0x108] sm:$0xff] }
 0x133   :  { %8452 = vst [vmem:[#allocation60_spill] sm:$0xff] %v5515_v14  ;;  %3710 = vrcp.f32 %v5527_v24  ;;  %vm854_vm5 = vweird.f32 %v5527_v24  ;;  %v5760_v14 = vld [vmem:[#allocation11 + $0x110] sm:$0xff] }
 0x134   :  { %3712 = vpow2.f32 %v3615_v16  ;;  %8472 = vst [vmem:[#allocation72_spill] sm:$0xff] %v5757_v33 }
 0x135   :  { %3714 = vpow2.f32 %v3616_v10  ;;  %8473 = vst [vmem:[#allocation73_spill] sm:$0xff] %v5760_v14 }
 0x136   :  { %3716 = vrcp.f32 %v5529_v39 }
 0x137   :  { %v527_v46 = vpop.f32.mrf.mxu2 }
 0x138   :  { %v5522_v37 = vadd.f32 %v527_v46, %v5466_v5  ;;  %v568_v12 = vpop.f32.mrf.mxu3 }
 0x139   :  { %v5525_v17 = vadd.f32 %v568_v12, %v5468_v28  ;;  %v3711_v30 = vpop.eup %3710 }
 0x13a   :  { %8454 = vst [vmem:[#allocation59_spill] sm:$0xff] %v5522_v37  ;;  %v3713_v27 = vpop.eup %3712  ;;  %v850_v12 = vmul.f32 %v3711_v30, %v5527_v24  ;;  %vm855_vm4 = vweird.f32 %v3711_v30  ;;  %v5775_v37 = vld [vmem:[#allocation11 + $0xf8] sm:$0xff] }
 0x13b   :  { %8455 = vst [vmem:[#allocation63_spill] sm:$0xff] %v5525_v17  ;;  %v3715_v32 = vpop.eup %3714  ;;  %v5542_v58 = vadd.f32 1.0, %v3713_v27  ;;  %vm5573_vm7 = vmor %vm854_vm5, %vm855_vm4  ;;  %v5778_v17 = vld [vmem:[#allocation11 + $0xc0] sm:$0xff] }
 0x13c   :  { %v5539_v61 = vpop.eup %3716  ;;  %v5544_v16 = vadd.f32 1.0, %v3715_v32  ;;  %v851_v13 = vsub.f32 1.0, %v850_v12  ;;  %v299_v32 = vadd.f32 %v5315_v51, %v5550_v1  ;;  %8478 = vst [vmem:[#allocation89_spill] sm:$0xff] %v5775_v37 }
 0x13d   :  { %3718 = vrcp.f32 %v5542_v58  ;;  %vm836_vm6 = vweird.f32 %v5539_v61  ;;  %vm996_vm13 = vweird.f32 %v5542_v58  ;;  %8479 = vst [vmem:[#allocation90_spill] sm:$0xff] %v5778_v17 }
 0x13e   :  { %3720 = vrcp.f32 %v5544_v16  ;;  %v852_v42 = vmul.f32 %v3711_v30, %v851_v13  ;;  %vm5582_vm9 = vmor %vm835_vm8, %vm836_vm6  ;;  %vm1015_vm15 = vweird.f32 %v5544_v16  ;;  %vm2027_vm6 = vcmp.gt.s32.totalorder %v5294_v47, 4 }
 0x13f   :  { %v530_v48 = vpop.f32.mrf.mxu2 }
 0x140   :  { %v5533_v36 = vadd.f32 %v530_v48, %v5466_v5  ;;  %v571_v46 = vpop.f32.mrf.mxu3  ;;  %v5546_v48 = vperm.slane %v164_v11, 3  ;;  %v853_v57 = vadd.f32 %v3711_v30, %v852_v42 }
 0x141   :  { %v5536_v41 = vadd.f32 %v571_v46, %v5468_v28  ;;  %v831_v46 = vmul.f32 %v5539_v61, %v5529_v39 }
 0x142   :  { %8456 = vst [vmem:[#allocation64_spill] sm:$0xff] %v5546_v48  ;;  %v340_v21 = vadd.f32 %v5321_v55, %v5546_v48  ;;  %v860_v55 = vand.u32 2147483648, %v5527_v24 }
 0x143   :  { %v832_v27 = vsub.f32 1.0, %v831_v46  ;;  %v5558_v0 = vpop.eup %3718 }
 0x144   :  { %v5560_v38 = vpop.eup %3720  ;;  %v992_v46 = vmul.f32 %v5558_v0, %v5542_v58  ;;  %vm997_vm14 = vweird.f32 %v5558_v0 }
 0x145   :  { %v833_v12 = vmul.f32 %v5539_v61, %v832_v27  ;;  %v1011_v51 = vmul.f32 %v5560_v38, %v5544_v16  ;;  %vm1016_vm0 = vweird.f32 %v5560_v38  ;;  %vm5603_vm2 = vmor %vm996_vm13, %vm997_vm14 }
 0x146   :  { %v993_v27 = vsub.f32 1.0, %v992_v46  ;;  %vm5611_vm3 = vmor %vm1015_vm15, %vm1016_vm0 }
 0x147   :  { %v533_v26 = vpop.f32.mrf.mxu2 }
 0x148   :  { %v574_v10 = vpop.f32.mrf.mxu3  ;;  %v534_v40 = vadd.f32 %v533_v26, %v5466_v5 }
 0x149   :  { %v575_v13 = vadd.f32 %v574_v10, %v5468_v28  ;;  %v839_v28 = vand.u32 2147483647, %v5529_v39 }
 0x14b   :  { %vm840_vm12 = vcmp.eq.f32.partialorder %v839_v28, 8.507059e+37 }
 0x14f   :  { %v799_v43 = vpop.f32.mrf.mxu2 }
 0x150   :  { %v819_v49 = vpop.f32.mrf.mxu3  ;;  %v824_v11 = vadd.f32 %v799_v43, %v299_v32  ;;  %v858_v43 = vand.u32 2147483647, %v5527_v24  ;;  %v861_v24 = vor.u32 1.1754944e-38, %v860_v55  ;;  %v1012_v32 = vsub.f32 1.0, %v1011_v51 }
 0x151   :  { %v825_v3 = vadd.f32 %v819_v49, %v340_v21  ;;  %v834_v21 = vadd.f32 %v5539_v61, %v833_v12  ;;  %v857_v49 = vsel %vm5573_vm7, %v3711_v30, %v853_v57 }
 0x152   :  { %vm859_vm10 = vcmp.eq.f32.partialorder %v858_v43, 8.507059e+37  ;;  %v8462_v43 = vmov 0   ;;  %v1013_v35 = vmul.f32 %v5560_v38, %v1012_v32 }
 0x153   :  { %v3614_v9 = vmul.f32 -1.442695, %v825_v3  ;;  %v838_v57 = vsel %vm5582_vm9, %v5539_v61, %v834_v21  ;;  %v862_v30 = vsel %vm859_vm10, %v861_v24, %v857_v49  ;;  %v1376_v32 = vsel %vm1375_vm1, 1, %v8462_v43  ;;  %v5628_v49 = vpop.permute.xlu0 %892 }
 0x154   :  { %v884_v26 = vmul.f32 0.0, %v862_v30  ;;  %v1014_v24 = vadd.f32 %v5560_v38, %v1013_v35  ;;  %8467 = vst [vmem:[#allocation67_spill] sm:$0xff] %v5628_v49 }
 0x155   :  { %3722 = vpow2.f32 %v3614_v9  ;;  %v841_v9 = vand.u32 2147483648, %v5529_v39 }
 0x156   :  { %3724 = vtanh.f32 %v824_v11  ;;  %v1018_v35 = vsel %vm5611_vm3, %v5560_v38, %v1014_v24 }
 0x157   :  { %v960_v12 = vpop.f32.mrf.mxu2  ;;  %v842_v42 = vor.u32 1.1754944e-38, %v841_v9  ;;  %v1000_v9 = vand.u32 2147483647, %v5542_v58 }
 0x158   :  { %v980_v3 = vpop.f32.mrf.mxu3  ;;  %v985_v51 = vadd.f32 %v960_v12, %v534_v40  ;;  %v1002_v40 = vand.u32 2147483648, %v5542_v58 }
 0x159   :  { %v986_v10 = vadd.f32 %v980_v3, %v575_v13  ;;  %v994_v13 = vmul.f32 %v5558_v0, %v993_v27  ;;  %v1213_v3 = vsel %vm1212_vm11, 1, %v8462_v43  ;;  %v843_v5 = vsel %vm840_vm12, %v842_v42, %v838_v57 }
 0x15a   :  { %1215 = vperm.xlu1 %3703, %v1213_v3   ;;  %v1019_v27 = vand.u32 2147483647, %v5544_v16  ;;  %v1003_v12 = vor.u32 1.1754944e-38, %v1002_v40  ;;  %vm1001_vm4 = vcmp.eq.f32.partialorder %v1000_v9, 8.507059e+37  ;;  %vm894_vm11 = vcmp.eq.s32.totalorder %v5628_v49, 1  ;;  %v6568_v49 = vld [vmem:[#allocation11 + $0x60] sm:$0xff] }
 0x15b   :  { %v3723_v18 = vpop.eup %3722  ;;  %v3617_v55 = vmul.f32 -1.442695, %v986_v10  ;;  %v995_v21 = vadd.f32 %v5558_v0, %v994_v13 }
 0x15c   :  { %v3725_v46 = vpop.eup %3724  ;;  %v868_v39 = vadd.f32 1.0, %v3723_v18  ;;  %v1021_v18 = vand.u32 2147483648, %v5544_v16  ;;  %vm1020_vm5 = vcmp.eq.f32.partialorder %v1019_v27, 8.507059e+37 }
 0x15d   :  { %v885_v61 = vmul.f32 %v3725_v46, %v843_v5 }
 0x15e   :  { %3726 = vrcp.f32 %v868_v39  ;;  %v1022_v57 = vor.u32 1.1754944e-38, %v1021_v18  ;;  %v878_v3 = vand.u32 2147483647, %v868_v39  ;;  %vm874_vm8 = vweird.f32 %v868_v39 }
 0x15f   :  { %3728 = vpow2.f32 %v3617_v55  ;;  %v5609_v28 = vadd.f32 %v885_v61, %v884_v26  ;;  %v999_v55 = vsel %vm5603_vm2, %v5558_v0, %v995_v21  ;;  %v2028_v61 = vsel %vm2027_vm6, 1, %v8462_v43 }
 0x160   :  { %3730 = vtanh.f32 %v985_v51  ;;  %v880_v51 = vand.u32 2147483648, %v868_v39  ;;  %v1004_v13 = vsel %vm1001_vm4, %v1003_v12, %v999_v55  ;;  %v1023_v5 = vsel %vm1020_vm5, %v1022_v57, %v1018_v35  ;;  %v5651_v57 = vld [vmem:[#allocation11 + $0x1e0] sm:$0xff]  ;;  %v5657_v55 = vld [vmem:[#allocation11 + $0x1f0] sm:$0xff]  ;;  %v5660_v35 = vld [vmem:[#allocation11 + $0x1f8] sm:$0xff] }
 0x161   :  { %3732 = vtanh.f32 %v5609_v28  ;;  %v1045_v18 = vmul.f32 0.0, %v1023_v5  ;;  %vm879_vm10 = vcmp.eq.f32.partialorder %v878_v3, 8.507059e+37  ;;  %v5674_v3 = vld [vmem:[#allocation11 + $0x1d8] sm:$0xff]  ;;  %v5677_v5 = vpop.permute.xlu0 %1053 }
 0x162   :  { %1378 = vperm.xlu1 %3703, %v1376_v32   ;;  %v881_v40 = vor.u32 1.1754944e-38, %v880_v51  ;;  %v5667_v51 = vld [vmem:[#allocation11 + $0x1c8] sm:$0xff]  ;;  %8469 = vst [vmem:[#allocation69_spill] sm:$0xff] %v5677_v5  ;;  %vm1055_vm0 = vcmp.eq.s32.totalorder %v5677_v5, 1 }
 0x163   :  { %v6559_v5 = vld [vmem:[#allocation11 + $0x88] sm:$0xff] }
 0x164   :  { %v3727_v11 = vpop.eup %3726 }
 0x165   :  { %v3729_v58 = vpop.eup %3728  ;;  %v870_v30 = vmul.f32 %v3727_v11, %v868_v39  ;;  %vm875_vm7 = vweird.f32 %v3727_v11 }
 0x166   :  { %v5622_v16 = vadd.f32 1.0, %v3729_v58  ;;  %v3731_v46 = vpop.eup %3730  ;;  %vm876_vm9 = vmor %vm874_vm8, %vm875_vm7 }
 0x167   :  { %v871_v42 = vsub.f32 1.0, %v870_v30  ;;  %v1046_v26 = vmul.f32 %v3731_v46, %v1004_v13  ;;  %v3733_v21 = vpop.eup %3732  ;;  %v5654_v30 = vld [vmem:[#allocation11 + $0x1e8] sm:$0xff] }
 0x168   :  { %3734 = vrcp.f32 %v5622_v16  ;;  %v1039_v58 = vand.u32 2147483647, %v5622_v16  ;;  %vm1035_vm13 = vweird.f32 %v5622_v16 }
 0x169   :  { %v872_v0 = vmul.f32 %v3727_v11, %v871_v42  ;;  %v5630_v27 = vadd.f32 %v1046_v26, %v1045_v18  ;;  %v5664_v42 = vld [vmem:[#allocation11 + $0x1c0] sm:$0xff]  ;;  %v5685_v18 = vld [vmem:[#allocation11 + $0x1b0] sm:$0xff] }
 0x16a   :  { %2030 = vperm.xlu1 %3703, %v2028_v61   ;;  %vm1040_vm15 = vcmp.eq.f32.partialorder %v1039_v58, 8.507059e+37  ;;  %v5679_v26 = vld [vmem:[#allocation11 + $0x1a0] sm:$0xff]  ;;  %v5724_v58 = vld [vmem:[#allocation11 + $0x170] sm:$0xff] }
 0x16b   :  { %v873_v38 = vadd.f32 %v3727_v11, %v872_v0  ;;  %3736 = vtanh.f32 %v5630_v27  ;;  %v5671_v0 = vld [vmem:[#allocation11 + $0x1d0] sm:$0xff] }
 0x16d   :  { %v877_v9 = vsel %vm876_vm9, %v3727_v11, %v873_v38  ;;  %v1041_v11 = vand.u32 2147483648, %v5622_v16  ;;  %v5682_v38 = vld [vmem:[#allocation11 + $0x1a8] sm:$0xff] }
 0x16e   :  { %v3735_v24 = vpop.eup %3734  ;;  %v882_v47 = vsel %vm879_vm10, %v881_v40, %v877_v9 }
 0x16f   :  { %v1031_v10 = vmul.f32 %v3735_v24, %v5622_v16  ;;  %v5633_v32 = vmul.f32 %v3733_v21, %v882_v47  ;;  %vm1036_vm12 = vweird.f32 %v3735_v24  ;;  %v1042_v13 = vor.u32 1.1754944e-38, %v1041_v11  ;;  %v5688_v21 = vld [vmem:[#allocation11 + $0x1b8] sm:$0xff]  ;;  %v5696_v47 = vld [vmem:[#allocation11 + $0x188] sm:$0xff]  ;;  %v5718_v11 = vld [vmem:[#allocation11 + $0x160] sm:$0xff] }
 0x170   :  { %vm1037_vm14 = vmor %vm1035_vm13, %vm1036_vm12 }
 0x171   :  { %8468 = vst [vmem:[#allocation68_spill] sm:$0xff] %v5633_v32  ;;  %v1032_v39 = vsub.f32 1.0, %v1031_v10  ;;  %3618 = vmatmul.msk.f32.vlgmr.msra.gmra.mxu0 %vm894_vm11, %v5633_v32  ;;  %3619 = vmatmul.msk.f32.vlgmr.msra.gmra.mxu1 %vm894_vm11, %v5633_v32  ;;  %v3737_v61 = vpop.eup %3736  ;;  %v5700_v10 = vld [vmem:[#allocation11 + $0x190] sm:$0xff] }
 0x172   :  { %3620 = vmatmul.msk.f32.vlgmr.msrb.gmra.mxu2 %vm894_vm11, %v5633_v32  ;;  %3621 = vmatmul.msk.f32.vlgmr.msrb.gmra.mxu3 %vm894_vm11, %v5633_v32 }
 0x173   :  { %v1033_v12 = vmul.f32 %v3735_v24, %v1032_v39  ;;  %1391 = vmatpush.msra.mxu0 %v5651_v57  ;;  %1411 = vmatpush.msra.mxu1 %v5654_v30  ;;  %v5703_v39 = vld [vmem:[#allocation11 + $0x198] sm:$0xff] }
 0x174   :  { %1431 = vmatpush.msrb.mxu2 %v5657_v55  ;;  %1451 = vmatpush.msrb.mxu3 %v5660_v35 }
 0x175   :  { %v1034_v46 = vadd.f32 %v3735_v24, %v1033_v12  ;;  %1392 = vmatpush.msra.mxu0 %v5664_v42  ;;  %1412 = vmatpush.msra.mxu1 %v5667_v51  ;;  %v5721_v12 = vld [vmem:[#allocation11 + $0x168] sm:$0xff] }
 0x176   :  { %1432 = vmatpush.msrb.mxu2 %v5671_v0  ;;  %1452 = vmatpush.msrb.mxu3 %v5674_v3 }
 0x177   :  { %v1038_v16 = vsel %vm1037_vm14, %v3735_v24, %v1034_v46  ;;  %1393 = vmatpush.msra.mxu0 %v5679_v26  ;;  %1413 = vmatpush.msra.mxu1 %v5682_v38  ;;  %v5693_v24 = vld [vmem:[#allocation11 + $0x180] sm:$0xff]  ;;  %v5727_v46 = vld [vmem:[#allocation11 + $0x178] sm:$0xff] }
 0x178   :  { %v1043_v40 = vsel %vm1040_vm15, %v1042_v13, %v1038_v16  ;;  %1433 = vmatpush.msrb.mxu2 %v5685_v18  ;;  %1453 = vmatpush.msrb.mxu3 %v5688_v21  ;;  %v5730_v13 = vld [vmem:[#allocation11 + $0x140] sm:$0xff]  ;;  %v5733_v16 = vld [vmem:[#allocation11 + $0x148] sm:$0xff] }
 0x179   :  { %v5691_v9 = vmul.f32 %v3737_v61, %v1043_v40  ;;  %1394 = vmatpush.msra.mxu0 %v5693_v24  ;;  %1414 = vmatpush.msra.mxu1 %v5696_v47  ;;  %v5736_v61 = vld [vmem:[#allocation11 + $0x150] sm:$0xff]  ;;  %v5739_v40 = vld [vmem:[#allocation11 + $0x158] sm:$0xff] }
 0x17a   :  { %1434 = vmatpush.msrb.mxu2 %v5700_v10  ;;  %1454 = vmatpush.msrb.mxu3 %v5703_v39 }
 0x17b   :  { %8470 = vst [vmem:[#allocation70_spill] sm:$0xff] %v5691_v9  ;;  %3625 = vmatmul.msk.f32.vlgmr.msrb.gmra.mxu0 %vm1055_vm0, %v5691_v9  ;;  %3626 = vmatmul.msk.f32.vlgmr.msrb.gmra.mxu1 %vm1055_vm0, %v5691_v9 }
 0x17c   :  { %3627 = vmatmul.msk.f32.vlgmr.msra.gmra.mxu2 %vm1055_vm0, %v5691_v9  ;;  %3628 = vmatmul.msk.f32.vlgmr.msra.gmra.mxu3 %vm1055_vm0, %v5691_v9 }
 0x17d   :  { %1395 = vmatpush.msra.mxu0 %v5718_v11  ;;  %1415 = vmatpush.msra.mxu1 %v5721_v12 }
 0x17e   :  { %1435 = vmatpush.msrb.mxu2 %v5724_v58  ;;  %1455 = vmatpush.msrb.mxu3 %v5727_v46 }
 0x17f   :  { %1396 = vmatpush.msra.mxu0 %v5730_v13  ;;  %1416 = vmatpush.msra.mxu1 %v5733_v16 }
 0x180   :  { %1436 = vmatpush.msrb.mxu2 %v5736_v61  ;;  %1456 = vmatpush.msrb.mxu3 %v5739_v40 }
 0x181   :  { %1397 = vmatpush.msra.mxu0 %v5742_v59  ;;  %1417 = vmatpush.msra.mxu1 %v5745_v60 }
 0x182   :  { %1437 = vmatpush.msrb.mxu2 %v5748_v63  ;;  %1457 = vmatpush.msrb.mxu3 %v5751_v7 }
 0x183   :  { %1398 = vmatpush.msra.mxu0 %v5754_v62  ;;  %1418 = vmatpush.msra.mxu1 %v5757_v33 }
 0x184   :  { %1438 = vmatpush.msrb.mxu2 %v5760_v14  ;;  %1458 = vmatpush.msrb.mxu3 %v5763_v45 }
 0x185   :  { %1399 = vmatpush.msra.mxu0 %v5766_v6  ;;  %1419 = vmatpush.msra.mxu1 %v5769_v23 }
 0x186   :  { %1439 = vmatpush.msrb.mxu2 %v5772_v2  ;;  %1459 = vmatpush.msrb.mxu3 %v5775_v37 }
 0x187   :  { %1400 = vmatpush.msra.mxu0 %v5778_v17  ;;  %1420 = vmatpush.msra.mxu1 %v5781_v52  ;;  %v5799_v52 = vld [vmem:[#allocation11 + $0xb8] sm:$0xff] }
 0x188   :  { %1440 = vmatpush.msrb.mxu2 %v5784_v22  ;;  %1460 = vmatpush.msrb.mxu3 %v5787_v25  ;;  %8486 = vst [vmem:[#allocation97_spill] sm:$0xff] %v5799_v52  ;;  %v5802_v22 = vld [vmem:[#allocation11 + $0x80] sm:$0xff]  ;;  %v5805_v25 = vld [vmem:[#allocation11 + $0x88] sm:$0xff] }
 0x189   :  { %1401 = vmatpush.msra.mxu0 %v5790_v56  ;;  %1421 = vmatpush.msra.mxu1 %v5793_v50  ;;  %8487 = vst [vmem:[#allocation98_spill] sm:$0xff] %v5802_v22  ;;  %v5808_v56 = vld [vmem:[#allocation11 + $0x90] sm:$0xff]  ;;  %v5811_v50 = vld [vmem:[#allocation11 + $0x98] sm:$0xff] }
 0x18a   :  { %1441 = vmatpush.msrb.mxu2 %v5796_v54  ;;  %1461 = vmatpush.msrb.mxu3 %v5799_v52  ;;  %8488 = vst [vmem:[#allocation99_spill] sm:$0xff] %v5805_v25  ;;  %v5814_v54 = vld [vmem:[#allocation11 + $0x60] sm:$0xff]  ;;  %v5817_v52 = vld [vmem:[#allocation11 + $0x68] sm:$0xff] }
 0x18b   :  { %1402 = vmatpush.msra.mxu0 %v5802_v22  ;;  %1422 = vmatpush.msra.mxu1 %v5805_v25  ;;  %8489 = vst [vmem:[#allocation100_spill] sm:$0xff] %v5808_v56  ;;  %v5820_v22 = vld [vmem:[#allocation11 + $0x70] sm:$0xff]  ;;  %v5823_v25 = vld [vmem:[#allocation11 + $0x78] sm:$0xff] }
 0x18c   :  { %1442 = vmatpush.msrb.mxu2 %v5808_v56  ;;  %8490 = vst [vmem:[#allocation101_spill] sm:$0xff] %v5811_v50  ;;  %1462 = vmatpush.msrb.mxu3 %v5811_v50  ;;  %v5826_v56 = vld [vmem:[#allocation11 + $0x40] sm:$0xff]  ;;  %v5829_v50 = vld [vmem:[#allocation11 + $0x48] sm:$0xff] }
 0x18d   :  { %8491 = vst [vmem:[#allocation102_spill] sm:$0xff] %v5814_v54  ;;  %1403 = vmatpush.msra.mxu0 %v5814_v54  ;;  %1423 = vmatpush.msra.mxu1 %v5817_v52  ;;  %v5832_v54 = vld [vmem:[#allocation11 + $0x50] sm:$0xff] }
 0x18e   :  { %8492 = vst [vmem:[#allocation103_spill] sm:$0xff] %v5817_v52  ;;  %1443 = vmatpush.msrb.mxu2 %v5820_v22  ;;  %1463 = vmatpush.msrb.mxu3 %v5823_v25  ;;  %v5835_v52 = vld [vmem:[#allocation11 + $0x58] sm:$0xff] }
 0x18f   :  { %8493 = vst [vmem:[#allocation104_spill] sm:$0xff] %v5820_v22  ;;  %1404 = vmatpush.msra.mxu0 %v5826_v56  ;;  %1424 = vmatpush.msra.mxu1 %v5829_v50  ;;  %v5838_v22 = vld [vmem:[#allocation11 + $0x20] sm:$0xff] }
 0x190   :  { %8494 = vst [vmem:[#allocation105_spill] sm:$0xff] %v5823_v25  ;;  %1444 = vmatpush.msrb.mxu2 %v5832_v54  ;;  %1464 = vmatpush.msrb.mxu3 %v5835_v52  ;;  %v5841_v25 = vld [vmem:[#allocation11 + $0x28] sm:$0xff] }
 0x191   :  { %8495 = vst [vmem:[#allocation106_spill] sm:$0xff] %v5826_v56  ;;  %1405 = vmatpush.msra.mxu0 %v5838_v22  ;;  %1425 = vmatpush.msra.mxu1 %v5841_v25  ;;  %v5844_v56 = vld [vmem:[#allocation11 + $0x30] sm:$0xff] }
 0x192   :  { %8496 = vst [vmem:[#allocation107_spill] sm:$0xff] %v5829_v50  ;;  %1445 = vmatpush.msrb.mxu2 %v5844_v56  ;;  %v5847_v50 = vld [vmem:[#allocation11 + $0x38] sm:$0xff] }
 0x193   :  { %8497 = vst [vmem:[#allocation108_spill] sm:$0xff] %v5832_v54  ;;  %1465 = vmatpush.msrb.mxu3 %v5847_v50  ;;  %v5850_v54 = vld [vmem:[#allocation11] sm:$0xff] }
 0x194   :  { %8498 = vst [vmem:[#allocation109_spill] sm:$0xff] %v5835_v52  ;;  %1406 = vmatpush.msra.mxu0 %v5850_v54  ;;  %v5853_v52 = vld [vmem:[#allocation11 + $0x8] sm:$0xff] }
 0x195   :  { %8499 = vst [vmem:[#allocation110_spill] sm:$0xff] %v5838_v22  ;;  %1426 = vmatpush.msra.mxu1 %v5853_v52  ;;  %v5856_v22 = vld [vmem:[#allocation11 + $0x10] sm:$0xff] }
 0x196   :  { %8500 = vst [vmem:[#allocation111_spill] sm:$0xff] %v5841_v25  ;;  %1446 = vmatpush.msrb.mxu2 %v5856_v22  ;;  %v5859_v25 = vld [vmem:[#allocation11 + $0x18] sm:$0xff] }
 0x197   :  { %8501 = vst [vmem:[#allocation112_spill] sm:$0xff] %v5844_v56  ;;  %1466 = vmatpush.msrb.mxu3 %v5859_v25  ;;  %v5862_v56 = vld [vmem:[#allocation14 + $0x1e0] sm:$0xff] }
 0x198   :  { %8502 = vst [vmem:[#allocation113_spill] sm:$0xff] %v5847_v50  ;;  %1554 = vmatpush.msrb.mxu0 %v5862_v56  ;;  %v5865_v50 = vld [vmem:[#allocation14 + $0x1e8] sm:$0xff] }
 0x199   :  { %8503 = vst [vmem:[#allocation114_spill] sm:$0xff] %v5850_v54  ;;  %1574 = vmatpush.msrb.mxu1 %v5865_v50  ;;  %v5868_v54 = vld [vmem:[#allocation14 + $0x1f0] sm:$0xff] }
 0x19a   :  { %8504 = vst [vmem:[#allocation115_spill] sm:$0xff] %v5853_v52  ;;  %1594 = vmatpush.msra.mxu2 %v5868_v54  ;;  %v5871_v52 = vld [vmem:[#allocation14 + $0x1f8] sm:$0xff] }
 0x19b   :  { %8505 = vst [vmem:[#allocation116_spill] sm:$0xff] %v5856_v22  ;;  %1614 = vmatpush.msra.mxu3 %v5871_v52  ;;  %v5874_v22 = vld [vmem:[#allocation14 + $0x1c0] sm:$0xff] }
 0x19c   :  { %8506 = vst [vmem:[#allocation117_spill] sm:$0xff] %v5859_v25  ;;  %1555 = vmatpush.msrb.mxu0 %v5874_v22  ;;  %v5877_v25 = vld [vmem:[#allocation14 + $0x1c8] sm:$0xff] }
 0x19d   :  { %8507 = vst [vmem:[#allocation118_spill] sm:$0xff] %v5862_v56  ;;  %1575 = vmatpush.msrb.mxu1 %v5877_v25  ;;  %v5880_v56 = vld [vmem:[#allocation14 + $0x1d0] sm:$0xff] }
 0x19e   :  { %8508 = vst [vmem:[#allocation119_spill] sm:$0xff] %v5865_v50  ;;  %1595 = vmatpush.msra.mxu2 %v5880_v56  ;;  %v5883_v50 = vld [vmem:[#allocation14 + $0x1d8] sm:$0xff] }
 0x19f   :  { %8509 = vst [vmem:[#allocation120_spill] sm:$0xff] %v5868_v54  ;;  %1615 = vmatpush.msra.mxu3 %v5883_v50  ;;  %v5886_v54 = vld [vmem:[#allocation14 + $0x1a0] sm:$0xff] }
 0x1a0   :  { %8510 = vst [vmem:[#allocation121_spill] sm:$0xff] %v5871_v52  ;;  %1556 = vmatpush.msrb.mxu0 %v5886_v54  ;;  %v5889_v52 = vld [vmem:[#allocation14 + $0x1a8] sm:$0xff] }
 0x1a1   :  { %8511 = vst [vmem:[#allocation122_spill] sm:$0xff] %v5874_v22  ;;  %1576 = vmatpush.msrb.mxu1 %v5889_v52  ;;  %v5892_v22 = vld [vmem:[#allocation14 + $0x1b0] sm:$0xff] }
 0x1a2   :  { %8512 = vst [vmem:[#allocation123_spill] sm:$0xff] %v5877_v25  ;;  %1596 = vmatpush.msra.mxu2 %v5892_v22  ;;  %v5895_v25 = vld [vmem:[#allocation14 + $0x1b8] sm:$0xff] }
 0x1a3   :  { %8513 = vst [vmem:[#allocation124_spill] sm:$0xff] %v5880_v56  ;;  %1616 = vmatpush.msra.mxu3 %v5895_v25  ;;  %v5898_v56 = vld [vmem:[#allocation14 + $0x180] sm:$0xff] }
 0x1a4   :  { %8514 = vst [vmem:[#allocation125_spill] sm:$0xff] %v5883_v50  ;;  %1557 = vmatpush.msrb.mxu0 %v5898_v56  ;;  %v5901_v50 = vld [vmem:[#allocation14 + $0x188] sm:$0xff] }
 0x1a5   :  { %8515 = vst [vmem:[#allocation126_spill] sm:$0xff] %v5886_v54  ;;  %1577 = vmatpush.msrb.mxu1 %v5901_v50  ;;  %v5904_v54 = vld [vmem:[#allocation14 + $0x190] sm:$0xff] }
 0x1a6   :  { %8516 = vst [vmem:[#allocation127_spill] sm:$0xff] %v5889_v52  ;;  %1597 = vmatpush.msra.mxu2 %v5904_v54  ;;  %v5907_v52 = vld [vmem:[#allocation14 + $0x198] sm:$0xff] }
 0x1a7   :  { %8517 = vst [vmem:[#allocation128_spill] sm:$0xff] %v5892_v22  ;;  %1617 = vmatpush.msra.mxu3 %v5907_v52  ;;  %v5910_v22 = vld [vmem:[#allocation14 + $0x160] sm:$0xff] }
 0x1a8   :  { %8518 = vst [vmem:[#allocation129_spill] sm:$0xff] %v5895_v25  ;;  %1558 = vmatpush.msrb.mxu0 %v5910_v22  ;;  %v5913_v25 = vld [vmem:[#allocation14 + $0x168] sm:$0xff] }
 0x1a9   :  { %8519 = vst [vmem:[#allocation130_spill] sm:$0xff] %v5898_v56  ;;  %1578 = vmatpush.msrb.mxu1 %v5913_v25  ;;  %v5916_v56 = vld [vmem:[#allocation14 + $0x170] sm:$0xff] }
 0x1aa   :  { %8520 = vst [vmem:[#allocation131_spill] sm:$0xff] %v5901_v50  ;;  %1598 = vmatpush.msra.mxu2 %v5916_v56  ;;  %v5919_v50 = vld [vmem:[#allocation14 + $0x178] sm:$0xff] }
 0x1ab   :  { %8521 = vst [vmem:[#allocation132_spill] sm:$0xff] %v5904_v54  ;;  %1618 = vmatpush.msra.mxu3 %v5919_v50  ;;  %v5922_v54 = vld [vmem:[#allocation14 + $0x140] sm:$0xff] }
 0x1ac   :  { %8522 = vst [vmem:[#allocation133_spill] sm:$0xff] %v5907_v52  ;;  %1559 = vmatpush.msrb.mxu0 %v5922_v54  ;;  %v5925_v52 = vld [vmem:[#allocation14 + $0x148] sm:$0xff] }
 0x1ad   :  { %8523 = vst [vmem:[#allocation134_spill] sm:$0xff] %v5910_v22  ;;  %1579 = vmatpush.msrb.mxu1 %v5925_v52  ;;  %v5928_v22 = vld [vmem:[#allocation14 + $0x150] sm:$0xff] }
 0x1ae   :  { %8524 = vst [vmem:[#allocation135_spill] sm:$0xff] %v5913_v25  ;;  %1599 = vmatpush.msra.mxu2 %v5928_v22  ;;  %v5931_v25 = vld [vmem:[#allocation14 + $0x158] sm:$0xff] }
 0x1af   :  { %8525 = vst [vmem:[#allocation136_spill] sm:$0xff] %v5916_v56  ;;  %1619 = vmatpush.msra.mxu3 %v5931_v25  ;;  %v5934_v56 = vld [vmem:[#allocation14 + $0x120] sm:$0xff] }
 0x1b0   :  { %8526 = vst [vmem:[#allocation137_spill] sm:$0xff] %v5919_v50  ;;  %1560 = vmatpush.msrb.mxu0 %v5934_v56  ;;  %v5937_v50 = vld [vmem:[#allocation14 + $0x128] sm:$0xff] }
 0x1b1   :  { %8527 = vst [vmem:[#allocation138_spill] sm:$0xff] %v5922_v54  ;;  %1580 = vmatpush.msrb.mxu1 %v5937_v50  ;;  %v5940_v54 = vld [vmem:[#allocation14 + $0x130] sm:$0xff] }
 0x1b2   :  { %8528 = vst [vmem:[#allocation139_spill] sm:$0xff] %v5925_v52  ;;  %1600 = vmatpush.msra.mxu2 %v5940_v54  ;;  %v5943_v52 = vld [vmem:[#allocation14 + $0x138] sm:$0xff] }
 0x1b3   :  { %8529 = vst [vmem:[#allocation140_spill] sm:$0xff] %v5928_v22  ;;  %1620 = vmatpush.msra.mxu3 %v5943_v52  ;;  %v5946_v22 = vld [vmem:[#allocation14 + $0x100] sm:$0xff] }
 0x1b4   :  { %8530 = vst [vmem:[#allocation141_spill] sm:$0xff] %v5931_v25  ;;  %1561 = vmatpush.msrb.mxu0 %v5946_v22  ;;  %v5949_v25 = vld [vmem:[#allocation14 + $0x108] sm:$0xff] }
 0x1b5   :  { %8531 = vst [vmem:[#allocation142_spill] sm:$0xff] %v5934_v56  ;;  %1581 = vmatpush.msrb.mxu1 %v5949_v25  ;;  %v5952_v56 = vld [vmem:[#allocation14 + $0x110] sm:$0xff] }
 0x1b6   :  { %8532 = vst [vmem:[#allocation143_spill] sm:$0xff] %v5937_v50  ;;  %1601 = vmatpush.msra.mxu2 %v5952_v56  ;;  %v5955_v50 = vld [vmem:[#allocation14 + $0x118] sm:$0xff] }
 0x1b7   :  { %8533 = vst [vmem:[#allocation144_spill] sm:$0xff] %v5940_v54  ;;  %1621 = vmatpush.msra.mxu3 %v5955_v50  ;;  %v5958_v54 = vld [vmem:[#allocation14 + $0xe0] sm:$0xff] }
 0x1b8   :  { %8534 = vst [vmem:[#allocation145_spill] sm:$0xff] %v5943_v52  ;;  %1562 = vmatpush.msrb.mxu0 %v5958_v54  ;;  %v5961_v52 = vld [vmem:[#allocation14 + $0xe8] sm:$0xff] }
 0x1b9   :  { %8535 = vst [vmem:[#allocation146_spill] sm:$0xff] %v5946_v22  ;;  %1582 = vmatpush.msrb.mxu1 %v5961_v52  ;;  %v5964_v22 = vld [vmem:[#allocation14 + $0xf0] sm:$0xff] }
 0x1ba   :  { %8536 = vst [vmem:[#allocation147_spill] sm:$0xff] %v5949_v25  ;;  %1602 = vmatpush.msra.mxu2 %v5964_v22  ;;  %v5967_v25 = vld [vmem:[#allocation14 + $0xf8] sm:$0xff] }
 0x1bb   :  { %8537 = vst [vmem:[#allocation148_spill] sm:$0xff] %v5952_v56  ;;  %1622 = vmatpush.msra.mxu3 %v5967_v25  ;;  %v5970_v56 = vld [vmem:[#allocation14 + $0xc0] sm:$0xff] }
 0x1bc   :  { %8538 = vst [vmem:[#allocation149_spill] sm:$0xff] %v5955_v50  ;;  %1563 = vmatpush.msrb.mxu0 %v5970_v56  ;;  %v5973_v50 = vld [vmem:[#allocation14 + $0xc8] sm:$0xff] }
 0x1bd   :  { %8539 = vst [vmem:[#allocation150_spill] sm:$0xff] %v5958_v54  ;;  %1583 = vmatpush.msrb.mxu1 %v5973_v50  ;;  %v5976_v54 = vld [vmem:[#allocation14 + $0xd0] sm:$0xff] }
 0x1be   :  { %8540 = vst [vmem:[#allocation151_spill] sm:$0xff] %v5961_v52  ;;  %1603 = vmatpush.msra.mxu2 %v5976_v54  ;;  %v5979_v52 = vld [vmem:[#allocation14 + $0xd8] sm:$0xff] }
 0x1bf   :  { %8541 = vst [vmem:[#allocation152_spill] sm:$0xff] %v5964_v22  ;;  %1623 = vmatpush.msra.mxu3 %v5979_v52  ;;  %v5982_v22 = vld [vmem:[#allocation14 + $0xa0] sm:$0xff] }
 0x1c0   :  { %8542 = vst [vmem:[#allocation153_spill] sm:$0xff] %v5967_v25  ;;  %1564 = vmatpush.msrb.mxu0 %v5982_v22  ;;  %v5985_v25 = vld [vmem:[#allocation14 + $0xa8] sm:$0xff] }
 0x1c1   :  { %8543 = vst [vmem:[#allocation154_spill] sm:$0xff] %v5970_v56  ;;  %1584 = vmatpush.msrb.mxu1 %v5985_v25  ;;  %v5988_v56 = vld [vmem:[#allocation14 + $0xb0] sm:$0xff] }
 0x1c2   :  { %8544 = vst [vmem:[#allocation155_spill] sm:$0xff] %v5973_v50  ;;  %1604 = vmatpush.msra.mxu2 %v5988_v56  ;;  %v5991_v50 = vld [vmem:[#allocation14 + $0xb8] sm:$0xff] }
 0x1c3   :  { %8545 = vst [vmem:[#allocation156_spill] sm:$0xff] %v5976_v54  ;;  %1624 = vmatpush.msra.mxu3 %v5991_v50  ;;  %v5994_v54 = vld [vmem:[#allocation14 + $0x80] sm:$0xff] }
 0x1c4   :  { %8546 = vst [vmem:[#allocation157_spill] sm:$0xff] %v5979_v52  ;;  %1565 = vmatpush.msrb.mxu0 %v5994_v54  ;;  %v5997_v52 = vld [vmem:[#allocation14 + $0x88] sm:$0xff] }
 0x1c5   :  { %8547 = vst [vmem:[#allocation158_spill] sm:$0xff] %v5982_v22  ;;  %1585 = vmatpush.msrb.mxu1 %v5997_v52  ;;  %v6000_v22 = vld [vmem:[#allocation14 + $0x90] sm:$0xff] }
 0x1c6   :  { %8548 = vst [vmem:[#allocation159_spill] sm:$0xff] %v5985_v25  ;;  %1605 = vmatpush.msra.mxu2 %v6000_v22  ;;  %v6003_v25 = vld [vmem:[#allocation14 + $0x98] sm:$0xff] }
 0x1c7   :  { %8549 = vst [vmem:[#allocation160_spill] sm:$0xff] %v5988_v56  ;;  %1625 = vmatpush.msra.mxu3 %v6003_v25  ;;  %v6006_v56 = vld [vmem:[#allocation14 + $0x60] sm:$0xff] }
 0x1c8   :  { %8550 = vst [vmem:[#allocation161_spill] sm:$0xff] %v5991_v50  ;;  %1566 = vmatpush.msrb.mxu0 %v6006_v56  ;;  %v6009_v50 = vld [vmem:[#allocation14 + $0x68] sm:$0xff] }
 0x1c9   :  { %8551 = vst [vmem:[#allocation162_spill] sm:$0xff] %v5994_v54  ;;  %1586 = vmatpush.msrb.mxu1 %v6009_v50  ;;  %v6012_v54 = vld [vmem:[#allocation14 + $0x70] sm:$0xff] }
 0x1ca   :  { %8552 = vst [vmem:[#allocation163_spill] sm:$0xff] %v5997_v52  ;;  %1606 = vmatpush.msra.mxu2 %v6012_v54  ;;  %v6015_v52 = vld [vmem:[#allocation14 + $0x78] sm:$0xff] }
 0x1cb   :  { %8553 = vst [vmem:[#allocation164_spill] sm:$0xff] %v6000_v22  ;;  %1626 = vmatpush.msra.mxu3 %v6015_v52  ;;  %v6018_v22 = vld [vmem:[#allocation14 + $0x40] sm:$0xff] }
 0x1cc   :  { %8554 = vst [vmem:[#allocation165_spill] sm:$0xff] %v6003_v25  ;;  %1567 = vmatpush.msrb.mxu0 %v6018_v22  ;;  %v6021_v25 = vld [vmem:[#allocation14 + $0x48] sm:$0xff] }
 0x1cd   :  { %8555 = vst [vmem:[#allocation166_spill] sm:$0xff] %v6006_v56  ;;  %1587 = vmatpush.msrb.mxu1 %v6021_v25  ;;  %v6024_v56 = vld [vmem:[#allocation14 + $0x50] sm:$0xff] }
 0x1ce   :  { %8556 = vst [vmem:[#allocation167_spill] sm:$0xff] %v6009_v50  ;;  %1607 = vmatpush.msra.mxu2 %v6024_v56  ;;  %v6027_v50 = vld [vmem:[#allocation14 + $0x58] sm:$0xff] }
 0x1cf   :  { %8557 = vst [vmem:[#allocation168_spill] sm:$0xff] %v6012_v54  ;;  %1627 = vmatpush.msra.mxu3 %v6027_v50  ;;  %v6030_v54 = vld [vmem:[#allocation14 + $0x20] sm:$0xff] }
 0x1d0   :  { %8558 = vst [vmem:[#allocation169_spill] sm:$0xff] %v6015_v52  ;;  %1568 = vmatpush.msrb.mxu0 %v6030_v54  ;;  %v6033_v52 = vld [vmem:[#allocation14 + $0x28] sm:$0xff] }
 0x1d1   :  { %8559 = vst [vmem:[#allocation170_spill] sm:$0xff] %v6018_v22  ;;  %1588 = vmatpush.msrb.mxu1 %v6033_v52  ;;  %v6036_v22 = vld [vmem:[#allocation14 + $0x30] sm:$0xff] }
 0x1d2   :  { %8560 = vst [vmem:[#allocation171_spill] sm:$0xff] %v6021_v25  ;;  %1608 = vmatpush.msra.mxu2 %v6036_v22  ;;  %v6039_v25 = vld [vmem:[#allocation14 + $0x38] sm:$0xff] }
 0x1d3   :  { %8561 = vst [vmem:[#allocation172_spill] sm:$0xff] %v6024_v56  ;;  %1628 = vmatpush.msra.mxu3 %v6039_v25  ;;  %v6042_v56 = vld [vmem:[#allocation14] sm:$0xff] }
 0x1d4   :  { %8562 = vst [vmem:[#allocation173_spill] sm:$0xff] %v6027_v50  ;;  %1569 = vmatpush.msrb.mxu0 %v6042_v56  ;;  %v6045_v50 = vld [vmem:[#allocation14 + $0x8] sm:$0xff] }
 0x1d5   :  { %8563 = vst [vmem:[#allocation174_spill] sm:$0xff] %v6030_v54  ;;  %1589 = vmatpush.msrb.mxu1 %v6045_v50  ;;  %v6048_v54 = vld [vmem:[#allocation14 + $0x10] sm:$0xff] }
 0x1d6   :  { %8564 = vst [vmem:[#allocation175_spill] sm:$0xff] %v6033_v52  ;;  %1609 = vmatpush.msra.mxu2 %v6048_v54  ;;  %v6051_v52 = vld [vmem:[#allocation14 + $0x18] sm:$0xff] }
 0x1d7   :  { %8565 = vst [vmem:[#allocation176_spill] sm:$0xff] %v6036_v22  ;;  %1629 = vmatpush.msra.mxu3 %v6051_v52  ;;  %v220_v22 = vadd.f32 %v5286_v20, %v5502_v8  ;;  %v490_v20 = vadd.f32 %v5476_v15, %v5517_v29 }
 0x1d8   :  { %8566 = vst [vmem:[#allocation177_spill] sm:$0xff] %v6039_v25  ;;  %v261_v25 = vadd.f32 %v5275_v44, %v5495_v4 }
 0x1d9   :  { %8567 = vst [vmem:[#allocation178_spill] sm:$0xff] %v6042_v56 }
 0x1da   :  { %8568 = vst [vmem:[#allocation179_spill] sm:$0xff] %v6045_v50 }
 0x1db   :  { %8569 = vst [vmem:[#allocation180_spill] sm:$0xff] %v6048_v54  ;;  %v343_v54 = vadd.f32 %v5344_v53, %v5546_v48 }
 0x1dc   :  { %8570 = vst [vmem:[#allocation181_spill] sm:$0xff] %v6051_v52  ;;  %v449_v52 = vadd.f32 %v5478_v34, %v5512_v31 }
 0x1ee   :  { %v1082_v17 = vpop.f32.mrf.mxu0  ;;  %v1102_v56 = vpop.f32.mrf.mxu1 }
 0x1ef   :  { %v1145_v37 = vadd.f32 %v1082_v17, %v220_v22  ;;  %v1146_v2 = vadd.f32 %v1102_v56, %v261_v25 }
 0x1f1   :  { %v3622_v23 = vmul.f32 -1.442695, %v1145_v37  ;;  %v3623_v50 = vmul.f32 -1.442695, %v1146_v2 }
 0x1f3   :  { %3738 = vpow2.f32 %v3622_v23 }
 0x1f4   :  { %3740 = vpow2.f32 %v3623_v50 }
 0x1f5   :  { %v1142_v6 = vpop.f32.mrf.mxu3  ;;  %v1122_v37 = vpop.f32.mrf.mxu2 }
 0x1f6   :  { %v1148_v45 = vadd.f32 %v1142_v6, %v343_v54  ;;  %v302_v54 = vadd.f32 %v5340_v19, %v5550_v1  ;;  %v6086_v1 = vpop.permute.xlu1 %1215 }
 0x1f7   :  { %8571 = vst [vmem:[#allocation182_spill] sm:$0xff] %v6086_v1  ;;  %vm1217_vm3 = vcmp.eq.s32.totalorder %v6086_v1, 1  ;;  %v6574_v1 = vld [vmem:[#allocation11 + $0x70] sm:$0xff] }
 0x1f8   :  { %v3624_v44 = vmul.f32 -1.442695, %v1148_v45  ;;  %v1245_v4 = vpop.f32.mrf.mxu0  ;;  %v1265_v8 = vpop.f32.mrf.mxu1  ;;  %v1147_v6 = vadd.f32 %v1122_v37, %v302_v54 }
 0x1f9   :  { %v3739_v22 = vpop.eup %3738  ;;  %v1308_v56 = vadd.f32 %v1245_v4, %v449_v52  ;;  %v1309_v25 = vadd.f32 %v1265_v8, %v490_v20 }
 0x1fa   :  { %v3741_v2 = vpop.eup %3740  ;;  %v1152_v23 = vadd.f32 1.0, %v3739_v22  ;;  %3742 = vpow2.f32 %v3624_v44 }
 0x1fb   :  { %v1171_v53 = vadd.f32 1.0, %v3741_v2  ;;  %v3629_v50 = vmul.f32 -1.442695, %v1308_v56  ;;  %v3630_v17 = vmul.f32 -1.442695, %v1309_v25  ;;  %v6073_v56 = vsel %vm894_vm11, %v5609_v28, 0.0 }
 0x1fc   :  { %3744 = vrcp.f32 %v1152_v23  ;;  %vm1158_vm5 = vweird.f32 %v1152_v23 }
 0x1fd   :  { %3746 = vrcp.f32 %v1171_v53  ;;  %vm1177_vm4 = vweird.f32 %v1171_v53 }
 0x1fe   :  { %3748 = vpow2.f32 %v3629_v50  ;;  %v1162_v50 = vand.u32 2147483647, %v1152_v23 }
 0x1ff   :  { %3750 = vpow2.f32 %v3630_v17  ;;  %v1305_v45 = vpop.f32.mrf.mxu3  ;;  %v1285_v25 = vpop.f32.mrf.mxu2  ;;  %v1164_v17 = vand.u32 2147483648, %v1152_v23 }
 0x200   :  { %v3743_v15 = vpop.eup %3742  ;;  %v1311_v52 = vadd.f32 %v1305_v45, %v5536_v41  ;;  %3752 = vtanh.f32 %v1147_v6  ;;  %v6078_v41 = vsel %vm1055_vm0, %v5630_v27, 0.0  ;;  %v1183_v45 = vand.u32 2147483648, %v1171_v53 }
 0x201   :  { %v6067_v34 = vadd.f32 1.0, %v3743_v15  ;;  %v1181_v15 = vand.u32 2147483647, %v1171_v53  ;;  %v1310_v27 = vadd.f32 %v1285_v25, %v5533_v36  ;;  %vm1163_vm6 = vcmp.eq.f32.partialorder %v1162_v50, 8.507059e+37 }
 0x202   :  { %v3745_v4 = vpop.eup %3744  ;;  %v3631_v8 = vmul.f32 -1.442695, %v1311_v52  ;;  %v1165_v36 = vor.u32 1.1754944e-38, %v1164_v17 }
 0x203   :  { %v3747_v20 = vpop.eup %3746  ;;  %v1154_v44 = vmul.f32 %v3745_v4, %v1152_v23  ;;  %3754 = vrcp.f32 %v6067_v34  ;;  %vm1159_vm1 = vweird.f32 %v3745_v4  ;;  %vm1182_vm9 = vcmp.eq.f32.partialorder %v1181_v15, 8.507059e+37 }
 0x204   :  { %v3749_v22 = vpop.eup %3748  ;;  %v1173_v19 = vmul.f32 %v3747_v20, %v1171_v53  ;;  %3756 = vpow2.f32 %v3631_v8  ;;  %vm1178_vm2 = vweird.f32 %v3747_v20  ;;  %vm1160_vm7 = vmor %vm1158_vm5, %vm1159_vm1  ;;  %vm1197_vm10 = vweird.f32 %v6067_v34 }
 0x205   :  { %v3751_v2 = vpop.eup %3750  ;;  %v1155_v37 = vsub.f32 1.0, %v1154_v44  ;;  %v6080_v54 = vadd.f32 1.0, %v3749_v22  ;;  %vm1179_vm8 = vmor %vm1177_vm4, %vm1178_vm2  ;;  %v1203_v17 = vand.u32 2147483648, %v6067_v34 }
 0x206   :  { %v1174_v6 = vsub.f32 1.0, %v1173_v19  ;;  %v6082_v52 = vadd.f32 1.0, %v3751_v2  ;;  %v3753_v8 = vpop.eup %3752  ;;  %v1184_v2 = vor.u32 1.1754944e-38, %v1183_v45 }
 0x207   :  { %v1156_v28 = vmul.f32 %v3745_v4, %v1155_v37  ;;  %3758 = vrcp.f32 %v6080_v54  ;;  %vm1321_vm1 = vweird.f32 %v6080_v54 }
 0x208   :  { %v1175_v29 = vmul.f32 %v3747_v20, %v1174_v6  ;;  %3760 = vrcp.f32 %v6082_v52  ;;  %vm1340_vm2 = vweird.f32 %v6082_v52 }
 0x209   :  { %v6090_v44 = vpop.eup %3754  ;;  %v1157_v22 = vadd.f32 %v3745_v4, %v1156_v28  ;;  %3762 = vtanh.f32 %v1310_v27  ;;  %v1201_v27 = vand.u32 2147483647, %v6067_v34 }
 0x20a   :  { %v3757_v19 = vpop.eup %3756  ;;  %v1176_v25 = vadd.f32 %v3747_v20, %v1175_v29  ;;  %v1193_v37 = vmul.f32 %v6090_v44, %v6067_v34  ;;  %vm1198_vm13 = vweird.f32 %v6090_v44 }
 0x20b   :  { %v1161_v6 = vsel %vm1160_vm7, %v3745_v4, %v1157_v22  ;;  %v6095_v31 = vadd.f32 1.0, %v3757_v19  ;;  %v1346_v22 = vand.u32 2147483648, %v6082_v52  ;;  %v1325_v19 = vand.u32 2147483647, %v6080_v54  ;;  %vm6130_vm4 = vmor %vm1197_vm10, %vm1198_vm13 }
 0x20c   :  { %v1166_v48 = vsel %vm1163_vm6, %v1165_v36, %v1161_v6  ;;  %v1180_v53 = vsel %vm1179_vm8, %v3747_v20, %v1176_v25  ;;  %v1194_v28 = vsub.f32 1.0, %v1193_v37  ;;  %v1344_v36 = vand.u32 2147483647, %v6082_v52  ;;  %v4122_v25 = vld [vmem:[%s7892_s1] sm:$0xff] }
 0x20d   :  { %v3759_v23 = vpop.eup %3758  ;;  %v1185_v50 = vsel %vm1182_vm9, %v1184_v2, %v1180_v53  ;;  %v1208_v45 = vmul.f32 %v3753_v8, %v1166_v48  ;;  %3764 = vrcp.f32 %v6095_v31  ;;  %v1327_v48 = vand.u32 2147483648, %v6080_v54 }
 0x20e   :  { %v3761_v29 = vpop.eup %3760  ;;  %v1207_v14 = vmul.f32 %v1185_v50, %v6073_v56  ;;  %v1195_v4 = vmul.f32 %v6090_v44, %v1194_v28  ;;  %v1317_v15 = vmul.f32 %v3759_v23, %v6080_v54  ;;  %vm1538_vm12 = vcmp.gt.s32.totalorder %v4122_v25, 2 }
 0x20f   :  { %v1336_v20 = vmul.f32 %v3761_v29, %v6082_v52  ;;  %v3763_v37 = vpop.eup %3762  ;;  %v1539_v28 = vsel %vm1538_vm12, 1, %v8462_v43  ;;  %vm1322_vm14 = vweird.f32 %v3759_v23  ;;  %vm1341_vm15 = vweird.f32 %v3761_v29 }
 0x210   :  { %v1209_v8 = vadd.f32 %v1208_v45, %v1207_v14  ;;  %v1318_v2 = vsub.f32 1.0, %v1317_v15  ;;  %v1196_v53 = vadd.f32 %v6090_v44, %v1195_v4  ;;  %1541 = vperm.xlu2 %3704, %v1539_v28   ;;  %v1204_v4 = vor.u32 1.1754944e-38, %v1203_v17  ;;  %vm1323_vm6 = vmor %vm1321_vm1, %vm1322_vm14 }
 0x211   :  { %v1337_v6 = vsub.f32 1.0, %v1336_v20  ;;  %vm1701_vm5 = vcmp.gt.s32.totalorder %v4122_v25, 5  ;;  %vm1326_vm7 = vcmp.eq.f32.partialorder %v1325_v19, 8.507059e+37  ;;  %vm1342_vm8 = vmor %vm1340_vm2, %vm1341_vm15  ;;  %v1347_v17 = vor.u32 1.1754944e-38, %v1346_v22 }
 0x212   :  { %3766 = vtanh.f32 %v1209_v8  ;;  %v1319_v50 = vmul.f32 %v3759_v23, %v1318_v2  ;;  %v6118_v14 = vsel %vm1217_vm3, %v1209_v8, %v6073_v56  ;;  %v1328_v8 = vor.u32 1.1754944e-38, %v1327_v48  ;;  %v6140_v56 = vpop.permute.xlu1 %1378 }
 0x213   :  { %8572 = vst [vmem:[#allocation183_spill] sm:$0xff] %v6118_v14  ;;  %v6120_v45 = vpop.eup %3764  ;;  %v1338_v15 = vmul.f32 %v3761_v29, %v1337_v6  ;;  %v1200_v52 = vsel %vm6130_vm4, %v6090_v44, %v1196_v53  ;;  %vm1345_vm9 = vcmp.eq.f32.partialorder %v1344_v36, 8.507059e+37  ;;  %vm1202_vm10 = vcmp.eq.f32.partialorder %v1201_v27, 8.507059e+37  ;;  %v8603_v53 = vld [vmem:[#allocation107_spill] sm:$0xff] }
 0x214   :  { %v1320_v20 = vadd.f32 %v3759_v23, %v1319_v50  ;;  %v1356_v2 = vmul.f32 %v6120_v45, %v6095_v31  ;;  %v1702_v14 = vsel %vm1701_vm5, 1, %v8462_v43  ;;  %v1205_v48 = vsel %vm1202_vm10, %v1204_v4, %v1200_v52  ;;  %8575 = vst [vmem:[#allocation184_spill] sm:$0xff] %v6140_v56  ;;  %v8606_v4 = vld [vmem:[#allocation110_spill] sm:$0xff]  ;;  %v8611_v52 = vld [vmem:[#allocation115_spill] sm:$0xff] }
 0x215   :  { %v1339_v54 = vadd.f32 %v3761_v29, %v1338_v15  ;;  %vm1380_vm12 = vcmp.eq.s32.totalorder %v6140_v56, 1  ;;  %vm1361_vm13 = vweird.f32 %v6120_v45  ;;  %v1366_v27 = vand.u32 2147483648, %v6095_v31  ;;  %v6577_v56 = vld [vmem:[#allocation11 + $0x78] sm:$0xff] }
 0x216   :  { %v1324_v6 = vsel %vm1323_vm6, %v3759_v23, %v1320_v20  ;;  %v1357_v28 = vsub.f32 1.0, %v1356_v2  ;;  %v895_v23 = vsel %vm894_vm11, %v5633_v32, 0.0  ;;  %vm1360_vm14 = vweird.f32 %v6095_v31  ;;  %v8607_v20 = vld [vmem:[#allocation111_spill] sm:$0xff]  ;;  %v8608_v2 = vld [vmem:[#allocation112_spill] sm:$0xff]  ;;  %v6571_v32 = vld [vmem:[#allocation11 + $0x68] sm:$0xff] }
 0x217   :  { %v1329_v50 = vsel %vm1326_vm7, %v1328_v8, %v1324_v6  ;;  %v1343_v34 = vsel %vm1342_vm8, %v3761_v29, %v1339_v54  ;;  %v1364_v22 = vand.u32 2147483647, %v6095_v31  ;;  %vm1362_vm15 = vmor %vm1360_vm14, %vm1361_vm13  ;;  %v1367_v36 = vor.u32 1.1754944e-38, %v1366_v27  ;;  %v8609_v8 = vld [vmem:[#allocation113_spill] sm:$0xff]  ;;  %v8610_v54 = vld [vmem:[#allocation114_spill] sm:$0xff] }
 0x218   :  { %v3767_v33 = vpop.eup %3766  ;;  %v1348_v25 = vsel %vm1345_vm9, %v1347_v17, %v1343_v34  ;;  %v1371_v62 = vmul.f32 %v3763_v37, %v1329_v50  ;;  %v1358_v19 = vmul.f32 %v6120_v45, %v1357_v28  ;;  %1704 = vperm.xlu2 %3704, %v1702_v14   ;;  %v8602_v37 = vld [vmem:[#allocation106_spill] sm:$0xff]  ;;  %v8604_v14 = vld [vmem:[#allocation108_spill] sm:$0xff]  ;;  %v8613_v6 = vld [vmem:[#allocation117_spill] sm:$0xff] }
 0x219   :  { %v1370_v15 = vmul.f32 %v1348_v25, %v6078_v41  ;;  %v6142_v44 = vmul.f32 %v3767_v33, %v1205_v48  ;;  %vm1365_vm1 = vcmp.eq.f32.partialorder %v1364_v22, 8.507059e+37  ;;  %v8612_v17 = vld [vmem:[#allocation116_spill] sm:$0xff]  ;;  %v8614_v28 = vld [vmem:[#allocation118_spill] sm:$0xff]  ;;  %v8615_v50 = vld [vmem:[#allocation119_spill] sm:$0xff] }
 0x21a   :  { %v1359_v33 = vadd.f32 %v6120_v45, %v1358_v19  ;;  %v8616_v34 = vld [vmem:[#allocation120_spill] sm:$0xff]  ;;  %v8617_v25 = vld [vmem:[#allocation121_spill] sm:$0xff]  ;;  %v8618_v19 = vld [vmem:[#allocation122_spill] sm:$0xff] }
 0x21b   :  { %8576 = vst [vmem:[#allocation185_spill] sm:$0xff] %v6142_v44  ;;  %v1372_v43 = vadd.f32 %v1371_v62, %v1370_v15  ;;  %v6151_v29 = vsel %vm1217_vm3, %v6142_v44, %v895_v23  ;;  %v8619_v48 = vld [vmem:[#allocation123_spill] sm:$0xff]  ;;  %v8620_v15 = vld [vmem:[#allocation124_spill] sm:$0xff]  ;;  %v8621_v23 = vld [vmem:[#allocation125_spill] sm:$0xff] }
 0x21c   :  { %1407 = vmatmul.f32.vlgmr.msra.gmra.mxu0 %v6151_v29  ;;  %1427 = vmatmul.f32.vlgmr.msra.gmra.mxu1 %v6151_v29  ;;  %v8624_v27 = vld [vmem:[#allocation128_spill] sm:$0xff]  ;;  %v8625_v22 = vld [vmem:[#allocation129_spill] sm:$0xff]  ;;  %v6565_v44 = vld [vmem:[#allocation11 + $0x98] sm:$0xff] }
 0x21d   :  { %3768 = vtanh.f32 %v1372_v43  ;;  %v6161_v62 = vsel %vm1380_vm12, %v1372_v43, %v6078_v41  ;;  %1447 = vmatmul.f32.vlgmr.msrb.gmra.mxu2 %v6151_v29  ;;  %1467 = vmatmul.f32.vlgmr.msrb.gmra.mxu3 %v6151_v29  ;;  %v1363_v41 = vsel %vm1362_vm15, %v6120_v45, %v1359_v33  ;;  %v8605_v45 = vld [vmem:[#allocation109_spill] sm:$0xff]  ;;  %v8622_v43 = vld [vmem:[#allocation126_spill] sm:$0xff]  ;;  %v8623_v33 = vld [vmem:[#allocation127_spill] sm:$0xff] }
 0x21e   :  { %1717 = vmatpush.msra.mxu0 %v5651_v57  ;;  %1737 = vmatpush.msra.mxu1 %v5654_v30  ;;  %v1368_v57 = vsel %vm1365_vm1, %v1367_v36, %v1363_v41  ;;  %v8626_v41 = vld [vmem:[#allocation130_spill] sm:$0xff]  ;;  %v8627_v36 = vld [vmem:[#allocation131_spill] sm:$0xff] }
 0x21f   :  { %1757 = vmatpush.msrb.mxu2 %v5657_v55  ;;  %1777 = vmatpush.msrb.mxu3 %v5660_v35  ;;  %v1056_v55 = vsel %vm1055_vm0, %v5691_v9, 0.0  ;;  %v6550_v9 = vld [vmem:[#allocation11 + $0xb0] sm:$0xff] }
 0x220   :  { %1718 = vmatpush.msra.mxu0 %v5664_v42  ;;  %1738 = vmatpush.msra.mxu1 %v5667_v51  ;;  %v8578_v42 = vld [vmem:[#allocation71_spill] sm:$0xff]  ;;  %v8579_v51 = vld [vmem:[#allocation72_spill] sm:$0xff] }
 0x221   :  { %1758 = vmatpush.msrb.mxu2 %v5671_v0  ;;  %1778 = vmatpush.msrb.mxu3 %v5674_v3  ;;  %v8580_v0 = vld [vmem:[#allocation73_spill] sm:$0xff]  ;;  %v8581_v3 = vld [vmem:[#allocation74_spill] sm:$0xff] }
 0x222   :  { %1719 = vmatpush.msra.mxu0 %v5679_v26  ;;  %1739 = vmatpush.msra.mxu1 %v5682_v38  ;;  %v8582_v26 = vld [vmem:[#allocation77_spill] sm:$0xff]  ;;  %v8583_v38 = vld [vmem:[#allocation87_spill] sm:$0xff] }
 0x223   :  { %v3769_v31 = vpop.eup %3768  ;;  %1759 = vmatpush.msrb.mxu2 %v5685_v18  ;;  %1779 = vmatpush.msrb.mxu3 %v5688_v21  ;;  %v8584_v18 = vld [vmem:[#allocation88_spill] sm:$0xff]  ;;  %v8589_v21 = vld [vmem:[#allocation93_spill] sm:$0xff] }
 0x224   :  { %v6180_v30 = vmul.f32 %v3769_v31, %v1368_v57  ;;  %1720 = vmatpush.msra.mxu0 %v5693_v24  ;;  %1740 = vmatpush.msra.mxu1 %v5696_v47  ;;  %v8590_v24 = vld [vmem:[#allocation94_spill] sm:$0xff]  ;;  %v8591_v47 = vld [vmem:[#allocation95_spill] sm:$0xff]  ;;  %v8628_v31 = vld [vmem:[#allocation132_spill] sm:$0xff]  ;;  %8708 = vst [vmem:[#allocation93_spill] sm:$0xff] %v6550_v9 }
 0x225   :  { %1760 = vmatpush.msrb.mxu2 %v5700_v10  ;;  %1780 = vmatpush.msrb.mxu3 %v5703_v39  ;;  %v8592_v10 = vld [vmem:[#allocation96_spill] sm:$0xff]  ;;  %v8593_v39 = vld [vmem:[#allocation97_spill] sm:$0xff] }
 0x226   :  { %8577 = vst [vmem:[#allocation186_spill] sm:$0xff] %v6180_v30  ;;  %v6192_v35 = vsel %vm1380_vm12, %v6180_v30, %v1056_v55  ;;  %1721 = vmatpush.msra.mxu0 %v5718_v11  ;;  %1741 = vmatpush.msra.mxu1 %v5721_v12  ;;  %v8594_v11 = vld [vmem:[#allocation98_spill] sm:$0xff]  ;;  %v8595_v12 = vld [vmem:[#allocation99_spill] sm:$0xff]  ;;  %v8629_v57 = vld [vmem:[#allocation133_spill] sm:$0xff] }
 0x227   :  { %1570 = vmatmul.f32.vlgmr.msrb.gmra.mxu0 %v6192_v35  ;;  %1590 = vmatmul.f32.vlgmr.msrb.gmra.mxu1 %v6192_v35  ;;  %v8630_v55 = vld [vmem:[#allocation134_spill] sm:$0xff]  ;;  %v6553_v30 = vld [vmem:[#allocation11 + $0xb8] sm:$0xff]  ;;  %8711 = vst [vmem:[#allocation96_spill] sm:$0xff] %v6559_v5 }
 0x228   :  { %1610 = vmatmul.f32.vlgmr.msra.gmra.mxu2 %v6192_v35  ;;  %1630 = vmatmul.f32.vlgmr.msra.gmra.mxu3 %v6192_v35  ;;  %8709 = vst [vmem:[#allocation94_spill] sm:$0xff] %v6553_v30 }
 0x229   :  { %1761 = vmatpush.msrb.mxu2 %v5724_v58  ;;  %1781 = vmatpush.msrb.mxu3 %v5727_v46  ;;  %v8596_v58 = vld [vmem:[#allocation100_spill] sm:$0xff]  ;;  %v8597_v46 = vld [vmem:[#allocation101_spill] sm:$0xff]  ;;  %8713 = vst [vmem:[#allocation98_spill] sm:$0xff] %v6565_v44 }
 0x22a   :  { %1722 = vmatpush.msra.mxu0 %v5730_v13  ;;  %1742 = vmatpush.msra.mxu1 %v5733_v16  ;;  %v8598_v13 = vld [vmem:[#allocation102_spill] sm:$0xff]  ;;  %v8599_v16 = vld [vmem:[#allocation103_spill] sm:$0xff]  ;;  %8714 = vst [vmem:[#allocation99_spill] sm:$0xff] %v6568_v49 }
 0x22b   :  { %1762 = vmatpush.msrb.mxu2 %v5736_v61  ;;  %1782 = vmatpush.msrb.mxu3 %v5739_v40  ;;  %v8600_v61 = vld [vmem:[#allocation104_spill] sm:$0xff]  ;;  %v8601_v40 = vld [vmem:[#allocation105_spill] sm:$0xff]  ;;  %8715 = vst [vmem:[#allocation100_spill] sm:$0xff] %v6571_v32 }
 0x22c   :  { %1723 = vmatpush.msra.mxu0 %v5742_v59  ;;  %1743 = vmatpush.msra.mxu1 %v5745_v60  ;;  %v8585_v59 = vld [vmem:[#allocation89_spill] sm:$0xff]  ;;  %v8586_v60 = vld [vmem:[#allocation90_spill] sm:$0xff]  ;;  %8716 = vst [vmem:[#allocation101_spill] sm:$0xff] %v6574_v1 }
 0x22d   :  { %1763 = vmatpush.msrb.mxu2 %v5748_v63  ;;  %1783 = vmatpush.msrb.mxu3 %v5751_v7  ;;  %v8587_v63 = vld [vmem:[#allocation91_spill] sm:$0xff]  ;;  %v8588_v7 = vld [vmem:[#allocation92_spill] sm:$0xff]  ;;  %8717 = vst [vmem:[#allocation102_spill] sm:$0xff] %v6577_v56 }
 0x22e   :  { %1724 = vmatpush.msra.mxu0 %v8578_v42  ;;  %1744 = vmatpush.msra.mxu1 %v8579_v51  ;;  %v8631_v42 = vld [vmem:[#allocation135_spill] sm:$0xff]  ;;  %v8632_v51 = vld [vmem:[#allocation136_spill] sm:$0xff] }
 0x22f   :  { %1764 = vmatpush.msrb.mxu2 %v8580_v0  ;;  %1784 = vmatpush.msrb.mxu3 %v8581_v3  ;;  %v8633_v0 = vld [vmem:[#allocation137_spill] sm:$0xff]  ;;  %v8634_v3 = vld [vmem:[#allocation138_spill] sm:$0xff] }
 0x230   :  { %1725 = vmatpush.msra.mxu0 %v8582_v26  ;;  %1745 = vmatpush.msra.mxu1 %v8583_v38  ;;  %v8635_v26 = vld [vmem:[#allocation139_spill] sm:$0xff]  ;;  %v8636_v38 = vld [vmem:[#allocation140_spill] sm:$0xff] }
 0x231   :  { %1765 = vmatpush.msrb.mxu2 %v8584_v18  ;;  %1785 = vmatpush.msrb.mxu3 %v8585_v59  ;;  %v8637_v18 = vld [vmem:[#allocation141_spill] sm:$0xff]  ;;  %v8638_v59 = vld [vmem:[#allocation142_spill] sm:$0xff] }
 0x232   :  { %1726 = vmatpush.msra.mxu0 %v8586_v60  ;;  %1746 = vmatpush.msra.mxu1 %v8587_v63  ;;  %v8639_v60 = vld [vmem:[#allocation143_spill] sm:$0xff]  ;;  %v8640_v63 = vld [vmem:[#allocation144_spill] sm:$0xff] }
 0x233   :  { %1766 = vmatpush.msrb.mxu2 %v8588_v7  ;;  %1786 = vmatpush.msrb.mxu3 %v8589_v21  ;;  %v8641_v7 = vld [vmem:[#allocation145_spill] sm:$0xff]  ;;  %v8642_v21 = vld [vmem:[#allocation146_spill] sm:$0xff] }
 0x234   :  { %1727 = vmatpush.msra.mxu0 %v8590_v24  ;;  %1747 = vmatpush.msra.mxu1 %v8591_v47  ;;  %v8643_v24 = vld [vmem:[#allocation147_spill] sm:$0xff]  ;;  %v8644_v47 = vld [vmem:[#allocation148_spill] sm:$0xff] }
 0x235   :  { %1767 = vmatpush.msrb.mxu2 %v8592_v10  ;;  %1787 = vmatpush.msrb.mxu3 %v8593_v39  ;;  %v8645_v10 = vld [vmem:[#allocation149_spill] sm:$0xff]  ;;  %v8646_v39 = vld [vmem:[#allocation150_spill] sm:$0xff] }
 0x236   :  { %1728 = vmatpush.msra.mxu0 %v8594_v11  ;;  %1748 = vmatpush.msra.mxu1 %v8595_v12  ;;  %v8647_v11 = vld [vmem:[#allocation151_spill] sm:$0xff]  ;;  %v8648_v12 = vld [vmem:[#allocation152_spill] sm:$0xff] }
 0x237   :  { %1768 = vmatpush.msrb.mxu2 %v8596_v58  ;;  %1788 = vmatpush.msrb.mxu3 %v8597_v46  ;;  %v8649_v58 = vld [vmem:[#allocation153_spill] sm:$0xff]  ;;  %v8650_v46 = vld [vmem:[#allocation154_spill] sm:$0xff] }
 0x238   :  { %1729 = vmatpush.msra.mxu0 %v8598_v13  ;;  %1749 = vmatpush.msra.mxu1 %v8599_v16  ;;  %v8651_v13 = vld [vmem:[#allocation155_spill] sm:$0xff]  ;;  %v8652_v16 = vld [vmem:[#allocation156_spill] sm:$0xff] }
 0x239   :  { %1769 = vmatpush.msrb.mxu2 %v8600_v61  ;;  %1789 = vmatpush.msrb.mxu3 %v8601_v40  ;;  %v8653_v61 = vld [vmem:[#allocation157_spill] sm:$0xff]  ;;  %v8654_v40 = vld [vmem:[#allocation158_spill] sm:$0xff] }
 0x23a   :  { %1730 = vmatpush.msra.mxu0 %v8602_v37  ;;  %1750 = vmatpush.msra.mxu1 %v8603_v53  ;;  %v8655_v37 = vld [vmem:[#allocation159_spill] sm:$0xff]  ;;  %v8656_v53 = vld [vmem:[#allocation160_spill] sm:$0xff] }
 0x23b   :  { %1770 = vmatpush.msrb.mxu2 %v8604_v14  ;;  %1790 = vmatpush.msrb.mxu3 %v8605_v45  ;;  %v8657_v14 = vld [vmem:[#allocation161_spill] sm:$0xff]  ;;  %v8658_v45 = vld [vmem:[#allocation162_spill] sm:$0xff] }
 0x23c   :  { %1731 = vmatpush.msra.mxu0 %v8606_v4  ;;  %1751 = vmatpush.msra.mxu1 %v8607_v20  ;;  %v8659_v4 = vld [vmem:[#allocation163_spill] sm:$0xff]  ;;  %v8660_v20 = vld [vmem:[#allocation164_spill] sm:$0xff] }
 0x23d   :  { %1771 = vmatpush.msrb.mxu2 %v8608_v2  ;;  %1791 = vmatpush.msrb.mxu3 %v8609_v8  ;;  %v8661_v2 = vld [vmem:[#allocation165_spill] sm:$0xff]  ;;  %v8662_v8 = vld [vmem:[#allocation166_spill] sm:$0xff] }
 0x23e   :  { %1732 = vmatpush.msra.mxu0 %v8610_v54  ;;  %1752 = vmatpush.msra.mxu1 %v8611_v52  ;;  %v8663_v54 = vld [vmem:[#allocation167_spill] sm:$0xff]  ;;  %v8664_v52 = vld [vmem:[#allocation168_spill] sm:$0xff] }
 0x23f   :  { %1772 = vmatpush.msrb.mxu2 %v8612_v17  ;;  %1792 = vmatpush.msrb.mxu3 %v8613_v6  ;;  %v8665_v17 = vld [vmem:[#allocation169_spill] sm:$0xff]  ;;  %v8666_v6 = vld [vmem:[#allocation170_spill] sm:$0xff] }
 0x240   :  { %1880 = vmatpush.msrb.mxu0 %v8614_v28  ;;  %1900 = vmatpush.msrb.mxu1 %v8615_v50  ;;  %v8667_v28 = vld [vmem:[#allocation171_spill] sm:$0xff]  ;;  %v8668_v50 = vld [vmem:[#allocation172_spill] sm:$0xff] }
 0x241   :  { %1920 = vmatpush.msra.mxu2 %v8616_v34  ;;  %1940 = vmatpush.msra.mxu3 %v8617_v25  ;;  %v8669_v34 = vld [vmem:[#allocation173_spill] sm:$0xff]  ;;  %v8670_v25 = vld [vmem:[#allocation174_spill] sm:$0xff] }
 0x242   :  { %1881 = vmatpush.msrb.mxu0 %v8618_v19  ;;  %1901 = vmatpush.msrb.mxu1 %v8619_v48  ;;  %v8671_v19 = vld [vmem:[#allocation175_spill] sm:$0xff]  ;;  %v8672_v48 = vld [vmem:[#allocation176_spill] sm:$0xff] }
 0x243   :  { %1921 = vmatpush.msra.mxu2 %v8620_v15  ;;  %1941 = vmatpush.msra.mxu3 %v8621_v23  ;;  %v8673_v15 = vld [vmem:[#allocation177_spill] sm:$0xff]  ;;  %v8674_v23 = vld [vmem:[#allocation178_spill] sm:$0xff] }
 0x244   :  { %1882 = vmatpush.msrb.mxu0 %v8622_v43  ;;  %1902 = vmatpush.msrb.mxu1 %v8623_v33  ;;  %v8675_v43 = vld [vmem:[#allocation179_spill] sm:$0xff]  ;;  %v8676_v33 = vld [vmem:[#allocation180_spill] sm:$0xff] }
 0x245   :  { %1922 = vmatpush.msra.mxu2 %v8624_v27  ;;  %1942 = vmatpush.msra.mxu3 %v8625_v22  ;;  %v8677_v27 = vld [vmem:[#allocation181_spill] sm:$0xff] }
 0x246   :  { %1883 = vmatpush.msrb.mxu0 %v8626_v41  ;;  %1903 = vmatpush.msrb.mxu1 %v8627_v36  ;;  %v8678_v22 = vld [vmem:[#allocation61_spill] sm:$0xff]  ;;  %v8679_v41 = vld [vmem:[#allocation26_spill] sm:$0xff] }
 0x247   :  { %1923 = vmatpush.msra.mxu2 %v8628_v31  ;;  %1943 = vmatpush.msra.mxu3 %v8629_v57  ;;  %v223_v36 = vadd.f32 %v8679_v41, %v8678_v22  ;;  %v8680_v31 = vld [vmem:[#allocation58_spill] sm:$0xff] }
 0x248   :  { %1884 = vmatpush.msrb.mxu0 %v8630_v55  ;;  %1904 = vmatpush.msrb.mxu1 %v8631_v42  ;;  %v8681_v57 = vld [vmem:[#allocation86_spill] sm:$0xff] }
 0x249   :  { %1924 = vmatpush.msra.mxu2 %v8632_v51  ;;  %1944 = vmatpush.msra.mxu3 %v8633_v0  ;;  %v264_v55 = vadd.f32 %v8681_v57, %v8680_v31 }
 0x24a   :  { %1885 = vmatpush.msrb.mxu0 %v8634_v3  ;;  %1905 = vmatpush.msrb.mxu1 %v8635_v26 }
 0x24b   :  { %1925 = vmatpush.msra.mxu2 %v8636_v38  ;;  %1945 = vmatpush.msra.mxu3 %v8637_v18  ;;  %v8682_v18 = vld [vmem:[#allocation64_spill] sm:$0xff] }
 0x24c   :  { %1886 = vmatpush.msrb.mxu0 %v8638_v59  ;;  %1906 = vmatpush.msrb.mxu1 %v8639_v60  ;;  %v8683_v59 = vld [vmem:[#allocation36_spill] sm:$0xff] }
 0x24d   :  { %1926 = vmatpush.msra.mxu2 %v8640_v63  ;;  %1946 = vmatpush.msra.mxu3 %v8641_v7  ;;  %v346_v60 = vadd.f32 %v8683_v59, %v8682_v18 }
 0x24e   :  { %1887 = vmatpush.msrb.mxu0 %v8642_v21  ;;  %1907 = vmatpush.msrb.mxu1 %v8643_v24  ;;  %v8684_v21 = vld [vmem:[#allocation55_spill] sm:$0xff]  ;;  %v8685_v24 = vld [vmem:[#allocation45_spill] sm:$0xff] }
 0x24f   :  { %1927 = vmatpush.msra.mxu2 %v8644_v47  ;;  %1947 = vmatpush.msra.mxu3 %v8645_v10  ;;  %v446_v47 = vadd.f32 %v8685_v24, %v8684_v21  ;;  %v8686_v10 = vld [vmem:[#allocation65_spill] sm:$0xff] }
 0x250   :  { %1888 = vmatpush.msrb.mxu0 %v8646_v39  ;;  %1908 = vmatpush.msrb.mxu1 %v8647_v11  ;;  %v8687_v39 = vld [vmem:[#allocation40_spill] sm:$0xff] }
 0x251   :  { %1928 = vmatpush.msra.mxu2 %v8648_v12  ;;  %1948 = vmatpush.msra.mxu3 %v8649_v58  ;;  %v487_v11 = vadd.f32 %v8687_v39, %v8686_v10 }
 0x252   :  { %1889 = vmatpush.msrb.mxu0 %v8650_v46  ;;  %1909 = vmatpush.msrb.mxu1 %v8651_v13 }
 0x253   :  { %1929 = vmatpush.msra.mxu2 %v8652_v16  ;;  %1949 = vmatpush.msra.mxu3 %v8653_v61 }
 0x254   :  { %1890 = vmatpush.msrb.mxu0 %v8654_v40  ;;  %1910 = vmatpush.msrb.mxu1 %v8655_v37 }
 0x255   :  { %1930 = vmatpush.msra.mxu2 %v8656_v53  ;;  %1950 = vmatpush.msra.mxu3 %v8657_v14 }
 0x256   :  { %1891 = vmatpush.msrb.mxu0 %v8658_v45  ;;  %1911 = vmatpush.msrb.mxu1 %v8659_v4 }
 0x257   :  { %1931 = vmatpush.msra.mxu2 %v8660_v20  ;;  %1951 = vmatpush.msra.mxu3 %v8661_v2  ;;  %v8688_v20 = vld [vmem:[#allocation66_spill] sm:$0xff]  ;;  %v8689_v2 = vld [vmem:[#allocation35_spill] sm:$0xff] }
 0x258   :  { %1892 = vmatpush.msrb.mxu0 %v8662_v8  ;;  %1912 = vmatpush.msrb.mxu1 %v8663_v54  ;;  %v305_v8 = vadd.f32 %v8689_v2, %v8688_v20 }
 0x259   :  { %1932 = vmatpush.msra.mxu2 %v8664_v52  ;;  %1952 = vmatpush.msra.mxu3 %v8665_v17 }
 0x25a   :  { %1893 = vmatpush.msrb.mxu0 %v8666_v6  ;;  %1913 = vmatpush.msrb.mxu1 %v8667_v28  ;;  %v8690_v28 = vld [vmem:[#allocation63_spill] sm:$0xff] }
 0x25b   :  { %1933 = vmatpush.msra.mxu2 %v8668_v50  ;;  %1953 = vmatpush.msra.mxu3 %v8669_v34 }
 0x25c   :  { %1894 = vmatpush.msrb.mxu0 %v8670_v25  ;;  %1914 = vmatpush.msrb.mxu1 %v8671_v19 }
 0x25d   :  { %1934 = vmatpush.msra.mxu2 %v8672_v48  ;;  %1954 = vmatpush.msra.mxu3 %v8673_v15 }
 0x25e   :  { %1895 = vmatpush.msrb.mxu0 %v8674_v23  ;;  %1915 = vmatpush.msrb.mxu1 %v8675_v43 }
 0x25f   :  { %1935 = vmatpush.msra.mxu2 %v8676_v33  ;;  %1955 = vmatpush.msra.mxu3 %v8677_v27 }
 0x299   :  { %v1408_v42 = vpop.f32.mrf.mxu0  ;;  %v1428_v51 = vpop.f32.mrf.mxu1 }
 0x29a   :  { %v1471_v0 = vadd.f32 %v1408_v42, %v223_v36  ;;  %v1472_v3 = vadd.f32 %v1428_v51, %v264_v55 }
 0x29c   :  { %v3632_v26 = vmul.f32 -1.442695, %v1471_v0  ;;  %v3633_v38 = vmul.f32 -1.442695, %v1472_v3 }
 0x29e   :  { %3770 = vpow2.f32 %v3632_v26 }
 0x29f   :  { %3772 = vpow2.f32 %v3633_v38 }
 0x2a0   :  { %v1468_v63 = vpop.f32.mrf.mxu3  ;;  %v1448_v14 = vpop.f32.mrf.mxu2 }
 0x2a1   :  { %v1474_v7 = vadd.f32 %v1468_v63, %v346_v60  ;;  %v1473_v17 = vadd.f32 %v1448_v14, %v305_v8 }
 0x2a3   :  { %v3634_v12 = vmul.f32 -1.442695, %v1474_v7 }
 0x2a4   :  { %v3771_v58 = vpop.eup %3770  ;;  %v1571_v46 = vpop.f32.mrf.mxu0 }
 0x2a5   :  { %v1591_v13 = vpop.f32.mrf.mxu1  ;;  %v3773_v16 = vpop.eup %3772  ;;  %v1478_v61 = vadd.f32 1.0, %v3771_v58  ;;  %3774 = vpow2.f32 %v3634_v12  ;;  %v1634_v40 = vadd.f32 %v1571_v46, %v446_v47 }
 0x2a6   :  { %v1635_v37 = vadd.f32 %v1591_v13, %v487_v11  ;;  %v1497_v53 = vadd.f32 1.0, %v3773_v16  ;;  %v6336_v46 = vpop.permute.xlu2 %1541 }
 0x2a7   :  { %3776 = vrcp.f32 %v1478_v61  ;;  %v3635_v45 = vmul.f32 -1.442695, %v1634_v40  ;;  %v1488_v41 = vand.u32 2147483647, %v1478_v61  ;;  %v1490_v36 = vand.u32 2147483648, %v1478_v61  ;;  %8691 = vst [vmem:[#allocation71_spill] sm:$0xff] %v6336_v46 }
 0x2a8   :  { %3778 = vrcp.f32 %v1497_v53  ;;  %v3636_v4 = vmul.f32 -1.442695, %v1635_v37  ;;  %v1509_v27 = vand.u32 2147483648, %v1497_v53  ;;  %v1507_v0 = vand.u32 2147483647, %v1497_v53  ;;  %v8692_v40 = vld [vmem:[#allocation183_spill] sm:$0xff] }
 0x2a9   :  { %3780 = vpow2.f32 %v3635_v45  ;;  %vm1503_vm5 = vweird.f32 %v1497_v53  ;;  %vm1484_vm6 = vweird.f32 %v1478_v61  ;;  %v1491_v59 = vor.u32 1.1754944e-38, %v1490_v36 }
 0x2aa   :  { %3782 = vpow2.f32 %v3636_v4  ;;  %v1510_v24 = vor.u32 1.1754944e-38, %v1509_v27  ;;  %vm1489_vm9 = vcmp.eq.f32.partialorder %v1488_v41, 8.507059e+37  ;;  %vm1508_vm10 = vcmp.eq.f32.partialorder %v1507_v0, 8.507059e+37  ;;  %v8693_v4 = vld [vmem:[#allocation59_spill] sm:$0xff] }
 0x2ab   :  { %v3775_v54 = vpop.eup %3774  ;;  %v1631_v52 = vpop.f32.mrf.mxu3  ;;  %vm1543_vm13 = vcmp.eq.s32.totalorder %v6336_v46, 1  ;;  %v6580_v46 = vld [vmem:[#allocation11 + $0x40] sm:$0xff] }
 0x2ac   :  { %v6322_v6 = vadd.f32 1.0, %v3775_v54  ;;  %v1637_v50 = vadd.f32 %v1631_v52, %v8690_v28  ;;  %v1611_v58 = vpop.f32.mrf.mxu2  ;;  %8718 = vst [vmem:[#allocation103_spill] sm:$0xff] %v6580_v46 }
 0x2ad   :  { %v3777_v34 = vpop.eup %3776  ;;  %v1636_v2 = vadd.f32 %v1611_v58, %v8693_v4 }
 0x2ae   :  { %v3779_v25 = vpop.eup %3778  ;;  %v1480_v19 = vmul.f32 %v3777_v34, %v1478_v61  ;;  %3784 = vrcp.f32 %v6322_v6  ;;  %v3637_v23 = vmul.f32 -1.442695, %v1637_v50  ;;  %vm1485_vm2 = vweird.f32 %v3777_v34 }
 0x2af   :  { %v1499_v48 = vmul.f32 %v3779_v25, %v1497_v53  ;;  %3786 = vtanh.f32 %v1473_v17  ;;  %v3781_v43 = vpop.eup %3780  ;;  %vm1504_vm4 = vweird.f32 %v3779_v25  ;;  %vm1486_vm7 = vmor %vm1484_vm6, %vm1485_vm2  ;;  %vm1523_vm14 = vweird.f32 %v6322_v6 }
 0x2b0   :  { %v1481_v15 = vsub.f32 1.0, %v1480_v19  ;;  %v3783_v57 = vpop.eup %3782  ;;  %v6326_v42 = vadd.f32 1.0, %v3781_v43  ;;  %3788 = vpow2.f32 %v3637_v23  ;;  %vm1505_vm8 = vmor %vm1503_vm5, %vm1504_vm4  ;;  %v1529_v17 = vand.u32 2147483648, %v6322_v6 }
 0x2b1   :  { %v1500_v33 = vsub.f32 1.0, %v1499_v48  ;;  %v6328_v3 = vadd.f32 1.0, %v3783_v57  ;;  %v1527_v50 = vand.u32 2147483647, %v6322_v6 }
 0x2b2   :  { %v1482_v55 = vmul.f32 %v3777_v34, %v1481_v15  ;;  %3790 = vrcp.f32 %v6326_v42  ;;  %v1651_v15 = vand.u32 2147483647, %v6326_v42  ;;  %v1653_v23 = vand.u32 2147483648, %v6326_v42 }
 0x2b3   :  { %v1501_v51 = vmul.f32 %v3779_v25, %v1500_v33  ;;  %3792 = vrcp.f32 %v6328_v3  ;;  %v1672_v43 = vand.u32 2147483648, %v6328_v3  ;;  %v1670_v27 = vand.u32 2147483647, %v6328_v3 }
 0x2b4   :  { %v6330_v26 = vpop.eup %3784  ;;  %v1483_v38 = vadd.f32 %v3777_v34, %v1482_v55  ;;  %v1530_v55 = vor.u32 1.1754944e-38, %v1529_v17  ;;  %vm1666_vm5 = vweird.f32 %v6328_v3  ;;  %vm1647_vm6 = vweird.f32 %v6326_v42  ;;  %v6418_v17 = vld [vmem:[#allocation11 + $0x1c8] sm:$0xff] }
 0x2b5   :  { %v1502_v60 = vadd.f32 %v3779_v25, %v1501_v51  ;;  %v1519_v63 = vmul.f32 %v6330_v26, %v6322_v6  ;;  %v3787_v7 = vpop.eup %3786  ;;  %vm1524_vm15 = vweird.f32 %v6330_v26  ;;  %v1654_v6 = vor.u32 1.1754944e-38, %v1653_v23  ;;  %v6445_v23 = vld [vmem:[#allocation11 + $0x1b8] sm:$0xff] }
 0x2b6   :  { %v1487_v47 = vsel %vm1486_vm7, %v3777_v34, %v1483_v38  ;;  %v3789_v13 = vpop.eup %3788  ;;  %vm6363_vm2 = vmor %vm1523_vm14, %vm1524_vm15  ;;  %vm1528_vm7 = vcmp.eq.f32.partialorder %v1527_v50, 8.507059e+37  ;;  %vm1671_vm14 = vcmp.eq.f32.partialorder %v1670_v27, 8.507059e+37  ;;  %v6430_v50 = vld [vmem:[#allocation11 + $0x1d8] sm:$0xff] }
 0x2b7   :  { %v1492_v39 = vsel %vm1489_vm9, %v1491_v59, %v1487_v47  ;;  %v1506_v11 = vsel %vm1505_vm8, %v3779_v25, %v1502_v60  ;;  %v1520_v12 = vsub.f32 1.0, %v1519_v63  ;;  %v6340_v14 = vadd.f32 1.0, %v3789_v13 }
 0x2b8   :  { %v1511_v16 = vsel %vm1508_vm10, %v1510_v24, %v1506_v11  ;;  %v1534_v61 = vmul.f32 %v3787_v7, %v1492_v39  ;;  %v3791_v45 = vpop.eup %3790  ;;  %vm1652_vm9 = vcmp.eq.f32.partialorder %v1651_v15, 8.507059e+37  ;;  %v1673_v63 = vor.u32 1.1754944e-38, %v1672_v43  ;;  %v6376_v11 = vpop.permute.xlu2 %1704  ;;  %v6442_v15 = vld [vmem:[#allocation11 + $0x1b0] sm:$0xff]  ;;  %v6448_v43 = vld [vmem:[#allocation11 + $0x180] sm:$0xff] }
 0x2b9   :  { %v1533_v37 = vmul.f32 %v1511_v16, %v8692_v40  ;;  %v1521_v53 = vmul.f32 %v6330_v26, %v1520_v12  ;;  %v3793_v8 = vpop.eup %3792  ;;  %v1643_v52 = vmul.f32 %v3791_v45, %v6326_v42  ;;  %3794 = vrcp.f32 %v6340_v14  ;;  %8696 = vst [vmem:[#allocation72_spill] sm:$0xff] %v6376_v11 }
 0x2ba   :  { %v1662_v28 = vmul.f32 %v3793_v8, %v6328_v3  ;;  %vm1648_vm1 = vweird.f32 %v3791_v45  ;;  %vm1667_vm4 = vweird.f32 %v3793_v8  ;;  %vm1706_vm15 = vcmp.eq.s32.totalorder %v6376_v11, 1  ;;  %v6583_v11 = vld [vmem:[#allocation11 + $0x48] sm:$0xff] }
 0x2bb   :  { %v1535_v54 = vadd.f32 %v1534_v61, %v1533_v37  ;;  %v1644_v34 = vsub.f32 1.0, %v1643_v52  ;;  %v1522_v19 = vadd.f32 %v6330_v26, %v1521_v53  ;;  %vm1649_vm8 = vmor %vm1647_vm6, %vm1648_vm1  ;;  %v6395_v53 = vld [vmem:[#allocation11 + $0x1e0] sm:$0xff]  ;;  %8719 = vst [vmem:[#allocation104_spill] sm:$0xff] %v6583_v11 }
 0x2bc   :  { %v1663_v48 = vsub.f32 1.0, %v1662_v28  ;;  %vm1668_vm10 = vmor %vm1666_vm5, %vm1667_vm4  ;;  %v6415_v52 = vld [vmem:[#allocation11 + $0x1c0] sm:$0xff]  ;;  %v6427_v28 = vld [vmem:[#allocation11 + $0x1d0] sm:$0xff] }
 0x2bd   :  { %3796 = vtanh.f32 %v1535_v54  ;;  %v6354_v25 = vsel %vm1543_vm13, %v1535_v54, %v8692_v40  ;;  %v1645_v33 = vmul.f32 %v3791_v45, %v1644_v34  ;;  %v1526_v57 = vsel %vm6363_vm2, %v6330_v26, %v1522_v19  ;;  %v6436_v34 = vld [vmem:[#allocation11 + $0x1a0] sm:$0xff]  ;;  %v6439_v19 = vld [vmem:[#allocation11 + $0x1a8] sm:$0xff] }
 0x2be   :  { %3798 = vtanh.f32 %v1636_v2  ;;  %v1664_v36 = vmul.f32 %v3793_v8, %v1663_v48  ;;  %v1531_v7 = vsel %vm1528_vm7, %v1530_v55, %v1526_v57  ;;  %v6407_v2 = vld [vmem:[#allocation11 + $0x1f0] sm:$0xff]  ;;  %vm1686_vm2 = vweird.f32 %v6340_v14  ;;  %v6457_v57 = vld [vmem:[#allocation11 + $0x198] sm:$0xff] }
 0x2bf   :  { %v6370_v51 = vpop.eup %3794  ;;  %v1646_v0 = vadd.f32 %v3791_v45, %v1645_v33  ;;  %v1690_v54 = vand.u32 2147483647, %v6340_v14  ;;  %v6451_v33 = vld [vmem:[#allocation11 + $0x188] sm:$0xff] }
 0x2c0   :  { %v1665_v38 = vadd.f32 %v3793_v8, %v1664_v36  ;;  %v1682_v59 = vmul.f32 %v6370_v51, %v6340_v14  ;;  %vm1687_vm1 = vweird.f32 %v6370_v51  ;;  %v6454_v36 = vld [vmem:[#allocation11 + $0x190] sm:$0xff] }
 0x2c1   :  { %v1650_v26 = vsel %vm1649_vm8, %v3791_v45, %v1646_v0  ;;  %v1692_v45 = vand.u32 2147483648, %v6340_v14  ;;  %vm6423_vm4 = vmor %vm1686_vm2, %vm1687_vm1  ;;  %vm1691_vm5 = vcmp.eq.f32.partialorder %v1690_v54, 8.507059e+37  ;;  %v6465_v0 = vld [vmem:[#allocation11 + $0x168] sm:$0xff]  ;;  %v6532_v54 = vld [vmem:[#allocation11 + $0xc0] sm:$0xff] }
 0x2c2   :  { %v1655_v47 = vsel %vm1652_vm9, %v1654_v6, %v1650_v26  ;;  %v1669_v3 = vsel %vm1668_vm10, %v3793_v8, %v1665_v38  ;;  %v1683_v39 = vsub.f32 1.0, %v1682_v59  ;;  %v6410_v8 = vld [vmem:[#allocation11 + $0x1f8] sm:$0xff]  ;;  %v6468_v6 = vld [vmem:[#allocation11 + $0x170] sm:$0xff]  ;;  %8702 = vst [vmem:[#allocation87_spill] sm:$0xff] %v6532_v54 }
 0x2c3   :  { %v3797_v60 = vpop.eup %3796  ;;  %v1674_v12 = vsel %vm1671_vm14, %v1673_v63, %v1669_v3  ;;  %v1693_v48 = vor.u32 1.1754944e-38, %v1692_v45  ;;  %v6471_v38 = vld [vmem:[#allocation11 + $0x178] sm:$0xff]  ;;  %v6483_v63 = vld [vmem:[#allocation11 + $0x148] sm:$0xff]  ;;  %v6490_v26 = vld [vmem:[#allocation11 + $0x150] sm:$0xff] }
 0x2c4   :  { %v3799_v24 = vpop.eup %3798  ;;  %v6378_v42 = vmul.f32 %v3797_v60, %v1531_v7  ;;  %v1696_v13 = vmul.f32 %v1674_v12, %v6161_v62  ;;  %v1684_v16 = vmul.f32 %v6370_v51, %v1683_v39  ;;  %v6480_v60 = vld [vmem:[#allocation11 + $0x140] sm:$0xff]  ;;  %v6505_v3 = vld [vmem:[#allocation11 + $0x138] sm:$0xff]  ;;  %v6511_v12 = vld [vmem:[#allocation11 + $0x108] sm:$0xff] }
 0x2c5   :  { %v1697_v58 = vmul.f32 %v3799_v24, %v1655_v47  ;;  %v6496_v7 = vld [vmem:[#allocation11 + $0x120] sm:$0xff]  ;;  %v6499_v24 = vld [vmem:[#allocation11 + $0x128] sm:$0xff]  ;;  %v6502_v47 = vld [vmem:[#allocation11 + $0x130] sm:$0xff] }
 0x2c6   :  { %8697 = vst [vmem:[#allocation73_spill] sm:$0xff] %v6378_v42  ;;  %v6386_v61 = vsel %vm1543_vm13, %v6378_v42, %v6151_v29  ;;  %v1685_v37 = vadd.f32 %v6370_v51, %v1684_v16  ;;  %v6398_v29 = vld [vmem:[#allocation11 + $0x1e8] sm:$0xff]  ;;  %v6508_v39 = vld [vmem:[#allocation11 + $0x100] sm:$0xff]  ;;  %v6529_v45 = vld [vmem:[#allocation11 + $0xf8] sm:$0xff] }
 0x2c7   :  { %1733 = vmatmul.f32.vlgmr.msra.gmra.mxu0 %v6386_v61  ;;  %1753 = vmatmul.f32.vlgmr.msra.gmra.mxu1 %v6386_v61  ;;  %v1698_v40 = vadd.f32 %v1697_v58, %v1696_v13  ;;  %v6514_v58 = vld [vmem:[#allocation11 + $0x110] sm:$0xff]  ;;  %v6517_v13 = vld [vmem:[#allocation11 + $0x118] sm:$0xff]  ;;  %v6520_v16 = vld [vmem:[#allocation11 + $0xe0] sm:$0xff]  ;;  %8701 = vst [vmem:[#allocation77_spill] sm:$0xff] %v6529_v45 }
 0x2c8   :  { %1773 = vmatmul.f32.vlgmr.msrb.gmra.mxu2 %v6386_v61  ;;  %1793 = vmatmul.f32.vlgmr.msrb.gmra.mxu3 %v6386_v61  ;;  %v1689_v14 = vsel %vm6423_vm4, %v6370_v51, %v1685_v37  ;;  %v6462_v51 = vld [vmem:[#allocation11 + $0x160] sm:$0xff]  ;;  %v6526_v37 = vld [vmem:[#allocation11 + $0xf0] sm:$0xff] }
 0x2c9   :  { %2043 = vmatpush.msra.mxu0 %v6395_v53  ;;  %2063 = vmatpush.msra.mxu1 %v6398_v29  ;;  %3800 = vtanh.f32 %v1698_v40  ;;  %v6405_v4 = vsel %vm1706_vm15, %v1698_v40, %v6161_v62  ;;  %v1694_v41 = vsel %vm1691_vm5, %v1693_v48, %v1689_v14  ;;  %v6523_v40 = vld [vmem:[#allocation11 + $0xe8] sm:$0xff]  ;;  %v6538_v14 = vld [vmem:[#allocation11 + $0xd0] sm:$0xff]  ;;  %v6541_v48 = vld [vmem:[#allocation11 + $0xd8] sm:$0xff] }
 0x2ca   :  { %2083 = vmatpush.msrb.mxu2 %v6407_v2  ;;  %2103 = vmatpush.msrb.mxu3 %v6410_v8  ;;  %v6535_v62 = vld [vmem:[#allocation11 + $0xc8] sm:$0xff]  ;;  %8704 = vst [vmem:[#allocation89_spill] sm:$0xff] %v6538_v14  ;;  %v6562_v42 = vld [vmem:[#allocation11 + $0x90] sm:$0xff] }
 0x2cb   :  { %2044 = vmatpush.msra.mxu0 %v6415_v52  ;;  %2064 = vmatpush.msra.mxu1 %v6418_v17  ;;  %8703 = vst [vmem:[#allocation88_spill] sm:$0xff] %v6535_v62 }
 0x2cc   :  { %2084 = vmatpush.msrb.mxu2 %v6427_v28  ;;  %2104 = vmatpush.msrb.mxu3 %v6430_v50  ;;  %8705 = vst [vmem:[#allocation90_spill] sm:$0xff] %v6541_v48 }
 0x2cd   :  { %2045 = vmatpush.msra.mxu0 %v6436_v34  ;;  %2065 = vmatpush.msra.mxu1 %v6439_v19  ;;  %8712 = vst [vmem:[#allocation97_spill] sm:$0xff] %v6562_v42 }
 0x2ce   :  { %2085 = vmatpush.msrb.mxu2 %v6442_v15  ;;  %2105 = vmatpush.msrb.mxu3 %v6445_v23 }
 0x2cf   :  { %2046 = vmatpush.msra.mxu0 %v6448_v43  ;;  %2066 = vmatpush.msra.mxu1 %v6451_v33  ;;  %v3801_v27 = vpop.eup %3800 }
 0x2d0   :  { %2086 = vmatpush.msrb.mxu2 %v6454_v36  ;;  %2106 = vmatpush.msrb.mxu3 %v6457_v57  ;;  %v6460_v55 = vmul.f32 %v3801_v27, %v1694_v41  ;;  %v6544_v27 = vld [vmem:[#allocation11 + $0xa0] sm:$0xff]  ;;  %v6547_v41 = vld [vmem:[#allocation11 + $0xa8] sm:$0xff] }
 0x2d1   :  { %2047 = vmatpush.msra.mxu0 %v6462_v51  ;;  %2067 = vmatpush.msra.mxu1 %v6465_v0  ;;  %8706 = vst [vmem:[#allocation91_spill] sm:$0xff] %v6544_v27 }
 0x2d2   :  { %8700 = vst [vmem:[#allocation74_spill] sm:$0xff] %v6460_v55  ;;  %2087 = vmatpush.msrb.mxu2 %v6468_v6  ;;  %2107 = vmatpush.msrb.mxu3 %v6471_v38  ;;  %v6478_v59 = vsel %vm1706_vm15, %v6460_v55, %v6192_v35  ;;  %v6493_v35 = vld [vmem:[#allocation11 + $0x158] sm:$0xff]  ;;  %v6556_v55 = vld [vmem:[#allocation11 + $0x80] sm:$0xff] }
 0x2d3   :  { %2048 = vmatpush.msra.mxu0 %v6480_v60  ;;  %2068 = vmatpush.msra.mxu1 %v6483_v63  ;;  %8707 = vst [vmem:[#allocation92_spill] sm:$0xff] %v6547_v41 }
 0x2d4   :  { %1896 = vmatmul.f32.vlgmr.msrb.gmra.mxu0 %v6478_v59  ;;  %1916 = vmatmul.f32.vlgmr.msrb.gmra.mxu1 %v6478_v59  ;;  %8710 = vst [vmem:[#allocation95_spill] sm:$0xff] %v6556_v55 }
 0x2d5   :  { %1936 = vmatmul.f32.vlgmr.msra.gmra.mxu2 %v6478_v59  ;;  %1956 = vmatmul.f32.vlgmr.msra.gmra.mxu3 %v6478_v59 }
 0x2d6   :  { %2088 = vmatpush.msrb.mxu2 %v6490_v26  ;;  %2108 = vmatpush.msrb.mxu3 %v6493_v35 }
 0x2d7   :  { %2049 = vmatpush.msra.mxu0 %v6496_v7  ;;  %2069 = vmatpush.msra.mxu1 %v6499_v24 }
 0x2d8   :  { %2089 = vmatpush.msrb.mxu2 %v6502_v47  ;;  %2109 = vmatpush.msrb.mxu3 %v6505_v3 }
 0x2d9   :  { %2050 = vmatpush.msra.mxu0 %v6508_v39  ;;  %2070 = vmatpush.msra.mxu1 %v6511_v12 }
 0x2da   :  { %2090 = vmatpush.msrb.mxu2 %v6514_v58  ;;  %2110 = vmatpush.msrb.mxu3 %v6517_v13 }
 0x2db   :  { %2051 = vmatpush.msra.mxu0 %v6520_v16  ;;  %2071 = vmatpush.msra.mxu1 %v6523_v40 }
 0x2dc   :  { %2091 = vmatpush.msrb.mxu2 %v6526_v37  ;;  %2111 = vmatpush.msrb.mxu3 %v6529_v45 }
 0x2dd   :  { %2052 = vmatpush.msra.mxu0 %v6532_v54  ;;  %2072 = vmatpush.msra.mxu1 %v6535_v62 }
 0x2de   :  { %2092 = vmatpush.msrb.mxu2 %v6538_v14  ;;  %2112 = vmatpush.msrb.mxu3 %v6541_v48 }
 0x2df   :  { %2053 = vmatpush.msra.mxu0 %v6544_v27  ;;  %2073 = vmatpush.msra.mxu1 %v6547_v41  ;;  %v8796_v41 = vld [vmem:[#allocation39_spill] sm:$0xff] }
 0x2e0   :  { %2093 = vmatpush.msrb.mxu2 %v6550_v9  ;;  %2113 = vmatpush.msrb.mxu3 %v6553_v30 }
 0x2e1   :  { %2054 = vmatpush.msra.mxu0 %v6556_v55  ;;  %2074 = vmatpush.msra.mxu1 %v6559_v5 }
 0x2e2   :  { %2094 = vmatpush.msrb.mxu2 %v6562_v42  ;;  %2114 = vmatpush.msrb.mxu3 %v6565_v44 }
 0x2e3   :  { %2055 = vmatpush.msra.mxu0 %v6568_v49  ;;  %2075 = vmatpush.msra.mxu1 %v6571_v32  ;;  %v6586_v49 = vld [vmem:[#allocation11 + $0x50] sm:$0xff]  ;;  %v6589_v32 = vld [vmem:[#allocation11 + $0x58] sm:$0xff] }
 0x2e4   :  { %2095 = vmatpush.msrb.mxu2 %v6574_v1  ;;  %2115 = vmatpush.msrb.mxu3 %v6577_v56  ;;  %8720 = vst [vmem:[#allocation105_spill] sm:$0xff] %v6586_v49  ;;  %v6592_v1 = vld [vmem:[#allocation11 + $0x20] sm:$0xff]  ;;  %v6595_v56 = vld [vmem:[#allocation11 + $0x28] sm:$0xff] }
 0x2e5   :  { %2056 = vmatpush.msra.mxu0 %v6580_v46  ;;  %2076 = vmatpush.msra.mxu1 %v6583_v11  ;;  %8721 = vst [vmem:[#allocation106_spill] sm:$0xff] %v6589_v32  ;;  %v6598_v46 = vld [vmem:[#allocation11 + $0x30] sm:$0xff]  ;;  %v6601_v11 = vld [vmem:[#allocation11 + $0x38] sm:$0xff] }
 0x2e6   :  { %2096 = vmatpush.msrb.mxu2 %v6586_v49  ;;  %2116 = vmatpush.msrb.mxu3 %v6589_v32  ;;  %8722 = vst [vmem:[#allocation107_spill] sm:$0xff] %v6592_v1  ;;  %v6604_v49 = vld [vmem:[#allocation11] sm:$0xff]  ;;  %v6607_v32 = vld [vmem:[#allocation11 + $0x8] sm:$0xff] }
 0x2e7   :  { %2057 = vmatpush.msra.mxu0 %v6592_v1  ;;  %8723 = vst [vmem:[#allocation108_spill] sm:$0xff] %v6595_v56  ;;  %2077 = vmatpush.msra.mxu1 %v6595_v56  ;;  %v6610_v1 = vld [vmem:[#allocation11 + $0x10] sm:$0xff]  ;;  %v6613_v56 = vld [vmem:[#allocation11 + $0x18] sm:$0xff] }
 0x2e8   :  { %8724 = vst [vmem:[#allocation109_spill] sm:$0xff] %v6598_v46  ;;  %2097 = vmatpush.msrb.mxu2 %v6598_v46  ;;  %2117 = vmatpush.msrb.mxu3 %v6601_v11  ;;  %v6616_v46 = vld [vmem:[#allocation14 + $0x1e0] sm:$0xff] }
 0x2e9   :  { %8725 = vst [vmem:[#allocation110_spill] sm:$0xff] %v6601_v11  ;;  %2058 = vmatpush.msra.mxu0 %v6604_v49  ;;  %2078 = vmatpush.msra.mxu1 %v6607_v32  ;;  %v6619_v11 = vld [vmem:[#allocation14 + $0x1e8] sm:$0xff] }
 0x2ea   :  { %8726 = vst [vmem:[#allocation111_spill] sm:$0xff] %v6604_v49  ;;  %2098 = vmatpush.msrb.mxu2 %v6610_v1  ;;  %2118 = vmatpush.msrb.mxu3 %v6613_v56  ;;  %v6622_v49 = vld [vmem:[#allocation14 + $0x1f0] sm:$0xff] }
 0x2eb   :  { %8727 = vst [vmem:[#allocation112_spill] sm:$0xff] %v6607_v32  ;;  %2200 = vmatpush.msrb.mxu0 %v6616_v46  ;;  %2220 = vmatpush.msrb.mxu1 %v6619_v11  ;;  %v6625_v32 = vld [vmem:[#allocation14 + $0x1f8] sm:$0xff] }
 0x2ec   :  { %8728 = vst [vmem:[#allocation113_spill] sm:$0xff] %v6610_v1  ;;  %2240 = vmatpush.msra.mxu2 %v6622_v49  ;;  %2260 = vmatpush.msra.mxu3 %v6625_v32  ;;  %v6628_v1 = vld [vmem:[#allocation14 + $0x1c0] sm:$0xff] }
 0x2ed   :  { %8729 = vst [vmem:[#allocation114_spill] sm:$0xff] %v6613_v56  ;;  %2201 = vmatpush.msrb.mxu0 %v6628_v1  ;;  %v6631_v56 = vld [vmem:[#allocation14 + $0x1c8] sm:$0xff] }
 0x2ee   :  { %8730 = vst [vmem:[#allocation115_spill] sm:$0xff] %v6616_v46  ;;  %2221 = vmatpush.msrb.mxu1 %v6631_v56  ;;  %v6634_v46 = vld [vmem:[#allocation14 + $0x1d0] sm:$0xff] }
 0x2ef   :  { %8731 = vst [vmem:[#allocation116_spill] sm:$0xff] %v6619_v11  ;;  %2241 = vmatpush.msra.mxu2 %v6634_v46  ;;  %v6637_v11 = vld [vmem:[#allocation14 + $0x1d8] sm:$0xff] }
 0x2f0   :  { %8732 = vst [vmem:[#allocation117_spill] sm:$0xff] %v6622_v49  ;;  %2261 = vmatpush.msra.mxu3 %v6637_v11  ;;  %v6640_v49 = vld [vmem:[#allocation14 + $0x1a0] sm:$0xff] }
 0x2f1   :  { %8733 = vst [vmem:[#allocation118_spill] sm:$0xff] %v6625_v32  ;;  %2202 = vmatpush.msrb.mxu0 %v6640_v49  ;;  %v6643_v32 = vld [vmem:[#allocation14 + $0x1a8] sm:$0xff] }
 0x2f2   :  { %8734 = vst [vmem:[#allocation119_spill] sm:$0xff] %v6628_v1  ;;  %2222 = vmatpush.msrb.mxu1 %v6643_v32  ;;  %v6646_v1 = vld [vmem:[#allocation14 + $0x1b0] sm:$0xff] }
 0x2f3   :  { %8735 = vst [vmem:[#allocation120_spill] sm:$0xff] %v6631_v56  ;;  %2242 = vmatpush.msra.mxu2 %v6646_v1  ;;  %v6649_v56 = vld [vmem:[#allocation14 + $0x1b8] sm:$0xff] }
 0x2f4   :  { %8736 = vst [vmem:[#allocation121_spill] sm:$0xff] %v6634_v46  ;;  %2262 = vmatpush.msra.mxu3 %v6649_v56  ;;  %v6652_v46 = vld [vmem:[#allocation14 + $0x180] sm:$0xff] }
 0x2f5   :  { %8737 = vst [vmem:[#allocation122_spill] sm:$0xff] %v6637_v11  ;;  %2203 = vmatpush.msrb.mxu0 %v6652_v46  ;;  %v6655_v11 = vld [vmem:[#allocation14 + $0x188] sm:$0xff] }
 0x2f6   :  { %8738 = vst [vmem:[#allocation123_spill] sm:$0xff] %v6640_v49  ;;  %2223 = vmatpush.msrb.mxu1 %v6655_v11  ;;  %v6658_v49 = vld [vmem:[#allocation14 + $0x190] sm:$0xff] }
 0x2f7   :  { %8739 = vst [vmem:[#allocation124_spill] sm:$0xff] %v6643_v32  ;;  %2243 = vmatpush.msra.mxu2 %v6658_v49  ;;  %v6661_v32 = vld [vmem:[#allocation14 + $0x198] sm:$0xff] }
 0x2f8   :  { %8740 = vst [vmem:[#allocation125_spill] sm:$0xff] %v6646_v1  ;;  %2263 = vmatpush.msra.mxu3 %v6661_v32  ;;  %v6664_v1 = vld [vmem:[#allocation14 + $0x160] sm:$0xff] }
 0x2f9   :  { %8741 = vst [vmem:[#allocation126_spill] sm:$0xff] %v6649_v56  ;;  %2204 = vmatpush.msrb.mxu0 %v6664_v1  ;;  %v6667_v56 = vld [vmem:[#allocation14 + $0x168] sm:$0xff] }
 0x2fa   :  { %8742 = vst [vmem:[#allocation127_spill] sm:$0xff] %v6652_v46  ;;  %2224 = vmatpush.msrb.mxu1 %v6667_v56  ;;  %v6670_v46 = vld [vmem:[#allocation14 + $0x170] sm:$0xff] }
 0x2fb   :  { %8743 = vst [vmem:[#allocation128_spill] sm:$0xff] %v6655_v11  ;;  %2244 = vmatpush.msra.mxu2 %v6670_v46  ;;  %v6673_v11 = vld [vmem:[#allocation14 + $0x178] sm:$0xff] }
 0x2fc   :  { %8744 = vst [vmem:[#allocation129_spill] sm:$0xff] %v6658_v49  ;;  %2264 = vmatpush.msra.mxu3 %v6673_v11  ;;  %v6676_v49 = vld [vmem:[#allocation14 + $0x140] sm:$0xff] }
 0x2fd   :  { %8745 = vst [vmem:[#allocation130_spill] sm:$0xff] %v6661_v32  ;;  %2205 = vmatpush.msrb.mxu0 %v6676_v49  ;;  %v6679_v32 = vld [vmem:[#allocation14 + $0x148] sm:$0xff] }
 0x2fe   :  { %8746 = vst [vmem:[#allocation131_spill] sm:$0xff] %v6664_v1  ;;  %2225 = vmatpush.msrb.mxu1 %v6679_v32  ;;  %v6682_v1 = vld [vmem:[#allocation14 + $0x150] sm:$0xff] }
 0x2ff   :  { %8747 = vst [vmem:[#allocation132_spill] sm:$0xff] %v6667_v56  ;;  %2245 = vmatpush.msra.mxu2 %v6682_v1  ;;  %v6685_v56 = vld [vmem:[#allocation14 + $0x158] sm:$0xff] }
 0x300   :  { %8748 = vst [vmem:[#allocation133_spill] sm:$0xff] %v6670_v46  ;;  %2265 = vmatpush.msra.mxu3 %v6685_v56  ;;  %v6688_v46 = vld [vmem:[#allocation14 + $0x120] sm:$0xff] }
 0x301   :  { %8749 = vst [vmem:[#allocation134_spill] sm:$0xff] %v6673_v11  ;;  %2206 = vmatpush.msrb.mxu0 %v6688_v46  ;;  %v6691_v11 = vld [vmem:[#allocation14 + $0x128] sm:$0xff] }
 0x302   :  { %8750 = vst [vmem:[#allocation135_spill] sm:$0xff] %v6676_v49  ;;  %2226 = vmatpush.msrb.mxu1 %v6691_v11  ;;  %v6694_v49 = vld [vmem:[#allocation14 + $0x130] sm:$0xff] }
 0x303   :  { %8751 = vst [vmem:[#allocation136_spill] sm:$0xff] %v6679_v32  ;;  %2246 = vmatpush.msra.mxu2 %v6694_v49  ;;  %v6697_v32 = vld [vmem:[#allocation14 + $0x138] sm:$0xff] }
 0x304   :  { %8752 = vst [vmem:[#allocation137_spill] sm:$0xff] %v6682_v1  ;;  %2266 = vmatpush.msra.mxu3 %v6697_v32  ;;  %v6700_v1 = vld [vmem:[#allocation14 + $0x100] sm:$0xff] }
 0x305   :  { %8753 = vst [vmem:[#allocation138_spill] sm:$0xff] %v6685_v56  ;;  %2207 = vmatpush.msrb.mxu0 %v6700_v1  ;;  %v6703_v56 = vld [vmem:[#allocation14 + $0x108] sm:$0xff] }
 0x306   :  { %8754 = vst [vmem:[#allocation139_spill] sm:$0xff] %v6688_v46  ;;  %2227 = vmatpush.msrb.mxu1 %v6703_v56  ;;  %v6706_v46 = vld [vmem:[#allocation14 + $0x110] sm:$0xff] }
 0x307   :  { %8755 = vst [vmem:[#allocation140_spill] sm:$0xff] %v6691_v11  ;;  %2247 = vmatpush.msra.mxu2 %v6706_v46  ;;  %v6709_v11 = vld [vmem:[#allocation14 + $0x118] sm:$0xff] }
 0x308   :  { %8756 = vst [vmem:[#allocation141_spill] sm:$0xff] %v6694_v49  ;;  %2267 = vmatpush.msra.mxu3 %v6709_v11  ;;  %v6712_v49 = vld [vmem:[#allocation14 + $0xe0] sm:$0xff] }
 0x309   :  { %8757 = vst [vmem:[#allocation142_spill] sm:$0xff] %v6697_v32  ;;  %2208 = vmatpush.msrb.mxu0 %v6712_v49  ;;  %v6715_v32 = vld [vmem:[#allocation14 + $0xe8] sm:$0xff] }
 0x30a   :  { %8758 = vst [vmem:[#allocation143_spill] sm:$0xff] %v6700_v1  ;;  %2228 = vmatpush.msrb.mxu1 %v6715_v32  ;;  %v6718_v1 = vld [vmem:[#allocation14 + $0xf0] sm:$0xff] }
 0x30b   :  { %8759 = vst [vmem:[#allocation144_spill] sm:$0xff] %v6703_v56  ;;  %2248 = vmatpush.msra.mxu2 %v6718_v1  ;;  %v6721_v56 = vld [vmem:[#allocation14 + $0xf8] sm:$0xff] }
 0x30c   :  { %8760 = vst [vmem:[#allocation145_spill] sm:$0xff] %v6706_v46  ;;  %2268 = vmatpush.msra.mxu3 %v6721_v56  ;;  %v6724_v46 = vld [vmem:[#allocation14 + $0xc0] sm:$0xff] }
 0x30d   :  { %8761 = vst [vmem:[#allocation146_spill] sm:$0xff] %v6709_v11  ;;  %2209 = vmatpush.msrb.mxu0 %v6724_v46  ;;  %v6727_v11 = vld [vmem:[#allocation14 + $0xc8] sm:$0xff] }
 0x30e   :  { %8762 = vst [vmem:[#allocation147_spill] sm:$0xff] %v6712_v49  ;;  %2229 = vmatpush.msrb.mxu1 %v6727_v11  ;;  %v6730_v49 = vld [vmem:[#allocation14 + $0xd0] sm:$0xff] }
 0x30f   :  { %8763 = vst [vmem:[#allocation148_spill] sm:$0xff] %v6715_v32  ;;  %2249 = vmatpush.msra.mxu2 %v6730_v49  ;;  %v6733_v32 = vld [vmem:[#allocation14 + $0xd8] sm:$0xff] }
 0x310   :  { %8764 = vst [vmem:[#allocation149_spill] sm:$0xff] %v6718_v1  ;;  %2269 = vmatpush.msra.mxu3 %v6733_v32  ;;  %v6736_v1 = vld [vmem:[#allocation14 + $0xa0] sm:$0xff] }
 0x311   :  { %8765 = vst [vmem:[#allocation150_spill] sm:$0xff] %v6721_v56  ;;  %2210 = vmatpush.msrb.mxu0 %v6736_v1  ;;  %v6739_v56 = vld [vmem:[#allocation14 + $0xa8] sm:$0xff] }
 0x312   :  { %8766 = vst [vmem:[#allocation151_spill] sm:$0xff] %v6724_v46  ;;  %2230 = vmatpush.msrb.mxu1 %v6739_v56  ;;  %v6742_v46 = vld [vmem:[#allocation14 + $0xb0] sm:$0xff] }
 0x313   :  { %8767 = vst [vmem:[#allocation152_spill] sm:$0xff] %v6727_v11  ;;  %2250 = vmatpush.msra.mxu2 %v6742_v46  ;;  %v6745_v11 = vld [vmem:[#allocation14 + $0xb8] sm:$0xff] }
 0x314   :  { %8768 = vst [vmem:[#allocation153_spill] sm:$0xff] %v6730_v49  ;;  %2270 = vmatpush.msra.mxu3 %v6745_v11  ;;  %v6748_v49 = vld [vmem:[#allocation14 + $0x80] sm:$0xff] }
 0x315   :  { %8769 = vst [vmem:[#allocation154_spill] sm:$0xff] %v6733_v32  ;;  %2211 = vmatpush.msrb.mxu0 %v6748_v49  ;;  %v6751_v32 = vld [vmem:[#allocation14 + $0x88] sm:$0xff] }
 0x316   :  { %8770 = vst [vmem:[#allocation155_spill] sm:$0xff] %v6736_v1  ;;  %2231 = vmatpush.msrb.mxu1 %v6751_v32  ;;  %v6754_v1 = vld [vmem:[#allocation14 + $0x90] sm:$0xff] }
 0x317   :  { %8771 = vst [vmem:[#allocation156_spill] sm:$0xff] %v6739_v56  ;;  %2251 = vmatpush.msra.mxu2 %v6754_v1  ;;  %v6757_v56 = vld [vmem:[#allocation14 + $0x98] sm:$0xff] }
 0x318   :  { %8772 = vst [vmem:[#allocation157_spill] sm:$0xff] %v6742_v46  ;;  %2271 = vmatpush.msra.mxu3 %v6757_v56  ;;  %v6760_v46 = vld [vmem:[#allocation14 + $0x60] sm:$0xff] }
 0x319   :  { %8773 = vst [vmem:[#allocation158_spill] sm:$0xff] %v6745_v11  ;;  %2212 = vmatpush.msrb.mxu0 %v6760_v46  ;;  %v6763_v11 = vld [vmem:[#allocation14 + $0x68] sm:$0xff] }
 0x31a   :  { %8774 = vst [vmem:[#allocation159_spill] sm:$0xff] %v6748_v49  ;;  %2232 = vmatpush.msrb.mxu1 %v6763_v11  ;;  %v6766_v49 = vld [vmem:[#allocation14 + $0x70] sm:$0xff] }
 0x31b   :  { %8775 = vst [vmem:[#allocation160_spill] sm:$0xff] %v6751_v32  ;;  %2252 = vmatpush.msra.mxu2 %v6766_v49  ;;  %v6769_v32 = vld [vmem:[#allocation14 + $0x78] sm:$0xff] }
 0x31c   :  { %8776 = vst [vmem:[#allocation161_spill] sm:$0xff] %v6754_v1  ;;  %2272 = vmatpush.msra.mxu3 %v6769_v32  ;;  %v6772_v1 = vld [vmem:[#allocation14 + $0x40] sm:$0xff] }
 0x31d   :  { %8777 = vst [vmem:[#allocation162_spill] sm:$0xff] %v6757_v56  ;;  %2213 = vmatpush.msrb.mxu0 %v6772_v1  ;;  %v6775_v56 = vld [vmem:[#allocation14 + $0x48] sm:$0xff] }
 0x31e   :  { %8778 = vst [vmem:[#allocation163_spill] sm:$0xff] %v6760_v46  ;;  %2233 = vmatpush.msrb.mxu1 %v6775_v56  ;;  %v6778_v46 = vld [vmem:[#allocation14 + $0x50] sm:$0xff] }
 0x31f   :  { %8779 = vst [vmem:[#allocation164_spill] sm:$0xff] %v6763_v11  ;;  %2253 = vmatpush.msra.mxu2 %v6778_v46  ;;  %v6781_v11 = vld [vmem:[#allocation14 + $0x58] sm:$0xff] }
 0x320   :  { %8780 = vst [vmem:[#allocation165_spill] sm:$0xff] %v6766_v49  ;;  %2273 = vmatpush.msra.mxu3 %v6781_v11  ;;  %v6784_v49 = vld [vmem:[#allocation14 + $0x20] sm:$0xff] }
 0x321   :  { %8781 = vst [vmem:[#allocation166_spill] sm:$0xff] %v6769_v32  ;;  %2214 = vmatpush.msrb.mxu0 %v6784_v49  ;;  %v6787_v32 = vld [vmem:[#allocation14 + $0x28] sm:$0xff] }
 0x322   :  { %8782 = vst [vmem:[#allocation167_spill] sm:$0xff] %v6772_v1  ;;  %2234 = vmatpush.msrb.mxu1 %v6787_v32  ;;  %v6790_v1 = vld [vmem:[#allocation14 + $0x30] sm:$0xff] }
 0x323   :  { %8783 = vst [vmem:[#allocation168_spill] sm:$0xff] %v6775_v56  ;;  %2254 = vmatpush.msra.mxu2 %v6790_v1  ;;  %v6793_v56 = vld [vmem:[#allocation14 + $0x38] sm:$0xff] }
 0x324   :  { %8784 = vst [vmem:[#allocation169_spill] sm:$0xff] %v6778_v46  ;;  %2274 = vmatpush.msra.mxu3 %v6793_v56  ;;  %v6796_v46 = vld [vmem:[#allocation14] sm:$0xff] }
 0x325   :  { %8785 = vst [vmem:[#allocation170_spill] sm:$0xff] %v6781_v11  ;;  %2215 = vmatpush.msrb.mxu0 %v6796_v46  ;;  %v6799_v11 = vld [vmem:[#allocation14 + $0x8] sm:$0xff] }
 0x326   :  { %8786 = vst [vmem:[#allocation171_spill] sm:$0xff] %v6784_v49  ;;  %2235 = vmatpush.msrb.mxu1 %v6799_v11  ;;  %v6802_v49 = vld [vmem:[#allocation14 + $0x10] sm:$0xff] }
 0x327   :  { %8787 = vst [vmem:[#allocation172_spill] sm:$0xff] %v6787_v32  ;;  %2255 = vmatpush.msra.mxu2 %v6802_v49  ;;  %v6805_v32 = vld [vmem:[#allocation14 + $0x18] sm:$0xff] }
 0x328   :  { %8788 = vst [vmem:[#allocation173_spill] sm:$0xff] %v6790_v1  ;;  %2275 = vmatpush.msra.mxu3 %v6805_v32  ;;  %v8794_v1 = vld [vmem:[#allocation75_spill] sm:$0xff] }
 0x329   :  { %8789 = vst [vmem:[#allocation174_spill] sm:$0xff] %v6793_v56  ;;  %v226_v44 = vadd.f32 %v8794_v1, %v8678_v22  ;;  %v8795_v56 = vld [vmem:[#allocation76_spill] sm:$0xff] }
 0x32a   :  { %8790 = vst [vmem:[#allocation175_spill] sm:$0xff] %v6796_v46  ;;  %v267_v42 = vadd.f32 %v8795_v56, %v8680_v31 }
 0x32b   :  { %8791 = vst [vmem:[#allocation176_spill] sm:$0xff] %v6799_v11 }
 0x32c   :  { %8792 = vst [vmem:[#allocation177_spill] sm:$0xff] %v6802_v49  ;;  %v349_v49 = vadd.f32 %v8796_v41, %v8682_v18 }
 0x32d   :  { %8793 = vst [vmem:[#allocation178_spill] sm:$0xff] %v6805_v32 }
 0x344   :  { %v1734_v5 = vpop.f32.mrf.mxu0  ;;  %v1754_v46 = vpop.f32.mrf.mxu1 }
 0x345   :  { %v1797_v55 = vadd.f32 %v1734_v5, %v226_v44  ;;  %v1798_v30 = vadd.f32 %v1754_v46, %v267_v42  ;;  %v8797_v5 = vld [vmem:[#allocation41_spill] sm:$0xff] }
 0x346   :  { %v443_v44 = vadd.f32 %v8797_v5, %v8684_v21 }
 0x347   :  { %v3638_v9 = vmul.f32 -1.442695, %v1797_v55  ;;  %v3639_v11 = vmul.f32 -1.442695, %v1798_v30  ;;  %v8798_v30 = vld [vmem:[#allocation46_spill] sm:$0xff]  ;;  %v8799_v55 = vld [vmem:[#allocation29_spill] sm:$0xff] }
 0x349   :  { %3802 = vpow2.f32 %v3638_v9  ;;  %v484_v9 = vadd.f32 %v8798_v30, %v8686_v10 }
 0x34a   :  { %3804 = vpow2.f32 %v3639_v11 }
 0x34b   :  { %v1794_v27 = vpop.f32.mrf.mxu3  ;;  %v1774_v42 = vpop.f32.mrf.mxu2 }
 0x34c   :  { %v1800_v48 = vadd.f32 %v1794_v27, %v349_v49 }
 0x34e   :  { %v3640_v32 = vmul.f32 -1.442695, %v1800_v48  ;;  %v308_v48 = vadd.f32 %v8799_v55, %v8688_v20 }
 0x34f   :  { %v3803_v14 = vpop.eup %3802 }
 0x350   :  { %v3805_v62 = vpop.eup %3804  ;;  %v1804_v1 = vadd.f32 1.0, %v3803_v14  ;;  %3806 = vpow2.f32 %v3640_v32  ;;  %v1799_v41 = vadd.f32 %v1774_v42, %v308_v48 }
 0x351   :  { %v1823_v22 = vadd.f32 1.0, %v3805_v62  ;;  %v1897_v56 = vpop.f32.mrf.mxu0  ;;  %v1917_v31 = vpop.f32.mrf.mxu1 }
 0x352   :  { %3808 = vrcp.f32 %v1804_v1  ;;  %v1960_v46 = vadd.f32 %v1897_v56, %v443_v44  ;;  %v1961_v11 = vadd.f32 %v1917_v31, %v484_v9  ;;  %v8800_v56 = vld [vmem:[#allocation60_spill] sm:$0xff]  ;;  %v1814_v10 = vand.u32 2147483647, %v1804_v1 }
 0x353   :  { %3810 = vrcp.f32 %v1823_v22  ;;  %v1816_v55 = vand.u32 2147483648, %v1804_v1  ;;  %vm1810_vm8 = vweird.f32 %v1804_v1  ;;  %vm1829_vm9 = vweird.f32 %v1823_v22 }
 0x354   :  { %v3641_v14 = vmul.f32 -1.442695, %v1960_v46  ;;  %v3642_v32 = vmul.f32 -1.442695, %v1961_v11  ;;  %v1835_v46 = vand.u32 2147483648, %v1823_v22  ;;  %vm1815_vm14 = vcmp.eq.f32.partialorder %v1814_v10, 8.507059e+37 }
 0x356   :  { %v3807_v49 = vpop.eup %3806  ;;  %3812 = vpow2.f32 %v3641_v14  ;;  %v1833_v14 = vand.u32 2147483647, %v1823_v22 }
 0x357   :  { %v6820_v62 = vadd.f32 1.0, %v3807_v49 }
 0x358   :  { %v3809_v27 = vpop.eup %3808  ;;  %v1957_v5 = vpop.f32.mrf.mxu3  ;;  %vm1834_vm2 = vcmp.eq.f32.partialorder %v1833_v14, 8.507059e+37 }
 0x359   :  { %v3811_v21 = vpop.eup %3810  ;;  %v1806_v18 = vmul.f32 %v3809_v27, %v1804_v1  ;;  %3814 = vrcp.f32 %v6820_v62  ;;  %v1963_v44 = vadd.f32 %v1957_v5, %v8800_v56  ;;  %vm1811_vm6 = vweird.f32 %v3809_v27 }
 0x35a   :  { %v1825_v30 = vmul.f32 %v3811_v21, %v1823_v22  ;;  %3816 = vpow2.f32 %v3642_v32  ;;  %vm1830_vm7 = vweird.f32 %v3811_v21  ;;  %vm1812_vm10 = vmor %vm1810_vm8, %vm1811_vm6  ;;  %v1836_v56 = vor.u32 1.1754944e-38, %v1835_v46 }
 0x35b   :  { %v1807_v31 = vsub.f32 1.0, %v1806_v18  ;;  %3818 = vtanh.f32 %v1799_v41  ;;  %v3643_v49 = vmul.f32 -1.442695, %v1963_v44  ;;  %v1817_v41 = vor.u32 1.1754944e-38, %v1816_v55  ;;  %vm1831_vm1 = vmor %vm1829_vm9, %vm1830_vm7 }
 0x35c   :  { %v1826_v9 = vsub.f32 1.0, %v1825_v30  ;;  %v3813_v42 = vpop.eup %3812  ;;  %vm1849_vm5 = vweird.f32 %v6820_v62 }
 0x35d   :  { %v1808_v11 = vmul.f32 %v3809_v27, %v1807_v31  ;;  %v6826_v18 = vadd.f32 1.0, %v3813_v42  ;;  %3820 = vpow2.f32 %v3643_v49 }
 0x35e   :  { %v1827_v48 = vmul.f32 %v3811_v21, %v1826_v9 }
 0x35f   :  { %v6824_v20 = vpop.eup %3814  ;;  %v1809_v32 = vadd.f32 %v3809_v27, %v1808_v11  ;;  %3822 = vrcp.f32 %v6826_v18  ;;  %vm1973_vm9 = vweird.f32 %v6826_v18 }
 0x360   :  { %v3817_v5 = vpop.eup %3816  ;;  %v1828_v30 = vadd.f32 %v3811_v21, %v1827_v48  ;;  %v1845_v31 = vmul.f32 %v6824_v20, %v6820_v62  ;;  %v1937_v48 = vpop.f32.mrf.mxu2  ;;  %vm1850_vm4 = vweird.f32 %v6824_v20 }
 0x361   :  { %v1813_v44 = vsel %vm1812_vm10, %v3809_v27, %v1809_v32  ;;  %v6831_v1 = vadd.f32 1.0, %v3817_v5  ;;  %v3819_v22 = vpop.eup %3818  ;;  %v1855_v32 = vand.u32 2147483648, %v6820_v62  ;;  %vm6850_vm7 = vmor %vm1849_vm5, %vm1850_vm4 }
 0x362   :  { %v1818_v9 = vsel %vm1815_vm14, %v1817_v41, %v1813_v44  ;;  %v1832_v11 = vsel %vm1831_vm1, %v3811_v21, %v1828_v30  ;;  %v1846_v49 = vsub.f32 1.0, %v1845_v31  ;;  %v6839_v41 = vpop.permute.xlu0 %1867  ;;  %v8802_v21 = vld [vmem:[#allocation62_spill] sm:$0xff] }
 0x363   :  { %v1837_v42 = vsel %vm1834_vm2, %v1836_v56, %v1832_v11  ;;  %v1860_v54 = vmul.f32 %v3819_v22, %v1818_v9  ;;  %3824 = vrcp.f32 %v6831_v1  ;;  %v3821_v46 = vpop.eup %3820  ;;  %8801 = vst [vmem:[#allocation179_spill] sm:$0xff] %v6839_v41  ;;  %v1962_v14 = vadd.f32 %v1937_v48, %v8802_v21 }
 0x364   :  { %v1859_v10 = vmul.f32 %v1837_v42, %v6354_v25  ;;  %v1847_v55 = vmul.f32 %v6824_v20, %v1846_v49  ;;  %v6837_v5 = vadd.f32 1.0, %v3821_v46  ;;  %vm1869_vm6 = vcmp.eq.s32.totalorder %v6839_v41, 1  ;;  %v7268_v41 = vld [vmem:[#allocation11 + $0x40] sm:$0xff] }
 0x365   :  { %v3823_v45 = vpop.eup %3822  ;;  %v1856_v11 = vor.u32 1.1754944e-38, %v1855_v32  ;;  %v1979_v49 = vand.u32 2147483648, %v6826_v18  ;;  %v1977_v48 = vand.u32 2147483647, %v6826_v18  ;;  %v1998_v46 = vand.u32 2147483648, %v6831_v1 }
 0x366   :  { %v1861_v27 = vadd.f32 %v1860_v54, %v1859_v10  ;;  %v1848_v30 = vadd.f32 %v6824_v20, %v1847_v55  ;;  %v1969_v31 = vmul.f32 %v3823_v45, %v6826_v18  ;;  %v1853_v54 = vand.u32 2147483647, %v6820_v62 }
 0x367   :  { %vm1974_vm8 = vweird.f32 %v3823_v45  ;;  %v1996_v32 = vand.u32 2147483647, %v6831_v1  ;;  %vm1992_vm1 = vweird.f32 %v6831_v1  ;;  %vm1978_vm4 = vcmp.eq.f32.partialorder %v1977_v48, 8.507059e+37 }
 0x368   :  { %3826 = vtanh.f32 %v1861_v27  ;;  %v1970_v44 = vsub.f32 1.0, %v1969_v31  ;;  %v1852_v42 = vsel %vm6850_vm7, %v6824_v20, %v1848_v30  ;;  %v6861_v62 = vsel %vm1869_vm6, %v1861_v27, %v6354_v25  ;;  %vm1975_vm2 = vmor %vm1973_vm9, %vm1974_vm8 }
 0x369   :  { %v3825_v56 = vpop.eup %3824  ;;  %3828 = vrcp.f32 %v6837_v5  ;;  %8805 = vst [vmem:[#allocation180_spill] sm:$0xff] %v6861_v62  ;;  %vm1854_vm10 = vcmp.eq.f32.partialorder %v1853_v54, 8.507059e+37  ;;  %v1980_v25 = vor.u32 1.1754944e-38, %v1979_v49  ;;  %v1999_v54 = vor.u32 1.1754944e-38, %v1998_v46  ;;  %v8839_v46 = vld [vmem:[#allocation116_spill] sm:$0xff] }
 0x36a   :  { %v1988_v22 = vmul.f32 %v3825_v56, %v6831_v1  ;;  %3830 = vtanh.f32 %v1962_v14  ;;  %v1971_v55 = vmul.f32 %v3823_v45, %v1970_v44  ;;  %vm1993_vm14 = vweird.f32 %v3825_v56 }
 0x36b   :  { %v1857_v30 = vsel %vm1854_vm10, %v1856_v11, %v1852_v42  ;;  %vm1994_vm5 = vmor %vm1992_vm1, %vm1993_vm14  ;;  %vm1997_vm7 = vcmp.eq.f32.partialorder %v1996_v32, 8.507059e+37  ;;  %vm2012_vm10 = vweird.f32 %v6837_v5  ;;  %v8840_v32 = vld [vmem:[#allocation117_spill] sm:$0xff] }
 0x36c   :  { %v1989_v10 = vsub.f32 1.0, %v1988_v22  ;;  %v1972_v20 = vadd.f32 %v3823_v45, %v1971_v55 }
 0x36e   :  { %v3827_v21 = vpop.eup %3826  ;;  %v1990_v14 = vmul.f32 %v3825_v56, %v1989_v10  ;;  %v1976_v44 = vsel %vm1975_vm2, %v3823_v45, %v1972_v20  ;;  %v6881_v10 = vpop.permute.xlu1 %2030  ;;  %v8843_v20 = vld [vmem:[#allocation120_spill] sm:$0xff] }
 0x36f   :  { %v3829_v31 = vpop.eup %3828  ;;  %v6868_v27 = vmul.f32 %v3827_v21, %v1857_v30  ;;  %v1981_v62 = vsel %vm1978_vm4, %v1980_v25, %v1976_v44  ;;  %8807 = vst [vmem:[#allocation26_spill] sm:$0xff] %v6881_v10  ;;  %vm2032_vm8 = vcmp.eq.s32.totalorder %v6881_v10, 1  ;;  %v8841_v21 = vld [vmem:[#allocation118_spill] sm:$0xff]  ;;  %v8844_v30 = vld [vmem:[#allocation121_spill] sm:$0xff]  ;;  %v8846_v25 = vld [vmem:[#allocation123_spill] sm:$0xff] }
 0x370   :  { %v1991_v22 = vadd.f32 %v3825_v56, %v1990_v14  ;;  %v2008_v18 = vmul.f32 %v3829_v31, %v6837_v5  ;;  %v3831_v9 = vpop.eup %3830  ;;  %vm2013_vm9 = vweird.f32 %v3829_v31  ;;  %v8842_v14 = vld [vmem:[#allocation119_spill] sm:$0xff]  ;;  %v8847_v44 = vld [vmem:[#allocation124_spill] sm:$0xff]  ;;  %v7262_v10 = vld [vmem:[#allocation11 + $0x70] sm:$0xff] }
 0x371   :  { %8806 = vst [vmem:[#allocation181_spill] sm:$0xff] %v6868_v27  ;;  %v6875_v11 = vsel %vm1869_vm6, %v6868_v27, %v6386_v61  ;;  %v2023_v49 = vmul.f32 %v3831_v9, %v1981_v62  ;;  %vm2014_vm14 = vmor %vm2012_vm10, %vm2013_vm9  ;;  %v8838_v62 = vld [vmem:[#allocation115_spill] sm:$0xff]  ;;  %v7271_v27 = vld [vmem:[#allocation11 + $0x48] sm:$0xff] }
 0x372   :  { %v1995_v1 = vsel %vm1994_vm5, %v3825_v56, %v1991_v22  ;;  %v2009_v42 = vsub.f32 1.0, %v2008_v18  ;;  %2059 = vmatmul.f32.vlgmr.msra.gmra.mxu0 %v6875_v11  ;;  %2079 = vmatmul.f32.vlgmr.msra.gmra.mxu1 %v6875_v11  ;;  %v8848_v22 = vld [vmem:[#allocation125_spill] sm:$0xff]  ;;  %v8849_v18 = vld [vmem:[#allocation126_spill] sm:$0xff]  ;;  %v8850_v9 = vld [vmem:[#allocation127_spill] sm:$0xff] }
 0x373   :  { %v2000_v45 = vsel %vm1997_vm7, %v1999_v54, %v1995_v1  ;;  %2099 = vmatmul.f32.vlgmr.msrb.gmra.mxu2 %v6875_v11  ;;  %2119 = vmatmul.f32.vlgmr.msrb.gmra.mxu3 %v6875_v11  ;;  %v8851_v54 = vld [vmem:[#allocation128_spill] sm:$0xff]  ;;  %v8852_v1 = vld [vmem:[#allocation129_spill] sm:$0xff] }
 0x374   :  { %v2022_v55 = vmul.f32 %v2000_v45, %v6405_v4  ;;  %v2010_v48 = vmul.f32 %v3829_v31, %v2009_v42  ;;  %2357 = vmatpush.msra.mxu0 %v6395_v53  ;;  %2377 = vmatpush.msra.mxu1 %v6398_v29  ;;  %v2018_v53 = vand.u32 2147483648, %v6837_v5  ;;  %v8854_v42 = vld [vmem:[#allocation131_spill] sm:$0xff]  ;;  %v8855_v45 = vld [vmem:[#allocation132_spill] sm:$0xff] }
 0x375   :  { %2397 = vmatpush.msrb.mxu2 %v6407_v2  ;;  %2417 = vmatpush.msrb.mxu3 %v6410_v8  ;;  %v2016_v2 = vand.u32 2147483647, %v6837_v5  ;;  %v8837_v5 = vld [vmem:[#allocation114_spill] sm:$0xff] }
 0x376   :  { %v2024_v61 = vadd.f32 %v2023_v49, %v2022_v55  ;;  %2358 = vmatpush.msra.mxu0 %v6415_v52  ;;  %2378 = vmatpush.msra.mxu1 %v6418_v17  ;;  %v2011_v56 = vadd.f32 %v3829_v31, %v2010_v48  ;;  %v8853_v49 = vld [vmem:[#allocation130_spill] sm:$0xff]  ;;  %v8856_v55 = vld [vmem:[#allocation133_spill] sm:$0xff] }
 0x377   :  { %2398 = vmatpush.msrb.mxu2 %v6427_v28  ;;  %2418 = vmatpush.msrb.mxu3 %v6430_v50  ;;  %vm2017_vm1 = vcmp.eq.f32.partialorder %v2016_v2, 8.507059e+37  ;;  %v8857_v48 = vld [vmem:[#allocation134_spill] sm:$0xff] }
 0x378   :  { %3832 = vtanh.f32 %v2024_v61  ;;  %2359 = vmatpush.msra.mxu0 %v6436_v34  ;;  %2379 = vmatpush.msra.mxu1 %v6439_v19  ;;  %v6899_v29 = vsel %vm2032_vm8, %v2024_v61, %v6405_v4  ;;  %v2015_v8 = vsel %vm2014_vm14, %v3829_v31, %v2011_v56  ;;  %v2019_v4 = vor.u32 1.1754944e-38, %v2018_v53  ;;  %v8809_v34 = vld [vmem:[#allocation77_spill] sm:$0xff]  ;;  %v8810_v19 = vld [vmem:[#allocation87_spill] sm:$0xff]  ;;  %v8845_v31 = vld [vmem:[#allocation122_spill] sm:$0xff] }
 0x379   :  { %2399 = vmatpush.msrb.mxu2 %v6442_v15  ;;  %2419 = vmatpush.msrb.mxu3 %v6445_v23  ;;  %v8811_v15 = vld [vmem:[#allocation88_spill] sm:$0xff]  ;;  %v8812_v23 = vld [vmem:[#allocation89_spill] sm:$0xff]  ;;  %v8858_v61 = vld [vmem:[#allocation135_spill] sm:$0xff] }
 0x37a   :  { %2360 = vmatpush.msra.mxu0 %v6448_v43  ;;  %2380 = vmatpush.msra.mxu1 %v6451_v33  ;;  %v2020_v17 = vsel %vm2017_vm1, %v2019_v4, %v2015_v8  ;;  %v8813_v43 = vld [vmem:[#allocation90_spill] sm:$0xff]  ;;  %v8814_v33 = vld [vmem:[#allocation91_spill] sm:$0xff]  ;;  %v8859_v56 = vld [vmem:[#allocation136_spill] sm:$0xff] }
 0x37b   :  { %2400 = vmatpush.msrb.mxu2 %v6454_v36  ;;  %2420 = vmatpush.msrb.mxu3 %v6457_v57  ;;  %v8815_v36 = vld [vmem:[#allocation92_spill] sm:$0xff]  ;;  %v8816_v57 = vld [vmem:[#allocation93_spill] sm:$0xff]  ;;  %v8861_v2 = vld [vmem:[#allocation138_spill] sm:$0xff]  ;;  %8938 = vst [vmem:[#allocation90_spill] sm:$0xff] %v7262_v10 }
 0x37c   :  { %2361 = vmatpush.msra.mxu0 %v6462_v51  ;;  %2381 = vmatpush.msra.mxu1 %v6465_v0  ;;  %v8817_v51 = vld [vmem:[#allocation94_spill] sm:$0xff]  ;;  %v8818_v0 = vld [vmem:[#allocation95_spill] sm:$0xff]  ;;  %v8860_v53 = vld [vmem:[#allocation137_spill] sm:$0xff]  ;;  %8940 = vst [vmem:[#allocation92_spill] sm:$0xff] %v7268_v41 }
 0x37d   :  { %2401 = vmatpush.msrb.mxu2 %v6468_v6  ;;  %2421 = vmatpush.msrb.mxu3 %v6471_v38  ;;  %v8819_v6 = vld [vmem:[#allocation96_spill] sm:$0xff]  ;;  %v8820_v38 = vld [vmem:[#allocation97_spill] sm:$0xff]  ;;  %v8862_v8 = vld [vmem:[#allocation139_spill] sm:$0xff]  ;;  %8941 = vst [vmem:[#allocation93_spill] sm:$0xff] %v7271_v27 }
 0x37e   :  { %v3833_v52 = vpop.eup %3832  ;;  %2362 = vmatpush.msra.mxu0 %v6480_v60  ;;  %2382 = vmatpush.msra.mxu1 %v6483_v63  ;;  %v8822_v60 = vld [vmem:[#allocation99_spill] sm:$0xff]  ;;  %v8823_v63 = vld [vmem:[#allocation100_spill] sm:$0xff] }
 0x37f   :  { %v6915_v28 = vmul.f32 %v3833_v52, %v2020_v17  ;;  %2402 = vmatpush.msrb.mxu2 %v6490_v26  ;;  %2422 = vmatpush.msrb.mxu3 %v6493_v35  ;;  %v8824_v26 = vld [vmem:[#allocation101_spill] sm:$0xff]  ;;  %v8825_v35 = vld [vmem:[#allocation102_spill] sm:$0xff]  ;;  %v8863_v4 = vld [vmem:[#allocation140_spill] sm:$0xff] }
 0x380   :  { %2363 = vmatpush.msra.mxu0 %v6496_v7  ;;  %2383 = vmatpush.msra.mxu1 %v6499_v24  ;;  %v8826_v7 = vld [vmem:[#allocation103_spill] sm:$0xff]  ;;  %v8827_v24 = vld [vmem:[#allocation104_spill] sm:$0xff]  ;;  %v8864_v52 = vld [vmem:[#allocation141_spill] sm:$0xff] }
 0x381   :  { %8808 = vst [vmem:[#allocation86_spill] sm:$0xff] %v6915_v28  ;;  %v6925_v50 = vsel %vm2032_vm8, %v6915_v28, %v6478_v59  ;;  %2403 = vmatpush.msrb.mxu2 %v6502_v47  ;;  %2423 = vmatpush.msrb.mxu3 %v6505_v3  ;;  %v8821_v59 = vld [vmem:[#allocation98_spill] sm:$0xff]  ;;  %v8828_v47 = vld [vmem:[#allocation105_spill] sm:$0xff]  ;;  %v7256_v28 = vld [vmem:[#allocation11 + $0x60] sm:$0xff] }
 0x382   :  { %2216 = vmatmul.f32.vlgmr.msrb.gmra.mxu0 %v6925_v50  ;;  %2236 = vmatmul.f32.vlgmr.msrb.gmra.mxu1 %v6925_v50  ;;  %v8829_v3 = vld [vmem:[#allocation106_spill] sm:$0xff]  ;;  %8936 = vst [vmem:[#allocation88_spill] sm:$0xff] %v7256_v28 }
 0x383   :  { %2256 = vmatmul.f32.vlgmr.msra.gmra.mxu2 %v6925_v50  ;;  %2276 = vmatmul.f32.vlgmr.msra.gmra.mxu3 %v6925_v50  ;;  %v8865_v17 = vld [vmem:[#allocation142_spill] sm:$0xff] }
 0x384   :  { %2364 = vmatpush.msra.mxu0 %v6508_v39  ;;  %2384 = vmatpush.msra.mxu1 %v6511_v12  ;;  %v8830_v39 = vld [vmem:[#allocation107_spill] sm:$0xff]  ;;  %v8831_v12 = vld [vmem:[#allocation108_spill] sm:$0xff] }
 0x385   :  { %2404 = vmatpush.msrb.mxu2 %v6514_v58  ;;  %2424 = vmatpush.msrb.mxu3 %v6517_v13  ;;  %v8832_v58 = vld [vmem:[#allocation109_spill] sm:$0xff]  ;;  %v8833_v13 = vld [vmem:[#allocation110_spill] sm:$0xff] }
 0x386   :  { %2365 = vmatpush.msra.mxu0 %v6520_v16  ;;  %2385 = vmatpush.msra.mxu1 %v6523_v40  ;;  %v8834_v16 = vld [vmem:[#allocation111_spill] sm:$0xff]  ;;  %v8835_v40 = vld [vmem:[#allocation112_spill] sm:$0xff] }
 0x387   :  { %2405 = vmatpush.msrb.mxu2 %v6526_v37  ;;  %2425 = vmatpush.msrb.mxu3 %v8809_v34  ;;  %v8836_v37 = vld [vmem:[#allocation113_spill] sm:$0xff]  ;;  %v8866_v34 = vld [vmem:[#allocation143_spill] sm:$0xff] }
 0x388   :  { %2366 = vmatpush.msra.mxu0 %v8810_v19  ;;  %2386 = vmatpush.msra.mxu1 %v8811_v15  ;;  %v8867_v19 = vld [vmem:[#allocation144_spill] sm:$0xff]  ;;  %v8868_v15 = vld [vmem:[#allocation145_spill] sm:$0xff] }
 0x389   :  { %2406 = vmatpush.msrb.mxu2 %v8812_v23  ;;  %2426 = vmatpush.msrb.mxu3 %v8813_v43  ;;  %v8869_v23 = vld [vmem:[#allocation146_spill] sm:$0xff]  ;;  %v8870_v43 = vld [vmem:[#allocation147_spill] sm:$0xff] }
 0x38a   :  { %2367 = vmatpush.msra.mxu0 %v8814_v33  ;;  %2387 = vmatpush.msra.mxu1 %v8815_v36  ;;  %v8871_v33 = vld [vmem:[#allocation148_spill] sm:$0xff]  ;;  %v8872_v36 = vld [vmem:[#allocation149_spill] sm:$0xff] }
 0x38b   :  { %2407 = vmatpush.msrb.mxu2 %v8816_v57  ;;  %2427 = vmatpush.msrb.mxu3 %v8817_v51  ;;  %v8873_v57 = vld [vmem:[#allocation150_spill] sm:$0xff]  ;;  %v8874_v51 = vld [vmem:[#allocation151_spill] sm:$0xff] }
 0x38c   :  { %2368 = vmatpush.msra.mxu0 %v8818_v0  ;;  %2388 = vmatpush.msra.mxu1 %v8819_v6  ;;  %v8875_v0 = vld [vmem:[#allocation152_spill] sm:$0xff]  ;;  %v8876_v6 = vld [vmem:[#allocation153_spill] sm:$0xff] }
 0x38d   :  { %2408 = vmatpush.msrb.mxu2 %v8820_v38  ;;  %2428 = vmatpush.msrb.mxu3 %v8821_v59  ;;  %v8877_v38 = vld [vmem:[#allocation154_spill] sm:$0xff]  ;;  %v8878_v59 = vld [vmem:[#allocation155_spill] sm:$0xff] }
 0x38e   :  { %2369 = vmatpush.msra.mxu0 %v8822_v60  ;;  %2389 = vmatpush.msra.mxu1 %v8823_v63  ;;  %v8879_v60 = vld [vmem:[#allocation156_spill] sm:$0xff]  ;;  %v8880_v63 = vld [vmem:[#allocation157_spill] sm:$0xff] }
 0x38f   :  { %2409 = vmatpush.msrb.mxu2 %v8824_v26  ;;  %2429 = vmatpush.msrb.mxu3 %v8825_v35  ;;  %v8881_v26 = vld [vmem:[#allocation158_spill] sm:$0xff]  ;;  %v8882_v35 = vld [vmem:[#allocation159_spill] sm:$0xff] }
 0x390   :  { %2370 = vmatpush.msra.mxu0 %v8826_v7  ;;  %2390 = vmatpush.msra.mxu1 %v8827_v24  ;;  %v8883_v7 = vld [vmem:[#allocation160_spill] sm:$0xff]  ;;  %v8884_v24 = vld [vmem:[#allocation161_spill] sm:$0xff] }
 0x391   :  { %2410 = vmatpush.msrb.mxu2 %v8828_v47  ;;  %2430 = vmatpush.msrb.mxu3 %v8829_v3  ;;  %v8885_v47 = vld [vmem:[#allocation162_spill] sm:$0xff]  ;;  %v8886_v3 = vld [vmem:[#allocation163_spill] sm:$0xff] }
 0x392   :  { %2371 = vmatpush.msra.mxu0 %v8830_v39  ;;  %2391 = vmatpush.msra.mxu1 %v8831_v12  ;;  %v8887_v39 = vld [vmem:[#allocation164_spill] sm:$0xff]  ;;  %v8888_v12 = vld [vmem:[#allocation165_spill] sm:$0xff] }
 0x393   :  { %2411 = vmatpush.msrb.mxu2 %v8832_v58  ;;  %2431 = vmatpush.msrb.mxu3 %v8833_v13  ;;  %v8889_v58 = vld [vmem:[#allocation166_spill] sm:$0xff]  ;;  %v8890_v13 = vld [vmem:[#allocation167_spill] sm:$0xff] }
 0x394   :  { %2372 = vmatpush.msra.mxu0 %v8834_v16  ;;  %2392 = vmatpush.msra.mxu1 %v8835_v40  ;;  %v8891_v16 = vld [vmem:[#allocation168_spill] sm:$0xff]  ;;  %v8892_v40 = vld [vmem:[#allocation169_spill] sm:$0xff] }
 0x395   :  { %2412 = vmatpush.msrb.mxu2 %v8836_v37  ;;  %2432 = vmatpush.msrb.mxu3 %v8837_v5  ;;  %v8893_v37 = vld [vmem:[#allocation170_spill] sm:$0xff]  ;;  %v8894_v5 = vld [vmem:[#allocation171_spill] sm:$0xff] }
 0x396   :  { %2514 = vmatpush.msrb.mxu0 %v8838_v62  ;;  %2534 = vmatpush.msrb.mxu1 %v8839_v46  ;;  %v8895_v62 = vld [vmem:[#allocation172_spill] sm:$0xff]  ;;  %v8896_v46 = vld [vmem:[#allocation173_spill] sm:$0xff] }
 0x397   :  { %2554 = vmatpush.msra.mxu2 %v8840_v32  ;;  %2574 = vmatpush.msra.mxu3 %v8841_v21  ;;  %v8897_v32 = vld [vmem:[#allocation174_spill] sm:$0xff]  ;;  %v8898_v21 = vld [vmem:[#allocation175_spill] sm:$0xff] }
 0x398   :  { %2515 = vmatpush.msrb.mxu0 %v8842_v14  ;;  %2535 = vmatpush.msrb.mxu1 %v8843_v20  ;;  %v8899_v14 = vld [vmem:[#allocation176_spill] sm:$0xff]  ;;  %v8900_v20 = vld [vmem:[#allocation177_spill] sm:$0xff] }
 0x399   :  { %2555 = vmatpush.msra.mxu2 %v8844_v30  ;;  %2575 = vmatpush.msra.mxu3 %v8845_v31  ;;  %v8901_v30 = vld [vmem:[#allocation178_spill] sm:$0xff]  ;;  %v8902_v31 = vld [vmem:[#allocation61_spill] sm:$0xff] }
 0x39a   :  { %2516 = vmatpush.msrb.mxu0 %v8846_v25  ;;  %2536 = vmatpush.msrb.mxu1 %v8847_v44  ;;  %v8903_v25 = vld [vmem:[#allocation78_spill] sm:$0xff] }
 0x39b   :  { %2556 = vmatpush.msra.mxu2 %v8848_v22  ;;  %2576 = vmatpush.msra.mxu3 %v8849_v18  ;;  %v229_v44 = vadd.f32 %v8903_v25, %v8902_v31  ;;  %v8904_v22 = vld [vmem:[#allocation58_spill] sm:$0xff]  ;;  %v8905_v18 = vld [vmem:[#allocation79_spill] sm:$0xff] }
 0x39c   :  { %2517 = vmatpush.msrb.mxu0 %v8850_v9  ;;  %2537 = vmatpush.msrb.mxu1 %v8851_v54  ;;  %v270_v9 = vadd.f32 %v8905_v18, %v8904_v22 }
 0x39d   :  { %2557 = vmatpush.msra.mxu2 %v8852_v1  ;;  %2577 = vmatpush.msra.mxu3 %v8853_v49 }
 0x39e   :  { %2518 = vmatpush.msrb.mxu0 %v8854_v42  ;;  %2538 = vmatpush.msrb.mxu1 %v8855_v45 }
 0x39f   :  { %2558 = vmatpush.msra.mxu2 %v8856_v55  ;;  %2578 = vmatpush.msra.mxu3 %v8857_v48  ;;  %v8906_v48 = vld [vmem:[#allocation64_spill] sm:$0xff] }
 0x3a0   :  { %2519 = vmatpush.msrb.mxu0 %v8858_v61  ;;  %2539 = vmatpush.msrb.mxu1 %v8859_v56  ;;  %v8907_v61 = vld [vmem:[#allocation34_spill] sm:$0xff] }
 0x3a1   :  { %2559 = vmatpush.msra.mxu2 %v8860_v53  ;;  %2579 = vmatpush.msra.mxu3 %v8861_v2  ;;  %v352_v56 = vadd.f32 %v8907_v61, %v8906_v48 }
 0x3a2   :  { %2520 = vmatpush.msrb.mxu0 %v8862_v8  ;;  %2540 = vmatpush.msrb.mxu1 %v8863_v4 }
 0x3a3   :  { %2560 = vmatpush.msra.mxu2 %v8864_v52  ;;  %2580 = vmatpush.msra.mxu3 %v8865_v17 }
 0x3a4   :  { %2521 = vmatpush.msrb.mxu0 %v8866_v34  ;;  %2541 = vmatpush.msrb.mxu1 %v8867_v19  ;;  %v8908_v19 = vld [vmem:[#allocation55_spill] sm:$0xff] }
 0x3a5   :  { %2561 = vmatpush.msra.mxu2 %v8868_v15  ;;  %2581 = vmatpush.msra.mxu3 %v8869_v23  ;;  %v8909_v15 = vld [vmem:[#allocation43_spill] sm:$0xff] }
 0x3a6   :  { %2522 = vmatpush.msrb.mxu0 %v8870_v43  ;;  %2542 = vmatpush.msrb.mxu1 %v8871_v33  ;;  %v440_v23 = vadd.f32 %v8909_v15, %v8908_v19  ;;  %v8910_v43 = vld [vmem:[#allocation65_spill] sm:$0xff]  ;;  %v8911_v33 = vld [vmem:[#allocation42_spill] sm:$0xff] }
 0x3a7   :  { %2562 = vmatpush.msra.mxu2 %v8872_v36  ;;  %2582 = vmatpush.msra.mxu3 %v8873_v57  ;;  %v481_v36 = vadd.f32 %v8911_v33, %v8910_v43 }
 0x3a8   :  { %2523 = vmatpush.msrb.mxu0 %v8874_v51  ;;  %2543 = vmatpush.msrb.mxu1 %v8875_v0 }
 0x3a9   :  { %2563 = vmatpush.msra.mxu2 %v8876_v6  ;;  %2583 = vmatpush.msra.mxu3 %v8877_v38 }
 0x3aa   :  { %2524 = vmatpush.msrb.mxu0 %v8878_v59  ;;  %2544 = vmatpush.msrb.mxu1 %v8879_v60  ;;  %v8912_v60 = vld [vmem:[#allocation66_spill] sm:$0xff] }
 0x3ab   :  { %2564 = vmatpush.msra.mxu2 %v8880_v63  ;;  %2584 = vmatpush.msra.mxu3 %v8881_v26  ;;  %v8913_v63 = vld [vmem:[#allocation30_spill] sm:$0xff] }
 0x3ac   :  { %2525 = vmatpush.msrb.mxu0 %v8882_v35  ;;  %2545 = vmatpush.msrb.mxu1 %v8883_v7  ;;  %v311_v26 = vadd.f32 %v8913_v63, %v8912_v60  ;;  %v8916_v63 = vld [vmem:[#allocation52_spill] sm:$0xff] }
 0x3ad   :  { %2565 = vmatpush.msra.mxu2 %v8884_v24  ;;  %2585 = vmatpush.msra.mxu3 %v8885_v47 }
 0x3ae   :  { %2526 = vmatpush.msrb.mxu0 %v8886_v3  ;;  %2546 = vmatpush.msrb.mxu1 %v8887_v39 }
 0x3af   :  { %2566 = vmatpush.msra.mxu2 %v8888_v12  ;;  %2586 = vmatpush.msra.mxu3 %v8889_v58 }
 0x3b0   :  { %2527 = vmatpush.msrb.mxu0 %v8890_v13  ;;  %2547 = vmatpush.msrb.mxu1 %v8891_v16 }
 0x3b1   :  { %2567 = vmatpush.msra.mxu2 %v8892_v40  ;;  %2587 = vmatpush.msra.mxu3 %v8893_v37 }
 0x3b2   :  { %2528 = vmatpush.msrb.mxu0 %v8894_v5  ;;  %2548 = vmatpush.msrb.mxu1 %v8895_v62  ;;  %v8914_v62 = vld [vmem:[#allocation56_spill] sm:$0xff] }
 0x3b3   :  { %2568 = vmatpush.msra.mxu2 %v8896_v46  ;;  %2588 = vmatpush.msra.mxu3 %v8897_v32 }
 0x3b4   :  { %2529 = vmatpush.msrb.mxu0 %v8898_v21  ;;  %2549 = vmatpush.msrb.mxu1 %v8899_v14 }
 0x3b5   :  { %2569 = vmatpush.msra.mxu2 %v8900_v20  ;;  %2589 = vmatpush.msra.mxu3 %v8901_v30 }
 0x3ef   :  { %v2060_v54 = vpop.f32.mrf.mxu0  ;;  %v2080_v1 = vpop.f32.mrf.mxu1 }
 0x3f0   :  { %v2123_v49 = vadd.f32 %v2060_v54, %v229_v44  ;;  %v2124_v42 = vadd.f32 %v2080_v1, %v270_v9 }
 0x3f2   :  { %v3644_v45 = vmul.f32 -1.442695, %v2123_v49  ;;  %v3645_v55 = vmul.f32 -1.442695, %v2124_v42 }
 0x3f4   :  { %3834 = vpow2.f32 %v3644_v45 }
 0x3f5   :  { %3836 = vpow2.f32 %v3645_v55 }
 0x3f6   :  { %v2120_v53 = vpop.f32.mrf.mxu3  ;;  %v2100_v0 = vpop.f32.mrf.mxu2 }
 0x3f7   :  { %v2126_v2 = vadd.f32 %v2120_v53, %v352_v56  ;;  %v2125_v3 = vadd.f32 %v2100_v0, %v311_v26 }
 0x3f9   :  { %v3646_v8 = vmul.f32 -1.442695, %v2126_v2 }
 0x3fa   :  { %v3835_v4 = vpop.eup %3834 }
 0x3fb   :  { %v3837_v52 = vpop.eup %3836  ;;  %v2130_v17 = vadd.f32 1.0, %v3835_v4  ;;  %3838 = vpow2.f32 %v3646_v8 }
 0x3fc   :  { %v2149_v34 = vadd.f32 1.0, %v3837_v52 }
 0x3fd   :  { %3840 = vrcp.f32 %v2130_v17  ;;  %v2140_v16 = vand.u32 2147483647, %v2130_v17  ;;  %v2142_v5 = vand.u32 2147483648, %v2130_v17  ;;  %vm2136_vm7 = vweird.f32 %v2130_v17 }
 0x3fe   :  { %3842 = vrcp.f32 %v2149_v34  ;;  %v2161_v32 = vand.u32 2147483648, %v2149_v34  ;;  %v2159_v14 = vand.u32 2147483647, %v2149_v34  ;;  %vm2155_vm5 = vweird.f32 %v2149_v34 }
 0x3ff   :  { %v2217_v57 = vpop.f32.mrf.mxu0  ;;  %v2237_v51 = vpop.f32.mrf.mxu1  ;;  %vm2141_vm9 = vcmp.eq.f32.partialorder %v2140_v16, 8.507059e+37  ;;  %v2143_v9 = vor.u32 1.1754944e-38, %v2142_v5 }
 0x400   :  { %v2280_v6 = vadd.f32 %v2217_v57, %v440_v23  ;;  %v2281_v38 = vadd.f32 %v2237_v51, %v481_v36  ;;  %v2162_v42 = vor.u32 1.1754944e-38, %v2161_v32  ;;  %vm2160_vm1 = vcmp.eq.f32.partialorder %v2159_v14, 8.507059e+37 }
 0x401   :  { %v3839_v59 = vpop.eup %3838 }
 0x402   :  { %v7045_v35 = vadd.f32 1.0, %v3839_v59  ;;  %v3647_v7 = vmul.f32 -1.442695, %v2280_v6  ;;  %v3648_v24 = vmul.f32 -1.442695, %v2281_v38 }
 0x403   :  { %v3841_v47 = vpop.eup %3840 }
 0x404   :  { %v3843_v39 = vpop.eup %3842  ;;  %v2132_v12 = vmul.f32 %v3841_v47, %v2130_v17  ;;  %3844 = vrcp.f32 %v7045_v35  ;;  %vm2137_vm2 = vweird.f32 %v3841_v47  ;;  %v8915_v17 = vld [vmem:[#allocation180_spill] sm:$0xff]  ;;  %v2181_v57 = vand.u32 2147483648, %v7045_v35 }
 0x405   :  { %v2151_v58 = vmul.f32 %v3843_v39, %v2149_v34  ;;  %3846 = vpow2.f32 %v3647_v7  ;;  %vm2156_vm4 = vweird.f32 %v3843_v39  ;;  %vm2138_vm10 = vmor %vm2136_vm7, %vm2137_vm2  ;;  %v2179_v6 = vand.u32 2147483647, %v7045_v35 }
 0x406   :  { %v2133_v13 = vsub.f32 1.0, %v2132_v12  ;;  %3848 = vpow2.f32 %v3648_v24  ;;  %v2277_v40 = vpop.f32.mrf.mxu3  ;;  %vm2157_vm14 = vmor %vm2155_vm5, %vm2156_vm4  ;;  %v2257_v36 = vpop.f32.mrf.mxu2  ;;  %vm2175_vm4 = vweird.f32 %v7045_v35  ;;  %v2182_v12 = vor.u32 1.1754944e-38, %v2181_v57 }
 0x407   :  { %v2152_v37 = vsub.f32 1.0, %v2151_v58  ;;  %3850 = vtanh.f32 %v2125_v3  ;;  %v2283_v46 = vadd.f32 %v2277_v40, %v8914_v62  ;;  %v2282_v26 = vadd.f32 %v2257_v36, %v8916_v63  ;;  %v7110_v36 = vld [vmem:[#allocation11 + $0x1a8] sm:$0xff] }
 0x408   :  { %v2134_v21 = vmul.f32 %v3841_v47, %v2133_v13  ;;  %vm2180_vm7 = vcmp.eq.f32.partialorder %v2179_v6, 8.507059e+37  ;;  %v7117_v6 = vld [vmem:[#allocation11 + $0x1b8] sm:$0xff] }
 0x409   :  { %v2153_v20 = vmul.f32 %v3843_v39, %v2152_v37  ;;  %v3649_v30 = vmul.f32 -1.442695, %v2283_v46 }
 0x40a   :  { %v3845_v25 = vpop.eup %3844  ;;  %v2135_v44 = vadd.f32 %v3841_v47, %v2134_v21 }
 0x40b   :  { %v3847_v18 = vpop.eup %3846  ;;  %v2154_v54 = vadd.f32 %v3843_v39, %v2153_v20  ;;  %v2171_v1 = vmul.f32 %v3845_v25, %v7045_v35  ;;  %3852 = vpow2.f32 %v3649_v30  ;;  %vm2176_vm2 = vweird.f32 %v3845_v25 }
 0x40c   :  { %v3849_v49 = vpop.eup %3848  ;;  %v2139_v45 = vsel %vm2138_vm10, %v3841_v47, %v2135_v44  ;;  %v2287_v55 = vadd.f32 1.0, %v3847_v18  ;;  %vm2177_vm5 = vmor %vm2175_vm4, %vm2176_vm2 }
 0x40d   :  { %v3851_v61 = vpop.eup %3850  ;;  %v2144_v56 = vsel %vm2141_vm9, %v2143_v9, %v2139_v45  ;;  %v2158_v53 = vsel %vm2157_vm14, %v3843_v39, %v2154_v54  ;;  %v2172_v2 = vsub.f32 1.0, %v2171_v1  ;;  %v2306_v8 = vadd.f32 1.0, %v3849_v49 }
 0x40e   :  { %v2163_v4 = vsel %vm2160_vm1, %v2162_v42, %v2158_v53  ;;  %v2186_v52 = vmul.f32 %v3851_v61, %v2144_v56  ;;  %3854 = vrcp.f32 %v2287_v55  ;;  %v2299_v16 = vand.u32 2147483648, %v2287_v55  ;;  %v7082_v61 = vld [vmem:[#allocation11 + $0x1e8] sm:$0xff] }
 0x40f   :  { %v2185_v34 = vmul.f32 %v2163_v4, %v8915_v17  ;;  %v2173_v15 = vmul.f32 %v3845_v25, %v2172_v2  ;;  %3856 = vrcp.f32 %v2306_v8  ;;  %v2318_v13 = vand.u32 2147483648, %v2306_v8  ;;  %v7087_v2 = vld [vmem:[#allocation11 + $0x1f0] sm:$0xff]  ;;  %v7093_v4 = vld [vmem:[#allocation11 + $0x1c0] sm:$0xff] }
 0x410   :  { %v2297_v35 = vand.u32 2147483647, %v2287_v55  ;;  %v2316_v46 = vand.u32 2147483647, %v2306_v8  ;;  %vm2312_vm14 = vweird.f32 %v2306_v8  ;;  %vm2293_vm1 = vweird.f32 %v2287_v55 }
 0x411   :  { %v3853_v23 = vpop.eup %3852  ;;  %v2187_v33 = vadd.f32 %v2186_v52, %v2185_v34  ;;  %v2174_v51 = vadd.f32 %v3845_v25, %v2173_v15  ;;  %v2300_v20 = vor.u32 1.1754944e-38, %v2299_v16  ;;  %v2319_v18 = vor.u32 1.1754944e-38, %v2318_v13  ;;  %v7096_v52 = vld [vmem:[#allocation11 + $0x1c8] sm:$0xff]  ;;  %v7099_v34 = vld [vmem:[#allocation11 + $0x1d0] sm:$0xff]  ;;  %v7102_v15 = vld [vmem:[#allocation11 + $0x1d8] sm:$0xff] }
 0x412   :  { %v7052_v0 = vadd.f32 1.0, %v3853_v23  ;;  %v7157_v13 = vld [vmem:[#allocation11 + $0x178] sm:$0xff]  ;;  %v7160_v16 = vld [vmem:[#allocation11 + $0x140] sm:$0xff] }
 0x413   :  { %3858 = vtanh.f32 %v2187_v33  ;;  %v7058_v38 = vsel %vm2032_vm8, %v2187_v33, %v8915_v17  ;;  %v2178_v3 = vsel %vm2177_vm5, %v3845_v25, %v2174_v51  ;;  %vm2298_vm5 = vcmp.eq.f32.partialorder %v2297_v35, 8.507059e+37  ;;  %v7107_v33 = vld [vmem:[#allocation11 + $0x1a0] sm:$0xff]  ;;  %v7114_v51 = vld [vmem:[#allocation11 + $0x1b0] sm:$0xff] }
 0x414   :  { %v3855_v59 = vpop.eup %3854  ;;  %3860 = vrcp.f32 %v7052_v0  ;;  %v2183_v5 = vsel %vm2180_vm7, %v2182_v12, %v2178_v3  ;;  %vm2317_vm7 = vcmp.eq.f32.partialorder %v2316_v46, 8.507059e+37  ;;  %v2338_v57 = vand.u32 2147483648, %v7052_v0  ;;  %v7148_v3 = vld [vmem:[#allocation11 + $0x160] sm:$0xff] }
 0x415   :  { %v3857_v7 = vpop.eup %3856  ;;  %v2289_v24 = vmul.f32 %v3855_v59, %v2287_v55  ;;  %3862 = vtanh.f32 %v2282_v26  ;;  %vm2294_vm9 = vweird.f32 %v3855_v59  ;;  %v7079_v55 = vld [vmem:[#allocation11 + $0x1e0] sm:$0xff]  ;;  %v2336_v63 = vand.u32 2147483647, %v7052_v0 }
 0x416   :  { %v2308_v47 = vmul.f32 %v3857_v7, %v2306_v8  ;;  %vm2313_vm10 = vweird.f32 %v3857_v7  ;;  %vm2295_vm2 = vmor %vm2293_vm1, %vm2294_vm9  ;;  %v7090_v8 = vld [vmem:[#allocation11 + $0x1f8] sm:$0xff]  ;;  %v7127_v26 = vld [vmem:[#allocation11 + $0x180] sm:$0xff]  ;;  %v2339_v12 = vor.u32 1.1754944e-38, %v2338_v57 }
 0x417   :  { %v2290_v39 = vsub.f32 1.0, %v2289_v24  ;;  %vm2314_vm4 = vmor %vm2312_vm14, %vm2313_vm10  ;;  %vm2332_vm10 = vweird.f32 %v7052_v0  ;;  %vm2337_vm1 = vcmp.eq.f32.partialorder %v2336_v63, 8.507059e+37  ;;  %v7235_v57 = vld [vmem:[#allocation11 + $0xa8] sm:$0xff]  ;;  %v7238_v63 = vld [vmem:[#allocation11 + $0xb0] sm:$0xff] }
 0x418   :  { %v2309_v58 = vsub.f32 1.0, %v2308_v47  ;;  %v7142_v47 = vld [vmem:[#allocation11 + $0x198] sm:$0xff]  ;;  %8929 = vst [vmem:[#allocation41_spill] sm:$0xff] %v7235_v57 }
 0x419   :  { %v3859_v40 = vpop.eup %3858  ;;  %v2291_v37 = vmul.f32 %v3855_v59, %v2290_v39  ;;  %v7151_v39 = vld [vmem:[#allocation11 + $0x168] sm:$0xff]  ;;  %8930 = vst [vmem:[#allocation46_spill] sm:$0xff] %v7238_v63  ;;  %v7241_v24 = vld [vmem:[#allocation11 + $0xb8] sm:$0xff] }
 0x41a   :  { %v2310_v62 = vmul.f32 %v3857_v7, %v2309_v58  ;;  %v7063_v32 = vmul.f32 %v3859_v40, %v2183_v5  ;;  %v7065_v21 = vpop.eup %3860  ;;  %v7154_v58 = vld [vmem:[#allocation11 + $0x170] sm:$0xff]  ;;  %v7163_v40 = vld [vmem:[#allocation11 + $0x148] sm:$0xff]  ;;  %8931 = vst [vmem:[#allocation29_spill] sm:$0xff] %v7241_v24 }
 0x41b   :  { %v2292_v14 = vadd.f32 %v3855_v59, %v2291_v37  ;;  %v2328_v25 = vmul.f32 %v7065_v21, %v7052_v0  ;;  %v3863_v54 = vpop.eup %3862  ;;  %vm2333_vm9 = vweird.f32 %v7065_v21  ;;  %v7166_v5 = vld [vmem:[#allocation11 + $0x150] sm:$0xff] }
 0x41c   :  { %8917 = vst [vmem:[#allocation36_spill] sm:$0xff] %v7063_v32  ;;  %v2311_v30 = vadd.f32 %v3857_v7, %v2310_v62  ;;  %v7073_v44 = vsel %vm2032_vm8, %v7063_v32, %v6875_v11  ;;  %vm7135_vm14 = vmor %vm2332_vm10, %vm2333_vm9  ;;  %v7169_v62 = vld [vmem:[#allocation11 + $0x158] sm:$0xff] }
 0x41d   :  { %v2296_v9 = vsel %vm2295_vm2, %v3855_v59, %v2292_v14  ;;  %2373 = vmatmul.f32.vlgmr.msra.gmra.mxu0 %v7073_v44  ;;  %2393 = vmatmul.f32.vlgmr.msra.gmra.mxu1 %v7073_v44  ;;  %v2329_v42 = vsub.f32 1.0, %v2328_v25  ;;  %v7177_v14 = vld [vmem:[#allocation11 + $0x128] sm:$0xff]  ;;  %v7265_v32 = vld [vmem:[#allocation11 + $0x78] sm:$0xff] }
 0x41e   :  { %v2301_v1 = vsel %vm2298_vm5, %v2300_v20, %v2296_v9  ;;  %v2315_v49 = vsel %vm2314_vm4, %v3857_v7, %v2311_v30  ;;  %2413 = vmatmul.f32.vlgmr.msrb.gmra.mxu2 %v7073_v44  ;;  %2433 = vmatmul.f32.vlgmr.msrb.gmra.mxu3 %v7073_v44  ;;  %v7130_v7 = vld [vmem:[#allocation11 + $0x188] sm:$0xff]  ;;  %v7180_v20 = vld [vmem:[#allocation11 + $0x130] sm:$0xff]  ;;  %v7183_v30 = vld [vmem:[#allocation11 + $0x138] sm:$0xff]  ;;  %8939 = vst [vmem:[#allocation91_spill] sm:$0xff] %v7265_v32 }
 0x41f   :  { %v2320_v45 = vsel %vm2317_vm7, %v2319_v18, %v2315_v49  ;;  %v2343_v11 = vmul.f32 %v3863_v54, %v2301_v1  ;;  %2671 = vmatpush.msra.mxu0 %v7079_v55  ;;  %2691 = vmatpush.msra.mxu1 %v7082_v61  ;;  %v2330_v53 = vmul.f32 %v7065_v21, %v2329_v42  ;;  %v7192_v18 = vld [vmem:[#allocation11 + $0x100] sm:$0xff]  ;;  %v7195_v9 = vld [vmem:[#allocation11 + $0x108] sm:$0xff]  ;;  %v7202_v54 = vld [vmem:[#allocation11 + $0x110] sm:$0xff] }
 0x420   :  { %v2342_v56 = vmul.f32 %v2320_v45, %v6899_v29  ;;  %2711 = vmatpush.msrb.mxu2 %v7087_v2  ;;  %2731 = vmatpush.msrb.mxu3 %v7090_v8  ;;  %v7208_v1 = vld [vmem:[#allocation11 + $0xe0] sm:$0xff]  ;;  %v7211_v49 = vld [vmem:[#allocation11 + $0xe8] sm:$0xff]  ;;  %v7214_v42 = vld [vmem:[#allocation11 + $0xf0] sm:$0xff] }
 0x421   :  { %2672 = vmatpush.msra.mxu0 %v7093_v4  ;;  %2692 = vmatpush.msra.mxu1 %v7096_v52  ;;  %v2331_v23 = vadd.f32 %v7065_v21, %v2330_v53  ;;  %8921 = vst [vmem:[#allocation40_spill] sm:$0xff] %v7208_v1  ;;  %v7217_v45 = vld [vmem:[#allocation11 + $0xf8] sm:$0xff]  ;;  %v7226_v53 = vld [vmem:[#allocation11 + $0xd0] sm:$0xff] }
 0x422   :  { %v2344_v17 = vadd.f32 %v2343_v11, %v2342_v56  ;;  %2712 = vmatpush.msrb.mxu2 %v7099_v34  ;;  %2732 = vmatpush.msrb.mxu3 %v7102_v15  ;;  %8922 = vst [vmem:[#allocation35_spill] sm:$0xff] %v7214_v42  ;;  %v7220_v11 = vld [vmem:[#allocation11 + $0xc0] sm:$0xff]  ;;  %v7223_v56 = vld [vmem:[#allocation11 + $0xc8] sm:$0xff] }
 0x423   :  { %2673 = vmatpush.msra.mxu0 %v7107_v33  ;;  %2693 = vmatpush.msra.mxu1 %v7110_v36  ;;  %v2335_v0 = vsel %vm7135_vm14, %v7065_v21, %v2331_v23  ;;  %v7174_v21 = vld [vmem:[#allocation11 + $0x120] sm:$0xff]  ;;  %8923 = vst [vmem:[#allocation63_spill] sm:$0xff] %v7217_v45 }
 0x424   :  { %3864 = vtanh.f32 %v2344_v17  ;;  %2713 = vmatpush.msrb.mxu2 %v7114_v51  ;;  %2733 = vmatpush.msrb.mxu3 %v7117_v6  ;;  %v7123_v59 = vsel %vm1869_vm6, %v2344_v17, %v6899_v29  ;;  %v7139_v29 = vld [vmem:[#allocation11 + $0x190] sm:$0xff]  ;;  %v2340_v35 = vsel %vm2337_vm1, %v2339_v12, %v2335_v0  ;;  %8924 = vst [vmem:[#allocation183_spill] sm:$0xff] %v7220_v11  ;;  %v7229_v17 = vld [vmem:[#allocation11 + $0xd8] sm:$0xff]  ;;  %v7232_v23 = vld [vmem:[#allocation11 + $0xa0] sm:$0xff] }
 0x425   :  { %2674 = vmatpush.msra.mxu0 %v7127_v26  ;;  %2694 = vmatpush.msra.mxu1 %v7130_v7  ;;  %8925 = vst [vmem:[#allocation59_spill] sm:$0xff] %v7223_v56  ;;  %v7244_v0 = vld [vmem:[#allocation11 + $0x80] sm:$0xff]  ;;  %v7247_v12 = vld [vmem:[#allocation11 + $0x88] sm:$0xff] }
 0x426   :  { %2714 = vmatpush.msrb.mxu2 %v7139_v29  ;;  %2734 = vmatpush.msrb.mxu3 %v7142_v47  ;;  %8926 = vst [vmem:[#allocation75_spill] sm:$0xff] %v7226_v53 }
 0x427   :  { %2675 = vmatpush.msra.mxu0 %v7148_v3  ;;  %2695 = vmatpush.msra.mxu1 %v7151_v39  ;;  %8927 = vst [vmem:[#allocation76_spill] sm:$0xff] %v7229_v17 }
 0x428   :  { %2715 = vmatpush.msrb.mxu2 %v7154_v58  ;;  %2735 = vmatpush.msrb.mxu3 %v7157_v13  ;;  %8928 = vst [vmem:[#allocation39_spill] sm:$0xff] %v7232_v23 }
 0x429   :  { %2676 = vmatpush.msra.mxu0 %v7160_v16  ;;  %2696 = vmatpush.msra.mxu1 %v7163_v40  ;;  %8932 = vst [vmem:[#allocation60_spill] sm:$0xff] %v7244_v0 }
 0x42a   :  { %v3865_v37 = vpop.eup %3864  ;;  %2716 = vmatpush.msrb.mxu2 %v7166_v5  ;;  %2736 = vmatpush.msrb.mxu3 %v7169_v62  ;;  %8933 = vst [vmem:[#allocation62_spill] sm:$0xff] %v7247_v12 }
 0x42b   :  { %v7172_v46 = vmul.f32 %v3865_v37, %v2340_v35  ;;  %2677 = vmatpush.msra.mxu0 %v7174_v21  ;;  %2697 = vmatpush.msra.mxu1 %v7177_v14  ;;  %v7250_v37 = vld [vmem:[#allocation11 + $0x90] sm:$0xff]  ;;  %v7253_v35 = vld [vmem:[#allocation11 + $0x98] sm:$0xff] }
 0x42c   :  { %2717 = vmatpush.msrb.mxu2 %v7180_v20  ;;  %2737 = vmatpush.msrb.mxu3 %v7183_v30  ;;  %8934 = vst [vmem:[#allocation77_spill] sm:$0xff] %v7250_v37 }
 0x42d   :  { %8920 = vst [vmem:[#allocation45_spill] sm:$0xff] %v7172_v46  ;;  %v7190_v25 = vsel %vm1869_vm6, %v7172_v46, %v6925_v50  ;;  %2678 = vmatpush.msra.mxu0 %v7192_v18  ;;  %2698 = vmatpush.msra.mxu1 %v7195_v9  ;;  %v7205_v50 = vld [vmem:[#allocation11 + $0x118] sm:$0xff]  ;;  %v7259_v46 = vld [vmem:[#allocation11 + $0x68] sm:$0xff] }
 0x42e   :  { %2530 = vmatmul.f32.vlgmr.msrb.gmra.mxu0 %v7190_v25  ;;  %2550 = vmatmul.f32.vlgmr.msrb.gmra.mxu1 %v7190_v25  ;;  %8935 = vst [vmem:[#allocation87_spill] sm:$0xff] %v7253_v35 }
 0x42f   :  { %2570 = vmatmul.f32.vlgmr.msra.gmra.mxu2 %v7190_v25  ;;  %2590 = vmatmul.f32.vlgmr.msra.gmra.mxu3 %v7190_v25  ;;  %8937 = vst [vmem:[#allocation89_spill] sm:$0xff] %v7259_v46 }
 0x430   :  { %2718 = vmatpush.msrb.mxu2 %v7202_v54  ;;  %2738 = vmatpush.msrb.mxu3 %v7205_v50 }
 0x431   :  { %2679 = vmatpush.msra.mxu0 %v7208_v1  ;;  %2699 = vmatpush.msra.mxu1 %v7211_v49 }
 0x432   :  { %2719 = vmatpush.msrb.mxu2 %v7214_v42  ;;  %2739 = vmatpush.msrb.mxu3 %v7217_v45 }
 0x433   :  { %2680 = vmatpush.msra.mxu0 %v7220_v11  ;;  %2700 = vmatpush.msra.mxu1 %v7223_v56 }
 0x434   :  { %2720 = vmatpush.msrb.mxu2 %v7226_v53  ;;  %2740 = vmatpush.msrb.mxu3 %v7229_v17 }
 0x435   :  { %2681 = vmatpush.msra.mxu0 %v7232_v23  ;;  %2701 = vmatpush.msra.mxu1 %v7235_v57  ;;  %v9018_v23 = vld [vmem:[#allocation38_spill] sm:$0xff] }
 0x436   :  { %2721 = vmatpush.msrb.mxu2 %v7238_v63  ;;  %2741 = vmatpush.msrb.mxu3 %v7241_v24 }
 0x437   :  { %2682 = vmatpush.msra.mxu0 %v7244_v0  ;;  %2702 = vmatpush.msra.mxu1 %v7247_v12 }
 0x438   :  { %2722 = vmatpush.msrb.mxu2 %v7250_v37  ;;  %2742 = vmatpush.msrb.mxu3 %v7253_v35  ;;  %v7277_v35 = vld [vmem:[#allocation11 + $0x58] sm:$0xff] }
 0x439   :  { %2683 = vmatpush.msra.mxu0 %v7256_v28  ;;  %2703 = vmatpush.msra.mxu1 %v7259_v46  ;;  %v7274_v28 = vld [vmem:[#allocation11 + $0x50] sm:$0xff]  ;;  %8943 = vst [vmem:[#allocation95_spill] sm:$0xff] %v7277_v35 }
 0x43a   :  { %2723 = vmatpush.msrb.mxu2 %v7262_v10  ;;  %2743 = vmatpush.msrb.mxu3 %v7265_v32  ;;  %8942 = vst [vmem:[#allocation94_spill] sm:$0xff] %v7274_v28  ;;  %v7280_v10 = vld [vmem:[#allocation11 + $0x20] sm:$0xff]  ;;  %v7283_v32 = vld [vmem:[#allocation11 + $0x28] sm:$0xff] }
 0x43b   :  { %2684 = vmatpush.msra.mxu0 %v7268_v41  ;;  %2704 = vmatpush.msra.mxu1 %v7271_v27  ;;  %8944 = vst [vmem:[#allocation96_spill] sm:$0xff] %v7280_v10  ;;  %v7286_v41 = vld [vmem:[#allocation11 + $0x30] sm:$0xff]  ;;  %v7289_v27 = vld [vmem:[#allocation11 + $0x38] sm:$0xff] }
 0x43c   :  { %2724 = vmatpush.msrb.mxu2 %v7274_v28  ;;  %2744 = vmatpush.msrb.mxu3 %v7277_v35  ;;  %8945 = vst [vmem:[#allocation97_spill] sm:$0xff] %v7283_v32  ;;  %v7292_v28 = vld [vmem:[#allocation11] sm:$0xff]  ;;  %v7295_v35 = vld [vmem:[#allocation11 + $0x8] sm:$0xff] }
 0x43d   :  { %2685 = vmatpush.msra.mxu0 %v7280_v10  ;;  %2705 = vmatpush.msra.mxu1 %v7283_v32  ;;  %8946 = vst [vmem:[#allocation98_spill] sm:$0xff] %v7286_v41  ;;  %v7298_v10 = vld [vmem:[#allocation11 + $0x10] sm:$0xff]  ;;  %v7301_v32 = vld [vmem:[#allocation11 + $0x18] sm:$0xff] }
 0x43e   :  { %2725 = vmatpush.msrb.mxu2 %v7286_v41  ;;  %8947 = vst [vmem:[#allocation99_spill] sm:$0xff] %v7289_v27  ;;  %2745 = vmatpush.msrb.mxu3 %v7289_v27  ;;  %v7304_v41 = vld [vmem:[#allocation14 + $0x1e0] sm:$0xff]  ;;  %v7307_v27 = vld [vmem:[#allocation14 + $0x1e8] sm:$0xff] }
 0x43f   :  { %8948 = vst [vmem:[#allocation100_spill] sm:$0xff] %v7292_v28  ;;  %2686 = vmatpush.msra.mxu0 %v7292_v28  ;;  %2706 = vmatpush.msra.mxu1 %v7295_v35  ;;  %v7310_v28 = vld [vmem:[#allocation14 + $0x1f0] sm:$0xff] }
 0x440   :  { %8949 = vst [vmem:[#allocation101_spill] sm:$0xff] %v7295_v35  ;;  %2726 = vmatpush.msrb.mxu2 %v7298_v10  ;;  %2746 = vmatpush.msrb.mxu3 %v7301_v32  ;;  %v7313_v35 = vld [vmem:[#allocation14 + $0x1f8] sm:$0xff] }
 0x441   :  { %8950 = vst [vmem:[#allocation102_spill] sm:$0xff] %v7298_v10  ;;  %2828 = vmatpush.msrb.mxu0 %v7304_v41  ;;  %2848 = vmatpush.msrb.mxu1 %v7307_v27  ;;  %v7316_v10 = vld [vmem:[#allocation14 + $0x1c0] sm:$0xff] }
 0x442   :  { %8951 = vst [vmem:[#allocation103_spill] sm:$0xff] %v7301_v32  ;;  %2868 = vmatpush.msra.mxu2 %v7310_v28  ;;  %2888 = vmatpush.msra.mxu3 %v7313_v35  ;;  %v7319_v32 = vld [vmem:[#allocation14 + $0x1c8] sm:$0xff] }
 0x443   :  { %8952 = vst [vmem:[#allocation104_spill] sm:$0xff] %v7304_v41  ;;  %2829 = vmatpush.msrb.mxu0 %v7316_v10  ;;  %2849 = vmatpush.msrb.mxu1 %v7319_v32  ;;  %v7322_v41 = vld [vmem:[#allocation14 + $0x1d0] sm:$0xff] }
 0x444   :  { %8953 = vst [vmem:[#allocation105_spill] sm:$0xff] %v7307_v27  ;;  %2869 = vmatpush.msra.mxu2 %v7322_v41  ;;  %v7325_v27 = vld [vmem:[#allocation14 + $0x1d8] sm:$0xff] }
 0x445   :  { %8954 = vst [vmem:[#allocation106_spill] sm:$0xff] %v7310_v28  ;;  %2889 = vmatpush.msra.mxu3 %v7325_v27  ;;  %v7328_v28 = vld [vmem:[#allocation14 + $0x1a0] sm:$0xff] }
 0x446   :  { %8955 = vst [vmem:[#allocation107_spill] sm:$0xff] %v7313_v35  ;;  %2830 = vmatpush.msrb.mxu0 %v7328_v28  ;;  %v7331_v35 = vld [vmem:[#allocation14 + $0x1a8] sm:$0xff] }
 0x447   :  { %8956 = vst [vmem:[#allocation108_spill] sm:$0xff] %v7316_v10  ;;  %2850 = vmatpush.msrb.mxu1 %v7331_v35  ;;  %v7334_v10 = vld [vmem:[#allocation14 + $0x1b0] sm:$0xff] }
 0x448   :  { %8957 = vst [vmem:[#allocation109_spill] sm:$0xff] %v7319_v32  ;;  %2870 = vmatpush.msra.mxu2 %v7334_v10  ;;  %v7337_v32 = vld [vmem:[#allocation14 + $0x1b8] sm:$0xff] }
 0x449   :  { %8958 = vst [vmem:[#allocation110_spill] sm:$0xff] %v7322_v41  ;;  %2890 = vmatpush.msra.mxu3 %v7337_v32  ;;  %v7340_v41 = vld [vmem:[#allocation14 + $0x180] sm:$0xff] }
 0x44a   :  { %8959 = vst [vmem:[#allocation111_spill] sm:$0xff] %v7325_v27  ;;  %2831 = vmatpush.msrb.mxu0 %v7340_v41  ;;  %v7343_v27 = vld [vmem:[#allocation14 + $0x188] sm:$0xff] }
 0x44b   :  { %8960 = vst [vmem:[#allocation112_spill] sm:$0xff] %v7328_v28  ;;  %2851 = vmatpush.msrb.mxu1 %v7343_v27  ;;  %v7346_v28 = vld [vmem:[#allocation14 + $0x190] sm:$0xff] }
 0x44c   :  { %8961 = vst [vmem:[#allocation113_spill] sm:$0xff] %v7331_v35  ;;  %2871 = vmatpush.msra.mxu2 %v7346_v28  ;;  %v7349_v35 = vld [vmem:[#allocation14 + $0x198] sm:$0xff] }
 0x44d   :  { %8962 = vst [vmem:[#allocation114_spill] sm:$0xff] %v7334_v10  ;;  %2891 = vmatpush.msra.mxu3 %v7349_v35  ;;  %v7352_v10 = vld [vmem:[#allocation14 + $0x160] sm:$0xff] }
 0x44e   :  { %8963 = vst [vmem:[#allocation115_spill] sm:$0xff] %v7337_v32  ;;  %2832 = vmatpush.msrb.mxu0 %v7352_v10  ;;  %v7355_v32 = vld [vmem:[#allocation14 + $0x168] sm:$0xff] }
 0x44f   :  { %8964 = vst [vmem:[#allocation116_spill] sm:$0xff] %v7340_v41  ;;  %2852 = vmatpush.msrb.mxu1 %v7355_v32  ;;  %v7358_v41 = vld [vmem:[#allocation14 + $0x170] sm:$0xff] }
 0x450   :  { %8965 = vst [vmem:[#allocation117_spill] sm:$0xff] %v7343_v27  ;;  %2872 = vmatpush.msra.mxu2 %v7358_v41  ;;  %v7361_v27 = vld [vmem:[#allocation14 + $0x178] sm:$0xff] }
 0x451   :  { %8966 = vst [vmem:[#allocation118_spill] sm:$0xff] %v7346_v28  ;;  %2892 = vmatpush.msra.mxu3 %v7361_v27  ;;  %v7364_v28 = vld [vmem:[#allocation14 + $0x140] sm:$0xff] }
 0x452   :  { %8967 = vst [vmem:[#allocation119_spill] sm:$0xff] %v7349_v35  ;;  %2833 = vmatpush.msrb.mxu0 %v7364_v28  ;;  %v7367_v35 = vld [vmem:[#allocation14 + $0x148] sm:$0xff] }
 0x453   :  { %8968 = vst [vmem:[#allocation120_spill] sm:$0xff] %v7352_v10  ;;  %2853 = vmatpush.msrb.mxu1 %v7367_v35  ;;  %v7370_v10 = vld [vmem:[#allocation14 + $0x150] sm:$0xff] }
 0x454   :  { %8969 = vst [vmem:[#allocation121_spill] sm:$0xff] %v7355_v32  ;;  %2873 = vmatpush.msra.mxu2 %v7370_v10  ;;  %v7373_v32 = vld [vmem:[#allocation14 + $0x158] sm:$0xff] }
 0x455   :  { %8970 = vst [vmem:[#allocation122_spill] sm:$0xff] %v7358_v41  ;;  %2893 = vmatpush.msra.mxu3 %v7373_v32  ;;  %v7376_v41 = vld [vmem:[#allocation14 + $0x120] sm:$0xff] }
 0x456   :  { %8971 = vst [vmem:[#allocation123_spill] sm:$0xff] %v7361_v27  ;;  %2834 = vmatpush.msrb.mxu0 %v7376_v41  ;;  %v7379_v27 = vld [vmem:[#allocation14 + $0x128] sm:$0xff] }
 0x457   :  { %8972 = vst [vmem:[#allocation124_spill] sm:$0xff] %v7364_v28  ;;  %2854 = vmatpush.msrb.mxu1 %v7379_v27  ;;  %v7382_v28 = vld [vmem:[#allocation14 + $0x130] sm:$0xff] }
 0x458   :  { %8973 = vst [vmem:[#allocation125_spill] sm:$0xff] %v7367_v35  ;;  %2874 = vmatpush.msra.mxu2 %v7382_v28  ;;  %v7385_v35 = vld [vmem:[#allocation14 + $0x138] sm:$0xff] }
 0x459   :  { %8974 = vst [vmem:[#allocation126_spill] sm:$0xff] %v7370_v10  ;;  %2894 = vmatpush.msra.mxu3 %v7385_v35  ;;  %v7388_v10 = vld [vmem:[#allocation14 + $0x100] sm:$0xff] }
 0x45a   :  { %8975 = vst [vmem:[#allocation127_spill] sm:$0xff] %v7373_v32  ;;  %2835 = vmatpush.msrb.mxu0 %v7388_v10  ;;  %v7391_v32 = vld [vmem:[#allocation14 + $0x108] sm:$0xff] }
 0x45b   :  { %8976 = vst [vmem:[#allocation128_spill] sm:$0xff] %v7376_v41  ;;  %2855 = vmatpush.msrb.mxu1 %v7391_v32  ;;  %v7394_v41 = vld [vmem:[#allocation14 + $0x110] sm:$0xff] }
 0x45c   :  { %8977 = vst [vmem:[#allocation129_spill] sm:$0xff] %v7379_v27  ;;  %2875 = vmatpush.msra.mxu2 %v7394_v41  ;;  %v7397_v27 = vld [vmem:[#allocation14 + $0x118] sm:$0xff] }
 0x45d   :  { %8978 = vst [vmem:[#allocation130_spill] sm:$0xff] %v7382_v28  ;;  %2895 = vmatpush.msra.mxu3 %v7397_v27  ;;  %v7400_v28 = vld [vmem:[#allocation14 + $0xe0] sm:$0xff] }
 0x45e   :  { %8979 = vst [vmem:[#allocation131_spill] sm:$0xff] %v7385_v35  ;;  %2836 = vmatpush.msrb.mxu0 %v7400_v28  ;;  %v7403_v35 = vld [vmem:[#allocation14 + $0xe8] sm:$0xff] }
 0x45f   :  { %8980 = vst [vmem:[#allocation132_spill] sm:$0xff] %v7388_v10  ;;  %2856 = vmatpush.msrb.mxu1 %v7403_v35  ;;  %v7406_v10 = vld [vmem:[#allocation14 + $0xf0] sm:$0xff] }
 0x460   :  { %8981 = vst [vmem:[#allocation133_spill] sm:$0xff] %v7391_v32  ;;  %2876 = vmatpush.msra.mxu2 %v7406_v10  ;;  %v7409_v32 = vld [vmem:[#allocation14 + $0xf8] sm:$0xff] }
 0x461   :  { %8982 = vst [vmem:[#allocation134_spill] sm:$0xff] %v7394_v41  ;;  %2896 = vmatpush.msra.mxu3 %v7409_v32  ;;  %v7412_v41 = vld [vmem:[#allocation14 + $0xc0] sm:$0xff] }
 0x462   :  { %8983 = vst [vmem:[#allocation135_spill] sm:$0xff] %v7397_v27  ;;  %2837 = vmatpush.msrb.mxu0 %v7412_v41  ;;  %v7415_v27 = vld [vmem:[#allocation14 + $0xc8] sm:$0xff] }
 0x463   :  { %8984 = vst [vmem:[#allocation136_spill] sm:$0xff] %v7400_v28  ;;  %2857 = vmatpush.msrb.mxu1 %v7415_v27  ;;  %v7418_v28 = vld [vmem:[#allocation14 + $0xd0] sm:$0xff] }
 0x464   :  { %8985 = vst [vmem:[#allocation137_spill] sm:$0xff] %v7403_v35  ;;  %2877 = vmatpush.msra.mxu2 %v7418_v28  ;;  %v7421_v35 = vld [vmem:[#allocation14 + $0xd8] sm:$0xff] }
 0x465   :  { %8986 = vst [vmem:[#allocation138_spill] sm:$0xff] %v7406_v10  ;;  %2897 = vmatpush.msra.mxu3 %v7421_v35  ;;  %v7424_v10 = vld [vmem:[#allocation14 + $0xa0] sm:$0xff] }
 0x466   :  { %8987 = vst [vmem:[#allocation139_spill] sm:$0xff] %v7409_v32  ;;  %2838 = vmatpush.msrb.mxu0 %v7424_v10  ;;  %v7427_v32 = vld [vmem:[#allocation14 + $0xa8] sm:$0xff] }
 0x467   :  { %8988 = vst [vmem:[#allocation140_spill] sm:$0xff] %v7412_v41  ;;  %2858 = vmatpush.msrb.mxu1 %v7427_v32  ;;  %v7430_v41 = vld [vmem:[#allocation14 + $0xb0] sm:$0xff] }
 0x468   :  { %8989 = vst [vmem:[#allocation141_spill] sm:$0xff] %v7415_v27  ;;  %2878 = vmatpush.msra.mxu2 %v7430_v41  ;;  %v7433_v27 = vld [vmem:[#allocation14 + $0xb8] sm:$0xff] }
 0x469   :  { %8990 = vst [vmem:[#allocation142_spill] sm:$0xff] %v7418_v28  ;;  %2898 = vmatpush.msra.mxu3 %v7433_v27  ;;  %v7436_v28 = vld [vmem:[#allocation14 + $0x80] sm:$0xff] }
 0x46a   :  { %8991 = vst [vmem:[#allocation143_spill] sm:$0xff] %v7421_v35  ;;  %2839 = vmatpush.msrb.mxu0 %v7436_v28  ;;  %v7439_v35 = vld [vmem:[#allocation14 + $0x88] sm:$0xff] }
 0x46b   :  { %8992 = vst [vmem:[#allocation144_spill] sm:$0xff] %v7424_v10  ;;  %2859 = vmatpush.msrb.mxu1 %v7439_v35  ;;  %v7442_v10 = vld [vmem:[#allocation14 + $0x90] sm:$0xff] }
 0x46c   :  { %8993 = vst [vmem:[#allocation145_spill] sm:$0xff] %v7427_v32  ;;  %2879 = vmatpush.msra.mxu2 %v7442_v10  ;;  %v7445_v32 = vld [vmem:[#allocation14 + $0x98] sm:$0xff] }
 0x46d   :  { %8994 = vst [vmem:[#allocation146_spill] sm:$0xff] %v7430_v41  ;;  %2899 = vmatpush.msra.mxu3 %v7445_v32  ;;  %v7448_v41 = vld [vmem:[#allocation14 + $0x60] sm:$0xff] }
 0x46e   :  { %8995 = vst [vmem:[#allocation147_spill] sm:$0xff] %v7433_v27  ;;  %2840 = vmatpush.msrb.mxu0 %v7448_v41  ;;  %v7451_v27 = vld [vmem:[#allocation14 + $0x68] sm:$0xff] }
 0x46f   :  { %8996 = vst [vmem:[#allocation148_spill] sm:$0xff] %v7436_v28  ;;  %2860 = vmatpush.msrb.mxu1 %v7451_v27  ;;  %v7454_v28 = vld [vmem:[#allocation14 + $0x70] sm:$0xff] }
 0x470   :  { %8997 = vst [vmem:[#allocation149_spill] sm:$0xff] %v7439_v35  ;;  %2880 = vmatpush.msra.mxu2 %v7454_v28  ;;  %v7457_v35 = vld [vmem:[#allocation14 + $0x78] sm:$0xff] }
 0x471   :  { %8998 = vst [vmem:[#allocation150_spill] sm:$0xff] %v7442_v10  ;;  %2900 = vmatpush.msra.mxu3 %v7457_v35  ;;  %v7460_v10 = vld [vmem:[#allocation14 + $0x40] sm:$0xff] }
 0x472   :  { %8999 = vst [vmem:[#allocation151_spill] sm:$0xff] %v7445_v32  ;;  %2841 = vmatpush.msrb.mxu0 %v7460_v10  ;;  %v7463_v32 = vld [vmem:[#allocation14 + $0x48] sm:$0xff] }
 0x473   :  { %9000 = vst [vmem:[#allocation152_spill] sm:$0xff] %v7448_v41  ;;  %2861 = vmatpush.msrb.mxu1 %v7463_v32  ;;  %v7466_v41 = vld [vmem:[#allocation14 + $0x50] sm:$0xff] }
 0x474   :  { %9001 = vst [vmem:[#allocation153_spill] sm:$0xff] %v7451_v27  ;;  %2881 = vmatpush.msra.mxu2 %v7466_v41  ;;  %v7469_v27 = vld [vmem:[#allocation14 + $0x58] sm:$0xff] }
 0x475   :  { %9002 = vst [vmem:[#allocation154_spill] sm:$0xff] %v7454_v28  ;;  %2901 = vmatpush.msra.mxu3 %v7469_v27  ;;  %v7472_v28 = vld [vmem:[#allocation14 + $0x20] sm:$0xff] }
 0x476   :  { %9003 = vst [vmem:[#allocation155_spill] sm:$0xff] %v7457_v35  ;;  %2842 = vmatpush.msrb.mxu0 %v7472_v28  ;;  %v7475_v35 = vld [vmem:[#allocation14 + $0x28] sm:$0xff] }
 0x477   :  { %9004 = vst [vmem:[#allocation156_spill] sm:$0xff] %v7460_v10  ;;  %2862 = vmatpush.msrb.mxu1 %v7475_v35  ;;  %v7478_v10 = vld [vmem:[#allocation14 + $0x30] sm:$0xff] }
 0x478   :  { %9005 = vst [vmem:[#allocation157_spill] sm:$0xff] %v7463_v32  ;;  %2882 = vmatpush.msra.mxu2 %v7478_v10  ;;  %v7481_v32 = vld [vmem:[#allocation14 + $0x38] sm:$0xff] }
 0x479   :  { %9006 = vst [vmem:[#allocation158_spill] sm:$0xff] %v7466_v41  ;;  %2902 = vmatpush.msra.mxu3 %v7481_v32  ;;  %v7484_v41 = vld [vmem:[#allocation14] sm:$0xff] }
 0x47a   :  { %9007 = vst [vmem:[#allocation159_spill] sm:$0xff] %v7469_v27  ;;  %2843 = vmatpush.msrb.mxu0 %v7484_v41  ;;  %v7487_v27 = vld [vmem:[#allocation14 + $0x8] sm:$0xff] }
 0x47b   :  { %9008 = vst [vmem:[#allocation160_spill] sm:$0xff] %v7472_v28  ;;  %2863 = vmatpush.msrb.mxu1 %v7487_v27  ;;  %v7490_v28 = vld [vmem:[#allocation14 + $0x10] sm:$0xff] }
 0x47c   :  { %9009 = vst [vmem:[#allocation161_spill] sm:$0xff] %v7475_v35  ;;  %2883 = vmatpush.msra.mxu2 %v7490_v28  ;;  %v7493_v35 = vld [vmem:[#allocation14 + $0x18] sm:$0xff] }
 0x47d   :  { %9010 = vst [vmem:[#allocation162_spill] sm:$0xff] %v7478_v10  ;;  %2903 = vmatpush.msra.mxu3 %v7493_v35  ;;  %v9016_v10 = vld [vmem:[#allocation80_spill] sm:$0xff] }
 0x47e   :  { %9011 = vst [vmem:[#allocation163_spill] sm:$0xff] %v7481_v32  ;;  %v232_v37 = vadd.f32 %v9016_v10, %v8902_v31  ;;  %v9017_v32 = vld [vmem:[#allocation81_spill] sm:$0xff] }
 0x47f   :  { %9012 = vst [vmem:[#allocation164_spill] sm:$0xff] %v7484_v41  ;;  %v273_v46 = vadd.f32 %v9017_v32, %v8904_v22  ;;  %v9019_v32 = vld [vmem:[#allocation31_spill] sm:$0xff] }
 0x480   :  { %9013 = vst [vmem:[#allocation165_spill] sm:$0xff] %v7487_v27 }
 0x481   :  { %9014 = vst [vmem:[#allocation166_spill] sm:$0xff] %v7490_v28  ;;  %v355_v28 = vadd.f32 %v9018_v23, %v8906_v48 }
 0x482   :  { %9015 = vst [vmem:[#allocation167_spill] sm:$0xff] %v7493_v35 }
 0x49a   :  { %v2374_v0 = vpop.f32.mrf.mxu0  ;;  %v2394_v41 = vpop.f32.mrf.mxu1 }
 0x49b   :  { %v2437_v24 = vadd.f32 %v2374_v0, %v232_v37  ;;  %v2438_v63 = vadd.f32 %v2394_v41, %v273_v46  ;;  %v437_v41 = vadd.f32 %v9019_v32, %v8908_v19  ;;  %v9020_v46 = vld [vmem:[#allocation27_spill] sm:$0xff] }
 0x49d   :  { %v3650_v12 = vmul.f32 -1.442695, %v2437_v24  ;;  %v3651_v27 = vmul.f32 -1.442695, %v2438_v63  ;;  %v478_v63 = vadd.f32 %v9020_v46, %v8910_v43 }
 0x49f   :  { %3866 = vpow2.f32 %v3650_v12 }
 0x4a0   :  { %3868 = vpow2.f32 %v3651_v27 }
 0x4a1   :  { %v2434_v17 = vpop.f32.mrf.mxu3  ;;  %v2414_v24 = vpop.f32.mrf.mxu2 }
 0x4a2   :  { %v2440_v53 = vadd.f32 %v2434_v17, %v355_v28  ;;  %v9021_v28 = vld [vmem:[#allocation33_spill] sm:$0xff] }
 0x4a4   :  { %v3652_v35 = vmul.f32 -1.442695, %v2440_v53  ;;  %v314_v53 = vadd.f32 %v9021_v28, %v8912_v60 }
 0x4a5   :  { %v3867_v57 = vpop.eup %3866 }
 0x4a6   :  { %v3869_v11 = vpop.eup %3868  ;;  %v2444_v10 = vadd.f32 1.0, %v3867_v57  ;;  %3870 = vpow2.f32 %v3652_v35  ;;  %v2439_v37 = vadd.f32 %v2414_v24, %v314_v53  ;;  %v9022_v24 = vld [vmem:[#allocation53_spill] sm:$0xff] }
 0x4a7   :  { %v2463_v31 = vadd.f32 1.0, %v3869_v11 }
 0x4a8   :  { %3872 = vrcp.f32 %v2444_v10  ;;  %v2454_v19 = vand.u32 2147483647, %v2444_v10  ;;  %v2456_v28 = vand.u32 2147483648, %v2444_v10  ;;  %vm2450_vm5 = vweird.f32 %v2444_v10 }
 0x4a9   :  { %3874 = vrcp.f32 %v2463_v31  ;;  %v2475_v42 = vand.u32 2147483648, %v2463_v31  ;;  %vm2469_vm7 = vweird.f32 %v2463_v31 }
 0x4aa   :  { %vm2455_vm9 = vcmp.eq.f32.partialorder %v2454_v19, 8.507059e+37 }
 0x4ab   :  { %v2531_v0 = vpop.f32.mrf.mxu0  ;;  %v2551_v23 = vpop.f32.mrf.mxu1 }
 0x4ac   :  { %v3871_v27 = vpop.eup %3870  ;;  %v2594_v17 = vadd.f32 %v2531_v0, %v437_v41  ;;  %v2595_v12 = vadd.f32 %v2551_v23, %v478_v63  ;;  %v2473_v0 = vand.u32 2147483647, %v2463_v31 }
 0x4ad   :  { %v7508_v57 = vadd.f32 1.0, %v3871_v27 }
 0x4ae   :  { %v3873_v11 = vpop.eup %3872  ;;  %v3653_v35 = vmul.f32 -1.442695, %v2594_v17  ;;  %v3654_v48 = vmul.f32 -1.442695, %v2595_v12  ;;  %vm2474_vm1 = vcmp.eq.f32.partialorder %v2473_v0, 8.507059e+37 }
 0x4af   :  { %v3875_v22 = vpop.eup %3874  ;;  %v2446_v32 = vmul.f32 %v3873_v11, %v2444_v10  ;;  %3876 = vrcp.f32 %v7508_v57  ;;  %vm2451_vm2 = vweird.f32 %v3873_v11 }
 0x4b0   :  { %v2465_v46 = vmul.f32 %v3875_v22, %v2463_v31  ;;  %3878 = vpow2.f32 %v3653_v35  ;;  %vm2470_vm4 = vweird.f32 %v3875_v22  ;;  %vm2452_vm10 = vmor %vm2450_vm5, %vm2451_vm2 }
 0x4b1   :  { %v2447_v43 = vsub.f32 1.0, %v2446_v32  ;;  %3880 = vpow2.f32 %v3654_v48  ;;  %v2476_v48 = vor.u32 1.1754944e-38, %v2475_v42  ;;  %v2457_v32 = vor.u32 1.1754944e-38, %v2456_v28  ;;  %vm2471_vm14 = vmor %vm2469_vm7, %vm2470_vm4 }
 0x4b2   :  { %v2466_v45 = vsub.f32 1.0, %v2465_v46  ;;  %3882 = vtanh.f32 %v2439_v37  ;;  %v2591_v41 = vpop.f32.mrf.mxu3  ;;  %v2571_v56 = vpop.f32.mrf.mxu2  ;;  %vm2489_vm4 = vweird.f32 %v7508_v57 }
 0x4b3   :  { %v2448_v63 = vmul.f32 %v3873_v11, %v2447_v43  ;;  %v2597_v23 = vadd.f32 %v2591_v41, %v9022_v24 }
 0x4b4   :  { %v2467_v27 = vmul.f32 %v3875_v22, %v2466_v45 }
 0x4b5   :  { %v3877_v53 = vpop.eup %3876  ;;  %v2449_v17 = vadd.f32 %v3873_v11, %v2448_v63  ;;  %v3655_v12 = vmul.f32 -1.442695, %v2597_v23 }
 0x4b6   :  { %v3879_v35 = vpop.eup %3878  ;;  %v2468_v46 = vadd.f32 %v3875_v22, %v2467_v27  ;;  %v2485_v37 = vmul.f32 %v3877_v53, %v7508_v57  ;;  %vm2490_vm2 = vweird.f32 %v3877_v53 }
 0x4b7   :  { %v3881_v43 = vpop.eup %3880  ;;  %v2453_v60 = vsel %vm2452_vm10, %v3873_v11, %v2449_v17  ;;  %v2601_v41 = vadd.f32 1.0, %v3879_v35  ;;  %3884 = vpow2.f32 %v3655_v12  ;;  %v2495_v11 = vand.u32 2147483648, %v7508_v57  ;;  %vm2491_vm5 = vmor %vm2489_vm4, %vm2490_vm2 }
 0x4b8   :  { %v3883_v45 = vpop.eup %3882  ;;  %v2458_v10 = vsel %vm2455_vm9, %v2457_v32, %v2453_v60  ;;  %v2472_v24 = vsel %vm2471_vm14, %v3875_v22, %v2468_v46  ;;  %v2486_v31 = vsub.f32 1.0, %v2485_v37  ;;  %v2620_v63 = vadd.f32 1.0, %v3881_v43 }
 0x4b9   :  { %v2477_v19 = vsel %vm2474_vm1, %v2476_v48, %v2472_v24  ;;  %v2500_v23 = vmul.f32 %v3883_v45, %v2458_v10  ;;  %3886 = vrcp.f32 %v2601_v41  ;;  %v2493_v22 = vand.u32 2147483647, %v7508_v57  ;;  %v9024_v48 = vld [vmem:[#allocation57_spill] sm:$0xff] }
 0x4ba   :  { %v2499_v42 = vmul.f32 %v2477_v19, %v7058_v38  ;;  %v2487_v28 = vmul.f32 %v3877_v53, %v2486_v31  ;;  %3888 = vrcp.f32 %v2620_v63  ;;  %v2596_v32 = vadd.f32 %v2571_v56, %v9024_v48 }
 0x4bb   :  { %vm2494_vm7 = vcmp.eq.f32.partialorder %v2493_v22, 8.507059e+37  ;;  %v2496_v10 = vor.u32 1.1754944e-38, %v2495_v11  ;;  %v2632_v31 = vand.u32 2147483648, %v2620_v63  ;;  %v2613_v19 = vand.u32 2147483648, %v2601_v41 }
 0x4bc   :  { %v2501_v27 = vadd.f32 %v2500_v23, %v2499_v42  ;;  %v2488_v0 = vadd.f32 %v3877_v53, %v2487_v28  ;;  %v2611_v57 = vand.u32 2147483647, %v2601_v41  ;;  %v2630_v28 = vand.u32 2147483647, %v2620_v63 }
 0x4bd   :  { %v3885_v1 = vpop.eup %3884  ;;  %vm2626_vm14 = vweird.f32 %v2620_v63  ;;  %vm2607_vm1 = vweird.f32 %v2601_v41  ;;  %v2614_v11 = vor.u32 1.1754944e-38, %v2613_v19  ;;  %v9052_v19 = vld [vmem:[#allocation98_spill] sm:$0xff] }
 0x4be   :  { %3890 = vtanh.f32 %v2501_v27  ;;  %v7515_v17 = vadd.f32 1.0, %v3885_v1  ;;  %v7521_v12 = vsel %vm1706_vm15, %v2501_v27, %v7058_v38  ;;  %v2492_v1 = vsel %vm2491_vm5, %v3877_v53, %v2488_v0 }
 0x4bf   :  { %v3887_v35 = vpop.eup %3886  ;;  %v2497_v42 = vsel %vm2494_vm7, %v2496_v10, %v2492_v1  ;;  %vm2612_vm5 = vcmp.eq.f32.partialorder %v2611_v57, 8.507059e+37  ;;  %vm2631_vm7 = vcmp.eq.f32.partialorder %v2630_v28, 8.507059e+37  ;;  %v9055_v57 = vld [vmem:[#allocation100_spill] sm:$0xff]  ;;  %v9058_v28 = vld [vmem:[#allocation103_spill] sm:$0xff] }
 0x4c0   :  { %v3889_v46 = vpop.eup %3888  ;;  %v2603_v37 = vmul.f32 %v3887_v35, %v2601_v41  ;;  %3892 = vrcp.f32 %v7515_v17  ;;  %vm2608_vm9 = vweird.f32 %v3887_v35 }
 0x4c1   :  { %v2622_v43 = vmul.f32 %v3889_v46, %v2620_v63  ;;  %3894 = vtanh.f32 %v2596_v32  ;;  %vm2627_vm10 = vweird.f32 %v3889_v46  ;;  %vm2609_vm2 = vmor %vm2607_vm1, %vm2608_vm9 }
 0x4c2   :  { %v2604_v45 = vsub.f32 1.0, %v2603_v37  ;;  %vm2628_vm4 = vmor %vm2626_vm14, %vm2627_vm10  ;;  %v2633_v37 = vor.u32 1.1754944e-38, %v2632_v31  ;;  %vm2646_vm10 = vweird.f32 %v7515_v17  ;;  %v9051_v31 = vld [vmem:[#allocation101_spill] sm:$0xff] }
 0x4c3   :  { %v2623_v24 = vsub.f32 1.0, %v2622_v43 }
 0x4c4   :  { %v3891_v38 = vpop.eup %3890  ;;  %v2605_v23 = vmul.f32 %v3887_v35, %v2604_v45 }
 0x4c5   :  { %v2624_v56 = vmul.f32 %v3889_v46, %v2623_v24  ;;  %v7526_v27 = vmul.f32 %v3891_v38, %v2497_v42  ;;  %v9053_v38 = vld [vmem:[#allocation105_spill] sm:$0xff]  ;;  %v9056_v42 = vld [vmem:[#allocation102_spill] sm:$0xff] }
 0x4c6   :  { %v7528_v48 = vpop.eup %3892  ;;  %v2606_v53 = vadd.f32 %v3887_v35, %v2605_v23  ;;  %v9054_v23 = vld [vmem:[#allocation99_spill] sm:$0xff] }
 0x4c7   :  { %v2625_v0 = vadd.f32 %v3889_v46, %v2624_v56  ;;  %v2642_v22 = vmul.f32 %v7528_v48, %v7515_v17  ;;  %v7536_v32 = vsel %vm1706_vm15, %v7526_v27, %v7073_v44  ;;  %v3895_v41 = vpop.eup %3894  ;;  %vm2647_vm9 = vweird.f32 %v7528_v48  ;;  %v9057_v56 = vld [vmem:[#allocation109_spill] sm:$0xff] }
 0x4c8   :  { %v2610_v43 = vsel %vm2609_vm2, %v3887_v35, %v2606_v53  ;;  %2687 = vmatmul.f32.vlgmr.msra.gmra.mxu0 %v7536_v32  ;;  %2707 = vmatmul.f32.vlgmr.msra.gmra.mxu1 %v7536_v32  ;;  %vm2648_vm14 = vmor %vm2646_vm10, %vm2647_vm9  ;;  %v9060_v53 = vld [vmem:[#allocation106_spill] sm:$0xff] }
 0x4c9   :  { %v2615_v63 = vsel %vm2612_vm5, %v2614_v11, %v2610_v43  ;;  %v2629_v1 = vsel %vm2628_vm4, %v3889_v46, %v2625_v0  ;;  %v2643_v45 = vsub.f32 1.0, %v2642_v22  ;;  %2727 = vmatmul.f32.vlgmr.msrb.gmra.mxu2 %v7536_v32  ;;  %2747 = vmatmul.f32.vlgmr.msrb.gmra.mxu3 %v7536_v32  ;;  %v9061_v11 = vld [vmem:[#allocation113_spill] sm:$0xff]  ;;  %v9062_v0 = vld [vmem:[#allocation107_spill] sm:$0xff]  ;;  %v9063_v22 = vld [vmem:[#allocation108_spill] sm:$0xff] }
 0x4ca   :  { %v2634_v10 = vsel %vm2631_vm7, %v2633_v37, %v2629_v1  ;;  %v2657_v44 = vmul.f32 %v3895_v41, %v2615_v63  ;;  %3005 = vmatpush.msra.mxu1 %v7082_v61  ;;  %2985 = vmatpush.msra.mxu0 %v7079_v55  ;;  %v2652_v55 = vand.u32 2147483648, %v7515_v17  ;;  %v9064_v37 = vld [vmem:[#allocation110_spill] sm:$0xff]  ;;  %v9065_v43 = vld [vmem:[#allocation117_spill] sm:$0xff]  ;;  %v9066_v41 = vld [vmem:[#allocation111_spill] sm:$0xff] }
 0x4cb   :  { %v2656_v35 = vmul.f32 %v2634_v10, %v7123_v59  ;;  %v2644_v24 = vmul.f32 %v7528_v48, %v2643_v45  ;;  %3025 = vmatpush.msrb.mxu2 %v7087_v2  ;;  %3045 = vmatpush.msrb.mxu3 %v7090_v8  ;;  %v9067_v63 = vld [vmem:[#allocation112_spill] sm:$0xff]  ;;  %v9068_v1 = vld [vmem:[#allocation114_spill] sm:$0xff]  ;;  %v9069_v45 = vld [vmem:[#allocation121_spill] sm:$0xff] }
 0x4cc   :  { %3006 = vmatpush.msra.mxu1 %v7096_v52  ;;  %2986 = vmatpush.msra.mxu0 %v7093_v4  ;;  %v2650_v4 = vand.u32 2147483647, %v7515_v17  ;;  %v9050_v17 = vld [vmem:[#allocation96_spill] sm:$0xff]  ;;  %v9070_v10 = vld [vmem:[#allocation115_spill] sm:$0xff] }
 0x4cd   :  { %v2658_v46 = vadd.f32 %v2657_v44, %v2656_v35  ;;  %3026 = vmatpush.msrb.mxu2 %v7099_v34  ;;  %3046 = vmatpush.msrb.mxu3 %v7102_v15  ;;  %v2645_v61 = vadd.f32 %v7528_v48, %v2644_v24  ;;  %v2653_v34 = vor.u32 1.1754944e-38, %v2652_v55  ;;  %v9071_v44 = vld [vmem:[#allocation116_spill] sm:$0xff]  ;;  %v9072_v35 = vld [vmem:[#allocation118_spill] sm:$0xff]  ;;  %v9073_v24 = vld [vmem:[#allocation125_spill] sm:$0xff] }
 0x4ce   :  { %3007 = vmatpush.msra.mxu1 %v7110_v36  ;;  %2987 = vmatpush.msra.mxu0 %v7107_v33  ;;  %vm2651_vm1 = vcmp.eq.f32.partialorder %v2650_v4, 8.507059e+37  ;;  %v9076_v55 = vld [vmem:[#allocation122_spill] sm:$0xff]  ;;  %v9077_v4 = vld [vmem:[#allocation129_spill] sm:$0xff] }
 0x4cf   :  { %3896 = vtanh.f32 %v2658_v46  ;;  %3027 = vmatpush.msrb.mxu2 %v7114_v51  ;;  %3047 = vmatpush.msrb.mxu3 %v7117_v6  ;;  %v7562_v8 = vsel %vm1543_vm13, %v2658_v46, %v7123_v59  ;;  %v2649_v52 = vsel %vm2648_vm14, %v7528_v48, %v2645_v61  ;;  %v9026_v6 = vld [vmem:[#allocation40_spill] sm:$0xff]  ;;  %v9027_v59 = vld [vmem:[#allocation59_spill] sm:$0xff] }
 0x4d0   :  { %3008 = vmatpush.msra.mxu1 %v7130_v7  ;;  %2988 = vmatpush.msra.mxu0 %v7127_v26  ;;  %v2654_v33 = vsel %vm2651_vm1, %v2653_v34, %v2649_v52  ;;  %v9028_v26 = vld [vmem:[#allocation35_spill] sm:$0xff]  ;;  %v9059_v48 = vld [vmem:[#allocation104_spill] sm:$0xff] }
 0x4d1   :  { %3028 = vmatpush.msrb.mxu2 %v7139_v29  ;;  %3048 = vmatpush.msrb.mxu3 %v7142_v47  ;;  %v9029_v7 = vld [vmem:[#allocation63_spill] sm:$0xff]  ;;  %v9031_v47 = vld [vmem:[#allocation41_spill] sm:$0xff]  ;;  %v9075_v61 = vld [vmem:[#allocation120_spill] sm:$0xff] }
 0x4d2   :  { %3009 = vmatpush.msra.mxu1 %v7151_v39  ;;  %2989 = vmatpush.msra.mxu0 %v7148_v3  ;;  %v9030_v29 = vld [vmem:[#allocation183_spill] sm:$0xff]  ;;  %v9033_v39 = vld [vmem:[#allocation76_spill] sm:$0xff] }
 0x4d3   :  { %3029 = vmatpush.msrb.mxu2 %v7154_v58  ;;  %3049 = vmatpush.msrb.mxu3 %v7157_v13  ;;  %v9032_v3 = vld [vmem:[#allocation75_spill] sm:$0xff]  ;;  %v9035_v13 = vld [vmem:[#allocation62_spill] sm:$0xff]  ;;  %v9079_v34 = vld [vmem:[#allocation124_spill] sm:$0xff] }
 0x4d4   :  { %3010 = vmatpush.msra.mxu1 %v7163_v40  ;;  %2990 = vmatpush.msra.mxu0 %v7160_v16  ;;  %v9034_v58 = vld [vmem:[#allocation39_spill] sm:$0xff]  ;;  %v9036_v16 = vld [vmem:[#allocation46_spill] sm:$0xff]  ;;  %v9037_v40 = vld [vmem:[#allocation29_spill] sm:$0xff] }
 0x4d5   :  { %v3897_v15 = vpop.eup %3896  ;;  %3030 = vmatpush.msrb.mxu2 %v7166_v5  ;;  %3050 = vmatpush.msrb.mxu3 %v7169_v62  ;;  %v9038_v5 = vld [vmem:[#allocation60_spill] sm:$0xff]  ;;  %v9039_v62 = vld [vmem:[#allocation89_spill] sm:$0xff]  ;;  %v9074_v46 = vld [vmem:[#allocation119_spill] sm:$0xff] }
 0x4d6   :  { %v7579_v36 = vmul.f32 %v3897_v15, %v2654_v33  ;;  %3011 = vmatpush.msra.mxu1 %v7177_v14  ;;  %2991 = vmatpush.msra.mxu0 %v7174_v21  ;;  %v9040_v21 = vld [vmem:[#allocation77_spill] sm:$0xff]  ;;  %v9041_v14 = vld [vmem:[#allocation87_spill] sm:$0xff]  ;;  %v9080_v15 = vld [vmem:[#allocation126_spill] sm:$0xff] }
 0x4d7   :  { %3031 = vmatpush.msrb.mxu2 %v7180_v20  ;;  %3051 = vmatpush.msrb.mxu3 %v7183_v30  ;;  %v9042_v20 = vld [vmem:[#allocation88_spill] sm:$0xff]  ;;  %v9043_v30 = vld [vmem:[#allocation93_spill] sm:$0xff]  ;;  %v9078_v52 = vld [vmem:[#allocation123_spill] sm:$0xff] }
 0x4d8   :  { %v7589_v51 = vsel %vm1543_vm13, %v7579_v36, %v7190_v25  ;;  %3012 = vmatpush.msra.mxu1 %v7195_v9  ;;  %2992 = vmatpush.msra.mxu0 %v7192_v18  ;;  %v9044_v25 = vld [vmem:[#allocation90_spill] sm:$0xff]  ;;  %v9045_v18 = vld [vmem:[#allocation91_spill] sm:$0xff]  ;;  %v9046_v9 = vld [vmem:[#allocation92_spill] sm:$0xff] }
 0x4d9   :  { %2844 = vmatmul.f32.vlgmr.msrb.gmra.mxu0 %v7589_v51  ;;  %2864 = vmatmul.f32.vlgmr.msrb.gmra.mxu1 %v7589_v51  ;;  %v9081_v33 = vld [vmem:[#allocation133_spill] sm:$0xff] }
 0x4da   :  { %2884 = vmatmul.f32.vlgmr.msra.gmra.mxu2 %v7589_v51  ;;  %2904 = vmatmul.f32.vlgmr.msra.gmra.mxu3 %v7589_v51 }
 0x4db   :  { %3013 = vmatpush.msra.mxu1 %v7211_v49  ;;  %3032 = vmatpush.msrb.mxu2 %v7202_v54  ;;  %v9047_v54 = vld [vmem:[#allocation97_spill] sm:$0xff]  ;;  %v9049_v49 = vld [vmem:[#allocation95_spill] sm:$0xff] }
 0x4dc   :  { %3052 = vmatpush.msrb.mxu3 %v7205_v50  ;;  %2993 = vmatpush.msra.mxu0 %v9026_v6  ;;  %v9048_v50 = vld [vmem:[#allocation94_spill] sm:$0xff]  ;;  %v9082_v6 = vld [vmem:[#allocation127_spill] sm:$0xff] }
 0x4dd   :  { %3014 = vmatpush.msra.mxu1 %v9027_v59  ;;  %3033 = vmatpush.msrb.mxu2 %v9028_v26  ;;  %v9083_v59 = vld [vmem:[#allocation128_spill] sm:$0xff]  ;;  %v9084_v26 = vld [vmem:[#allocation130_spill] sm:$0xff] }
 0x4de   :  { %3053 = vmatpush.msrb.mxu3 %v9029_v7  ;;  %2994 = vmatpush.msra.mxu0 %v9030_v29  ;;  %v9085_v7 = vld [vmem:[#allocation137_spill] sm:$0xff]  ;;  %v9086_v29 = vld [vmem:[#allocation131_spill] sm:$0xff] }
 0x4df   :  { %3015 = vmatpush.msra.mxu1 %v9031_v47  ;;  %3034 = vmatpush.msrb.mxu2 %v9032_v3  ;;  %v9087_v47 = vld [vmem:[#allocation132_spill] sm:$0xff]  ;;  %v9088_v3 = vld [vmem:[#allocation134_spill] sm:$0xff] }
 0x4e0   :  { %3054 = vmatpush.msrb.mxu3 %v9033_v39  ;;  %2995 = vmatpush.msra.mxu0 %v9034_v58  ;;  %v9089_v39 = vld [vmem:[#allocation141_spill] sm:$0xff]  ;;  %v9090_v58 = vld [vmem:[#allocation135_spill] sm:$0xff] }
 0x4e1   :  { %3016 = vmatpush.msra.mxu1 %v9035_v13  ;;  %3035 = vmatpush.msrb.mxu2 %v9036_v16  ;;  %v9091_v13 = vld [vmem:[#allocation136_spill] sm:$0xff]  ;;  %v9092_v16 = vld [vmem:[#allocation138_spill] sm:$0xff] }
 0x4e2   :  { %3055 = vmatpush.msrb.mxu3 %v9037_v40  ;;  %2996 = vmatpush.msra.mxu0 %v9038_v5  ;;  %v9093_v40 = vld [vmem:[#allocation145_spill] sm:$0xff]  ;;  %v9094_v5 = vld [vmem:[#allocation139_spill] sm:$0xff] }
 0x4e3   :  { %3017 = vmatpush.msra.mxu1 %v9039_v62  ;;  %3036 = vmatpush.msrb.mxu2 %v9040_v21  ;;  %v9095_v62 = vld [vmem:[#allocation140_spill] sm:$0xff]  ;;  %v9096_v21 = vld [vmem:[#allocation142_spill] sm:$0xff] }
 0x4e4   :  { %3056 = vmatpush.msrb.mxu3 %v9041_v14  ;;  %2997 = vmatpush.msra.mxu0 %v9042_v20  ;;  %v9097_v14 = vld [vmem:[#allocation149_spill] sm:$0xff]  ;;  %v9098_v20 = vld [vmem:[#allocation143_spill] sm:$0xff] }
 0x4e5   :  { %3018 = vmatpush.msra.mxu1 %v9043_v30  ;;  %3037 = vmatpush.msrb.mxu2 %v9044_v25  ;;  %v9099_v30 = vld [vmem:[#allocation144_spill] sm:$0xff]  ;;  %v9100_v25 = vld [vmem:[#allocation146_spill] sm:$0xff] }
 0x4e6   :  { %3057 = vmatpush.msrb.mxu3 %v9045_v18  ;;  %2998 = vmatpush.msra.mxu0 %v9046_v9  ;;  %v9101_v18 = vld [vmem:[#allocation153_spill] sm:$0xff]  ;;  %v9102_v9 = vld [vmem:[#allocation147_spill] sm:$0xff] }
 0x4e7   :  { %3019 = vmatpush.msra.mxu1 %v9047_v54  ;;  %3038 = vmatpush.msrb.mxu2 %v9048_v50  ;;  %v9103_v54 = vld [vmem:[#allocation148_spill] sm:$0xff]  ;;  %v9104_v50 = vld [vmem:[#allocation150_spill] sm:$0xff] }
 0x4e8   :  { %3058 = vmatpush.msrb.mxu3 %v9049_v49  ;;  %2999 = vmatpush.msra.mxu0 %v9050_v17  ;;  %v9105_v49 = vld [vmem:[#allocation157_spill] sm:$0xff]  ;;  %v9106_v17 = vld [vmem:[#allocation151_spill] sm:$0xff] }
 0x4e9   :  { %3020 = vmatpush.msra.mxu1 %v9051_v31  ;;  %3039 = vmatpush.msrb.mxu2 %v9052_v19  ;;  %v9107_v31 = vld [vmem:[#allocation152_spill] sm:$0xff]  ;;  %v9108_v19 = vld [vmem:[#allocation154_spill] sm:$0xff] }
 0x4ea   :  { %3059 = vmatpush.msrb.mxu3 %v9054_v23  ;;  %3000 = vmatpush.msra.mxu0 %v9055_v57  ;;  %v9110_v23 = vld [vmem:[#allocation155_spill] sm:$0xff]  ;;  %v9111_v57 = vld [vmem:[#allocation156_spill] sm:$0xff] }
 0x4eb   :  { %3159 = vmatpush.msrb.mxu1 %v9053_v38  ;;  %3040 = vmatpush.msrb.mxu2 %v9056_v42  ;;  %v9109_v38 = vld [vmem:[#allocation161_spill] sm:$0xff]  ;;  %v9112_v42 = vld [vmem:[#allocation158_spill] sm:$0xff] }
 0x4ec   :  { %3060 = vmatpush.msrb.mxu3 %v9058_v28  ;;  %3139 = vmatpush.msrb.mxu0 %v9059_v48  ;;  %v9114_v28 = vld [vmem:[#allocation159_spill] sm:$0xff]  ;;  %v9115_v48 = vld [vmem:[#allocation160_spill] sm:$0xff] }
 0x4ed   :  { %3160 = vmatpush.msrb.mxu1 %v9057_v56  ;;  %3179 = vmatpush.msra.mxu2 %v9060_v53  ;;  %v9113_v56 = vld [vmem:[#allocation165_spill] sm:$0xff]  ;;  %v9116_v53 = vld [vmem:[#allocation162_spill] sm:$0xff] }
 0x4ee   :  { %3199 = vmatpush.msra.mxu3 %v9062_v0  ;;  %3140 = vmatpush.msrb.mxu0 %v9063_v22  ;;  %v9118_v0 = vld [vmem:[#allocation164_spill] sm:$0xff]  ;;  %v9119_v22 = vld [vmem:[#allocation166_spill] sm:$0xff] }
 0x4ef   :  { %3161 = vmatpush.msrb.mxu1 %v9061_v11  ;;  %3180 = vmatpush.msra.mxu2 %v9064_v37  ;;  %v9117_v11 = vld [vmem:[#allocation163_spill] sm:$0xff] }
 0x4f0   :  { %3200 = vmatpush.msra.mxu3 %v9066_v41  ;;  %3141 = vmatpush.msrb.mxu0 %v9067_v63  ;;  %v9120_v37 = vld [vmem:[#allocation167_spill] sm:$0xff]  ;;  %v9122_v41 = vld [vmem:[#allocation82_spill] sm:$0xff] }
 0x4f1   :  { %3162 = vmatpush.msrb.mxu1 %v9065_v43  ;;  %3181 = vmatpush.msra.mxu2 %v9068_v1  ;;  %v9121_v43 = vld [vmem:[#allocation61_spill] sm:$0xff]  ;;  %v9123_v1 = vld [vmem:[#allocation58_spill] sm:$0xff] }
 0x4f2   :  { %3201 = vmatpush.msra.mxu3 %v9070_v10  ;;  %3142 = vmatpush.msrb.mxu0 %v9071_v44  ;;  %v235_v63 = vadd.f32 %v9122_v41, %v9121_v43 }
 0x4f3   :  { %3163 = vmatpush.msrb.mxu1 %v9069_v45  ;;  %3182 = vmatpush.msra.mxu2 %v9072_v35  ;;  %v9124_v45 = vld [vmem:[#allocation83_spill] sm:$0xff] }
 0x4f4   :  { %3202 = vmatpush.msra.mxu3 %v9074_v46  ;;  %3143 = vmatpush.msrb.mxu0 %v9075_v61  ;;  %v276_v10 = vadd.f32 %v9124_v45, %v9123_v1 }
 0x4f5   :  { %3164 = vmatpush.msrb.mxu1 %v9073_v24  ;;  %3183 = vmatpush.msra.mxu2 %v9076_v55 }
 0x4f6   :  { %3203 = vmatpush.msra.mxu3 %v9078_v52  ;;  %3144 = vmatpush.msrb.mxu0 %v9079_v34  ;;  %v9126_v52 = vld [vmem:[#allocation47_spill] sm:$0xff] }
 0x4f7   :  { %3165 = vmatpush.msrb.mxu1 %v9077_v4  ;;  %3184 = vmatpush.msra.mxu2 %v9080_v15  ;;  %v9125_v4 = vld [vmem:[#allocation64_spill] sm:$0xff] }
 0x4f8   :  { %3204 = vmatpush.msra.mxu3 %v9082_v6  ;;  %3145 = vmatpush.msrb.mxu0 %v9083_v59  ;;  %v358_v34 = vadd.f32 %v9126_v52, %v9125_v4 }
 0x4f9   :  { %3166 = vmatpush.msrb.mxu1 %v9081_v33  ;;  %3185 = vmatpush.msra.mxu2 %v9084_v26 }
 0x4fa   :  { %3205 = vmatpush.msra.mxu3 %v9086_v29  ;;  %3146 = vmatpush.msrb.mxu0 %v9087_v47  ;;  %v9127_v47 = vld [vmem:[#allocation55_spill] sm:$0xff] }
 0x4fb   :  { %3167 = vmatpush.msrb.mxu1 %v9085_v7  ;;  %3186 = vmatpush.msra.mxu2 %v9088_v3  ;;  %v9128_v3 = vld [vmem:[#allocation25_spill] sm:$0xff] }
 0x4fc   :  { %3206 = vmatpush.msra.mxu3 %v9090_v58  ;;  %3147 = vmatpush.msrb.mxu0 %v9091_v13  ;;  %v9129_v58 = vld [vmem:[#allocation65_spill] sm:$0xff]  ;;  %v9130_v13 = vld [vmem:[#allocation28_spill] sm:$0xff] }
 0x4fd   :  { %3168 = vmatpush.msrb.mxu1 %v9089_v39  ;;  %3187 = vmatpush.msra.mxu2 %v9092_v16  ;;  %v434_v39 = vadd.f32 %v9128_v3, %v9127_v47  ;;  %v475_v16 = vadd.f32 %v9130_v13, %v9129_v58 }
 0x4fe   :  { %3207 = vmatpush.msra.mxu3 %v9094_v5  ;;  %3148 = vmatpush.msrb.mxu0 %v9095_v62 }
 0x4ff   :  { %3169 = vmatpush.msrb.mxu1 %v9093_v40  ;;  %3188 = vmatpush.msra.mxu2 %v9096_v21 }
 0x500   :  { %3208 = vmatpush.msra.mxu3 %v9098_v20  ;;  %3149 = vmatpush.msrb.mxu0 %v9099_v30  ;;  %v9132_v20 = vld [vmem:[#allocation37_spill] sm:$0xff] }
 0x501   :  { %3170 = vmatpush.msrb.mxu1 %v9097_v14  ;;  %3189 = vmatpush.msra.mxu2 %v9100_v25  ;;  %v9131_v14 = vld [vmem:[#allocation66_spill] sm:$0xff] }
 0x502   :  { %3209 = vmatpush.msra.mxu3 %v9102_v9  ;;  %3150 = vmatpush.msrb.mxu0 %v9103_v54  ;;  %v317_v30 = vadd.f32 %v9132_v20, %v9131_v14 }
 0x503   :  { %3171 = vmatpush.msrb.mxu1 %v9101_v18  ;;  %3190 = vmatpush.msra.mxu2 %v9104_v50 }
 0x504   :  { %3210 = vmatpush.msra.mxu3 %v9106_v17  ;;  %3151 = vmatpush.msrb.mxu0 %v9107_v31 }
 0x505   :  { %3172 = vmatpush.msrb.mxu1 %v9105_v49  ;;  %3191 = vmatpush.msra.mxu2 %v9108_v19 }
 0x506   :  { %3211 = vmatpush.msra.mxu3 %v9110_v23  ;;  %3152 = vmatpush.msrb.mxu0 %v9111_v57 }
 0x507   :  { %3173 = vmatpush.msrb.mxu1 %v9109_v38  ;;  %3192 = vmatpush.msra.mxu2 %v9112_v42 }
 0x508   :  { %3212 = vmatpush.msra.mxu3 %v9114_v28  ;;  %3153 = vmatpush.msrb.mxu0 %v9115_v48 }
 0x509   :  { %3174 = vmatpush.msrb.mxu1 %v9113_v56  ;;  %3193 = vmatpush.msra.mxu2 %v9116_v53 }
 0x50a   :  { %3213 = vmatpush.msra.mxu3 %v9117_v11  ;;  %3154 = vmatpush.msrb.mxu0 %v9118_v0  ;;  %v9133_v0 = vld [vmem:[#allocation48_spill] sm:$0xff] }
 0x50b   :  { %3194 = vmatpush.msra.mxu2 %v9119_v22 }
 0x50c   :  { %3214 = vmatpush.msra.mxu3 %v9120_v37 }
 0x545   :  { %v2688_v44 = vpop.f32.mrf.mxu0  ;;  %v2708_v35 = vpop.f32.mrf.mxu1 }
 0x546   :  { %v2751_v24 = vadd.f32 %v2688_v44, %v235_v63  ;;  %v2752_v46 = vadd.f32 %v2708_v35, %v276_v10 }
 0x548   :  { %v3656_v61 = vmul.f32 -1.442695, %v2751_v24  ;;  %v3657_v55 = vmul.f32 -1.442695, %v2752_v46 }
 0x54a   :  { %3898 = vpow2.f32 %v3656_v61 }
 0x54b   :  { %3900 = vpow2.f32 %v3657_v55 }
 0x54c   :  { %v2748_v15 = vpop.f32.mrf.mxu3  ;;  %v2728_v40 = vpop.f32.mrf.mxu2 }
 0x54d   :  { %v2754_v33 = vadd.f32 %v2748_v15, %v358_v34  ;;  %v2753_v50 = vadd.f32 %v2728_v40, %v317_v30 }
 0x54f   :  { %v3658_v6 = vmul.f32 -1.442695, %v2754_v33 }
 0x550   :  { %v3899_v59 = vpop.eup %3898 }
 0x551   :  { %v3901_v26 = vpop.eup %3900  ;;  %v2758_v7 = vadd.f32 1.0, %v3899_v59  ;;  %3902 = vpow2.f32 %v3658_v6 }
 0x552   :  { %v2777_v29 = vadd.f32 1.0, %v3901_v26 }
 0x553   :  { %3904 = vrcp.f32 %v2758_v7  ;;  %v2768_v57 = vand.u32 2147483647, %v2758_v7  ;;  %v2770_v28 = vand.u32 2147483648, %v2758_v7  ;;  %vm2764_vm5 = vweird.f32 %v2758_v7 }
 0x554   :  { %3906 = vrcp.f32 %v2777_v29  ;;  %v2789_v56 = vand.u32 2147483648, %v2777_v29  ;;  %v2787_v11 = vand.u32 2147483647, %v2777_v29  ;;  %vm2783_vm7 = vweird.f32 %v2777_v29 }
 0x555   :  { %vm2769_vm9 = vcmp.eq.f32.partialorder %v2768_v57, 8.507059e+37  ;;  %v2771_v35 = vor.u32 1.1754944e-38, %v2770_v28 }
 0x556   :  { %v2845_v5 = vpop.f32.mrf.mxu0  ;;  %v2865_v62 = vpop.f32.mrf.mxu1  ;;  %v2790_v44 = vor.u32 1.1754944e-38, %v2789_v56  ;;  %vm2788_vm1 = vcmp.eq.f32.partialorder %v2787_v11, 8.507059e+37 }
 0x557   :  { %v3903_v21 = vpop.eup %3902  ;;  %v2908_v25 = vadd.f32 %v2845_v5, %v434_v39  ;;  %v2909_v18 = vadd.f32 %v2865_v62, %v475_v16 }
 0x558   :  { %v7707_v9 = vadd.f32 1.0, %v3903_v21 }
 0x559   :  { %v3905_v54 = vpop.eup %3904  ;;  %v3659_v49 = vmul.f32 -1.442695, %v2908_v25  ;;  %v3660_v17 = vmul.f32 -1.442695, %v2909_v18  ;;  %v9135_v18 = vld [vmem:[#allocation54_spill] sm:$0xff] }
 0x55a   :  { %v3907_v31 = vpop.eup %3906  ;;  %v2760_v19 = vmul.f32 %v3905_v54, %v2758_v7  ;;  %3908 = vrcp.f32 %v7707_v9  ;;  %vm2765_vm2 = vweird.f32 %v3905_v54  ;;  %v2809_v40 = vand.u32 2147483648, %v7707_v9 }
 0x55b   :  { %v2779_v38 = vmul.f32 %v3907_v31, %v2777_v29  ;;  %3910 = vpow2.f32 %v3659_v49  ;;  %vm2784_vm4 = vweird.f32 %v3907_v31  ;;  %vm2766_vm10 = vmor %vm2764_vm5, %vm2765_vm2  ;;  %v2807_v21 = vand.u32 2147483647, %v7707_v9 }
 0x55c   :  { %v2761_v23 = vsub.f32 1.0, %v2760_v19  ;;  %3912 = vpow2.f32 %v3660_v17  ;;  %vm2785_vm14 = vmor %vm2783_vm7, %vm2784_vm4  ;;  %vm2803_vm4 = vweird.f32 %v7707_v9 }
 0x55d   :  { %v2780_v42 = vsub.f32 1.0, %v2779_v38  ;;  %3914 = vtanh.f32 %v2753_v50  ;;  %v2905_v48 = vpop.f32.mrf.mxu3  ;;  %v2885_v13 = vpop.f32.mrf.mxu2  ;;  %vm2808_vm7 = vcmp.eq.f32.partialorder %v2807_v21, 8.507059e+37  ;;  %v2810_v38 = vor.u32 1.1754944e-38, %v2809_v40  ;;  %v3314_v40 = vld [vmem:[#allocation15 + $0x50] sm:$0xff] }
 0x55e   :  { %v2762_v53 = vmul.f32 %v3905_v54, %v2761_v23  ;;  %v2911_v22 = vadd.f32 %v2905_v48, %v9133_v0 }
 0x55f   :  { %v2781_v37 = vmul.f32 %v3907_v31, %v2780_v42 }
 0x560   :  { %v3909_v41 = vpop.eup %3908  ;;  %v2763_v63 = vadd.f32 %v3905_v54, %v2762_v53  ;;  %v3661_v45 = vmul.f32 -1.442695, %v2911_v22 }
 0x561   :  { %v3911_v10 = vpop.eup %3910  ;;  %v2782_v24 = vadd.f32 %v3907_v31, %v2781_v37  ;;  %v2799_v46 = vmul.f32 %v3909_v41, %v7707_v9  ;;  %vm2804_vm2 = vweird.f32 %v3909_v41 }
 0x562   :  { %v3913_v61 = vpop.eup %3912  ;;  %v2767_v55 = vsel %vm2766_vm10, %v3905_v54, %v2763_v63  ;;  %v2915_v52 = vadd.f32 1.0, %v3911_v10  ;;  %3916 = vpow2.f32 %v3661_v45  ;;  %v2910_v54 = vadd.f32 %v2885_v13, %v9135_v18  ;;  %vm2805_vm5 = vmor %vm2803_vm4, %vm2804_vm2  ;;  %v3319_v10 = vld [vmem:[#allocation15 + $0x78] sm:$0xff] }
 0x563   :  { %v3915_v34 = vpop.eup %3914  ;;  %v2772_v15 = vsel %vm2769_vm9, %v2771_v35, %v2767_v55  ;;  %v2786_v33 = vsel %vm2785_vm14, %v3907_v31, %v2782_v24  ;;  %v2800_v6 = vsub.f32 1.0, %v2799_v46  ;;  %v2934_v59 = vadd.f32 1.0, %v3913_v61 }
 0x564   :  { %v2791_v26 = vsel %vm2788_vm1, %v2790_v44, %v2786_v33  ;;  %v2814_v7 = vmul.f32 %v3915_v34, %v2772_v15  ;;  %3918 = vrcp.f32 %v2915_v52  ;;  %v2927_v42 = vand.u32 2147483648, %v2915_v52 }
 0x565   :  { %v2813_v29 = vmul.f32 %v2791_v26, %v7521_v12  ;;  %v2801_v3 = vmul.f32 %v3909_v41, %v2800_v6  ;;  %3920 = vrcp.f32 %v2934_v59  ;;  %v2946_v57 = vand.u32 2147483648, %v2934_v59  ;;  %v3317_v6 = vld [vmem:[#allocation15 + $0x68] sm:$0xff]  ;;  %v3316_v26 = vld [vmem:[#allocation15 + $0x60] sm:$0xff] }
 0x566   :  { %v2925_v9 = vand.u32 2147483647, %v2915_v52  ;;  %v2944_v53 = vand.u32 2147483647, %v2934_v59  ;;  %vm2940_vm14 = vweird.f32 %v2934_v59  ;;  %vm2921_vm1 = vweird.f32 %v2915_v52 }
 0x567   :  { %v2815_v39 = vadd.f32 %v2814_v7, %v2813_v29  ;;  %v2802_v5 = vadd.f32 %v3909_v41, %v2801_v3  ;;  %v2928_v37 = vor.u32 1.1754944e-38, %v2927_v42  ;;  %v2947_v44 = vor.u32 1.1754944e-38, %v2946_v57  ;;  %v3315_v3 = vld [vmem:[#allocation15 + $0x58] sm:$0xff]  ;;  %v3305_v57 = vld [vmem:[#allocation15 + $0x8] sm:$0xff]  ;;  %v3304_v42 = vld [vmem:[#allocation15] sm:$0xff] }
 0x568   :  { %v3917_v16 = vpop.eup %3916 }
 0x569   :  { %3922 = vtanh.f32 %v2815_v39  ;;  %v7714_v62 = vadd.f32 1.0, %v3917_v16  ;;  %v7720_v30 = vsel %vm1380_vm12, %v2815_v39, %v7521_v12  ;;  %v2806_v31 = vsel %vm2805_vm5, %v3909_v41, %v2802_v5  ;;  %v9160_v39 = vld [vmem:[#allocation70_spill] sm:$0xff] }
 0x56a   :  { %v3919_v25 = vpop.eup %3918  ;;  %v2811_v28 = vsel %vm2808_vm7, %v2810_v38, %v2806_v31  ;;  %vm2926_vm5 = vcmp.eq.f32.partialorder %v2925_v9, 8.507059e+37  ;;  %vm2945_vm7 = vcmp.eq.f32.partialorder %v2944_v53, 8.507059e+37  ;;  %v3309_v31 = vld [vmem:[#allocation15 + $0x28] sm:$0xff]  ;;  %v3307_v38 = vld [vmem:[#allocation15 + $0x18] sm:$0xff]  ;;  %v9143_v53 = vld [vmem:[#allocation36_spill] sm:$0xff] }
 0x56b   :  { %v3921_v50 = vpop.eup %3920  ;;  %v2917_v49 = vmul.f32 %v3919_v25, %v2915_v52  ;;  %3924 = vrcp.f32 %v7714_v62  ;;  %vm2922_vm9 = vweird.f32 %v3919_v25  ;;  %v3318_v52 = vld [vmem:[#allocation15 + $0x70] sm:$0xff]  ;;  %v2966_v29 = vand.u32 2147483648, %v7714_v62  ;;  %v9140_v9 = vld [vmem:[#allocation73_spill] sm:$0xff] }
 0x56c   :  { %v2936_v17 = vmul.f32 %v3921_v50, %v2934_v59  ;;  %3926 = vtanh.f32 %v2910_v54  ;;  %vm2941_vm10 = vweird.f32 %v3921_v50  ;;  %vm2923_vm2 = vmor %vm2921_vm1, %vm2922_vm9  ;;  %v2964_v16 = vand.u32 2147483647, %v7714_v62 }
 0x56d   :  { %v2918_v19 = vsub.f32 1.0, %v2917_v49  ;;  %vm2942_vm4 = vmor %vm2940_vm14, %vm2941_vm10  ;;  %vm2960_vm10 = vweird.f32 %v7714_v62  ;;  %v2967_v21 = vor.u32 1.1754944e-38, %v2966_v29 }
 0x56e   :  { %v2937_v23 = vsub.f32 1.0, %v2936_v17  ;;  %vm2965_vm1 = vcmp.eq.f32.partialorder %v2964_v16, 8.507059e+37  ;;  %v3310_v17 = vld [vmem:[#allocation15 + $0x30] sm:$0xff]  ;;  %v9148_v16 = vld [vmem:[#allocation24_spill] sm:$0xff] }
 0x56f   :  { %v3923_v12 = vpop.eup %3922  ;;  %v2919_v56 = vmul.f32 %v3919_v25, %v2918_v19  ;;  %v3308_v19 = vld [vmem:[#allocation15 + $0x20] sm:$0xff] }
 0x570   :  { %v2938_v48 = vmul.f32 %v3921_v50, %v2937_v23  ;;  %v7725_v11 = vmul.f32 %v3923_v12, %v2811_v28  ;;  %v3306_v23 = vld [vmem:[#allocation15 + $0x10] sm:$0xff]  ;;  %v9141_v28 = vld [vmem:[#allocation181_spill] sm:$0xff] }
 0x571   :  { %v3925_v0 = vpop.eup %3924  ;;  %v2920_v22 = vadd.f32 %v3919_v25, %v2919_v56  ;;  %v9139_v56 = vld [vmem:[#allocation185_spill] sm:$0xff]  ;;  %v9159_v12 = vld [vmem:[#allocation186_spill] sm:$0xff] }
 0x572   :  { %v2939_v41 = vadd.f32 %v3921_v50, %v2938_v48  ;;  %v2956_v63 = vmul.f32 %v3925_v0, %v7714_v62  ;;  %v2818_v45 = vsel %vm1380_vm12, %v7725_v11, %v7536_v32  ;;  %v3927_v24 = vpop.eup %3926  ;;  %vm2961_vm9 = vweird.f32 %v3925_v0  ;;  %v3311_v62 = vld [vmem:[#allocation15 + $0x38] sm:$0xff] }
 0x573   :  { %v2924_v35 = vsel %vm2923_vm2, %v3919_v25, %v2920_v22  ;;  %3001 = vmatmul.f32.vlgmr.msra.gmra.mxu0 %v2818_v45  ;;  %3021 = vmatmul.f32.vlgmr.msra.gmra.mxu1 %v2818_v45  ;;  %vm2962_vm14 = vmor %vm2960_vm10, %vm2961_vm9  ;;  %v3313_v25 = vld [vmem:[#allocation15 + $0x48] sm:$0xff]  ;;  %v9145_v22 = vld [vmem:[#allocation84_spill] sm:$0xff] }
 0x574   :  { %v2929_v46 = vsel %vm2926_vm5, %v2928_v37, %v2924_v35  ;;  %v2943_v61 = vsel %vm2942_vm4, %v3921_v50, %v2939_v41  ;;  %v2957_v55 = vsub.f32 1.0, %v2956_v63  ;;  %3041 = vmatmul.f32.vlgmr.msrb.gmra.mxu2 %v2818_v45  ;;  %3061 = vmatmul.f32.vlgmr.msrb.gmra.mxu3 %v2818_v45  ;;  %v3312_v50 = vld [vmem:[#allocation15 + $0x40] sm:$0xff]  ;;  %v238_v37 = vadd.f32 %v9145_v22, %v9121_v43  ;;  %v9146_v41 = vld [vmem:[#allocation85_spill] sm:$0xff]  ;;  %v3335_v45 = vld [vmem:[#allocation17 + $0x78] sm:$0xff] }
 0x575   :  { %v2948_v34 = vsel %vm2945_vm7, %v2947_v44, %v2943_v61  ;;  %v2971_v15 = vmul.f32 %v3927_v24, %v2929_v46  ;;  %3377 = vmatpush.msra.mxu1 %v3319_v10  ;;  %v279_v63 = vadd.f32 %v9146_v41, %v9123_v1  ;;  %3336 = vmatpush.msra.mxu0 %v3335_v45  ;;  %v3334_v46 = vld [vmem:[#allocation17 + $0x70] sm:$0xff] }
 0x576   :  { %v2970_v32 = vmul.f32 %v2948_v34, %v7562_v8  ;;  %v2958_v33 = vmul.f32 %v3925_v0, %v2957_v55  ;;  %v3333_v55 = vld [vmem:[#allocation17 + $0x68] sm:$0xff]  ;;  %v3331_v34 = vld [vmem:[#allocation17 + $0x58] sm:$0xff] }
 0x577   :  { %3378 = vmatpush.msra.mxu1 %v3318_v52  ;;  %3337 = vmatpush.msra.mxu0 %v3334_v46  ;;  %v9147_v52 = vld [vmem:[#allocation51_spill] sm:$0xff] }
 0x578   :  { %v2972_v59 = vadd.f32 %v2971_v15, %v2970_v32  ;;  %v2959_v7 = vadd.f32 %v3925_v0, %v2958_v33  ;;  %v361_v43 = vadd.f32 %v9147_v52, %v9125_v4  ;;  %v3330_v32 = vld [vmem:[#allocation17 + $0x50] sm:$0xff]  ;;  %v3327_v4 = vld [vmem:[#allocation17 + $0x38] sm:$0xff] }
 0x579   :  { %3379 = vmatpush.msra.mxu1 %v3317_v6  ;;  %3338 = vmatpush.msra.mxu0 %v3333_v55 }
 0x57a   :  { %3928 = vtanh.f32 %v2972_v59  ;;  %v7737_v13 = vsel %vm1217_vm3, %v2972_v59, %v7562_v8  ;;  %v2963_v5 = vsel %vm2962_vm14, %v3925_v0, %v2959_v7  ;;  %v3329_v59 = vld [vmem:[#allocation17 + $0x48] sm:$0xff] }
 0x57b   :  { %3380 = vmatpush.msra.mxu1 %v3316_v26  ;;  %v2968_v54 = vsel %vm2965_vm1, %v2967_v21, %v2963_v5  ;;  %v9149_v5 = vld [vmem:[#allocation32_spill] sm:$0xff] }
 0x57c   :  { %v472_v21 = vadd.f32 %v9149_v5, %v9129_v58 }
 0x57d   :  { %3381 = vmatpush.msra.mxu1 %v3315_v3  ;;  %v3328_v3 = vld [vmem:[#allocation17 + $0x40] sm:$0xff] }
 0x57f   :  { %3382 = vmatpush.msra.mxu1 %v3314_v40  ;;  %v431_v40 = vadd.f32 %v9148_v16, %v9127_v47 }
 0x580   :  { %v3929_v18 = vpop.eup %3928 }
 0x581   :  { %v7741_v49 = vmul.f32 %v3929_v18, %v2968_v54  ;;  %3383 = vmatpush.msra.mxu1 %v3313_v25 }
 0x583   :  { %v2975_v8 = vsel %vm1217_vm3, %v7741_v49, %v7589_v51  ;;  %3384 = vmatpush.msra.mxu1 %v3312_v50  ;;  %v9137_v51 = vld [vmem:[#allocation68_spill] sm:$0xff]  ;;  %v3326_v50 = vld [vmem:[#allocation17 + $0x30] sm:$0xff] }
 0x584   :  { %3155 = vmatmul.f32.vlgmr.msrb.gmra.mxu0 %v2975_v8  ;;  %3175 = vmatmul.f32.vlgmr.msrb.gmra.mxu1 %v2975_v8 }
 0x585   :  { %3195 = vmatmul.f32.vlgmr.msra.gmra.mxu2 %v2975_v8  ;;  %3215 = vmatmul.f32.vlgmr.msra.gmra.mxu3 %v2975_v8 }
 0x586   :  { %3385 = vmatpush.msra.mxu1 %v3311_v62  ;;  %v9150_v62 = vld [vmem:[#allocation49_spill] sm:$0xff] }
 0x588   :  { %3386 = vmatpush.msra.mxu1 %v3310_v17  ;;  %v320_v17 = vadd.f32 %v9150_v62, %v9131_v14 }
 0x58a   :  { %3387 = vmatpush.msra.mxu1 %v3309_v31 }
 0x58c   :  { %3388 = vmatpush.msra.mxu1 %v3308_v19 }
 0x58e   :  { %3389 = vmatpush.msra.mxu1 %v3307_v38 }
 0x590   :  { %3390 = vmatpush.msra.mxu1 %v3306_v23  ;;  %v3325_v23 = vld [vmem:[#allocation17 + $0x28] sm:$0xff] }
 0x592   :  { %3391 = vmatpush.msra.mxu1 %v3305_v57 }
 0x594   :  { %3392 = vmatpush.msra.mxu1 %v3304_v42 }
 0x595   :  { %3676 = vmatmul.msk.f32.vlgmr.msra.gmra.mxu1 %vm894_vm11, %v9137_v51 }
 0x59d   :  { %3677 = vmatmul.msk.f32.gmra.mxu1 %vm1217_vm3, %v9139_v56 }
 0x5a5   :  { %3678 = vmatmul.msk.f32.gmra.mxu1 %vm1543_vm13, %v9140_v9  ;;  %v3324_v9 = vld [vmem:[#allocation17 + $0x20] sm:$0xff] }
 0x5ad   :  { %3679 = vmatmul.msk.f32.gmra.mxu1 %vm1869_vm6, %v9141_v28  ;;  %v3323_v28 = vld [vmem:[#allocation17 + $0x18] sm:$0xff] }
 0x5b5   :  { %3680 = vmatmul.msk.f32.gmra.mxu1 %vm2032_vm8, %v9143_v53 }
 0x5bd   :  { %3681 = vmatmul.msk.f32.gmra.mxu1 %vm1706_vm15, %v7526_v27 }
 0x5c5   :  { %3682 = vmatmul.msk.f32.gmra.mxu1 %vm1380_vm12, %v7725_v11  ;;  %v3332_v11 = vld [vmem:[#allocation17 + $0x60] sm:$0xff] }
 0x5c6   :  { %3339 = vmatpush.msra.mxu0 %v3332_v11 }
 0x5c8   :  { %3340 = vmatpush.msra.mxu0 %v3331_v34 }
 0x5ca   :  { %3341 = vmatpush.msra.mxu0 %v3330_v32 }
 0x5cc   :  { %3342 = vmatpush.msra.mxu0 %v3329_v59 }
 0x5ce   :  { %3343 = vmatpush.msra.mxu0 %v3328_v3 }
 0x5d0   :  { %3344 = vmatpush.msra.mxu0 %v3327_v4 }
 0x5d2   :  { %3345 = vmatpush.msra.mxu0 %v3326_v50 }
 0x5d4   :  { %3346 = vmatpush.msra.mxu0 %v3325_v23 }
 0x5d6   :  { %3347 = vmatpush.msra.mxu0 %v3324_v9 }
 0x5d8   :  { %3348 = vmatpush.msra.mxu0 %v3323_v28 }
 0x5f0   :  { %v3002_v10 = vpop.f32.mrf.mxu0  ;;  %v3022_v44 = vpop.f32.mrf.mxu1 }
 0x5f1   :  { %v3065_v35 = vadd.f32 %v3002_v10, %v238_v37  ;;  %v3066_v24 = vadd.f32 %v3022_v44, %v279_v63  ;;  %v3322_v37 = vld [vmem:[#allocation17 + $0x10] sm:$0xff] }
 0x5f2   :  { %3349 = vmatpush.msra.mxu0 %v3322_v37 }
 0x5f3   :  { %v3662_v61 = vmul.f32 -1.442695, %v3065_v35  ;;  %v3663_v27 = vmul.f32 -1.442695, %v3066_v24  ;;  %v9151_v24 = vld [vmem:[#allocation50_spill] sm:$0xff] }
 0x5f5   :  { %3930 = vpow2.f32 %v3662_v61  ;;  %v3321_v61 = vld [vmem:[#allocation17 + $0x8] sm:$0xff] }
 0x5f6   :  { %3932 = vpow2.f32 %v3663_v27  ;;  %3350 = vmatpush.msra.mxu0 %v3321_v61 }
 0x5f7   :  { %v3062_v1 = vpop.f32.mrf.mxu3  ;;  %v3042_v25 = vpop.f32.mrf.mxu2 }
 0x5f8   :  { %v3068_v15 = vadd.f32 %v3062_v1, %v361_v43  ;;  %v3067_v47 = vadd.f32 %v3042_v25, %v320_v17  ;;  %v3320_v1 = vld [vmem:[#allocation17] sm:$0xff] }
 0x5f9   :  { %3351 = vmatpush.msra.mxu0 %v3320_v1 }
 0x5fa   :  { %v3664_v33 = vmul.f32 -1.442695, %v3068_v15 }
 0x5fb   :  { %v3931_v6 = vpop.eup %3930 }
 0x5fc   :  { %v3933_v26 = vpop.eup %3932  ;;  %v7774_v7 = vadd.f32 1.0, %v3931_v6  ;;  %3934 = vpow2.f32 %v3664_v33 }
 0x5fd   :  { %v7776_v29 = vadd.f32 1.0, %v3933_v26 }
 0x5fe   :  { %3936 = vrcp.f32 %v7774_v7  ;;  %v3082_v22 = vand.u32 2147483647, %v7774_v7  ;;  %v3084_v45 = vand.u32 2147483648, %v7774_v7  ;;  %vm3078_vm5 = vweird.f32 %v7774_v7 }
 0x5ff   :  { %3938 = vrcp.f32 %v7776_v29  ;;  %v3103_v63 = vand.u32 2147483648, %v7776_v29  ;;  %v3101_v35 = vand.u32 2147483647, %v7776_v29  ;;  %vm3097_vm7 = vweird.f32 %v7776_v29 }
 0x600   :  { %vm7798_vm9 = vcmp.eq.f32.partialorder %v3082_v22, 8.507059e+37  ;;  %v3085_v32 = vor.u32 1.1754944e-38, %v3084_v45 }
 0x601   :  { %v3156_v18 = vpop.f32.mrf.mxu0  ;;  %v3176_v54 = vpop.f32.mrf.mxu1  ;;  %v3104_v15 = vor.u32 1.1754944e-38, %v3103_v63  ;;  %vm3102_vm1 = vcmp.eq.f32.partialorder %v3101_v35, 8.507059e+37 }
 0x602   :  { %v3935_v8 = vpop.eup %3934  ;;  %v3219_v31 = vadd.f32 %v3156_v18, %v431_v40  ;;  %v3220_v19 = vadd.f32 %v3176_v54, %v472_v21 }
 0x603   :  { %v7786_v38 = vadd.f32 1.0, %v3935_v8 }
 0x604   :  { %v3937_v57 = vpop.eup %3936  ;;  %v3665_v42 = vmul.f32 -1.442695, %v3219_v31  ;;  %v3666_v51 = vmul.f32 -1.442695, %v3220_v19 }
 0x605   :  { %v3939_v58 = vpop.eup %3938  ;;  %v3074_v56 = vmul.f32 %v3937_v57, %v7774_v7  ;;  %3940 = vrcp.f32 %v7786_v38  ;;  %vm3079_vm2 = vweird.f32 %v3937_v57  ;;  %v3121_v31 = vand.u32 2147483647, %v7786_v38 }
 0x606   :  { %v3093_v14 = vmul.f32 %v3939_v58, %v7776_v29  ;;  %3942 = vpow2.f32 %v3665_v42  ;;  %vm3098_vm4 = vweird.f32 %v3939_v58  ;;  %vm3080_vm10 = vmor %vm3078_vm5, %vm3079_vm2  ;;  %v3123_v19 = vand.u32 2147483648, %v7786_v38 }
 0x607   :  { %v3075_v53 = vsub.f32 1.0, %v3074_v56  ;;  %3944 = vpow2.f32 %v3666_v51  ;;  %vm3099_vm14 = vmor %vm3097_vm7, %vm3098_vm4  ;;  %vm3117_vm4 = vweird.f32 %v7786_v38  ;;  %vm3122_vm7 = vcmp.eq.f32.partialorder %v3121_v31, 8.507059e+37 }
 0x608   :  { %v3094_v41 = vsub.f32 1.0, %v3093_v14  ;;  %3946 = vtanh.f32 %v3067_v47  ;;  %v3216_v10 = vpop.f32.mrf.mxu3  ;;  %v3196_v50 = vpop.f32.mrf.mxu2  ;;  %v3124_v9 = vor.u32 1.1754944e-38, %v3123_v19 }
 0x609   :  { %v3076_v44 = vmul.f32 %v3937_v57, %v3075_v53  ;;  %v3222_v46 = vadd.f32 %v3216_v10, %v9151_v24 }
 0x60a   :  { %v3095_v27 = vmul.f32 %v3939_v58, %v3094_v41 }
 0x60b   :  { %v3941_v55 = vpop.eup %3940  ;;  %v3077_v11 = vadd.f32 %v3937_v57, %v3076_v44  ;;  %v3667_v43 = vmul.f32 -1.442695, %v3222_v46 }
 0x60c   :  { %v3943_v34 = vpop.eup %3942  ;;  %v3096_v33 = vadd.f32 %v3939_v58, %v3095_v27  ;;  %v3113_v6 = vmul.f32 %v3941_v55, %v7786_v38  ;;  %vm3118_vm2 = vweird.f32 %v3941_v55 }
 0x60d   :  { %v3945_v59 = vpop.eup %3944  ;;  %v3081_v26 = vsel %vm3080_vm10, %v3937_v57, %v3077_v11  ;;  %v3226_v7 = vadd.f32 1.0, %v3943_v34  ;;  %3948 = vpow2.f32 %v3667_v43  ;;  %v9154_v57 = vld [vmem:[#allocation44_spill] sm:$0xff]  ;;  %vm3119_vm5 = vmor %vm3117_vm4, %vm3118_vm2 }
 0x60e   :  { %v3947_v29 = vpop.eup %3946  ;;  %v3086_v3 = vsel %vm7798_vm9, %v3085_v32, %v3081_v26  ;;  %v3100_v4 = vsel %vm3099_vm14, %v3939_v58, %v3096_v33  ;;  %v3114_v16 = vsub.f32 1.0, %v3113_v6  ;;  %v3245_v40 = vadd.f32 1.0, %v3945_v59 }
 0x60f   :  { %v3105_v5 = vsel %vm3102_vm1, %v3104_v15, %v3100_v4  ;;  %v3128_v21 = vmul.f32 %v3947_v29, %v3086_v3  ;;  %3950 = vrcp.f32 %v3226_v7  ;;  %v3221_v47 = vadd.f32 %v3196_v50, %v9154_v57 }
 0x610   :  { %v3127_v25 = vmul.f32 %v3105_v5, %v7720_v30  ;;  %3952 = vrcp.f32 %v3245_v40  ;;  %v3115_v18 = vmul.f32 %v3941_v55, %v3114_v16  ;;  %v3257_v14 = vand.u32 2147483648, %v3245_v40 }
 0x611   :  { %v3238_v53 = vand.u32 2147483648, %v3226_v7  ;;  %v3236_v41 = vand.u32 2147483647, %v3226_v7  ;;  %v3255_v38 = vand.u32 2147483647, %v3245_v40  ;;  %vm3232_vm14 = vweird.f32 %v3226_v7 }
 0x612   :  { %v3129_v54 = vadd.f32 %v3128_v21, %v3127_v25  ;;  %v3116_v62 = vadd.f32 %v3941_v55, %v3115_v18  ;;  %vm3251_vm1 = vweird.f32 %v3245_v40  ;;  %v9157_v21 = vld [vmem:[#allocation86_spill] sm:$0xff]  ;;  %v3394_v2 = vpop.f32.mrf.mxu1 }
 0x613   :  { %v3949_v8 = vpop.eup %3948  ;;  %v3239_v24 = vor.u32 1.1754944e-38, %v3238_v53  ;;  %v9158_v25 = vld [vmem:[#allocation74_spill] sm:$0xff] }
 0x614   :  { %3954 = vtanh.f32 %v3129_v54  ;;  %v3265_v17 = vadd.f32 1.0, %v3949_v8  ;;  %v3120_v58 = vsel %vm3119_vm5, %v3941_v55, %v3116_v62  ;;  %v3258_v55 = vor.u32 1.1754944e-38, %v3257_v14 }
 0x615   :  { %v3951_v23 = vpop.eup %3950  ;;  %v3125_v63 = vsel %vm3122_vm7, %v3124_v9, %v3120_v58  ;;  %vm3237_vm5 = vcmp.eq.f32.partialorder %v3236_v41, 8.507059e+37  ;;  %vm3256_vm7 = vcmp.eq.f32.partialorder %v3255_v38, 8.507059e+37 }
 0x616   :  { %v3953_v42 = vpop.eup %3952  ;;  %v3228_v30 = vmul.f32 %v3951_v23, %v3226_v7  ;;  %3956 = vrcp.f32 %v3265_v17  ;;  %vm3233_vm9 = vweird.f32 %v3951_v23  ;;  %v3277_v7 = vand.u32 2147483648, %v3265_v17 }
 0x617   :  { %v3247_v51 = vmul.f32 %v3953_v42, %v3245_v40  ;;  %3958 = vtanh.f32 %v3221_v47  ;;  %vm3252_vm10 = vweird.f32 %v3953_v42  ;;  %vm3234_vm2 = vmor %vm3232_vm14, %vm3233_vm9  ;;  %vm3271_vm14 = vweird.f32 %v3265_v17 }
 0x618   :  { %v3229_v56 = vsub.f32 1.0, %v3228_v30  ;;  %vm3253_vm4 = vmor %vm3251_vm1, %vm3252_vm10  ;;  %v3275_v29 = vand.u32 2147483647, %v3265_v17  ;;  %v3278_v4 = vor.u32 1.1754944e-38, %v3277_v7 }
 0x619   :  { %v3248_v28 = vsub.f32 1.0, %v3247_v51 }
 0x61a   :  { %v3955_v22 = vpop.eup %3954  ;;  %v3230_v37 = vmul.f32 %v3951_v23, %v3229_v56  ;;  %vm3276_vm1 = vcmp.eq.f32.partialorder %v3275_v29, 8.507059e+37 }
 0x61b   :  { %v3249_v45 = vmul.f32 %v3953_v42, %v3248_v28  ;;  %v3131_v10 = vmul.f32 %v3955_v22, %v3125_v63 }
 0x61c   :  { %v3957_v44 = vpop.eup %3956  ;;  %v3231_v35 = vadd.f32 %v3951_v23, %v3230_v37 }
 0x61d   :  { %v3250_v46 = vadd.f32 %v3953_v42, %v3249_v45  ;;  %v3267_v61 = vmul.f32 %v3957_v44, %v3265_v17  ;;  %3683 = vmatmul.msk.f32.gmra.mxu1 %vm1055_vm0, %v3131_v10  ;;  %v3959_v52 = vpop.eup %3958  ;;  %vm3272_vm9 = vweird.f32 %v3957_v44 }
 0x61e   :  { %v3235_v11 = vsel %vm3234_vm2, %v3951_v23, %v3231_v35  ;;  %vm3273_vm10 = vmor %vm3271_vm14, %vm3272_vm9 }
 0x61f   :  { %v3240_v43 = vsel %vm3237_vm5, %v3239_v24, %v3235_v11  ;;  %v3254_v1 = vsel %vm3253_vm4, %v3953_v42, %v3250_v46  ;;  %v3268_v34 = vsub.f32 1.0, %v3267_v61 }
 0x620   :  { %v3259_v15 = vsel %vm3256_vm7, %v3258_v55, %v3254_v1  ;;  %v3282_v32 = vmul.f32 %v3959_v52, %v3240_v43 }
 0x621   :  { %v3281_v33 = vmul.f32 %v3259_v15, %v7737_v13  ;;  %v3269_v6 = vmul.f32 %v3957_v44, %v3268_v34  ;;  %v9156_v13 = vld [vmem:[#allocation45_spill] sm:$0xff] }
 0x623   :  { %v3283_v59 = vadd.f32 %v3282_v32, %v3281_v33  ;;  %v3270_v26 = vadd.f32 %v3957_v44, %v3269_v6 }
 0x625   :  { %3960 = vtanh.f32 %v3283_v59  ;;  %v3274_v3 = vsel %vm3273_vm10, %v3957_v44, %v3270_v26 }
 0x626   :  { %v3279_v40 = vsel %vm3276_vm1, %v3278_v4, %v3274_v3 }
 0x62b   :  { %v3961_v16 = vpop.eup %3960 }
 0x62c   :  { %v3285_v5 = vmul.f32 %v3961_v16, %v3279_v40 }
 0x62e   :  { %3668 = vmatmul.msk.f32.vlgmr.msra.gmra.mxu0 %vm894_vm11, %v3285_v5 }
 0x636   :  { %3669 = vmatmul.msk.f32.gmra.mxu0 %vm1217_vm3, %v7741_v49  ;;  %v3705_v49 = vld [vmem:[%s7901_s10] ss:$0 sm:$0xff]  ;;  %s4594_s10 = smov [#allocation18]  }
 0x637   :  { %s3530_s18 = sshll.u32 %s4594_s10, 4  ;;  %s3531_s18 = int_to_ptr.vmem [resolvable:$true] %s3530_s18 }
 0x63e   :  { %3670 = vmatmul.msk.f32.gmra.mxu0 %vm1543_vm13, %v7579_v36  ;;  %v3397_v36 = vpop.f32.mrf.mxu1 }
 0x646   :  { %3671 = vmatmul.msk.f32.gmra.mxu0 %vm1869_vm6, %v9156_v13  ;;  %v3400_v60 = vpop.f32.mrf.mxu1 }
 0x64e   :  { %3672 = vmatmul.msk.f32.gmra.mxu0 %vm2032_vm8, %v9157_v21  ;;  %v3403_v17 = vpop.f32.mrf.mxu1 }
 0x656   :  { %3673 = vmatmul.msk.f32.gmra.mxu0 %vm1706_vm15, %v9158_v25  ;;  %v3406_v47 = vpop.f32.mrf.mxu1 }
 0x65e   :  { %3674 = vmatmul.msk.f32.gmra.mxu0 %vm1380_vm12, %v9159_v12  ;;  %v3409_v58 = vpop.f32.mrf.mxu1 }
 0x666   :  { %3675 = vmatmul.msk.f32.gmra.mxu0 %vm1055_vm0, %v9160_v39  ;;  %v3412_v14 = vpop.f32.mrf.mxu1 }
 0x69a   :  { %v3415_v41 = vpop.f32.mrf.mxu1 }
 0x6ab   :  { %v3353_v48 = vpop.f32.mrf.mxu0 }
 0x6ac   :  { %v3395_v0 = vadd.f32 %v3394_v2, %v3353_v48 }
 0x6ae   :  { %v7841_v18 = vadd.f32 %v3705_v49, %v3395_v0 }
 0x6b0   :  { %3430 = vmax.xlane.f32.xlu2 %v7841_v18 }
 0x6b3   :  { %v3356_v54 = vpop.f32.mrf.mxu0 }
 0x6b4   :  { %v3398_v20 = vadd.f32 %v3397_v36, %v3356_v54 }
 0x6b6   :  { %v7844_v50 = vadd.f32 %v3705_v49, %v3398_v20 }
 0x6b8   :  { %3432 = vmax.xlane.f32.xlu0 %v7844_v50 }
 0x6bb   :  { %v3359_v8 = vpop.f32.mrf.mxu0 }
 0x6bc   :  { %v3401_v62 = vadd.f32 %v3400_v60, %v3359_v8 }
 0x6be   :  { %v7847_v31 = vadd.f32 %v3705_v49, %v3401_v62 }
 0x6c0   :  { %3434 = vmax.xlane.f32.xlu1 %v7847_v31 }
 0x6c3   :  { %v3362_v19 = vpop.f32.mrf.mxu0 }
 0x6c4   :  { %v3404_v23 = vadd.f32 %v3403_v17, %v3362_v19 }
 0x6c6   :  { %v7850_v57 = vadd.f32 %v3705_v49, %v3404_v23 }
 0x6c8   :  { %3436 = vmax.xlane.f32.xlu2 %v7850_v57 }
 0x6cb   :  { %v3365_v42 = vpop.f32.mrf.mxu0 }
 0x6cc   :  { %v3407_v30 = vadd.f32 %v3406_v47, %v3365_v42 }
 0x6ce   :  { %v7853_v51 = vadd.f32 %v3705_v49, %v3407_v30 }
 0x6d0   :  { %3438 = vmax.xlane.f32.xlu2 %v7853_v51 }
 0x6d3   :  { %v3368_v56 = vpop.f32.mrf.mxu0 }
 0x6d4   :  { %v3410_v9 = vadd.f32 %v3409_v58, %v3368_v56 }
 0x6d6   :  { %v7856_v28 = vadd.f32 %v3705_v49, %v3410_v9 }
 0x6d8   :  { %3440 = vmax.xlane.f32.xlu0 %v7856_v28 }
 0x6db   :  { %v3371_v53 = vpop.f32.mrf.mxu0 }
 0x6dc   :  { %v3413_v22 = vadd.f32 %v3412_v14, %v3371_v53 }
 0x6de   :  { %v7859_v37 = vadd.f32 %v3705_v49, %v3413_v22 }
 0x6e0   :  { %3442 = vmax.xlane.f32.xlu1 %v7859_v37 }
 0x6e3   :  { %v3374_v63 = vpop.f32.mrf.mxu0 }
 0x6e4   :  { %v3416_v45 = vadd.f32 %v3415_v41, %v3374_v63 }
 0x6e6   :  { %v7862_v38 = vadd.f32 %v3705_v49, %v3416_v45 }
 0x6e8   :  { %3444 = vmax.xlane.f32.xlu2 %v7862_v38 }
 0x723   :  { %v3431_v10 = vpop.xlane.xlu2 %3430 }
 0x724   :  { %v3446_v44 = vsub.f32 %v7841_v18, %v3431_v10 }
 0x726   :  { %v3454_v35 = vmul.f32 1.442695, %v3446_v44 }
 0x728   :  { %3962 = vpow2.f32 %v3454_v35 }
 0x72b   :  { %v3433_v24 = vpop.xlane.xlu0 %3432 }
 0x72c   :  { %v3447_v46 = vsub.f32 %v7844_v50, %v3433_v24 }
 0x72e   :  { %v3963_v61 = vpop.eup %3962  ;;  %v3456_v27 = vmul.f32 1.442695, %v3447_v46 }
 0x72f   :  { %3470 = vadd.xlane.f32.xlu0 %v3963_v61 }
 0x730   :  { %3964 = vpow2.f32 %v3456_v27 }
 0x733   :  { %v3435_v55 = vpop.xlane.xlu1 %3434 }
 0x734   :  { %v3448_v11 = vsub.f32 %v7847_v31, %v3435_v55 }
 0x736   :  { %v3965_v52 = vpop.eup %3964  ;;  %v3458_v43 = vmul.f32 1.442695, %v3448_v11 }
 0x737   :  { %3472 = vadd.xlane.f32.xlu1 %v3965_v52 }
 0x738   :  { %3966 = vpow2.f32 %v3458_v43 }
 0x73b   :  { %v3437_v1 = vpop.xlane.xlu2 %3436 }
 0x73c   :  { %v3449_v34 = vsub.f32 %v7850_v57, %v3437_v1 }
 0x73e   :  { %v3967_v15 = vpop.eup %3966  ;;  %v3460_v32 = vmul.f32 1.442695, %v3449_v34 }
 0x73f   :  { %3474 = vadd.xlane.f32.xlu2 %v3967_v15 }
 0x740   :  { %3968 = vpow2.f32 %v3460_v32 }
 0x743   :  { %v3439_v33 = vpop.xlane.xlu2 %3438 }
 0x744   :  { %v3450_v6 = vsub.f32 %v7853_v51, %v3439_v33 }
 0x746   :  { %v3969_v59 = vpop.eup %3968  ;;  %v3462_v26 = vmul.f32 1.442695, %v3450_v6 }
 0x747   :  { %3476 = vadd.xlane.f32.xlu0 %v3969_v59 }
 0x748   :  { %3970 = vpow2.f32 %v3462_v26 }
 0x74b   :  { %v3441_v7 = vpop.xlane.xlu0 %3440 }
 0x74c   :  { %v3451_v29 = vsub.f32 %v7856_v28, %v3441_v7 }
 0x74e   :  { %v3971_v3 = vpop.eup %3970  ;;  %v3464_v4 = vmul.f32 1.442695, %v3451_v29 }
 0x74f   :  { %3478 = vadd.xlane.f32.xlu1 %v3971_v3 }
 0x750   :  { %3972 = vpow2.f32 %v3464_v4 }
 0x753   :  { %v3443_v16 = vpop.xlane.xlu1 %3442 }
 0x754   :  { %v3452_v40 = vsub.f32 %v7859_v37, %v3443_v16 }
 0x756   :  { %v3973_v5 = vpop.eup %3972  ;;  %v3466_v13 = vmul.f32 1.442695, %v3452_v40 }
 0x757   :  { %3480 = vadd.xlane.f32.xlu2 %v3973_v5 }
 0x758   :  { %3974 = vpow2.f32 %v3466_v13 }
 0x75b   :  { %v7872_v21 = vpop.xlane.xlu2 %3444 }
 0x75c   :  { %v3453_v25 = vsub.f32 %v7862_v38, %v7872_v21 }
 0x75e   :  { %v3975_v12 = vpop.eup %3974  ;;  %v3468_v39 = vmul.f32 1.442695, %v3453_v25 }
 0x75f   :  { %3482 = vadd.xlane.f32.xlu0 %v3975_v12 }
 0x760   :  { %3976 = vpow2.f32 %v3468_v39 }
 0x766   :  { %v3977_v2 = vpop.eup %3976 }
 0x767   :  { %3484 = vadd.xlane.f32.xlu1 %v3977_v2 }
 0x7a2   :  { %v3471_v36 = vpop.xlane.xlu0 %3470 }
 0x7a3   :  { %3978 = vlog2.f32 %v3471_v36 }
 0x7a9   :  { %v3979_v49 = vpop.eup %3978 }
 0x7aa   :  { %v3487_v48 = vmul.f32 0.6931472, %v3979_v49  ;;  %v3473_v0 = vpop.xlane.xlu1 %3472 }
 0x7ab   :  { %3980 = vlog2.f32 %v3473_v0 }
 0x7ac   :  { %v3502_v60 = vadd.f32 %v3487_v48, %v3431_v10 }
 0x7ae   :  { %v3510_v54 = vsub.f32 %v7841_v18, %v3502_v60 }
 0x7b0   :  { %3518 = vst [vmem:[#allocation18] sm:$0xff] %v3510_v54 }
 0x7b1   :  { %v3981_v20 = vpop.eup %3980 }
 0x7b2   :  { %v3489_v8 = vmul.f32 0.6931472, %v3981_v20  ;;  %v3475_v62 = vpop.xlane.xlu2 %3474 }
 0x7b3   :  { %3982 = vlog2.f32 %v3475_v62 }
 0x7b4   :  { %v3503_v17 = vadd.f32 %v3489_v8, %v3433_v24 }
 0x7b6   :  { %v3511_v19 = vsub.f32 %v7844_v50, %v3503_v17 }
 0x7b8   :  { %3519 = vst [vmem:[#allocation18 + $0x8] sm:$0xff] %v3511_v19 }
 0x7b9   :  { %v3983_v23 = vpop.eup %3982 }
 0x7ba   :  { %v3491_v47 = vmul.f32 0.6931472, %v3983_v23  ;;  %v3477_v42 = vpop.xlane.xlu0 %3476 }
 0x7bb   :  { %3984 = vlog2.f32 %v3477_v42 }
 0x7bc   :  { %v3504_v30 = vadd.f32 %v3491_v47, %v3435_v55 }
 0x7be   :  { %v3512_v58 = vsub.f32 %v7847_v31, %v3504_v30 }
 0x7c0   :  { %3520 = vst [vmem:[#allocation18 + $0x10] sm:$0xff] %v3512_v58 }
 0x7c1   :  { %v3985_v56 = vpop.eup %3984 }
 0x7c2   :  { %v3493_v9 = vmul.f32 0.6931472, %v3985_v56  ;;  %v3479_v18 = vpop.xlane.xlu1 %3478 }
 0x7c3   :  { %3986 = vlog2.f32 %v3479_v18 }
 0x7c4   :  { %v3505_v14 = vadd.f32 %v3493_v9, %v3437_v1 }
 0x7c6   :  { %v3513_v53 = vsub.f32 %v7850_v57, %v3505_v14 }
 0x7c8   :  { %3521 = vst [vmem:[#allocation18 + $0x18] sm:$0xff] %v3513_v53 }
 0x7c9   :  { %v3987_v22 = vpop.eup %3986 }
 0x7ca   :  { %v3495_v41 = vmul.f32 0.6931472, %v3987_v22  ;;  %v3481_v50 = vpop.xlane.xlu2 %3480 }
 0x7cb   :  { %3988 = vlog2.f32 %v3481_v50 }
 0x7cc   :  { %v3506_v63 = vadd.f32 %v3495_v41, %v3439_v33 }
 0x7ce   :  { %v3514_v45 = vsub.f32 %v7853_v51, %v3506_v63 }
 0x7d0   :  { %3522 = vst [vmem:[#allocation18 + $0x20] sm:$0xff] %v3514_v45 }
 0x7d1   :  { %v3989_v10 = vpop.eup %3988 }
 0x7d2   :  { %v3497_v44 = vmul.f32 0.6931472, %v3989_v10  ;;  %v3483_v31 = vpop.xlane.xlu0 %3482 }
 0x7d3   :  { %3990 = vlog2.f32 %v3483_v31 }
 0x7d4   :  { %v3507_v35 = vadd.f32 %v3497_v44, %v3441_v7 }
 0x7d6   :  { %v3515_v24 = vsub.f32 %v7856_v28, %v3507_v35 }
 0x7d8   :  { %3523 = vst [vmem:[#allocation18 + $0x28] sm:$0xff] %v3515_v24 }
 0x7d9   :  { %v3991_v46 = vpop.eup %3990 }
 0x7da   :  { %v3499_v61 = vmul.f32 0.6931472, %v3991_v46  ;;  %v3485_v57 = vpop.xlane.xlu1 %3484 }
 0x7db   :  { %3992 = vlog2.f32 %v3485_v57 }
 0x7dc   :  { %v3508_v27 = vadd.f32 %v3499_v61, %v3443_v16 }
 0x7de   :  { %v3516_v55 = vsub.f32 %v7859_v37, %v3508_v27 }
 0x7e0   :  { %3524 = vst [vmem:[#allocation18 + $0x30] sm:$0xff] %v3516_v55 }
 0x7e1   :  { %v3993_v11 = vpop.eup %3992 }
 0x7e2   :  { %v3501_v52 = vmul.f32 0.6931472, %v3993_v11 }
 0x7e4   :  { %v3509_v51 = vadd.f32 %v3501_v52, %v7872_v21 }
 0x7e6   :  { %v3517_v28 = vsub.f32 %v7862_v38, %v3509_v51 }
 0x7e8   :  { %3525 = vst [vmem:[#allocation18 + $0x38] sm:$0xff] %v3517_v28 }
 0x7e9   :  { %3538 = dma.vmem_to_hbm [thread:$0]  %s3531_s18, 1024, %s3533_s21, [#allocation8], %s4586_s16, %s4586_s16, %s4587_s17  }
 0x7ea   :  { %4579 = dma.done.wait [#allocation8], 1024  }
 0x7eb   :  { %4580 = vsyncadd [#allocation8], 4294966272 }
 0x7ec   :  { %3543 = vsyncpa [#allocation7], 1 }
 0x7ed   :  { %3544 = vsyncpa [#allocation10], 1 }
 0x7ee   :  { %3545 = vsyncpa [#allocation13], 1 }
 0x7ef   :  { %3546 = vsyncpa [#allocation16], 1 }
 0x7f0   :  { %3547 = vsyncpa [#allocation8], 1 }

</bundles_post_ra>
